<compile_context>
chip_gen: v7x
topology: tpu7x:2x2x1
jax: 0.10.0
libtpu: 0.0.40
codegen_flags: <defaults>
</compile_context>

<pallas_src>
import numpy as np

import jax
import jax.numpy as jnp
from jax.experimental import pallas as pl
from jax.experimental.pallas import tpu as pltpu


# ---------------------------------------------------------------------------
# Architecture constants (pinned by LeNet: 28x28x1 input, fc1 = 4*4*50)
# ---------------------------------------------------------------------------
_H = 28                      # input spatial size
_K = 5                       # conv kernel size
_C1, _C2 = 20, 50            # conv output channels
_O1 = _H - _K + 1            # 24 (conv1 output rows/cols)
_P1 = _O1 // 2               # 12 (pool1 output)
_O2 = _P1 - _K + 1           # 8  (conv2 output)
_P2 = _O2 // 2               # 4  (pool2 output)
_FC1 = 500
_NCLS = 10
_HALF = 256                  # lane-aligned half width of split Toeplitz outputs
_NCOL = 2 * _HALF            # 512 (even half | odd half)


def _round_up(a, m):
    return ((a + m - 1) // m) * m


# ---------------------------------------------------------------------------
# The fused kernel: one grid step == B samples, everything stays in VMEM.
# Activation layouts inside the kernel (b is always the sublane-minor index):
#   conv1 acc : rows (oh, b)   cols par*256 + co*12 + ow2
#   pooled1   : rows (oh2, b)  cols ci*12 + ow2
#   conv2 acc : rows (oh3, b)  cols par*256 + co2*4 + ow4
#   pooled2   : rows (oh4, b)  cols co2*4 + ow4
# ---------------------------------------------------------------------------
def _lenet_kernel(x_ref, t1_ref, b1_ref, t2_ref, b2_ref,
                  wf1_ref, bf1_ref, wf2_ref, bf2_ref, out_ref):
    f32 = jnp.float32
    B = x_ref.shape[1]                      # batch tile (multiple of 8)

    # ---- conv1: 5 accumulated width-Toeplitz GEMMs on the MXU --------------
    acc1 = None
    for kh in range(_K):
        slab = x_ref[kh:kh + _O1, :, :].reshape(_O1 * B, _H)        # (24B, 28)
        part = jnp.dot(slab, t1_ref[kh], preferred_element_type=f32)
        acc1 = part if acc1 is None else acc1 + part                # (24B, 512)

    # ---- fused pool1 (2x2) + bias + ReLU ------------------------------------
    a1 = acc1.reshape(_P1, 2, B, _NCOL)         # 8-aligned outer split (B%8==0)
    m1 = jnp.maximum(a1[:, 0], a1[:, 1])        # max over output-row pairs
    m1 = jnp.maximum(m1[..., :_HALF], m1[..., _HALF:])   # max over col pairs
    x2 = jnp.maximum(m1 + b1_ref[...], 0.0)     # (12, B, 256)

    # ---- conv2: 5 accumulated width-Toeplitz GEMMs --------------------------
    acc2 = None
    for kh in range(_K):
        slab = x2[kh:kh + _O2].reshape(_O2 * B, _HALF)               # (8B, 256)
        part = jnp.dot(slab, t2_ref[kh], preferred_element_type=f32)
        acc2 = part if acc2 is None else acc2 + part                 # (8B, 512)

    # ---- fused pool2 (2x2) + bias + ReLU ------------------------------------
    a2 = acc2.reshape(_P2, 2, B, _NCOL)
    m2 = jnp.maximum(a2[:, 0], a2[:, 1])
    m2 = jnp.maximum(m2[..., :_HALF], m2[..., _HALF:])
    x3 = jnp.maximum(m2 + b2_ref[...], 0.0)     # (4, B, 256)

    # ---- fc1: dense (B,800)x(800,500) as 4 accumulated K=256 GEMMs ---------
    h = None
    for p in range(_P2):
        part = jnp.dot(x3[p], wf1_ref[p], preferred_element_type=f32)
        h = part if h is None else h + part                          # (B, 500)
    h = jnp.maximum(h + bf1_ref[...], 0.0)

    # ---- fc2 -----------------------------------------------------------------
    out_ref[...] = jnp.dot(h, wf2_ref[...], preferred_element_type=f32) + bf2_ref[...]


# ---------------------------------------------------------------------------
# One-time weight repacking (PyTorch layouts -> Toeplitz / kernel layouts).
# ---------------------------------------------------------------------------
def pack_params(p):
    w1 = np.asarray(p["conv1_w"], np.float32)   # (20, 1, 5, 5)
    b1 = np.asarray(p["conv1_b"], np.float32)   # (20,)
    w2 = np.asarray(p["conv2_w"], np.float32)   # (50, 20, 5, 5)
    b2 = np.asarray(p["conv2_b"], np.float32)   # (50,)
    wf1 = np.asarray(p["fc1_w"], np.float32)    # (500, 800)
    bf1 = np.asarray(p["fc1_b"], np.float32)    # (500,)
    wf2 = np.asarray(p["fc2_w"], np.float32)    # (10, 500)
    bf2 = np.asarray(p["fc2_b"], np.float32)    # (10,)

    # conv1 width-Toeplitz: t1[kh, iw, par*256 + co*12 + ow2] = w1[co,0,kh,kw]
    # with iw = (2*ow2 + par) + kw  (even/odd output columns in separate halves
    # so pool1-over-width is a max of the two 256-lane halves).
    t1 = np.zeros((_K, _H, _NCOL), np.float32)
    for kh in range(_K):
        for kw in range(_K):
            for co in range(_C1):
                for ow2 in range(_P1):
                    for par in range(2):
                        iw = 2 * ow2 + par + kw
                        t1[kh, iw, par * _HALF + co * _P1 + ow2] = w1[co, 0, kh, kw]
    b1row = np.zeros((1, _HALF), np.float32)
    b1row[0, :_C1 * _P1] = np.repeat(b1, _P1)

    # conv2 width-Toeplitz on the pooled1 lane layout (ci*12 + ow2):
    # t2[kh, ci*12+ow2, par*256 + co*4 + ow4] = w2[co, ci, kh, kw]
    # with ow2 = (2*ow4 + par) + kw.
    t2 = np.zeros((_K, _HALF, _NCOL), np.float32)
    for kh in range(_K):
        for kw in range(_K):
            for co in range(_C2):
                for ci in range(_C1):
                    for ow4 in range(_P2):
                        for par in range(2):
                            ow2 = 2 * ow4 + par + kw
                            t2[kh, ci * _P1 + ow2, par * _HALF + co * _P2 + ow4] = \
                                w2[co, ci, kh, kw]
    b2row = np.zeros((1, _HALF), np.float32)
    b2row[0, :_C2 * _P2] = np.repeat(b2, _P2)

    # fc1 repack: pooled2 lane index (co*4 + ow4) at row oh4 maps to PyTorch's
    # flattened index co*16 + oh4*4 + ow4.
    wf1p = np.zeros((_P2, _HALF, _FC1), np.float32)
    for oh4 in range(_P2):
        for co in range(_C2):
            for ow4 in range(_P2):
                wf1p[oh4, co * _P2 + ow4, :] = \
                    wf1[:, co * _P2 * _P2 + oh4 * _P2 + ow4]

    return dict(
        t1=jnp.asarray(t1), b1=jnp.asarray(b1row),
        t2=jnp.asarray(t2), b2=jnp.asarray(b2row),
        wf1=jnp.asarray(wf1p), bf1=jnp.asarray(bf1.reshape(1, _FC1)),
        wf2=jnp.asarray(np.ascontiguousarray(wf2.T)),
        bf2=jnp.asarray(bf2.reshape(1, _NCLS)))


# ---------------------------------------------------------------------------
# Wrapper: batch-tiled pallas_call.
# ---------------------------------------------------------------------------
def lenet_forward(x_nchw, pp, block_b=32):
    """x_nchw: (N, 1, 28, 28) float; pp: pack_params(...) output."""
    N = x_nchw.shape[0]
    B = min(int(block_b), _round_up(N, 8))
    B = max(8, (B // 8) * 8)                 # batch tile: multiple of 8
    n_pad = _round_up(N, B)
    steps = n_pad // B                       # note: make even for best v7x use

    x = x_nchw.astype(jnp.float32).reshape(N, _H, _H)
    if n_pad != N:
        x = jnp.pad(x, ((0, n_pad - N), (0, 0), (0, 0)))
    # (28, n_pad, 28): batch sits in the sublane dimension inside the kernel.
    x_t = jnp.transpose(x, (1, 0, 2))

    def const_spec(a):
        nd = a.ndim
        return pl.BlockSpec(a.shape, lambda i, nd=nd: (0,) * nd)

    order = ("t1", "b1", "t2", "b2", "wf1", "bf1", "wf2", "bf2")
    in_specs = [pl.BlockSpec((_H, B, _H), lambda i: (0, i, 0))]
    in_specs += [const_spec(pp[k]) for k in order]

    flops_per_step = 2 * (
        _K * (_O1 * B) * _H * _NCOL          # conv1 Toeplitz GEMMs
        + _K * (_O2 * B) * _HALF * _NCOL     # conv2 Toeplitz GEMMs
        + _P2 * B * _HALF * _FC1             # fc1
        + B * _FC1 * _NCLS)                  # fc2
    param_bytes = sum(int(v.size) * v.dtype.itemsize for v in pp.values())
    cost = pl.CostEstimate(
        flops=int(steps * flops_per_step),
        transcendentals=0,
        bytes_accessed=int(x_t.size * 4 + param_bytes + n_pad * _NCLS * 4))

    out = pl.pallas_call(
        _lenet_kernel,
        out_shape=jax.ShapeDtypeStruct((n_pad, _NCLS), jnp.float32),
        grid=(steps,),
        in_specs=in_specs,
        out_specs=pl.BlockSpec((B, _NCLS), lambda i: (i, 0)),
        compiler_params=pltpu.CompilerParams(
            dimension_semantics=("parallel",),
            vmem_limit_bytes=48 * 1024 * 1024),
        cost_estimate=cost,
    )(x_t, *[pp[k] for k in order])
    return out[:N]


# ---------------------------------------------------------------------------
# Deterministic parameter init (PyTorch-default-style uniform)
# ---------------------------------------------------------------------------
def init_params(key):
    def uinit(k, shape, fan_in):
        bound = 1.0 / (fan_in ** 0.5)
        return jax.random.uniform(k, shape, jnp.float32, -bound, bound)

    ks = jax.random.split(key, 8)
    return {
        "conv1_w": uinit(ks[0], (20, 1, 5, 5), 1 * 5 * 5),
        "conv1_b": uinit(ks[1], (20,), 1 * 5 * 5),
        "conv2_w": uinit(ks[2], (50, 20, 5, 5), 20 * 5 * 5),
        "conv2_b": uinit(ks[3], (50,), 20 * 5 * 5),
        "fc1_w": uinit(ks[4], (500, 800), 800),
        "fc1_b": uinit(ks[5], (500,), 800),
        "fc2_w": uinit(ks[6], (10, 500), 500),
        "fc2_b": uinit(ks[7], (10,), 500),
    }


# ---------------------------------------------------------------------------
# Pure-JAX reference (for correctness check)
# ---------------------------------------------------------------------------
def lenet_reference(x, p):
    dn = ("NCHW", "OIHW", "NCHW")

    def block(y, w, b):
        y = jax.lax.conv_general_dilated(y, w, (1, 1), "VALID",
                                         dimension_numbers=dn)
        y = jnp.maximum(y + b[None, :, None, None], 0.0)
        n, c, h, w_ = y.shape
        return y.reshape(n, c, h // 2, 2, w_ // 2, 2).max(axis=(3, 5))

    y = block(x, p["conv1_w"], p["conv1_b"])
    y = block(y, p["conv2_w"], p["conv2_b"])
    y = y.reshape(y.shape[0], -1)
    y = jnp.maximum(y @ p["fc1_w"].T + p["fc1_b"], 0.0)
    return y @ p["fc2_w"].T + p["fc2_b"]


if __name__ == "__main__":
    key = jax.random.PRNGKey(0)
    kx, kp = jax.random.split(key)
    # LeNet's fc1 (800 = 50*4*4) pins the input to 1x28x28.  N=12 with a
    # batch tile of 8 exercises both multi-step grids and tail padding.
    x = jax.random.normal(kx, (12, 1, 28, 28), dtype=jnp.float32)
    params = init_params(kp)
    packed = pack_params(params)            # one-time weight repack

    fwd = jax.jit(lambda xx, pp: lenet_forward(xx, pp, block_b=8))
    out = jax.block_until_ready(fwd(x, packed))
    assert out.shape == (12, 10) and out.dtype == jnp.float32

    ref = jax.block_until_ready(jax.jit(lenet_reference)(x, params))
    if not jnp.allclose(out, ref, rtol=5e-2, atol=5e-3):
        raise AssertionError(
            f"mismatch vs reference, max abs diff = {jnp.max(jnp.abs(out - ref))}")

    print("KERNEL_OK")
</pallas_src>

<mosaic_0001>
module attributes {stable_mosaic.version = 11 : i64} {
  func.func @_lenet_kernel(%arg0: i32, %arg1: memref<28x8x28xf32, #tpu.memory_space<vmem>>, %arg2: memref<5x28x512xf32, #tpu.memory_space<vmem>>, %arg3: memref<1x256xf32, #tpu.memory_space<vmem>>, %arg4: memref<5x256x512xf32, #tpu.memory_space<vmem>>, %arg5: memref<1x256xf32, #tpu.memory_space<vmem>>, %arg6: memref<4x256x500xf32, #tpu.memory_space<vmem>>, %arg7: memref<1x500xf32, #tpu.memory_space<vmem>>, %arg8: memref<500x10xf32, #tpu.memory_space<vmem>>, %arg9: memref<1x10xf32, #tpu.memory_space<vmem>>, %arg10: memref<8x10xf32, #tpu.memory_space<vmem>>) attributes {dimension_semantics = [#tpu.dimension_semantics<parallel>], iteration_bounds = array<i64: 2>, scalar_prefetch = 0 : i64, scratch_operands = 0 : i64, tpu.core_type = #tpu.core_type<tc>, window_params = [{transform_indices = @transform_0, window_bounds = array<i64: 28, 8, 28>}, {pipeline_mode = #tpu.pipeline_mode<synchronous>, transform_indices = @transform_1, window_bounds = array<i64: 5, 28, 512>}, {pipeline_mode = #tpu.pipeline_mode<synchronous>, transform_indices = @transform_2, window_bounds = array<i64: 1, 256>}, {pipeline_mode = #tpu.pipeline_mode<synchronous>, transform_indices = @transform_3, window_bounds = array<i64: 5, 256, 512>}, {pipeline_mode = #tpu.pipeline_mode<synchronous>, transform_indices = @transform_4, window_bounds = array<i64: 1, 256>}, {pipeline_mode = #tpu.pipeline_mode<synchronous>, transform_indices = @transform_5, window_bounds = array<i64: 4, 256, 500>}, {pipeline_mode = #tpu.pipeline_mode<synchronous>, transform_indices = @transform_6, window_bounds = array<i64: 1, 500>}, {pipeline_mode = #tpu.pipeline_mode<synchronous>, transform_indices = @transform_7, window_bounds = array<i64: 500, 10>}, {pipeline_mode = #tpu.pipeline_mode<synchronous>, transform_indices = @transform_8, window_bounds = array<i64: 1, 10>}, {transform_indices = @transform_9, window_bounds = array<i64: 8, 10>}]} {
    %c0 = arith.constant 0 : index
    %c0_0 = arith.constant 0 : index
    %c0_1 = arith.constant 0 : index
    %0 = vector.load %arg1[%c0, %c0_0, %c0_1] : memref<28x8x28xf32, #tpu.memory_space<vmem>>, vector<24x8x28xf32>
    %1 = vector.shape_cast %0 : vector<24x8x28xf32> to vector<192x28xf32>
    %c0_2 = arith.constant 0 : index
    %c0_3 = arith.constant 0 : index
    %c0_4 = arith.constant 0 : index
    %2 = vector.load %arg2[%c0_2, %c0_3, %c0_4] : memref<5x28x512xf32, #tpu.memory_space<vmem>>, vector<1x28x512xf32>
    %3 = vector.shape_cast %2 : vector<1x28x512xf32> to vector<28x512xf32>
    %cst = arith.constant dense<0.000000e+00> : vector<192x512xf32>
    %4 = tpu.matmul %1, %3, %cst {dimension_numbers = #tpu.dot_dimension_numbers<[1], [0], [0], [1], [0, 0, 1, 1], [], []>} : vector<192x28xf32>, vector<28x512xf32>, vector<192x512xf32> -> vector<192x512xf32>
    %c1 = arith.constant 1 : index
    %c0_5 = arith.constant 0 : index
    %c0_6 = arith.constant 0 : index
    %5 = vector.load %arg1[%c1, %c0_5, %c0_6] : memref<28x8x28xf32, #tpu.memory_space<vmem>>, vector<24x8x28xf32>
    %6 = vector.shape_cast %5 : vector<24x8x28xf32> to vector<192x28xf32>
    %c1_7 = arith.constant 1 : index
    %c0_8 = arith.constant 0 : index
    %c0_9 = arith.constant 0 : index
    %7 = vector.load %arg2[%c1_7, %c0_8, %c0_9] : memref<5x28x512xf32, #tpu.memory_space<vmem>>, vector<1x28x512xf32>
    %8 = vector.shape_cast %7 : vector<1x28x512xf32> to vector<28x512xf32>
    %cst_10 = arith.constant dense<0.000000e+00> : vector<192x512xf32>
    %9 = tpu.matmul %6, %8, %cst_10 {dimension_numbers = #tpu.dot_dimension_numbers<[1], [0], [0], [1], [0, 0, 1, 1], [], []>} : vector<192x28xf32>, vector<28x512xf32>, vector<192x512xf32> -> vector<192x512xf32>
    %10 = arith.addf %4, %9 : vector<192x512xf32>
    %c2 = arith.constant 2 : index
    %c0_11 = arith.constant 0 : index
    %c0_12 = arith.constant 0 : index
    %11 = vector.load %arg1[%c2, %c0_11, %c0_12] : memref<28x8x28xf32, #tpu.memory_space<vmem>>, vector<24x8x28xf32>
    %12 = vector.shape_cast %11 : vector<24x8x28xf32> to vector<192x28xf32>
    %c2_13 = arith.constant 2 : index
    %c0_14 = arith.constant 0 : index
    %c0_15 = arith.constant 0 : index
    %13 = vector.load %arg2[%c2_13, %c0_14, %c0_15] : memref<5x28x512xf32, #tpu.memory_space<vmem>>, vector<1x28x512xf32>
    %14 = vector.shape_cast %13 : vector<1x28x512xf32> to vector<28x512xf32>
    %cst_16 = arith.constant dense<0.000000e+00> : vector<192x512xf32>
    %15 = tpu.matmul %12, %14, %cst_16 {dimension_numbers = #tpu.dot_dimension_numbers<[1], [0], [0], [1], [0, 0, 1, 1], [], []>} : vector<192x28xf32>, vector<28x512xf32>, vector<192x512xf32> -> vector<192x512xf32>
    %16 = arith.addf %10, %15 : vector<192x512xf32>
    %c3 = arith.constant 3 : index
    %c0_17 = arith.constant 0 : index
    %c0_18 = arith.constant 0 : index
    %17 = vector.load %arg1[%c3, %c0_17, %c0_18] : memref<28x8x28xf32, #tpu.memory_space<vmem>>, vector<24x8x28xf32>
    %18 = vector.shape_cast %17 : vector<24x8x28xf32> to vector<192x28xf32>
    %c3_19 = arith.constant 3 : index
    %c0_20 = arith.constant 0 : index
    %c0_21 = arith.constant 0 : index
    %19 = vector.load %arg2[%c3_19, %c0_20, %c0_21] : memref<5x28x512xf32, #tpu.memory_space<vmem>>, vector<1x28x512xf32>
    %20 = vector.shape_cast %19 : vector<1x28x512xf32> to vector<28x512xf32>
    %cst_22 = arith.constant dense<0.000000e+00> : vector<192x512xf32>
    %21 = tpu.matmul %18, %20, %cst_22 {dimension_numbers = #tpu.dot_dimension_numbers<[1], [0], [0], [1], [0, 0, 1, 1], [], []>} : vector<192x28xf32>, vector<28x512xf32>, vector<192x512xf32> -> vector<192x512xf32>
    %22 = arith.addf %16, %21 : vector<192x512xf32>
    %c4 = arith.constant 4 : index
    %c0_23 = arith.constant 0 : index
    %c0_24 = arith.constant 0 : index
    %23 = vector.load %arg1[%c4, %c0_23, %c0_24] : memref<28x8x28xf32, #tpu.memory_space<vmem>>, vector<24x8x28xf32>
    %24 = vector.shape_cast %23 : vector<24x8x28xf32> to vector<192x28xf32>
    %c4_25 = arith.constant 4 : index
    %c0_26 = arith.constant 0 : index
    %c0_27 = arith.constant 0 : index
    %25 = vector.load %arg2[%c4_25, %c0_26, %c0_27] : memref<5x28x512xf32, #tpu.memory_space<vmem>>, vector<1x28x512xf32>
    %26 = vector.shape_cast %25 : vector<1x28x512xf32> to vector<28x512xf32>
    %cst_28 = arith.constant dense<0.000000e+00> : vector<192x512xf32>
    %27 = tpu.matmul %24, %26, %cst_28 {dimension_numbers = #tpu.dot_dimension_numbers<[1], [0], [0], [1], [0, 0, 1, 1], [], []>} : vector<192x28xf32>, vector<28x512xf32>, vector<192x512xf32> -> vector<192x512xf32>
    %28 = arith.addf %22, %27 : vector<192x512xf32>
    %29 = vector.shape_cast %28 : vector<192x512xf32> to vector<12x2x8x512xf32>
    %30 = vector.extract_strided_slice %29 {offsets = [0, 0, 0, 0], sizes = [12, 1, 8, 512], strides = [1, 1, 1, 1]} : vector<12x2x8x512xf32> to vector<12x1x8x512xf32>
    %31 = vector.shape_cast %30 : vector<12x1x8x512xf32> to vector<12x8x512xf32>
    %32 = vector.extract_strided_slice %29 {offsets = [0, 1, 0, 0], sizes = [12, 1, 8, 512], strides = [1, 1, 1, 1]} : vector<12x2x8x512xf32> to vector<12x1x8x512xf32>
    %33 = vector.shape_cast %32 : vector<12x1x8x512xf32> to vector<12x8x512xf32>
    %34 = arith.maximumf %31, %33 : vector<12x8x512xf32>
    %35 = vector.extract_strided_slice %34 {offsets = [0, 0, 0], sizes = [12, 8, 256], strides = [1, 1, 1]} : vector<12x8x512xf32> to vector<12x8x256xf32>
    %36 = vector.extract_strided_slice %34 {offsets = [0, 0, 256], sizes = [12, 8, 256], strides = [1, 1, 1]} : vector<12x8x512xf32> to vector<12x8x256xf32>
    %37 = arith.maximumf %35, %36 : vector<12x8x256xf32>
    %c0_29 = arith.constant 0 : index
    %c0_30 = arith.constant 0 : index
    %38 = vector.load %arg3[%c0_29, %c0_30] : memref<1x256xf32, #tpu.memory_space<vmem>>, vector<1x256xf32>
    %39 = vector.shape_cast %38 : vector<1x256xf32> to vector<1x1x256xf32>
    %40 = vector.broadcast %39 : vector<1x1x256xf32> to vector<12x8x256xf32>
    %41 = arith.addf %37, %40 : vector<12x8x256xf32>
    %cst_31 = arith.constant 0.000000e+00 : f32
    %42 = vector.broadcast %cst_31 : f32 to vector<12x8x256xf32>
    %43 = arith.maximumf %41, %42 : vector<12x8x256xf32>
    %44 = vector.extract_strided_slice %43 {offsets = [0, 0, 0], sizes = [8, 8, 256], strides = [1, 1, 1]} : vector<12x8x256xf32> to vector<8x8x256xf32>
    %45 = vector.shape_cast %44 : vector<8x8x256xf32> to vector<64x256xf32>
    %c0_32 = arith.constant 0 : index
    %c0_33 = arith.constant 0 : index
    %c0_34 = arith.constant 0 : index
    %46 = vector.load %arg4[%c0_32, %c0_33, %c0_34] : memref<5x256x512xf32, #tpu.memory_space<vmem>>, vector<1x256x512xf32>
    %47 = vector.shape_cast %46 : vector<1x256x512xf32> to vector<256x512xf32>
    %cst_35 = arith.constant dense<0.000000e+00> : vector<64x512xf32>
    %48 = tpu.matmul %45, %47, %cst_35 {dimension_numbers = #tpu.dot_dimension_numbers<[1], [0], [0], [1], [0, 0, 1, 1], [], []>} : vector<64x256xf32>, vector<256x512xf32>, vector<64x512xf32> -> vector<64x512xf32>
    %49 = vector.extract_strided_slice %43 {offsets = [1, 0, 0], sizes = [8, 8, 256], strides = [1, 1, 1]} : vector<12x8x256xf32> to vector<8x8x256xf32>
    %50 = vector.shape_cast %49 : vector<8x8x256xf32> to vector<64x256xf32>
    %c1_36 = arith.constant 1 : index
    %c0_37 = arith.constant 0 : index
    %c0_38 = arith.constant 0 : index
    %51 = vector.load %arg4[%c1_36, %c0_37, %c0_38] : memref<5x256x512xf32, #tpu.memory_space<vmem>>, vector<1x256x512xf32>
    %52 = vector.shape_cast %51 : vector<1x256x512xf32> to vector<256x512xf32>
    %cst_39 = arith.constant dense<0.000000e+00> : vector<64x512xf32>
    %53 = tpu.matmul %50, %52, %cst_39 {dimension_numbers = #tpu.dot_dimension_numbers<[1], [0], [0], [1], [0, 0, 1, 1], [], []>} : vector<64x256xf32>, vector<256x512xf32>, vector<64x512xf32> -> vector<64x512xf32>
    %54 = arith.addf %48, %53 : vector<64x512xf32>
    %55 = vector.extract_strided_slice %43 {offsets = [2, 0, 0], sizes = [8, 8, 256], strides = [1, 1, 1]} : vector<12x8x256xf32> to vector<8x8x256xf32>
    %56 = vector.shape_cast %55 : vector<8x8x256xf32> to vector<64x256xf32>
    %c2_40 = arith.constant 2 : index
    %c0_41 = arith.constant 0 : index
    %c0_42 = arith.constant 0 : index
    %57 = vector.load %arg4[%c2_40, %c0_41, %c0_42] : memref<5x256x512xf32, #tpu.memory_space<vmem>>, vector<1x256x512xf32>
    %58 = vector.shape_cast %57 : vector<1x256x512xf32> to vector<256x512xf32>
    %cst_43 = arith.constant dense<0.000000e+00> : vector<64x512xf32>
    %59 = tpu.matmul %56, %58, %cst_43 {dimension_numbers = #tpu.dot_dimension_numbers<[1], [0], [0], [1], [0, 0, 1, 1], [], []>} : vector<64x256xf32>, vector<256x512xf32>, vector<64x512xf32> -> vector<64x512xf32>
    %60 = arith.addf %54, %59 : vector<64x512xf32>
    %61 = vector.extract_strided_slice %43 {offsets = [3, 0, 0], sizes = [8, 8, 256], strides = [1, 1, 1]} : vector<12x8x256xf32> to vector<8x8x256xf32>
    %62 = vector.shape_cast %61 : vector<8x8x256xf32> to vector<64x256xf32>
    %c3_44 = arith.constant 3 : index
    %c0_45 = arith.constant 0 : index
    %c0_46 = arith.constant 0 : index
    %63 = vector.load %arg4[%c3_44, %c0_45, %c0_46] : memref<5x256x512xf32, #tpu.memory_space<vmem>>, vector<1x256x512xf32>
    %64 = vector.shape_cast %63 : vector<1x256x512xf32> to vector<256x512xf32>
    %cst_47 = arith.constant dense<0.000000e+00> : vector<64x512xf32>
    %65 = tpu.matmul %62, %64, %cst_47 {dimension_numbers = #tpu.dot_dimension_numbers<[1], [0], [0], [1], [0, 0, 1, 1], [], []>} : vector<64x256xf32>, vector<256x512xf32>, vector<64x512xf32> -> vector<64x512xf32>
    %66 = arith.addf %60, %65 : vector<64x512xf32>
    %67 = vector.extract_strided_slice %43 {offsets = [4, 0, 0], sizes = [8, 8, 256], strides = [1, 1, 1]} : vector<12x8x256xf32> to vector<8x8x256xf32>
    %68 = vector.shape_cast %67 : vector<8x8x256xf32> to vector<64x256xf32>
    %c4_48 = arith.constant 4 : index
    %c0_49 = arith.constant 0 : index
    %c0_50 = arith.constant 0 : index
    %69 = vector.load %arg4[%c4_48, %c0_49, %c0_50] : memref<5x256x512xf32, #tpu.memory_space<vmem>>, vector<1x256x512xf32>
    %70 = vector.shape_cast %69 : vector<1x256x512xf32> to vector<256x512xf32>
    %cst_51 = arith.constant dense<0.000000e+00> : vector<64x512xf32>
    %71 = tpu.matmul %68, %70, %cst_51 {dimension_numbers = #tpu.dot_dimension_numbers<[1], [0], [0], [1], [0, 0, 1, 1], [], []>} : vector<64x256xf32>, vector<256x512xf32>, vector<64x512xf32> -> vector<64x512xf32>
    %72 = arith.addf %66, %71 : vector<64x512xf32>
    %73 = vector.shape_cast %72 : vector<64x512xf32> to vector<4x2x8x512xf32>
    %74 = vector.extract_strided_slice %73 {offsets = [0, 0, 0, 0], sizes = [4, 1, 8, 512], strides = [1, 1, 1, 1]} : vector<4x2x8x512xf32> to vector<4x1x8x512xf32>
    %75 = vector.shape_cast %74 : vector<4x1x8x512xf32> to vector<4x8x512xf32>
    %76 = vector.extract_strided_slice %73 {offsets = [0, 1, 0, 0], sizes = [4, 1, 8, 512], strides = [1, 1, 1, 1]} : vector<4x2x8x512xf32> to vector<4x1x8x512xf32>
    %77 = vector.shape_cast %76 : vector<4x1x8x512xf32> to vector<4x8x512xf32>
    %78 = arith.maximumf %75, %77 : vector<4x8x512xf32>
    %79 = vector.extract_strided_slice %78 {offsets = [0, 0, 0], sizes = [4, 8, 256], strides = [1, 1, 1]} : vector<4x8x512xf32> to vector<4x8x256xf32>
    %80 = vector.extract_strided_slice %78 {offsets = [0, 0, 256], sizes = [4, 8, 256], strides = [1, 1, 1]} : vector<4x8x512xf32> to vector<4x8x256xf32>
    %81 = arith.maximumf %79, %80 : vector<4x8x256xf32>
    %c0_52 = arith.constant 0 : index
    %c0_53 = arith.constant 0 : index
    %82 = vector.load %arg5[%c0_52, %c0_53] : memref<1x256xf32, #tpu.memory_space<vmem>>, vector<1x256xf32>
    %83 = vector.shape_cast %82 : vector<1x256xf32> to vector<1x1x256xf32>
    %84 = vector.broadcast %83 : vector<1x1x256xf32> to vector<4x8x256xf32>
    %85 = arith.addf %81, %84 : vector<4x8x256xf32>
    %cst_54 = arith.constant 0.000000e+00 : f32
    %86 = vector.broadcast %cst_54 : f32 to vector<4x8x256xf32>
    %87 = arith.maximumf %85, %86 : vector<4x8x256xf32>
    %88 = vector.extract_strided_slice %87 {offsets = [0, 0, 0], sizes = [1, 8, 256], strides = [1, 1, 1]} : vector<4x8x256xf32> to vector<1x8x256xf32>
    %89 = vector.shape_cast %88 : vector<1x8x256xf32> to vector<8x256xf32>
    %c0_55 = arith.constant 0 : index
    %c0_56 = arith.constant 0 : index
    %c0_57 = arith.constant 0 : index
    %90 = vector.load %arg6[%c0_55, %c0_56, %c0_57] : memref<4x256x500xf32, #tpu.memory_space<vmem>>, vector<1x256x500xf32>
    %91 = vector.shape_cast %90 : vector<1x256x500xf32> to vector<256x500xf32>
    %cst_58 = arith.constant dense<0.000000e+00> : vector<8x500xf32>
    %92 = tpu.matmul %89, %91, %cst_58 {dimension_numbers = #tpu.dot_dimension_numbers<[1], [0], [0], [1], [0, 0, 1, 1], [], []>} : vector<8x256xf32>, vector<256x500xf32>, vector<8x500xf32> -> vector<8x500xf32>
    %93 = vector.extract_strided_slice %87 {offsets = [1, 0, 0], sizes = [1, 8, 256], strides = [1, 1, 1]} : vector<4x8x256xf32> to vector<1x8x256xf32>
    %94 = vector.shape_cast %93 : vector<1x8x256xf32> to vector<8x256xf32>
    %c1_59 = arith.constant 1 : index
    %c0_60 = arith.constant 0 : index
    %c0_61 = arith.constant 0 : index
    %95 = vector.load %arg6[%c1_59, %c0_60, %c0_61] : memref<4x256x500xf32, #tpu.memory_space<vmem>>, vector<1x256x500xf32>
    %96 = vector.shape_cast %95 : vector<1x256x500xf32> to vector<256x500xf32>
    %cst_62 = arith.constant dense<0.000000e+00> : vector<8x500xf32>
    %97 = tpu.matmul %94, %96, %cst_62 {dimension_numbers = #tpu.dot_dimension_numbers<[1], [0], [0], [1], [0, 0, 1, 1], [], []>} : vector<8x256xf32>, vector<256x500xf32>, vector<8x500xf32> -> vector<8x500xf32>
    %98 = arith.addf %92, %97 : vector<8x500xf32>
    %99 = vector.extract_strided_slice %87 {offsets = [2, 0, 0], sizes = [1, 8, 256], strides = [1, 1, 1]} : vector<4x8x256xf32> to vector<1x8x256xf32>
    %100 = vector.shape_cast %99 : vector<1x8x256xf32> to vector<8x256xf32>
    %c2_63 = arith.constant 2 : index
    %c0_64 = arith.constant 0 : index
    %c0_65 = arith.constant 0 : index
    %101 = vector.load %arg6[%c2_63, %c0_64, %c0_65] : memref<4x256x500xf32, #tpu.memory_space<vmem>>, vector<1x256x500xf32>
    %102 = vector.shape_cast %101 : vector<1x256x500xf32> to vector<256x500xf32>
    %cst_66 = arith.constant dense<0.000000e+00> : vector<8x500xf32>
    %103 = tpu.matmul %100, %102, %cst_66 {dimension_numbers = #tpu.dot_dimension_numbers<[1], [0], [0], [1], [0, 0, 1, 1], [], []>} : vector<8x256xf32>, vector<256x500xf32>, vector<8x500xf32> -> vector<8x500xf32>
    %104 = arith.addf %98, %103 : vector<8x500xf32>
    %105 = vector.extract_strided_slice %87 {offsets = [3, 0, 0], sizes = [1, 8, 256], strides = [1, 1, 1]} : vector<4x8x256xf32> to vector<1x8x256xf32>
    %106 = vector.shape_cast %105 : vector<1x8x256xf32> to vector<8x256xf32>
    %c3_67 = arith.constant 3 : index
    %c0_68 = arith.constant 0 : index
    %c0_69 = arith.constant 0 : index
    %107 = vector.load %arg6[%c3_67, %c0_68, %c0_69] : memref<4x256x500xf32, #tpu.memory_space<vmem>>, vector<1x256x500xf32>
    %108 = vector.shape_cast %107 : vector<1x256x500xf32> to vector<256x500xf32>
    %cst_70 = arith.constant dense<0.000000e+00> : vector<8x500xf32>
    %109 = tpu.matmul %106, %108, %cst_70 {dimension_numbers = #tpu.dot_dimension_numbers<[1], [0], [0], [1], [0, 0, 1, 1], [], []>} : vector<8x256xf32>, vector<256x500xf32>, vector<8x500xf32> -> vector<8x500xf32>
    %110 = arith.addf %104, %109 : vector<8x500xf32>
    %c0_71 = arith.constant 0 : index
    %c0_72 = arith.constant 0 : index
    %111 = vector.load %arg7[%c0_71, %c0_72] : memref<1x500xf32, #tpu.memory_space<vmem>>, vector<1x500xf32>
    %112 = vector.broadcast %111 : vector<1x500xf32> to vector<8x500xf32>
    %113 = arith.addf %110, %112 : vector<8x500xf32>
    %cst_73 = arith.constant 0.000000e+00 : f32
    %114 = vector.broadcast %cst_73 : f32 to vector<8x500xf32>
    %115 = arith.maximumf %113, %114 : vector<8x500xf32>
    %c0_74 = arith.constant 0 : index
    %c0_75 = arith.constant 0 : index
    %116 = vector.load %arg8[%c0_74, %c0_75] : memref<500x10xf32, #tpu.memory_space<vmem>>, vector<500x10xf32>
    %cst_76 = arith.constant dense<0.000000e+00> : vector<8x10xf32>
    %117 = tpu.matmul %115, %116, %cst_76 {dimension_numbers = #tpu.dot_dimension_numbers<[1], [0], [0], [1], [0, 0, 1, 1], [], []>} : vector<8x500xf32>, vector<500x10xf32>, vector<8x10xf32> -> vector<8x10xf32>
    %c0_77 = arith.constant 0 : index
    %c0_78 = arith.constant 0 : index
    %118 = vector.load %arg9[%c0_77, %c0_78] : memref<1x10xf32, #tpu.memory_space<vmem>>, vector<1x10xf32>
    %119 = vector.broadcast %118 : vector<1x10xf32> to vector<8x10xf32>
    %120 = arith.addf %117, %119 : vector<8x10xf32>
    %c0_79 = arith.constant 0 : index
    %c0_80 = arith.constant 0 : index
    %121 = vector.load %arg10[%c0_79, %c0_80] : memref<8x10xf32, #tpu.memory_space<vmem>>, vector<8x10xf32>
    tpu.vector_store %arg10[%c0_79, %c0_80], %120 {strides = array<i32>} : memref<8x10xf32, #tpu.memory_space<vmem>>, vector<8x10xf32>,
    return
  }
  func.func @transform_0(%arg0: i32) -> (i32, i32, i32) {
    %c0_i32 = arith.constant 0 : i32
    %c0_i32_0 = arith.constant 0 : i32
    %c0_i32_1 = arith.constant 0 : i32
    return %c0_i32, %arg0, %c0_i32_0 : i32, i32, i32
  }
  func.func @transform_1(%arg0: i32) -> (i32, i32, i32) {
    %c0_i32 = arith.constant 0 : i32
    %c0_i32_0 = arith.constant 0 : i32
    %c0_i32_1 = arith.constant 0 : i32
    %c0_i32_2 = arith.constant 0 : i32
    return %c0_i32, %c0_i32_0, %c0_i32_1 : i32, i32, i32
  }
  func.func @transform_2(%arg0: i32) -> (i32, i32) {
    %c0_i32 = arith.constant 0 : i32
    %c0_i32_0 = arith.constant 0 : i32
    %c0_i32_1 = arith.constant 0 : i32
    return %c0_i32, %c0_i32_0 : i32, i32
  }
  func.func @transform_3(%arg0: i32) -> (i32, i32, i32) {
    %c0_i32 = arith.constant 0 : i32
    %c0_i32_0 = arith.constant 0 : i32
    %c0_i32_1 = arith.constant 0 : i32
    %c0_i32_2 = arith.constant 0 : i32
    return %c0_i32, %c0_i32_0, %c0_i32_1 : i32, i32, i32
  }
  func.func @transform_4(%arg0: i32) -> (i32, i32) {
    %c0_i32 = arith.constant 0 : i32
    %c0_i32_0 = arith.constant 0 : i32
    %c0_i32_1 = arith.constant 0 : i32
    return %c0_i32, %c0_i32_0 : i32, i32
  }
  func.func @transform_5(%arg0: i32) -> (i32, i32, i32) {
    %c0_i32 = arith.constant 0 : i32
    %c0_i32_0 = arith.constant 0 : i32
    %c0_i32_1 = arith.constant 0 : i32
    %c0_i32_2 = arith.constant 0 : i32
    return %c0_i32, %c0_i32_0, %c0_i32_1 : i32, i32, i32
  }
  func.func @transform_6(%arg0: i32) -> (i32, i32) {
    %c0_i32 = arith.constant 0 : i32
    %c0_i32_0 = arith.constant 0 : i32
    %c0_i32_1 = arith.constant 0 : i32
    return %c0_i32, %c0_i32_0 : i32, i32
  }
  func.func @transform_7(%arg0: i32) -> (i32, i32) {
    %c0_i32 = arith.constant 0 : i32
    %c0_i32_0 = arith.constant 0 : i32
    %c0_i32_1 = arith.constant 0 : i32
    return %c0_i32, %c0_i32_0 : i32, i32
  }
  func.func @transform_8(%arg0: i32) -> (i32, i32) {
    %c0_i32 = arith.constant 0 : i32
    %c0_i32_0 = arith.constant 0 : i32
    %c0_i32_1 = arith.constant 0 : i32
    return %c0_i32, %c0_i32_0 : i32, i32
  }
  func.func @transform_9(%arg0: i32) -> (i32, i32) {
    %c0_i32 = arith.constant 0 : i32
    %c0_i32_0 = arith.constant 0 : i32
    return %arg0, %c0_i32 : i32, i32
  }
}

</mosaic_0001>

<bundles_post_ra>
// kernel: _lambda_.1
= control target key start
LH: loop header
LB: loop body
LE: loop exit
PB: predicated region body
PF: predicated region fallthrough
CT: control target
= control target key end

     0   :  { %14 = vsyncpa [#allocation4], 0  ;;  %s15780_s0 = inlined_call_operand.vmem [shape: f32[28,16,28], index: 0, kind: input, shape index: {}]   ;;  %s15781_s1 = inlined_call_operand.vmem [shape: f32[5,28,512], index: 1, kind: input, shape index: {}]   ;;  %s15782_s2 = inlined_call_operand.vmem [shape: f32[1,256], index: 2, kind: input, shape index: {}]   ;;  %s15783_s3 = inlined_call_operand.vmem [shape: f32[5,256,512], index: 3, kind: input, shape index: {}]   ;;  %s15784_s4 = inlined_call_operand.vmem [shape: f32[1,256], index: 4, kind: input, shape index: {}]   ;;  %s15785_s5 = inlined_call_operand.vmem [shape: f32[4,256,500], index: 5, kind: input, shape index: {}]   ;;  %s15786_s6 = inlined_call_operand.vmem [shape: f32[1,500], index: 6, kind: input, shape index: {}]   ;;  %s15787_s7 = inlined_call_operand.vmem [shape: f32[500,10], index: 7, kind: input, shape index: {}]   ;;  %s15788_s8 = inlined_call_operand.vmem [shape: f32[1,10], index: 8, kind: input, shape index: {}]   ;;  %s15789_s9 = inlined_call_operand.hbm [shape: f32[16,10], index: 9, kind: output, shape index: {}]  }
   0x1   :  { %16 = vsyncpa [#allocation4 + $0x1], 0  ;;  %s10337_s30 = smov 0   ;;  %s10339_s10 = smov 0  }
   0x2   :  { %s10341_s11 = smov 0   ;;  %s10343_s12 = smov 0  }
   0x3 LB: > { %s15791_s13 = sadd.s32 4294967295, %s10281_s12   ;;  %s6954_s14 = sadd.s32 4294967294, %s10281_s12   ;;  %s10281_s12 = sphi %s10343_s12, %s15802_s12   ;;  %s10277_s11 = sphi %s10341_s11, %s15801_s11   ;;  %s10273_s10 = sphi %s10339_s10, %s15800_s10   ;;  %s10269_s30 = sphi %s10337_s30, %s15799_s30  }
   0x4   : > { %s10360_s15 = sadd.s32 1, %s10281_s12   ;;  %s29_s16 = sadd.s32 1, %s10277_s11 }
   0x5   : > { %s26_s17 = ssub.s32 %s10281_s12, %s10360_s15  ;;  %p36_p0 = scmp.ne.s32.totalorder %s10277_s11, %s10273_s10 }
   0x6   : > { %p27_p1 = scmp.eq.s32.totalorder %s26_s17, 0  ;;  %p37_p2 = scmp.eq.s32.totalorder %s10281_s12, 0 }
   0x7   : > { %p234_p3 = scmp.eq.s32.totalorder %s15791_s13, 1  ;;  %p239_p4 = scmp.ne.s32.totalorder %s10273_s10, %s10269_s30 }
   0x8   : > { %s10373_s18 = scalar_select %p27_p1, %s10277_s11, %s29_s16  }
   0x9   : > { %p38_p5 = por %p37_p2, %p36_p0  ;;  %p10375_p6 = por %p234_p3, %p36_p0 }
   0xa   : > { %p240_p7 = scmp.eq.s32.totalorder %s6954_s14, 1  ;;  %p6956_p9 = scmp.ge.s32.totalorder %s10281_s12, 2 }
   0xc   : > { %p10379_p8 = por %p240_p7, %p239_p4  ;;  %280 = sbr.rel (%p6956_p9) target bundleno = 37 (0x25), region = 48 }
  0x13   : > { %283 = sbr.rel (!%p38_p5) target bundleno = 37 (0x25), region = 52  ;;  %s285_s21 = sand.u32 (%p38_p5), 1, %s10277_s11  }
  0x14   : > { %s6957_s22 = sshll.u32 (%p38_p5), %s10281_s12, 3  ;;  %s10175_s23 = smul.u32 (%p38_p5), 224, %s285_s21 }
  0x15   : > { %s10391_s26 = scalar_lea.vmem (%p38_p5), %s15780_s0, %s6957_s22 }
  0x16   : > { %v371_v0 = vld [vmem:[%s10391_s26] sm:$0xff] (%p38_p5)  ;;  %v373_v1 = vld [vmem:[%s10391_s26 + $0x10] sm:$0xff] (%p38_p5)  ;;  %s10399_s27 = scalar_lea.vmem (%p38_p5), [#allocation2], %s10175_s23 }
  0x17   : > { %v375_v2 = vld [vmem:[%s10391_s26 + $0x20] sm:$0xff] (%p38_p5)  ;;  %v377_v3 = vld [vmem:[%s10391_s26 + $0x30] sm:$0xff] (%p38_p5)  ;;  %372 = vst [vmem:[%s10399_s27] sm:$0xff] (%p38_p5), %v371_v0  ;;  %374 = vst [vmem:[%s10399_s27 + $0x8] sm:$0xff] (%p38_p5), %v373_v1 }
  0x18   : > { %v379_v4 = vld [vmem:[%s10391_s26 + $0x40] sm:$0xff] (%p38_p5)  ;;  %v381_v5 = vld [vmem:[%s10391_s26 + $0x50] sm:$0xff] (%p38_p5)  ;;  %376 = vst [vmem:[%s10399_s27 + $0x10] sm:$0xff] (%p38_p5), %v375_v2  ;;  %378 = vst [vmem:[%s10399_s27 + $0x18] sm:$0xff] (%p38_p5), %v377_v3 }
  0x19   : > { %380 = vst [vmem:[%s10399_s27 + $0x20] sm:$0xff] (%p38_p5), %v379_v4  ;;  %382 = vst [vmem:[%s10399_s27 + $0x28] sm:$0xff] (%p38_p5), %v381_v5  ;;  %v383_v6 = vld [vmem:[%s10391_s26 + $0x60] sm:$0xff] (%p38_p5)  ;;  %v385_v7 = vld [vmem:[%s10391_s26 + $0x70] sm:$0xff] (%p38_p5) }
  0x1a   : > { %v387_v8 = vld [vmem:[%s10391_s26 + $0x80] sm:$0xff]  ;;  %384 = vst [vmem:[%s10399_s27 + $0x30] sm:$0xff] %v383_v6  ;;  %386 = vst [vmem:[%s10399_s27 + $0x38] sm:$0xff] %v385_v7  ;;  %v389_v9 = vld [vmem:[%s10391_s26 + $0x90] sm:$0xff] }
  0x1b   : > { %388 = vst [vmem:[%s10399_s27 + $0x40] sm:$0xff] %v387_v8  ;;  %v391_v10 = vld [vmem:[%s10391_s26 + $0xa0] sm:$0xff]  ;;  %v393_v11 = vld [vmem:[%s10391_s26 + $0xb0] sm:$0xff]  ;;  %390 = vst [vmem:[%s10399_s27 + $0x48] sm:$0xff] %v389_v9 }
  0x1c   : > { %392 = vst [vmem:[%s10399_s27 + $0x50] sm:$0xff] %v391_v10  ;;  %394 = vst [vmem:[%s10399_s27 + $0x58] sm:$0xff] %v393_v11  ;;  %v395_v12 = vld [vmem:[%s10391_s26 + $0xc0] sm:$0xff]  ;;  %v397_v13 = vld [vmem:[%s10391_s26 + $0xd0] sm:$0xff] }
  0x1d   : > { %v399_v14 = vld [vmem:[%s10391_s26 + $0xe0] sm:$0xff]  ;;  %396 = vst [vmem:[%s10399_s27 + $0x60] sm:$0xff] %v395_v12  ;;  %398 = vst [vmem:[%s10399_s27 + $0x68] sm:$0xff] %v397_v13  ;;  %v401_v15 = vld [vmem:[%s10391_s26 + $0xf0] sm:$0xff] }
  0x1e   : > { %400 = vst [vmem:[%s10399_s27 + $0x70] sm:$0xff] %v399_v14  ;;  %v403_v16 = vld [vmem:[%s10391_s26 + $0x100] sm:$0xff]  ;;  %v405_v17 = vld [vmem:[%s10391_s26 + $0x110] sm:$0xff]  ;;  %402 = vst [vmem:[%s10399_s27 + $0x78] sm:$0xff] %v401_v15 }
  0x1f   : > { %404 = vst [vmem:[%s10399_s27 + $0x80] sm:$0xff] %v403_v16  ;;  %406 = vst [vmem:[%s10399_s27 + $0x88] sm:$0xff] %v405_v17  ;;  %v407_v18 = vld [vmem:[%s10391_s26 + $0x120] sm:$0xff]  ;;  %v409_v19 = vld [vmem:[%s10391_s26 + $0x130] sm:$0xff] }
  0x20   : > { %v411_v20 = vld [vmem:[%s10391_s26 + $0x140] sm:$0xff]  ;;  %408 = vst [vmem:[%s10399_s27 + $0x90] sm:$0xff] %v407_v18  ;;  %410 = vst [vmem:[%s10399_s27 + $0x98] sm:$0xff] %v409_v19  ;;  %v413_v21 = vld [vmem:[%s10391_s26 + $0x150] sm:$0xff] }
  0x21   : > { %412 = vst [vmem:[%s10399_s27 + $0xa0] sm:$0xff] %v411_v20  ;;  %v415_v22 = vld [vmem:[%s10391_s26 + $0x160] sm:$0xff]  ;;  %v417_v23 = vld [vmem:[%s10391_s26 + $0x170] sm:$0xff]  ;;  %414 = vst [vmem:[%s10399_s27 + $0xa8] sm:$0xff] %v413_v21 }
  0x22   : > { %416 = vst [vmem:[%s10399_s27 + $0xb0] sm:$0xff] %v415_v22  ;;  %418 = vst [vmem:[%s10399_s27 + $0xb8] sm:$0xff] %v417_v23  ;;  %v419_v24 = vld [vmem:[%s10391_s26 + $0x180] sm:$0xff]  ;;  %v421_v25 = vld [vmem:[%s10391_s26 + $0x190] sm:$0xff] }
  0x23   : > { %v423_v26 = vld [vmem:[%s10391_s26 + $0x1a0] sm:$0xff]  ;;  %420 = vst [vmem:[%s10399_s27 + $0xc0] sm:$0xff] %v419_v24  ;;  %422 = vst [vmem:[%s10399_s27 + $0xc8] sm:$0xff] %v421_v25  ;;  %v425_v27 = vld [vmem:[%s10391_s26 + $0x1b0] sm:$0xff] }
  0x24   : > { %424 = vst [vmem:[%s10399_s27 + $0xd0] sm:$0xff] %v423_v26  ;;  %426 = vst [vmem:[%s10399_s27 + $0xd8] sm:$0xff] %v425_v27 }
  0x25 PF: > { %p6958_p10 = scmp.ge.s32.totalorder %s10281_s12, 1  ;;  %p431_p11 = scmp.lt.s32.totalorder %s10281_s12, 3 }
  0x27   : > { %p432_p12 = pnand %p6958_p10, %p431_p11 }
  0x28   : > { %v6985_v28 = vld [vmem:[%s15781_s1 + $0x88] sm:$0xff] (!%p432_p12)  ;;  %v6987_v30 = vld [vmem:[%s15781_s1 + $0x98] sm:$0xff] (!%p432_p12)  ;;  %vm628_vm0 = vcmask (!%p432_p12), 1043456   ;;  %v6984_v33 = vld [vmem:[%s15781_s1 + $0x80] sm:$0xff] (!%p432_p12)  ;;  %v15790_v35 = vmov (!%p432_p12), 0.0   ;;  %s10474_s28 = sand.u32 (!%p432_p12), 1, %s10273_s10  }
  0x29   : > { %435 = sbr.rel (%p432_p12) target bundleno = 1818 (0x71a), region = 90  ;;  %v6989_v29 = vld [vmem:[%s15781_s1 + $0xa8] sm:$0xff] (!%p432_p12)  ;;  %v6991_v32 = vld [vmem:[%s15781_s1 + $0xb8] sm:$0xff] (!%p432_p12)  ;;  %v6988_v34 = vld [vmem:[%s15781_s1 + $0xa0] sm:$0xff] (!%p432_p12)  ;;  %705 = vmatprep.mubr.f32.mxu0 (!%p432_p12), %v15790_v35  ;;  %932 = vmatprep.mubr.f32.mxu1 (!%p432_p12), %v15790_v35  ;;  %vm10284_vm1 = vmmov (!%p432_p12), 1   ;;  %vm555_vm3 = vcmask (!%p432_p12), 228352  }
  0x2a   : > { %v8318_v31 = vpack.c.bf16 (!%p432_p12), %v6989_v29, %v6985_v28  ;;  %v8328_v36 = vpack.c.bf16 (!%p432_p12), %v6991_v32, %v6987_v30  ;;  %v8320_v37 = vpack.c.bf16 (!%p432_p12), %v6988_v34, %v6984_v33  ;;  %v6986_v38 = vld [vmem:[%s15781_s1 + $0x90] sm:$0xff] (!%p432_p12)  ;;  %v6993_v40 = vld [vmem:[%s15781_s1 + $0xc8] sm:$0xff] (!%p432_p12)  ;;  %s10176_s23 = smul.u32 (!%p432_p12), 224, %s10474_s28  ;;  %vm10490_vm2 = vmpackc.low (!%p432_p12), %vm628_vm0, %vm10284_vm1  ;;  %vm6726_vm4 = vcmask (!%p432_p12), 949248   ;;  %s6959_s16 = sshll.u32 (!%p432_p12), %s10474_s28, 3 }
  0x2b   : > { %v6990_v39 = vld [vmem:[%s15781_s1 + $0xb0] sm:$0xff] (!%p432_p12)  ;;  %v6997_v42 = vld [vmem:[%s15781_s1 + $0xe8] sm:$0xf] (!%p432_p12)  ;;  %v6995_v44 = vld [vmem:[%s15781_s1 + $0xd8] sm:$0xff] (!%p432_p12)  ;;  %s472_s22 = scalar_lea.vmem (!%p432_p12), [#allocation3], %s6959_s16  ;;  %vm6873_vm5 = vcmask (!%p432_p12), 80896  }
  0x2c   : > { %8319 = vmatprep.subr.bf16.mxu0 (!%p432_p12), %v8318_v31  ;;  %v8330_v41 = vpack.c.bf16 (!%p432_p12), %v6990_v39, %v6986_v38  ;;  %9647 = vmatprep.subr.bf16.mxu1 (!%p432_p12), %v8328_v36  ;;  %v8322_v45 = vpack.c.bf16 (!%p432_p12), %v6997_v42, %v6993_v40  ;;  %v6999_v46 = vld [vmem:[%s15781_s1 + $0xf8] sm:$0xf] (!%p432_p12)  ;;  %v6992_v47 = vld [vmem:[%s15781_s1 + $0xc0] sm:$0xff] (!%p432_p12)  ;;  %v6994_v51 = vld [vmem:[%s15781_s1 + $0xd0] sm:$0xff] (!%p432_p12)  ;;  %s10518_s29 = scalar_lea.vmem (!%p432_p12), [#allocation2], %s10176_s23  ;;  %s15798_s23 = sadd.s32 (!%p432_p12), 4294967295, %s10281_s12  }
  0x2d   : > { %8321 = vmatpush1.bf16.msra.mxu0 (!%p432_p12), %v8320_v37  ;;  %v6996_v48 = vld [vmem:[%s15781_s1 + $0xe0] sm:$0xf] (!%p432_p12)  ;;  %v8332_v49 = vpack.c.bf16 (!%p432_p12), %v6999_v46, %v6995_v44  ;;  %v6998_v52 = vld [vmem:[%s15781_s1 + $0xf0] sm:$0xf] (!%p432_p12)  ;;  %v10521_v54 = vld [vmem:[%s10518_s29 + $0x8] sm:$0xff] (!%p432_p12)  ;;  %s8280_s21 = sshll.u32 (!%p432_p12), %s15798_s23, 7 }
  0x2e   : > { %9649 = vmatpush1.bf16.msra.mxu1 (!%p432_p12), %v8330_v41  ;;  %v8325_v50 = vpack.c.bf16 (!%p432_p12), %v6996_v48, %v6992_v47  ;;  %8324 = vmatprep.subr.msk.bf16.mxu0 (!%p432_p12), %vm10490_vm2, %v8322_v45  ;;  %v8335_v53 = vpack.c.bf16 (!%p432_p12), %v6998_v52, %v6994_v51  ;;  %v10524_v55 = vld [vmem:[%s10518_s29 + $0x20] sm:$0xff] (!%p432_p12)  ;;  %v500_v56 = vld [vmem:[%s15781_s1 + $0x18] sm:$0xff] (!%p432_p12)  ;;  %v499_v58 = vld [vmem:[%s15781_s1 + $0x10] sm:$0xff] (!%p432_p12)  ;;  %s6889_s24 = sshll.u32 (!%p432_p12), %s472_s22, 4  ;;  %s15736_s26 = scalar_lea.hbm (!%p432_p12), %s15789_s9, %s8280_s21  ;;  %s15738_s24 = int_to_ptr.vmem [resolvable:$true] %s6889_s24 }
  0x2f   : > { %9648 = vmatprep.subr.msk.bf16.mxu1 (!%p432_p12), %vm10490_vm2, %v8332_v49  ;;  %v504_v57 = vld [vmem:[%s15781_s1 + $0x38] sm:$0xff] (!%p432_p12)  ;;  %v503_v60 = vld [vmem:[%s15781_s1 + $0x30] sm:$0xff] (!%p432_p12)  ;;  %v10550_v63 = vld [vmem:[%s10518_s29 + $0x28] sm:$0xff] (!%p432_p12)  ;;  %s6876_s27 = scalar_lea.sflag (!%p432_p12), [#allocation4], %s10474_s28  ;;  %s10219_s14 = scalar_lea.vmem (!%p432_p12), %s15738_s24, 128 }
  0x30   : > { %v8348_v59 = vpack.c.bf16 %v504_v57, %v500_v56  ;;  %v8350_v61 = vpack.c.bf16 %v503_v60, %v499_v58  ;;  %v10545_v62 = vld [vmem:[%s10518_s29 + $0x10] sm:$0xff]  ;;  %v508_v0 = vld [vmem:[%s15781_s1 + $0x58] sm:$0xff]  ;;  %v498_v7 = vld [vmem:[%s15781_s1 + $0x8] sm:$0xff]  ;;  %p10220_p13 = scmp.ne.s32.totalorder %s15738_s24, %s10219_s14  ;;  %s10286_s16 = smov [#allocation3]  }
  0x31   : > { %8327 = vmatpush1.bf16.msk.msra.mxu0 %vm10490_vm2, %v8325_v50  ;;  %v512_v1 = vld [vmem:[%s15781_s1 + $0x78] sm:$0xf]  ;;  %v507_v2 = vld [vmem:[%s15781_s1 + $0x50] sm:$0xff]  ;;  %v502_v9 = vld [vmem:[%s15781_s1 + $0x28] sm:$0xff]  ;;  %s10223_s17 = sshll.u32 %s10286_s16, 4  ;;  %s10224_s17 = int_to_ptr.vmem [resolvable:$false] %s10223_s17 }
  0x32   : > { %9650 = vmatpush1.bf16.msk.msra.mxu1 %vm10490_vm2, %v8335_v53  ;;  %8329 = vmatprep.subr.bf16.mxu0 %v8328_v36  ;;  %v511_v3 = vld [vmem:[%s15781_s1 + $0x70] sm:$0xf]  ;;  %v8352_v4 = vpack.c.bf16 %v512_v1, %v508_v0  ;;  %v10572_v6 = vld [vmem:[%s10518_s29 + $0x18] sm:$0xff]  ;;  %v8338_v10 = vpack.c.bf16 %v502_v9, %v498_v7  ;;  %v10612_v15 = vld [vmem:[%s10518_s29 + $0x40] sm:$0xff]  ;;  %p10221_p0 = pnand %p10220_p13, %p10375_p6  ;;  %s10225_s13 = scalar_lea.vmem %s10224_s17, 256 }
  0x33   : > { %8349 = vmatprep.subr.bf16.mxu1 %v8348_v59  ;;  %v8355_v5 = vpack.c.bf16 %v511_v3, %v507_v2  ;;  %v10579_v8 = vld [vmem:[%s10518_s29 + $0x30] sm:$0xff]  ;;  %v7131_v11 = vld [vmem:[%s15781_s1 + $0x118] sm:$0xff]  ;;  %v10621_v16 = vld [vmem:[%s10518_s29 + $0x48] sm:$0xff]  ;;  %p10226_p2 = scmp.lt.s32.totalorder %s15738_s24, %s10224_s17  ;;  %p10227_p3 = scmp.lt.s32.totalorder %s10225_s13, %s10219_s14 }
  0x34   : > { %7002 = vmatmul.mubr.msk.f32.vlgmr.msra.gmra.mrb[0].mxu0 %vm555_vm3, %v10521_v54  ;;  %v7135_v12 = vld [vmem:[%s15781_s1 + $0x138] sm:$0xff]  ;;  %v10630_v17 = vld [vmem:[%s10518_s29 + $0x50] sm:$0xff]  ;;  %v10648_v19 = vld [vmem:[%s10518_s29 + $0x60] sm:$0xff]  ;;  %p10222_p1 = pneg %p10221_p0 }
  0x35   : > { %7031 = vmatmul.mubr.msk.f32.vlgmr.msra.gmra.mrb[0].mxu1 %vm555_vm3, %v10524_v55  ;;  %8331 = vmatpush1.bf16.msra.mxu0 %v8330_v41  ;;  %v10603_v13 = vld [vmem:[%s10518_s29 + $0x38] sm:$0xff]  ;;  %v8368_v14 = vpack.c.bf16 %v7135_v12, %v7131_v11  ;;  %v10657_v20 = vld [vmem:[%s10518_s29 + $0x68] sm:$0xff]  ;;  %v10666_v21 = vld [vmem:[%s10518_s29 + $0x70] sm:$0xff]  ;;  %p10228_p4 = por %p10227_p3, %p10226_p2 }
  0x36   : > { %711 = vmatprep.mubr.f32.mxu0 %v15790_v35  ;;  %938 = vmatprep.mubr.f32.mxu1 %v15790_v35  ;;  %v10639_v18 = vld [vmem:[%s10518_s29 + $0x58] sm:$0xff]  ;;  %v10684_v23 = vld [vmem:[%s10518_s29 + $0x80] sm:$0xff]  ;;  %v10693_v24 = vld [vmem:[%s10518_s29 + $0x88] sm:$0xff] }
  0x37   : > { %8334 = vmatprep.subr.msk.bf16.mxu0 %vm10490_vm2, %v8332_v49  ;;  %8351 = vmatpush1.bf16.msra.mxu1 %v8350_v61  ;;  %v10675_v22 = vld [vmem:[%s10518_s29 + $0x78] sm:$0xff]  ;;  %v10702_v25 = vld [vmem:[%s10518_s29 + $0x90] sm:$0xff]  ;;  %v10720_v27 = vld [vmem:[%s10518_s29 + $0xa0] sm:$0xff]  ;;  %p10229_p5 = pnand %p10228_p4, %p10222_p1 }
  0x38   : > { %7003 = vmatmul.mubr.msk.f32.gmra.mrb[2].mxu0 %vm555_vm3, %v10545_v62  ;;  %8354 = vmatprep.subr.msk.bf16.mxu1 %vm10490_vm2, %v8352_v4  ;;  %v10711_v26 = vld [vmem:[%s10518_s29 + $0x98] sm:$0xff]  ;;  %v10729_v28 = vld [vmem:[%s10518_s29 + $0xa8] sm:$0xff]  ;;  %v10738_v29 = vld [vmem:[%s10518_s29 + $0xb0] sm:$0xff] }
  0x39   : > { %7032 = vmatmul.mubr.msk.f32.gmra.mrb[2].mxu1 %vm555_vm3, %v10550_v63  ;;  %717 = vmatprep.mubr.f32.mxu0 %v15790_v35  ;;  %v10747_v30 = vld [vmem:[%s10518_s29 + $0xb8] sm:$0xff]  ;;  %v10756_v31 = vld [vmem:[%s10518_s29 + $0xc0] sm:$0xff]  ;;  %v7130_v32 = vld [vmem:[%s15781_s1 + $0x110] sm:$0xff] }
  0x3a   : > { %944 = vmatprep.mubr.f32.mxu1 %v15790_v35  ;;  %8337 = vmatpush1.bf16.msk.msra.mxu0 %vm10490_vm2, %v8335_v53  ;;  %v7134_v33 = vld [vmem:[%s15781_s1 + $0x130] sm:$0xff]  ;;  %v7139_v34 = vld [vmem:[%s15781_s1 + $0x158] sm:$0xff]  ;;  %v473_v37 = vld [vmem:[%s10518_s29] sm:$0xff] }
  0x3b   : > { %8357 = vmatpush1.bf16.msk.msra.mxu1 %vm10490_vm2, %v8355_v5  ;;  %8339 = vmatprep.subr.bf16.mxu0 %v8338_v10  ;;  %v7143_v36 = vld [vmem:[%s15781_s1 + $0x178] sm:$0xf]  ;;  %v8370_v38 = vpack.c.bf16 %v7134_v33, %v7130_v32  ;;  %v7138_v40 = vld [vmem:[%s15781_s1 + $0x150] sm:$0xff]  ;;  %v497_v47 = vld [vmem:[%s15781_s1] sm:$0xff] }
  0x3c   : > { %7004 = vmatmul.mubr.msk.f32.gmra.mrb[4].mxu0 %vm555_vm3, %v10572_v6  ;;  %8369 = vmatprep.subr.bf16.mxu1 %v8368_v14  ;;  %v8372_v39 = vpack.c.bf16 %v7143_v36, %v7139_v34  ;;  %v7142_v41 = vld [vmem:[%s15781_s1 + $0x170] sm:$0xf]  ;;  %v7223_v42 = vld [vmem:[%s15781_s1 + $0x198] sm:$0xff]  ;;  %v501_v48 = vld [vmem:[%s15781_s1 + $0x20] sm:$0xff] }
  0x3d   : > { %7033 = vmatmul.mubr.msk.f32.gmra.mrb[4].mxu1 %vm555_vm3, %v10579_v8  ;;  %723 = vmatprep.mubr.f32.mxu0 %v15790_v35  ;;  %v7227_v44 = vld [vmem:[%s15781_s1 + $0x1b8] sm:$0xff]  ;;  %v8375_v45 = vpack.c.bf16 %v7142_v41, %v7138_v40  ;;  %v506_v49 = vld [vmem:[%s15781_s1 + $0x48] sm:$0xff]  ;;  %v8340_v51 = vpack.c.bf16 %v501_v48, %v497_v47  ;;  %v505_v53 = vld [vmem:[%s15781_s1 + $0x40] sm:$0xff] }
  0x3e   : > { %950 = vmatprep.mubr.f32.mxu1 %v15790_v35  ;;  %v8388_v46 = vpack.c.bf16 %v7227_v44, %v7223_v42  ;;  %v510_v50 = vld [vmem:[%s15781_s1 + $0x68] sm:$0xf]  ;;  %v509_v56 = vld [vmem:[%s15781_s1 + $0x60] sm:$0xf]  ;;  %v7226_v14 = vld [vmem:[%s15781_s1 + $0x1b0] sm:$0xff] }
  0x3f   : > { %v8342_v52 = vpack.c.bf16 %v510_v50, %v506_v49  ;;  %v7129_v57 = vld [vmem:[%s15781_s1 + $0x108] sm:$0xff]  ;;  %v8345_v59 = vpack.c.bf16 %v509_v56, %v505_v53  ;;  %v7128_v61 = vld [vmem:[%s15781_s1 + $0x100] sm:$0xff]  ;;  %v7231_v32 = vld [vmem:[%s15781_s1 + $0x1d8] sm:$0xff] }
  0x40   : > { %7005 = vmatmul.mubr.msk.f32.gmra.mrb[6].mxu0 %vm555_vm3, %v10524_v55  ;;  %v7133_v58 = vld [vmem:[%s15781_s1 + $0x128] sm:$0xff]  ;;  %v7132_v0 = vld [vmem:[%s15781_s1 + $0x120] sm:$0xff]  ;;  %v7235_v33 = vld [vmem:[%s15781_s1 + $0x1f8] sm:$0xf] }
  0x41   : > { %7034 = vmatmul.mubr.msk.f32.gmra.mrb[6].mxu1 %vm555_vm3, %v10603_v13  ;;  %729 = vmatprep.mubr.f32.mxu0 %v15790_v35  ;;  %v8358_v60 = vpack.c.bf16 %v7133_v58, %v7129_v57  ;;  %v7137_v1 = vld [vmem:[%s15781_s1 + $0x148] sm:$0xff]  ;;  %v8360_v3 = vpack.c.bf16 %v7132_v0, %v7128_v61  ;;  %v7136_v5 = vld [vmem:[%s15781_s1 + $0x140] sm:$0xff]  ;;  %v8392_v36 = vpack.c.bf16 %v7235_v33, %v7231_v32  ;;  %v7319_v40 = vld [vmem:[%s15781_s1 + $0x238] sm:$0xff] }
  0x42   : > { %956 = vmatprep.mubr.f32.mxu1 %v15790_v35  ;;  %v7141_v2 = vld [vmem:[%s15781_s1 + $0x168] sm:$0xf]  ;;  %v7140_v7 = vld [vmem:[%s15781_s1 + $0x160] sm:$0xf]  ;;  %v7314_v58 = vld [vmem:[%s15781_s1 + $0x210] sm:$0xff] }
  0x43   : > { %v8362_v4 = vpack.c.bf16 %v7141_v2, %v7137_v1  ;;  %v7221_v9 = vld [vmem:[%s15781_s1 + $0x188] sm:$0xff]  ;;  %v8365_v11 = vpack.c.bf16 %v7140_v7, %v7136_v5  ;;  %v7220_v44 = vld [vmem:[%s15781_s1 + $0x180] sm:$0xff]  ;;  %v7327_v61 = vld [vmem:[%s15781_s1 + $0x278] sm:$0xf] }
  0x44   : > { %7006 = vmatmul.mubr.msk.f32.gmra.mrb[8].mxu0 %vm555_vm3, %v10550_v63  ;;  %v7225_v10 = vld [vmem:[%s15781_s1 + $0x1a8] sm:$0xff]  ;;  %v7228_v50 = vld [vmem:[%s15781_s1 + $0x1c0] sm:$0xff]  ;;  %v7322_v2 = vld [vmem:[%s15781_s1 + $0x250] sm:$0xff] }
  0x45   : > { %7035 = vmatmul.mubr.msk.f32.gmra.mrb[8].mxu1 %vm555_vm3, %v10612_v15  ;;  %735 = vmatprep.mubr.f32.mxu0 %v15790_v35  ;;  %v8378_v12 = vpack.c.bf16 %v7225_v10, %v7221_v9  ;;  %v7233_v47 = vld [vmem:[%s15781_s1 + $0x1e8] sm:$0xf]  ;;  %v7312_v5 = vld [vmem:[%s15781_s1 + $0x200] sm:$0xff] }
  0x46   : > { %962 = vmatprep.mubr.f32.mxu1 %v15790_v35  ;;  %v7317_v53 = vld [vmem:[%s15781_s1 + $0x228] sm:$0xff]  ;;  %v7316_v7 = vld [vmem:[%s15781_s1 + $0x220] sm:$0xff] }
  0x47   : > { %v11186_v57 = vld [vmem:[%s10518_s29 + $0xc8] sm:$0xff] }
  0x48   : > { %7007 = vmatmul.mubr.msk.f32.gmra.mrb[10].mxu0 %vm555_vm3, %v10579_v8  ;;  %v7321_v9 = vld [vmem:[%s15781_s1 + $0x248] sm:$0xff] }
  0x49   : > { %7036 = vmatmul.mubr.msk.f32.gmra.mrb[10].mxu1 %vm555_vm3, %v10621_v16  ;;  %741 = vmatprep.mubr.f32.mxu0 %v15790_v35  ;;  %v7325_v10 = vld [vmem:[%s15781_s1 + $0x268] sm:$0xf] }
  0x4a   : > { %968 = vmatprep.mubr.f32.mxu1 %v15790_v35 }
  0x4c   : > { %7008 = vmatmul.mubr.msk.f32.gmra.mrb[12].mxu0 %vm555_vm3, %v10603_v13 }
  0x4d   : > { %7037 = vmatmul.mubr.msk.f32.gmra.mrb[12].mxu1 %vm555_vm3, %v10630_v17  ;;  %747 = vmatprep.mubr.f32.mxu0 %v15790_v35 }
  0x4e   : > { %974 = vmatprep.mubr.f32.mxu1 %v15790_v35 }
  0x50   : > { %7009 = vmatmul.mubr.msk.f32.gmra.mrb[14].mxu0 %vm555_vm3, %v10612_v15 }
  0x51   : > { %7038 = vmatmul.mubr.msk.f32.gmra.mrb[14].mxu1 %vm555_vm3, %v10639_v18  ;;  %753 = vmatprep.mubr.f32.mxu0 %v15790_v35 }
  0x52   : > { %980 = vmatprep.mubr.f32.mxu1 %v15790_v35 }
  0x54   : > { %7010 = vmatmul.mubr.msk.f32.gmra.mrb[16].mxu0 %vm555_vm3, %v10621_v16 }
  0x55   : > { %7039 = vmatmul.mubr.msk.f32.gmra.mrb[16].mxu1 %vm555_vm3, %v10648_v19  ;;  %759 = vmatprep.mubr.f32.mxu0 %v15790_v35 }
  0x56   : > { %986 = vmatprep.mubr.f32.mxu1 %v15790_v35 }
  0x58   : > { %7011 = vmatmul.mubr.msk.f32.gmra.mrb[18].mxu0 %vm555_vm3, %v10630_v17 }
  0x59   : > { %7040 = vmatmul.mubr.msk.f32.gmra.mrb[18].mxu1 %vm555_vm3, %v10657_v20  ;;  %765 = vmatprep.mubr.f32.mxu0 %v15790_v35 }
  0x5a   : > { %992 = vmatprep.mubr.f32.mxu1 %v15790_v35 }
  0x5c   : > { %7012 = vmatmul.mubr.msk.f32.gmra.mrb[20].mxu0 %vm555_vm3, %v10639_v18 }
  0x5d   : > { %7041 = vmatmul.mubr.msk.f32.gmra.mrb[20].mxu1 %vm555_vm3, %v10666_v21  ;;  %771 = vmatprep.mubr.f32.mxu0 %v15790_v35 }
  0x5e   : > { %998 = vmatprep.mubr.f32.mxu1 %v15790_v35 }
  0x60   : > { %7013 = vmatmul.mubr.msk.f32.gmra.mrb[22].mxu0 %vm555_vm3, %v10648_v19 }
  0x61   : > { %7042 = vmatmul.mubr.msk.f32.gmra.mrb[22].mxu1 %vm555_vm3, %v10675_v22  ;;  %777 = vmatprep.mubr.f32.mxu0 %v15790_v35 }
  0x62   : > { %1004 = vmatprep.mubr.f32.mxu1 %v15790_v35 }
  0x64   : > { %7014 = vmatmul.mubr.msk.f32.gmra.mrb[24].mxu0 %vm555_vm3, %v10657_v20 }
  0x65   : > { %7043 = vmatmul.mubr.msk.f32.gmra.mrb[24].mxu1 %vm555_vm3, %v10684_v23  ;;  %783 = vmatprep.mubr.f32.mxu0 %v15790_v35 }
  0x66   : > { %1010 = vmatprep.mubr.f32.mxu1 %v15790_v35 }
  0x68   : > { %7015 = vmatmul.mubr.msk.f32.gmra.mrb[26].mxu0 %vm555_vm3, %v10666_v21 }
  0x69   : > { %7044 = vmatmul.mubr.msk.f32.gmra.mrb[26].mxu1 %vm555_vm3, %v10693_v24  ;;  %789 = vmatprep.mubr.f32.mxu0 %v15790_v35 }
  0x6a   : > { %1016 = vmatprep.mubr.f32.mxu1 %v15790_v35 }
  0x6c   : > { %7016 = vmatmul.mubr.msk.f32.gmra.mrb[28].mxu0 %vm555_vm3, %v10675_v22 }
  0x6d   : > { %7045 = vmatmul.mubr.msk.f32.gmra.mrb[28].mxu1 %vm555_vm3, %v10702_v25  ;;  %795 = vmatprep.mubr.f32.mxu0 %v15790_v35 }
  0x6e   : > { %1022 = vmatprep.mubr.f32.mxu1 %v15790_v35 }
  0x70   : > { %7017 = vmatmul.mubr.msk.f32.gmra.mrb[30].mxu0 %vm555_vm3, %v10684_v23 }
  0x71   : > { %7046 = vmatmul.mubr.msk.f32.gmra.mrb[30].mxu1 %vm555_vm3, %v10711_v26  ;;  %801 = vmatprep.mubr.f32.mxu0 %v15790_v35 }
  0x72   : > { %1028 = vmatprep.mubr.f32.mxu1 %v15790_v35 }
  0x74   : > { %7018 = vmatmul.mubr.msk.f32.gmra.mrb[32].mxu0 %vm555_vm3, %v10693_v24 }
  0x75   : > { %7047 = vmatmul.mubr.msk.f32.gmra.mrb[32].mxu1 %vm555_vm3, %v10720_v27  ;;  %807 = vmatprep.mubr.f32.mxu0 %v15790_v35 }
  0x76   : > { %1034 = vmatprep.mubr.f32.mxu1 %v15790_v35 }
  0x78   : > { %7019 = vmatmul.mubr.msk.f32.gmra.mrb[34].mxu0 %vm555_vm3, %v10702_v25 }
  0x79   : > { %7048 = vmatmul.mubr.msk.f32.gmra.mrb[34].mxu1 %vm555_vm3, %v10729_v28  ;;  %813 = vmatprep.mubr.f32.mxu0 %v15790_v35 }
  0x7a   : > { %1040 = vmatprep.mubr.f32.mxu1 %v15790_v35 }
  0x7c   : > { %7020 = vmatmul.mubr.msk.f32.gmra.mrb[36].mxu0 %vm555_vm3, %v10711_v26 }
  0x7d   : > { %7049 = vmatmul.mubr.msk.f32.gmra.mrb[36].mxu1 %vm555_vm3, %v10738_v29  ;;  %819 = vmatprep.mubr.f32.mxu0 %v15790_v35 }
  0x7e   : > { %1046 = vmatprep.mubr.f32.mxu1 %v15790_v35 }
  0x80   : > { %7021 = vmatmul.mubr.msk.f32.gmra.mrb[38].mxu0 %vm555_vm3, %v10720_v27 }
  0x81   : > { %7050 = vmatmul.mubr.msk.f32.gmra.mrb[38].mxu1 %vm555_vm3, %v10747_v30  ;;  %825 = vmatprep.mubr.f32.mxu0 %v15790_v35 }
  0x82   : > { %1052 = vmatprep.mubr.f32.mxu1 %v15790_v35 }
  0x84   : > { %7022 = vmatmul.mubr.msk.f32.gmra.mrb[40].mxu0 %vm555_vm3, %v10729_v28 }
  0x85   : > { %7051 = vmatmul.mubr.msk.f32.gmra.mrb[40].mxu1 %vm555_vm3, %v10756_v31  ;;  %831 = vmatprep.mubr.f32.mxu0 %v15790_v35 }
  0x86   : > { %1416 = vmatprep.mubr.f32.mxu1 %v15790_v35 }
  0x88   : > { %7023 = vmatmul.mubr.msk.f32.gmra.mrb[42].mxu0 %vm555_vm3, %v10738_v29 }
  0x89   : > { %7080 = vmatmul.mubr.msk.f32.vlgmr.msra.gmra.mrb[42].mxu1 %vm555_vm3, %v473_v37  ;;  %837 = vmatprep.mubr.f32.mxu0 %v15790_v35 }
  0x8a   : > { %1422 = vmatprep.mubr.f32.mxu1 %v15790_v35  ;;  %8371 = vmatpush1.bf16.msra.mxu1 %v8370_v38  ;;  %v7234_v38 = vld [vmem:[%s15781_s1 + $0x1f0] sm:$0xf] }
  0x8b   : > { %8374 = vmatprep.subr.msk.bf16.mxu1 %vm10490_vm2, %v8372_v39  ;;  %v7315_v39 = vld [vmem:[%s15781_s1 + $0x218] sm:$0xff] }
  0x8c   : > { %7024 = vmatmul.mubr.msk.f32.gmra.mrb[44].mxu0 %vm555_vm3, %v10747_v30  ;;  %v8408_v42 = vpack.c.bf16 %v7319_v40, %v7315_v39  ;;  %v11443_v39 = vld [vmem:[%s10518_s29 + $0x28] sm:$0xff] }
  0x8d   : > { %7081 = vmatmul.mubr.msk.f32.gmra.mrb[44].mxu1 %vm555_vm3, %v10521_v54  ;;  %843 = vmatprep.mubr.f32.mxu0 %v15790_v35 }
  0x8e   : > { %1428 = vmatprep.mubr.f32.mxu1 %v15790_v35  ;;  %8377 = vmatpush1.bf16.msk.msra.mxu1 %vm10490_vm2, %v8375_v45  ;;  %v7224_v45 = vld [vmem:[%s15781_s1 + $0x1a0] sm:$0xff] }
  0x8f   : > { %8389 = vmatprep.subr.bf16.mxu1 %v8388_v46  ;;  %v7229_v46 = vld [vmem:[%s15781_s1 + $0x1c8] sm:$0xff]  ;;  %v8380_v48 = vpack.c.bf16 %v7224_v45, %v7220_v44  ;;  %v7407_v44 = vld [vmem:[%s15783_s3 + $0x4d8] sm:$0xff] }
  0x90   : > { %7025 = vmatmul.mubr.msk.f32.gmra.mrb[46].mxu0 %vm555_vm3, %v10756_v31  ;;  %v8382_v49 = vpack.c.bf16 %v7233_v47, %v7229_v46  ;;  %v7411_v45 = vld [vmem:[%s15783_s3 + $0x4f8] sm:$0xff]  ;;  %v11464_v46 = vld [vmem:[%s10518_s29 + $0x30] sm:$0xff] }
  0x91   : > { %7082 = vmatmul.mubr.msk.f32.gmra.mrb[46].mxu1 %vm555_vm3, %v10545_v62  ;;  %914 = vmatprep.mubr.f32.mxu0 %v15790_v35  ;;  %v8494_v47 = vpack.c.bf16 %v7411_v45, %v7407_v44  ;;  %v7409_v44 = vld [vmem:[%s15783_s3 + $0x4e8] sm:$0xff] }
  0x92   : > { %1434 = vmatprep.mubr.f32.mxu1 %v15790_v35 }
  0x94   : > { %7028 = vmatmul.mubr.msk.f32.vlgmr.msra.gmra.mrb[48].mxu0 %vm555_vm3, %v10521_v54 }
  0x95   : > { %7083 = vmatmul.mubr.msk.f32.gmra.mrb[0].mxu1 %vm555_vm3, %v10572_v6  ;;  %8341 = vmatpush1.bf16.msra.mxu0 %v8340_v51  ;;  %v7232_v51 = vld [vmem:[%s15781_s1 + $0x1e0] sm:$0xf] }
  0x96   : > { %920 = vmatprep.mubr.f32.mxu0 %v15790_v35  ;;  %1440 = vmatprep.mubr.f32.mxu1 %v15790_v35  ;;  %v8385_v56 = vpack.c.bf16 %v7232_v51, %v7228_v50  ;;  %v7415_v50 = vld [vmem:[%s15783_s3 + $0x518] sm:$0xff] }
  0x97   : > { %8344 = vmatprep.subr.msk.bf16.mxu0 %vm10490_vm2, %v8342_v52  ;;  %v7313_v52 = vld [vmem:[%s15781_s1 + $0x208] sm:$0xff]  ;;  %v7419_v51 = vld [vmem:[%s15783_s3 + $0x538] sm:$0xff] }
  0x98   : > { %7029 = vmatmul.mubr.msk.f32.gmra.mrb[50].mxu0 %vm555_vm3, %v10545_v62 }
  0x99   : > { %7084 = vmatmul.mubr.msk.f32.gmra.mrb[2].mxu1 %vm555_vm3, %v10524_v55  ;;  %926 = vmatprep.mubr.f32.mxu0 %v15790_v35 }
  0x9a   : > { %8347 = vmatpush1.bf16.msk.msra.mxu0 %vm10490_vm2, %v8345_v59  ;;  %1446 = vmatprep.mubr.f32.mxu1 %v15790_v35  ;;  %v7318_v59 = vld [vmem:[%s15781_s1 + $0x230] sm:$0xff] }
  0x9b   : > { %8359 = vmatprep.subr.bf16.mxu0 %v8358_v60  ;;  %v7323_v60 = vld [vmem:[%s15781_s1 + $0x258] sm:$0xff]  ;;  %v8410_v0 = vpack.c.bf16 %v7318_v59, %v7314_v58 }
  0x9c   : > { %7030 = vmatmul.mubr.msk.f32.gmra.mrb[52].mxu0 %vm555_vm3, %v10572_v6  ;;  %v8412_v1 = vpack.c.bf16 %v7327_v61, %v7323_v60  ;;  %v7423_v58 = vld [vmem:[%s15783_s3 + $0x558] sm:$0xff]  ;;  %v11506_v60 = vld [vmem:[%s10518_s29 + $0x40] sm:$0xff] }
  0x9d   : > { %7085 = vmatmul.mubr.msk.f32.gmra.mrb[4].mxu1 %vm555_vm3, %v10550_v63  ;;  %1207 = vmatprep.mubr.f32.mxu0 %v15790_v35  ;;  %v7427_v59 = vld [vmem:[%s15783_s3 + $0x578] sm:$0xff] }
  0x9e   : > { %1452 = vmatprep.mubr.f32.mxu1 %v15790_v35  ;;  %v8502_v61 = vpack.c.bf16 %v7427_v59, %v7423_v58  ;;  %v7421_v58 = vld [vmem:[%s15783_s3 + $0x548] sm:$0xff] }
  0x9f   : > { %v7425_v59 = vld [vmem:[%s15783_s3 + $0x568] sm:$0xff] }
  0xa0   : > { %7054 = vmatmul.mubr.msk.f32.vlgmr.msra.gmra.mrb[0].mxu0 %vm555_vm3, %v473_v37  ;;  %v7230_v37 = vld [vmem:[%s15781_s1 + $0x1d0] sm:$0xff] }
  0xa1   : > { %7086 = vmatmul.mubr.msk.f32.gmra.mrb[6].mxu1 %vm555_vm3, %v10579_v8  ;;  %8361 = vmatpush1.bf16.msra.mxu0 %v8360_v3  ;;  %v8395_v41 = vpack.c.bf16 %v7234_v38, %v7230_v37  ;;  %v7326_v3 = vld [vmem:[%s15781_s1 + $0x270] sm:$0xf]  ;;  %v7399_v37 = vld [vmem:[%s15783_s3 + $0x498] sm:$0xff] }
  0xa2   : > { %1213 = vmatprep.mubr.f32.mxu0 %v15790_v35  ;;  %1458 = vmatprep.mubr.f32.mxu1 %v15790_v35  ;;  %v7403_v38 = vld [vmem:[%s15783_s3 + $0x4b8] sm:$0xff] }
  0xa3   : > { %8364 = vmatprep.subr.msk.bf16.mxu0 %vm10490_vm2, %v8362_v4  ;;  %v8415_v4 = vpack.c.bf16 %v7326_v3, %v7322_v2  ;;  %v8490_v40 = vpack.c.bf16 %v7403_v38, %v7399_v37  ;;  %v7431_v2 = vld [vmem:[%s15783_s3 + $0x598] sm:$0xff] }
  0xa4   : > { %7055 = vmatmul.mubr.msk.f32.gmra.mrb[2].mxu0 %vm555_vm3, %v10521_v54  ;;  %v7222_v54 = vld [vmem:[%s15781_s1 + $0x190] sm:$0xff]  ;;  %v7435_v3 = vld [vmem:[%s15783_s3 + $0x5b8] sm:$0xff] }
  0xa5   : > { %7087 = vmatmul.mubr.msk.f32.gmra.mrb[8].mxu1 %vm555_vm3, %v10603_v13  ;;  %1219 = vmatprep.mubr.f32.mxu0 %v15790_v35  ;;  %v8390_v34 = vpack.c.bf16 %v7226_v14, %v7222_v54  ;;  %v7320_v54 = vld [vmem:[%s15781_s1 + $0x240] sm:$0xff] }
  0xa6   : > { %1464 = vmatprep.mubr.f32.mxu1 %v15790_v35  ;;  %8367 = vmatpush1.bf16.msk.msra.mxu0 %vm10490_vm2, %v8365_v11  ;;  %v8400_v11 = vpack.c.bf16 %v7316_v7, %v7312_v5  ;;  %v7324_v14 = vld [vmem:[%s15781_s1 + $0x260] sm:$0xf] }
  0xa7   : > { %8379 = vmatprep.subr.bf16.mxu0 %v8378_v12  ;;  %v8402_v12 = vpack.c.bf16 %v7325_v10, %v7321_v9  ;;  %v8405_v32 = vpack.c.bf16 %v7324_v14, %v7320_v54  ;;  %v7380_v7 = vld [vmem:[%s15783_s3 + $0x400] sm:$0xff]  ;;  %v7389_v10 = vld [vmem:[%s15783_s3 + $0x448] sm:$0xff]  ;;  %v7430_v54 = vld [vmem:[%s15783_s3 + $0x590] sm:$0xff] }
  0xa8   : > { %7056 = vmatmul.mubr.msk.f32.gmra.mrb[4].mxu0 %vm555_vm3, %v10545_v62  ;;  %v7384_v9 = vld [vmem:[%s15783_s3 + $0x420] sm:$0xff]  ;;  %v7434_v14 = vld [vmem:[%s15783_s3 + $0x5b0] sm:$0xff] }
  0xa9   : > { %7088 = vmatmul.mubr.msk.f32.gmra.mrb[10].mxu1 %vm555_vm3, %v10612_v15  ;;  %1225 = vmatprep.mubr.f32.mxu0 %v15790_v35 }
  0xaa   : > { %1470 = vmatprep.mubr.f32.mxu1 %v15790_v35 }
  0xac   : > { %7057 = vmatmul.mubr.msk.f32.gmra.mrb[6].mxu0 %vm555_vm3, %v10572_v6 }
  0xad   : > { %7089 = vmatmul.mubr.msk.f32.gmra.mrb[12].mxu1 %vm555_vm3, %v10621_v16  ;;  %1231 = vmatprep.mubr.f32.mxu0 %v15790_v35 }
  0xae   : > { %1476 = vmatprep.mubr.f32.mxu1 %v15790_v35 }
  0xb0   : > { %7058 = vmatmul.mubr.msk.f32.gmra.mrb[8].mxu0 %vm555_vm3, %v10524_v55 }
  0xb1   : > { %7090 = vmatmul.mubr.msk.f32.gmra.mrb[14].mxu1 %vm555_vm3, %v10630_v17  ;;  %1237 = vmatprep.mubr.f32.mxu0 %v15790_v35 }
  0xb2   : > { %1482 = vmatprep.mubr.f32.mxu1 %v15790_v35 }
  0xb4   : > { %7059 = vmatmul.mubr.msk.f32.gmra.mrb[10].mxu0 %vm555_vm3, %v10550_v63 }
  0xb5   : > { %7091 = vmatmul.mubr.msk.f32.gmra.mrb[16].mxu1 %vm555_vm3, %v10639_v18  ;;  %1243 = vmatprep.mubr.f32.mxu0 %v15790_v35 }
  0xb6   : > { %1488 = vmatprep.mubr.f32.mxu1 %v15790_v35 }
  0xb8   : > { %7060 = vmatmul.mubr.msk.f32.gmra.mrb[12].mxu0 %vm555_vm3, %v10579_v8 }
  0xb9   : > { %7092 = vmatmul.mubr.msk.f32.gmra.mrb[18].mxu1 %vm555_vm3, %v10648_v19  ;;  %1249 = vmatprep.mubr.f32.mxu0 %v15790_v35 }
  0xba   : > { %1494 = vmatprep.mubr.f32.mxu1 %v15790_v35 }
  0xbc   : > { %7061 = vmatmul.mubr.msk.f32.gmra.mrb[14].mxu0 %vm555_vm3, %v10603_v13 }
  0xbd   : > { %7093 = vmatmul.mubr.msk.f32.gmra.mrb[20].mxu1 %vm555_vm3, %v10657_v20  ;;  %1255 = vmatprep.mubr.f32.mxu0 %v15790_v35 }
  0xbe   : > { %1500 = vmatprep.mubr.f32.mxu1 %v15790_v35 }
  0xc0   : > { %7062 = vmatmul.mubr.msk.f32.gmra.mrb[16].mxu0 %vm555_vm3, %v10612_v15 }
  0xc1   : > { %7094 = vmatmul.mubr.msk.f32.gmra.mrb[22].mxu1 %vm555_vm3, %v10666_v21  ;;  %1261 = vmatprep.mubr.f32.mxu0 %v15790_v35 }
  0xc2   : > { %1506 = vmatprep.mubr.f32.mxu1 %v15790_v35 }
  0xc4   : > { %7063 = vmatmul.mubr.msk.f32.gmra.mrb[18].mxu0 %vm555_vm3, %v10621_v16 }
  0xc5   : > { %7095 = vmatmul.mubr.msk.f32.gmra.mrb[24].mxu1 %vm555_vm3, %v10675_v22  ;;  %1267 = vmatprep.mubr.f32.mxu0 %v15790_v35 }
  0xc6   : > { %1512 = vmatprep.mubr.f32.mxu1 %v15790_v35 }
  0xc8   : > { %7064 = vmatmul.mubr.msk.f32.gmra.mrb[20].mxu0 %vm555_vm3, %v10630_v17 }
  0xc9   : > { %7096 = vmatmul.mubr.msk.f32.gmra.mrb[26].mxu1 %vm555_vm3, %v10684_v23  ;;  %1273 = vmatprep.mubr.f32.mxu0 %v15790_v35 }
  0xca   : > { %1518 = vmatprep.mubr.f32.mxu1 %v15790_v35 }
  0xcc   : > { %7065 = vmatmul.mubr.msk.f32.gmra.mrb[22].mxu0 %vm555_vm3, %v10639_v18 }
  0xcd   : > { %7097 = vmatmul.mubr.msk.f32.gmra.mrb[28].mxu1 %vm555_vm3, %v10693_v24  ;;  %1279 = vmatprep.mubr.f32.mxu0 %v15790_v35 }
  0xce   : > { %1524 = vmatprep.mubr.f32.mxu1 %v15790_v35 }
  0xd0   : > { %7066 = vmatmul.mubr.msk.f32.gmra.mrb[24].mxu0 %vm555_vm3, %v10648_v19 }
  0xd1   : > { %7098 = vmatmul.mubr.msk.f32.gmra.mrb[30].mxu1 %vm555_vm3, %v10702_v25  ;;  %1285 = vmatprep.mubr.f32.mxu0 %v15790_v35 }
  0xd2   : > { %1530 = vmatprep.mubr.f32.mxu1 %v15790_v35 }
  0xd4   : > { %7067 = vmatmul.mubr.msk.f32.gmra.mrb[26].mxu0 %vm555_vm3, %v10657_v20 }
  0xd5   : > { %7099 = vmatmul.mubr.msk.f32.gmra.mrb[32].mxu1 %vm555_vm3, %v10711_v26  ;;  %1291 = vmatprep.mubr.f32.mxu0 %v15790_v35 }
  0xd6   : > { %1536 = vmatprep.mubr.f32.mxu1 %v15790_v35 }
  0xd8   : > { %7068 = vmatmul.mubr.msk.f32.gmra.mrb[28].mxu0 %vm555_vm3, %v10666_v21 }
  0xd9   : > { %7100 = vmatmul.mubr.msk.f32.gmra.mrb[34].mxu1 %vm555_vm3, %v10720_v27  ;;  %1297 = vmatprep.mubr.f32.mxu0 %v15790_v35 }
  0xda   : > { %1542 = vmatprep.mubr.f32.mxu1 %v15790_v35 }
  0xdc   : > { %7069 = vmatmul.mubr.msk.f32.gmra.mrb[30].mxu0 %vm555_vm3, %v10675_v22 }
  0xdd   : > { %7101 = vmatmul.mubr.msk.f32.gmra.mrb[36].mxu1 %vm555_vm3, %v10729_v28  ;;  %1303 = vmatprep.mubr.f32.mxu0 %v15790_v35 }
  0xde   : > { %1548 = vmatprep.mubr.f32.mxu1 %v15790_v35 }
  0xe0   : > { %7070 = vmatmul.mubr.msk.f32.gmra.mrb[32].mxu0 %vm555_vm3, %v10684_v23 }
  0xe1   : > { %7102 = vmatmul.mubr.msk.f32.gmra.mrb[38].mxu1 %vm555_vm3, %v10738_v29  ;;  %1309 = vmatprep.mubr.f32.mxu0 %v15790_v35 }
  0xe2   : > { %1554 = vmatprep.mubr.f32.mxu1 %v15790_v35 }
  0xe4   : > { %7071 = vmatmul.mubr.msk.f32.gmra.mrb[34].mxu0 %vm555_vm3, %v10693_v24 }
  0xe5   : > { %7103 = vmatmul.mubr.msk.f32.gmra.mrb[40].mxu1 %vm555_vm3, %v10747_v30  ;;  %1315 = vmatprep.mubr.f32.mxu0 %v15790_v35 }
  0xe6   : > { %1960 = vmatprep.mubr.f32.mxu1 %v15790_v35 }
  0xe8   : > { %7072 = vmatmul.mubr.msk.f32.gmra.mrb[36].mxu0 %vm555_vm3, %v10702_v25 }
  0xe9   : > { %7172 = vmatmul.mubr.msk.f32.vlgmr.msra.gmra.mrb[42].mxu1 %vm555_vm3, %v10545_v62  ;;  %1321 = vmatprep.mubr.f32.mxu0 %v15790_v35 }
  0xea   : > { %1966 = vmatprep.mubr.f32.mxu1 %v15790_v35  ;;  %8391 = vmatpush1.bf16.msra.mxu1 %v8390_v34 }
  0xeb   : > { %8394 = vmatprep.subr.msk.bf16.mxu1 %vm10490_vm2, %v8392_v36  ;;  %v7394_v36 = vld [vmem:[%s15783_s3 + $0x470] sm:$0xff] }
  0xec   : > { %7073 = vmatmul.mubr.msk.f32.gmra.mrb[38].mxu0 %vm555_vm3, %v10711_v26 }
  0xed   : > { %7173 = vmatmul.mubr.msk.f32.gmra.mrb[44].mxu1 %vm555_vm3, %v10572_v6  ;;  %1327 = vmatprep.mubr.f32.mxu0 %v15790_v35 }
  0xee   : > { %1972 = vmatprep.mubr.f32.mxu1 %v15790_v35  ;;  %8397 = vmatpush1.bf16.msk.msra.mxu1 %vm10490_vm2, %v8395_v41  ;;  %v7398_v41 = vld [vmem:[%s15783_s3 + $0x490] sm:$0xff] }
  0xef   : > { %8409 = vmatprep.subr.bf16.mxu1 %v8408_v42  ;;  %v7402_v42 = vld [vmem:[%s15783_s3 + $0x4b0] sm:$0xff] }
  0xf0   : > { %7074 = vmatmul.mubr.msk.f32.gmra.mrb[40].mxu0 %vm555_vm3, %v10720_v27 }
  0xf1   : > { %7174 = vmatmul.mubr.msk.f32.gmra.mrb[46].mxu1 %vm555_vm3, %v10524_v55  ;;  %1333 = vmatprep.mubr.f32.mxu0 %v15790_v35 }
  0xf2   : > { %1978 = vmatprep.mubr.f32.mxu1 %v15790_v35 }
  0xf4   : > { %7075 = vmatmul.mubr.msk.f32.gmra.mrb[42].mxu0 %vm555_vm3, %v10729_v28 }
  0xf5   : > { %7175 = vmatmul.mubr.msk.f32.gmra.mrb[0].mxu1 %vm555_vm3, %v10550_v63  ;;  %1339 = vmatprep.mubr.f32.mxu0 %v15790_v35 }
  0xf6   : > { %1984 = vmatprep.mubr.f32.mxu1 %v15790_v35 }
  0xf8   : > { %7076 = vmatmul.mubr.msk.f32.gmra.mrb[44].mxu0 %vm555_vm3, %v10738_v29 }
  0xf9   : > { %7176 = vmatmul.mubr.msk.f32.gmra.mrb[2].mxu1 %vm555_vm3, %v10579_v8  ;;  %1345 = vmatprep.mubr.f32.mxu0 %v15790_v35 }
  0xfa   : > { %1990 = vmatprep.mubr.f32.mxu1 %v15790_v35 }
  0xfc   : > { %7077 = vmatmul.mubr.msk.f32.gmra.mrb[46].mxu0 %vm555_vm3, %v10747_v30 }
  0xfd   : > { %7177 = vmatmul.mubr.msk.f32.gmra.mrb[4].mxu1 %vm555_vm3, %v10603_v13  ;;  %1751 = vmatprep.mubr.f32.mxu0 %v15790_v35 }
  0xfe   : > { %1996 = vmatprep.mubr.f32.mxu1 %v15790_v35 }
 0x100   : > { %7146 = vmatmul.mubr.msk.f32.vlgmr.msra.gmra.mrb[0].mxu0 %vm555_vm3, %v10545_v62  ;;  %v8398_v62 = vpack.c.bf16 %v7317_v53, %v7313_v52  ;;  %v11485_v52 = vld [vmem:[%s10518_s29 + $0x38] sm:$0xff]  ;;  %v8498_v53 = vpack.c.bf16 %v7419_v51, %v7415_v50  ;;  %v7413_v50 = vld [vmem:[%s15783_s3 + $0x508] sm:$0xff] }
 0x101   : > { %7178 = vmatmul.mubr.msk.f32.gmra.mrb[6].mxu1 %vm555_vm3, %v10612_v15  ;;  %8381 = vmatpush1.bf16.msra.mxu0 %v8380_v48  ;;  %v7406_v48 = vld [vmem:[%s15783_s3 + $0x4d0] sm:$0xff]  ;;  %v7417_v51 = vld [vmem:[%s15783_s3 + $0x528] sm:$0xff] }
 0x102   : > { %1757 = vmatprep.mubr.f32.mxu0 %v15790_v35  ;;  %2002 = vmatprep.mubr.f32.mxu1 %v15790_v35 }
 0x103   : > { %8384 = vmatprep.subr.msk.bf16.mxu0 %vm10490_vm2, %v8382_v49  ;;  %v7410_v49 = vld [vmem:[%s15783_s3 + $0x4f0] sm:$0xff] }
 0x104   : > { %7147 = vmatmul.mubr.msk.f32.gmra.mrb[2].mxu0 %vm555_vm3, %v10572_v6 }
 0x105   : > { %7179 = vmatmul.mubr.msk.f32.gmra.mrb[8].mxu1 %vm555_vm3, %v10621_v16  ;;  %1763 = vmatprep.mubr.f32.mxu0 %v15790_v35 }
 0x106   : > { %2008 = vmatprep.mubr.f32.mxu1 %v15790_v35  ;;  %8387 = vmatpush1.bf16.msk.msra.mxu0 %vm10490_vm2, %v8385_v56  ;;  %v7414_v56 = vld [vmem:[%s15783_s3 + $0x510] sm:$0xff] }
 0x107   : > { %8399 = vmatprep.subr.bf16.mxu0 %v8398_v62  ;;  %v7418_v62 = vld [vmem:[%s15783_s3 + $0x530] sm:$0xff] }
 0x108   : > { %7148 = vmatmul.mubr.msk.f32.gmra.mrb[4].mxu0 %vm555_vm3, %v10524_v55 }
 0x109   : > { %7180 = vmatmul.mubr.msk.f32.gmra.mrb[10].mxu1 %vm555_vm3, %v10630_v17  ;;  %1769 = vmatprep.mubr.f32.mxu0 %v15790_v35 }
 0x10a   : > { %2014 = vmatprep.mubr.f32.mxu1 %v15790_v35 }
 0x10c   : > { %7149 = vmatmul.mubr.msk.f32.gmra.mrb[6].mxu0 %vm555_vm3, %v10550_v63 }
 0x10d   : > { %7181 = vmatmul.mubr.msk.f32.gmra.mrb[12].mxu1 %vm555_vm3, %v10639_v18  ;;  %1775 = vmatprep.mubr.f32.mxu0 %v15790_v35 }
 0x10e   : > { %2020 = vmatprep.mubr.f32.mxu1 %v15790_v35 }
 0x110   : > { %7150 = vmatmul.mubr.msk.f32.gmra.mrb[8].mxu0 %vm555_vm3, %v10579_v8 }
 0x111   : > { %7182 = vmatmul.mubr.msk.f32.gmra.mrb[14].mxu1 %vm555_vm3, %v10648_v19  ;;  %1781 = vmatprep.mubr.f32.mxu0 %v15790_v35 }
 0x112   : > { %2026 = vmatprep.mubr.f32.mxu1 %v15790_v35 }
 0x114   : > { %7151 = vmatmul.mubr.msk.f32.gmra.mrb[10].mxu0 %vm555_vm3, %v10603_v13 }
 0x115   : > { %7183 = vmatmul.mubr.msk.f32.gmra.mrb[16].mxu1 %vm555_vm3, %v10657_v20  ;;  %1787 = vmatprep.mubr.f32.mxu0 %v15790_v35 }
 0x116   : > { %2032 = vmatprep.mubr.f32.mxu1 %v15790_v35 }
 0x118   : > { %7152 = vmatmul.mubr.msk.f32.gmra.mrb[12].mxu0 %vm555_vm3, %v10612_v15 }
 0x119   : > { %7184 = vmatmul.mubr.msk.f32.gmra.mrb[18].mxu1 %vm555_vm3, %v10666_v21  ;;  %1793 = vmatprep.mubr.f32.mxu0 %v15790_v35 }
 0x11a   : > { %2038 = vmatprep.mubr.f32.mxu1 %v15790_v35 }
 0x11c   : > { %7153 = vmatmul.mubr.msk.f32.gmra.mrb[14].mxu0 %vm555_vm3, %v10621_v16 }
 0x11d   : > { %7185 = vmatmul.mubr.msk.f32.gmra.mrb[20].mxu1 %vm555_vm3, %v10675_v22  ;;  %1799 = vmatprep.mubr.f32.mxu0 %v15790_v35 }
 0x11e   : > { %2044 = vmatprep.mubr.f32.mxu1 %v15790_v35 }
 0x120   : > { %7154 = vmatmul.mubr.msk.f32.gmra.mrb[16].mxu0 %vm555_vm3, %v10630_v17 }
 0x121   : > { %7186 = vmatmul.mubr.msk.f32.gmra.mrb[22].mxu1 %vm555_vm3, %v10684_v23  ;;  %1805 = vmatprep.mubr.f32.mxu0 %v15790_v35 }
 0x122   : > { %2050 = vmatprep.mubr.f32.mxu1 %v15790_v35 }
 0x124   : > { %7155 = vmatmul.mubr.msk.f32.gmra.mrb[18].mxu0 %vm555_vm3, %v10639_v18 }
 0x125   : > { %7187 = vmatmul.mubr.msk.f32.gmra.mrb[24].mxu1 %vm555_vm3, %v10693_v24  ;;  %1811 = vmatprep.mubr.f32.mxu0 %v15790_v35 }
 0x126   : > { %2056 = vmatprep.mubr.f32.mxu1 %v15790_v35 }
 0x128   : > { %7156 = vmatmul.mubr.msk.f32.gmra.mrb[20].mxu0 %vm555_vm3, %v10648_v19 }
 0x129   : > { %7188 = vmatmul.mubr.msk.f32.gmra.mrb[26].mxu1 %vm555_vm3, %v10702_v25  ;;  %1817 = vmatprep.mubr.f32.mxu0 %v15790_v35 }
 0x12a   : > { %2062 = vmatprep.mubr.f32.mxu1 %v15790_v35 }
 0x12c   : > { %7157 = vmatmul.mubr.msk.f32.gmra.mrb[22].mxu0 %vm555_vm3, %v10657_v20 }
 0x12d   : > { %7189 = vmatmul.mubr.msk.f32.gmra.mrb[28].mxu1 %vm555_vm3, %v10711_v26  ;;  %1823 = vmatprep.mubr.f32.mxu0 %v15790_v35 }
 0x12e   : > { %2068 = vmatprep.mubr.f32.mxu1 %v15790_v35 }
 0x130   : > { %7158 = vmatmul.mubr.msk.f32.gmra.mrb[24].mxu0 %vm555_vm3, %v10666_v21 }
 0x131   : > { %7190 = vmatmul.mubr.msk.f32.gmra.mrb[30].mxu1 %vm555_vm3, %v10720_v27  ;;  %1829 = vmatprep.mubr.f32.mxu0 %v15790_v35 }
 0x132   : > { %2074 = vmatprep.mubr.f32.mxu1 %v15790_v35 }
 0x134   : > { %7159 = vmatmul.mubr.msk.f32.gmra.mrb[26].mxu0 %vm555_vm3, %v10675_v22 }
 0x135   : > { %7191 = vmatmul.mubr.msk.f32.gmra.mrb[32].mxu1 %vm555_vm3, %v10729_v28  ;;  %1835 = vmatprep.mubr.f32.mxu0 %v15790_v35 }
 0x136   : > { %2080 = vmatprep.mubr.f32.mxu1 %v15790_v35 }
 0x138   : > { %7160 = vmatmul.mubr.msk.f32.gmra.mrb[28].mxu0 %vm555_vm3, %v10684_v23 }
 0x139   : > { %7192 = vmatmul.mubr.msk.f32.gmra.mrb[34].mxu1 %vm555_vm3, %v10738_v29  ;;  %1841 = vmatprep.mubr.f32.mxu0 %v15790_v35 }
 0x13a   : > { %2086 = vmatprep.mubr.f32.mxu1 %v15790_v35 }
 0x13c   : > { %7161 = vmatmul.mubr.msk.f32.gmra.mrb[30].mxu0 %vm555_vm3, %v10693_v24 }
 0x13d   : > { %7193 = vmatmul.mubr.msk.f32.gmra.mrb[36].mxu1 %vm555_vm3, %v10747_v30  ;;  %1847 = vmatprep.mubr.f32.mxu0 %v15790_v35 }
 0x13e   : > { %2092 = vmatprep.mubr.f32.mxu1 %v15790_v35 }
 0x140   : > { %7162 = vmatmul.mubr.msk.f32.gmra.mrb[32].mxu0 %vm555_vm3, %v10702_v25 }
 0x141   : > { %7194 = vmatmul.mubr.msk.f32.gmra.mrb[38].mxu1 %vm555_vm3, %v10756_v31  ;;  %1853 = vmatprep.mubr.f32.mxu0 %v15790_v35 }
 0x142   : > { %2098 = vmatprep.mubr.f32.mxu1 %v15790_v35 }
 0x144   : > { %7163 = vmatmul.mubr.msk.f32.gmra.mrb[34].mxu0 %vm555_vm3, %v10711_v26 }
 0x145   : > { %7195 = vmatmul.mubr.msk.f32.gmra.mrb[40].mxu1 %vm555_vm3, %v11186_v57  ;;  %1859 = vmatprep.mubr.f32.mxu0 %v15790_v35 }
 0x146   : > { %2600 = vmatprep.mubr.f32.mxu1 %v15790_v35 }
 0x148   : > { %7164 = vmatmul.mubr.msk.f32.gmra.mrb[36].mxu0 %vm555_vm3, %v10720_v27 }
 0x149   : > { %7264 = vmatmul.mubr.msk.f32.vlgmr.msra.gmra.mrb[42].mxu1 %vm555_vm3, %v10572_v6  ;;  %1865 = vmatprep.mubr.f32.mxu0 %v15790_v35 }
 0x14a   : > { %2606 = vmatprep.mubr.f32.mxu1 %v15790_v35  ;;  %8411 = vmatpush1.bf16.msra.mxu1 %v8410_v0  ;;  %v7422_v0 = vld [vmem:[%s15783_s3 + $0x550] sm:$0xff] }
 0x14b   : > { %8414 = vmatprep.subr.msk.bf16.mxu1 %vm10490_vm2, %v8412_v1  ;;  %v7426_v1 = vld [vmem:[%s15783_s3 + $0x570] sm:$0xff] }
 0x14c   : > { %7165 = vmatmul.mubr.msk.f32.gmra.mrb[38].mxu0 %vm555_vm3, %v10729_v28  ;;  %v8504_v5 = vpack.c.bf16 %v7426_v1, %v7422_v0  ;;  %v7420_v0 = vld [vmem:[%s15783_s3 + $0x540] sm:$0xff] }
 0x14d   : > { %7265 = vmatmul.mubr.msk.f32.gmra.mrb[44].mxu1 %vm555_vm3, %v10524_v55  ;;  %1871 = vmatprep.mubr.f32.mxu0 %v15790_v35  ;;  %v7424_v1 = vld [vmem:[%s15783_s3 + $0x560] sm:$0xff] }
 0x14e   : > { %2612 = vmatprep.mubr.f32.mxu1 %v15790_v35  ;;  %8417 = vmatpush1.bf16.msk.msra.mxu1 %vm10490_vm2, %v8415_v4  ;;  %v11527_v4 = vld [vmem:[%s10518_s29 + $0x48] sm:$0xff] }
 0x150   : > { %7166 = vmatmul.mubr.msk.f32.gmra.mrb[40].mxu0 %vm555_vm3, %v10738_v29 }
 0x151   : > { %7266 = vmatmul.mubr.msk.f32.gmra.mrb[46].mxu1 %vm555_vm3, %v10550_v63  ;;  %1877 = vmatprep.mubr.f32.mxu0 %v15790_v35 }
 0x152   : > { %2618 = vmatprep.mubr.f32.mxu1 %v15790_v35 }
 0x154   : > { %7167 = vmatmul.mubr.msk.f32.gmra.mrb[42].mxu0 %vm555_vm3, %v10747_v30 }
 0x155   : > { %7267 = vmatmul.mubr.msk.f32.gmra.mrb[0].mxu1 %vm555_vm3, %v10579_v8  ;;  %1883 = vmatprep.mubr.f32.mxu0 %v15790_v35 }
 0x156   : > { %2624 = vmatprep.mubr.f32.mxu1 %v15790_v35 }
 0x158   : > { %7168 = vmatmul.mubr.msk.f32.gmra.mrb[44].mxu0 %vm555_vm3, %v10756_v31 }
 0x159   : > { %7268 = vmatmul.mubr.msk.f32.gmra.mrb[2].mxu1 %vm555_vm3, %v10603_v13  ;;  %1889 = vmatprep.mubr.f32.mxu0 %v15790_v35 }
 0x15a   : > { %2630 = vmatprep.mubr.f32.mxu1 %v15790_v35 }
 0x15c   : > { %7169 = vmatmul.mubr.msk.f32.gmra.mrb[46].mxu0 %vm555_vm3, %v11186_v57 }
 0x15d   : > { %7269 = vmatmul.mubr.msk.f32.gmra.mrb[4].mxu1 %vm555_vm3, %v10612_v15  ;;  %2391 = vmatprep.mubr.f32.mxu0 %v15790_v35 }
 0x15e   : > { %2636 = vmatprep.mubr.f32.mxu1 %v15790_v35 }
 0x160   : > { %7238 = vmatmul.mubr.msk.f32.vlgmr.msra.gmra.mrb[0].mxu0 %vm555_vm3, %v10572_v6 }
 0x161   : > { %7270 = vmatmul.mubr.msk.f32.gmra.mrb[6].mxu1 %vm555_vm3, %v10621_v16  ;;  %8401 = vmatpush1.bf16.msra.mxu0 %v8400_v11  ;;  %v8506_v11 = vpack.c.bf16 %v7435_v3, %v7431_v2  ;;  %v7429_v2 = vld [vmem:[%s15783_s3 + $0x588] sm:$0xff] }
 0x162   : > { %2397 = vmatprep.mubr.f32.mxu0 %v15790_v35  ;;  %2642 = vmatprep.mubr.f32.mxu1 %v15790_v35  ;;  %v7433_v3 = vld [vmem:[%s15783_s3 + $0x5a8] sm:$0xff] }
 0x163   : > { %8404 = vmatprep.subr.msk.bf16.mxu0 %vm10490_vm2, %v8402_v12  ;;  %v7393_v12 = vld [vmem:[%s15783_s3 + $0x468] sm:$0xff] }
 0x164   : > { %7239 = vmatmul.mubr.msk.f32.gmra.mrb[2].mxu0 %vm555_vm3, %v10524_v55 }
 0x165   : > { %7271 = vmatmul.mubr.msk.f32.gmra.mrb[8].mxu1 %vm555_vm3, %v10630_v17  ;;  %2403 = vmatprep.mubr.f32.mxu0 %v15790_v35 }
 0x166   : > { %2648 = vmatprep.mubr.f32.mxu1 %v15790_v35  ;;  %8407 = vmatpush1.bf16.msk.msra.mxu0 %vm10490_vm2, %v8405_v32  ;;  %v7439_v32 = vld [vmem:[%s15783_s3 + $0x5d8] sm:$0xff] }
 0x167   : > { %v11286_v6 = vpop.f32.mrb[48].mxu0 }
 0x168   : > { %v11288_v33 = vpop.f32.mrb[49].mxu0  ;;  %7240 = vmatmul.mubr.msk.f32.gmra.mrb[4].mxu0 %vm555_vm3, %v10550_v63 }
 0x169   : > { %7272 = vmatmul.mubr.msk.f32.gmra.mrb[10].mxu1 %vm555_vm3, %v10639_v18  ;;  %2409 = vmatprep.mubr.f32.mxu0 %v15790_v35 }
 0x16a   : > { %2654 = vmatprep.mubr.f32.mxu1 %v15790_v35 }
 0x16b   : > { %v11296_v55 = vpop.f32.mrb[50].mxu0 }
 0x16c   : > { %v11298_v34 = vpop.f32.mrb[51].mxu0  ;;  %7241 = vmatmul.mubr.msk.f32.gmra.mrb[6].mxu0 %vm555_vm3, %v10579_v8  ;;  %v7381_v8 = vld [vmem:[%s15783_s3 + $0x408] sm:$0xff] }
 0x16d   : > { %7273 = vmatmul.mubr.msk.f32.gmra.mrb[12].mxu1 %vm555_vm3, %v10648_v19  ;;  %2415 = vmatprep.mubr.f32.mxu0 %v15790_v35 }
 0x16e   : > { %2660 = vmatprep.mubr.f32.mxu1 %v15790_v35 }
 0x16f   : > { %v11306_v43 = vpop.f32.mrb[52].mxu0 }
 0x170   : > { %v11308_v63 = vpop.f32.mrb[53].mxu0  ;;  %7242 = vmatmul.mubr.msk.f32.gmra.mrb[8].mxu0 %vm555_vm3, %v10603_v13  ;;  %v7385_v13 = vld [vmem:[%s15783_s3 + $0x428] sm:$0xff] }
 0x171   : > { %7274 = vmatmul.mubr.msk.f32.gmra.mrb[14].mxu1 %vm555_vm3, %v10657_v20  ;;  %2421 = vmatprep.mubr.f32.mxu0 %v15790_v35 }
 0x172   : > { %2666 = vmatprep.mubr.f32.mxu1 %v15790_v35 }
 0x174   : > { %7243 = vmatmul.mubr.msk.f32.gmra.mrb[10].mxu0 %vm555_vm3, %v10612_v15  ;;  %v7383_v15 = vld [vmem:[%s15783_s3 + $0x418] sm:$0xff] }
 0x175   : > { %7275 = vmatmul.mubr.msk.f32.gmra.mrb[16].mxu1 %vm555_vm3, %v10666_v21  ;;  %2427 = vmatprep.mubr.f32.mxu0 %v15790_v35 }
 0x176   : > { %2672 = vmatprep.mubr.f32.mxu1 %v15790_v35 }
 0x178   : > { %7244 = vmatmul.mubr.msk.f32.gmra.mrb[12].mxu0 %vm555_vm3, %v10621_v16  ;;  %v8418_v16 = vpack.c.bf16 %v7385_v13, %v7381_v8  ;;  %v7443_v8 = vld [vmem:[%s15783_s3 + $0x5f8] sm:$0xff]  ;;  %v11560_v13 = vld [vmem:[%s10518_s29 + $0x50] sm:$0xff] }
 0x179   : > { %7276 = vmatmul.mubr.msk.f32.gmra.mrb[18].mxu1 %vm555_vm3, %v10675_v22  ;;  %2433 = vmatprep.mubr.f32.mxu0 %v15790_v35 }
 0x17a   : > { %2678 = vmatprep.mubr.f32.mxu1 %v15790_v35  ;;  %8419 = vmatprep.subr.bf16.mxu0 %v8418_v16  ;;  %v8422_v16 = vpack.c.bf16 %v7393_v12, %v7389_v10  ;;  %v7432_v10 = vld [vmem:[%s15783_s3 + $0x5a0] sm:$0xff]  ;;  %v7441_v12 = vld [vmem:[%s15783_s3 + $0x5e8] sm:$0xff] }
 0x17c   : > { %7245 = vmatmul.mubr.msk.f32.gmra.mrb[14].mxu0 %vm555_vm3, %v10630_v17  ;;  %v7387_v17 = vld [vmem:[%s15783_s3 + $0x438] sm:$0xff] }
 0x17d   : > { %7277 = vmatmul.mubr.msk.f32.gmra.mrb[20].mxu1 %vm555_vm3, %v10684_v23  ;;  %2439 = vmatprep.mubr.f32.mxu0 %v15790_v35 }
 0x17e   : > { %2684 = vmatprep.mubr.f32.mxu1 %v15790_v35 }
 0x180   : > { %7246 = vmatmul.mubr.msk.f32.gmra.mrb[16].mxu0 %vm555_vm3, %v10639_v18  ;;  %v8482_v18 = vpack.c.bf16 %v7387_v17, %v7383_v15  ;;  %v8420_v15 = vpack.c.bf16 %v7384_v9, %v7380_v7  ;;  %v7388_v17 = vld [vmem:[%s15783_s3 + $0x440] sm:$0xff]  ;;  %v8440_v7 = vpack.c.bf16 %v7424_v1, %v7420_v0  ;;  %v7462_v0 = vld [vmem:[%s15783_s3 + $0x690] sm:$0xff] }
 0x181   : > { %7278 = vmatmul.mubr.msk.f32.gmra.mrb[22].mxu1 %vm555_vm3, %v10693_v24  ;;  %2445 = vmatprep.mubr.f32.mxu0 %v15790_v35  ;;  %v7428_v9 = vld [vmem:[%s15783_s3 + $0x580] sm:$0xff] }
 0x182   : > { %2690 = vmatprep.mubr.f32.mxu1 %v15790_v35  ;;  %8483 = vmatprep.subr.bf16.mxu1 %v8482_v18  ;;  %v7392_v18 = vld [vmem:[%s15783_s3 + $0x460] sm:$0xff] }
 0x183   : > { %v8424_v37 = vpack.c.bf16 %v7392_v18, %v7388_v17  ;;  %v7301_v17 = vld [vmem:[%s10518_s29 + $0x88] sm:$0xff] }
 0x184   : > { %7247 = vmatmul.mubr.msk.f32.gmra.mrb[18].mxu0 %vm555_vm3, %v10648_v19  ;;  %v11401_v19 = vld [vmem:[%s10518_s29 + $0xd0] sm:$0xff] }
 0x185   : > { %7279 = vmatmul.mubr.msk.f32.gmra.mrb[24].mxu1 %vm555_vm3, %v10702_v25  ;;  %2451 = vmatprep.mubr.f32.mxu0 %v15790_v35 }
 0x186   : > { %2696 = vmatprep.mubr.f32.mxu1 %v15790_v35 }
 0x188   : > { %7248 = vmatmul.mubr.msk.f32.gmra.mrb[20].mxu0 %vm555_vm3, %v10657_v20  ;;  %v7382_v20 = vld [vmem:[%s15783_s3 + $0x410] sm:$0xff] }
 0x189   : > { %7280 = vmatmul.mubr.msk.f32.gmra.mrb[26].mxu1 %vm555_vm3, %v10711_v26  ;;  %2457 = vmatprep.mubr.f32.mxu0 %v15790_v35 }
 0x18a   : > { %2702 = vmatprep.mubr.f32.mxu1 %v15790_v35 }
 0x18c   : > { %7249 = vmatmul.mubr.msk.f32.gmra.mrb[22].mxu0 %vm555_vm3, %v10666_v21  ;;  %v7386_v21 = vld [vmem:[%s15783_s3 + $0x430] sm:$0xff] }
 0x18d   : > { %7281 = vmatmul.mubr.msk.f32.gmra.mrb[28].mxu1 %vm555_vm3, %v10720_v27  ;;  %2463 = vmatprep.mubr.f32.mxu0 %v15790_v35 }
 0x18e   : > { %2708 = vmatprep.mubr.f32.mxu1 %v15790_v35 }
 0x190   : > { %7250 = vmatmul.mubr.msk.f32.gmra.mrb[24].mxu0 %vm555_vm3, %v10675_v22  ;;  %v7391_v22 = vld [vmem:[%s15783_s3 + $0x458] sm:$0xff] }
 0x191   : > { %7282 = vmatmul.mubr.msk.f32.gmra.mrb[30].mxu1 %vm555_vm3, %v10729_v28  ;;  %2469 = vmatprep.mubr.f32.mxu0 %v15790_v35 }
 0x192   : > { %2714 = vmatprep.mubr.f32.mxu1 %v15790_v35 }
 0x194   : > { %7251 = vmatmul.mubr.msk.f32.gmra.mrb[26].mxu0 %vm555_vm3, %v10684_v23  ;;  %v7395_v23 = vld [vmem:[%s15783_s3 + $0x478] sm:$0xff] }
 0x195   : > { %7283 = vmatmul.mubr.msk.f32.gmra.mrb[32].mxu1 %vm555_vm3, %v10738_v29  ;;  %2475 = vmatprep.mubr.f32.mxu0 %v15790_v35 }
 0x196   : > { %2720 = vmatprep.mubr.f32.mxu1 %v15790_v35 }
 0x198   : > { %7252 = vmatmul.mubr.msk.f32.gmra.mrb[28].mxu0 %vm555_vm3, %v10693_v24  ;;  %v11422_v24 = vld [vmem:[%s10518_s29 + $0x20] sm:$0xff] }
 0x199   : > { %7284 = vmatmul.mubr.msk.f32.gmra.mrb[34].mxu1 %vm555_vm3, %v10747_v30  ;;  %2481 = vmatprep.mubr.f32.mxu0 %v15790_v35 }
 0x19a   : > { %2726 = vmatprep.mubr.f32.mxu1 %v15790_v35 }
 0x19c   : > { %7253 = vmatmul.mubr.msk.f32.gmra.mrb[30].mxu0 %vm555_vm3, %v10702_v25  ;;  %v8484_v25 = vpack.c.bf16 %v7386_v21, %v7382_v20  ;;  %v7397_v20 = vld [vmem:[%s15783_s3 + $0x488] sm:$0xff]  ;;  %v8508_v21 = vpack.c.bf16 %v7434_v14, %v7430_v54  ;;  %v7300_v54 = vld [vmem:[%s10518_s29 + $0x80] sm:$0xff]  ;;  %v8444_v14 = vpack.c.bf16 %v7432_v10, %v7428_v9  ;;  %v7475_v10 = vld [vmem:[%s15783_s3 + $0x6f8] sm:$0xff] }
 0x19d   : > { %7285 = vmatmul.mubr.msk.f32.gmra.mrb[36].mxu1 %vm555_vm3, %v10756_v31  ;;  %2487 = vmatprep.mubr.f32.mxu0 %v15790_v35 }
 0x19e   : > { %2732 = vmatprep.mubr.f32.mxu1 %v15790_v35 }
 0x1a0   : > { %7254 = vmatmul.mubr.msk.f32.gmra.mrb[32].mxu0 %vm555_vm3, %v10711_v26  ;;  %v8486_v26 = vpack.c.bf16 %v7395_v23, %v7391_v22  ;;  %v7401_v22 = vld [vmem:[%s15783_s3 + $0x4a8] sm:$0xff]  ;;  %v8510_v23 = vpack.c.bf16 %v7443_v8, %v7439_v32  ;;  %v7436_v32 = vld [vmem:[%s15783_s3 + $0x5c0] sm:$0xff] }
 0x1a1   : > { %7286 = vmatmul.mubr.msk.f32.gmra.mrb[38].mxu1 %vm555_vm3, %v11186_v57  ;;  %2493 = vmatprep.mubr.f32.mxu0 %v15790_v35  ;;  %v8426_v38 = vpack.c.bf16 %v7401_v22, %v7397_v20  ;;  %v7440_v8 = vld [vmem:[%s15783_s3 + $0x5e0] sm:$0xff]  ;;  %v7302_v20 = vld [vmem:[%s10518_s29 + $0x90] sm:$0xff] }
 0x1a2   : > { %2738 = vmatprep.mubr.f32.mxu1 %v15790_v35  ;;  %v8448_v18 = vpack.c.bf16 %v7440_v8, %v7436_v32  ;;  %v7304_v22 = vld [vmem:[%s10518_s29 + $0xa0] sm:$0xff]  ;;  %v7474_v32 = vld [vmem:[%s15783_s3 + $0x6f0] sm:$0xff] }
 0x1a4   : > { %7255 = vmatmul.mubr.msk.f32.gmra.mrb[34].mxu0 %vm555_vm3, %v10720_v27  ;;  %v7390_v27 = vld [vmem:[%s15783_s3 + $0x450] sm:$0xff] }
 0x1a5   : > { %7287 = vmatmul.mubr.msk.f32.gmra.mrb[40].mxu1 %vm555_vm3, %v11401_v19  ;;  %2499 = vmatprep.mubr.f32.mxu0 %v15790_v35 }
 0x1a6   : > { %3240 = vmatprep.mubr.f32.mxu1 %v15790_v35 }
 0x1a8   : > { %7256 = vmatmul.mubr.msk.f32.gmra.mrb[36].mxu0 %vm555_vm3, %v10729_v28  ;;  %v8488_v28 = vpack.c.bf16 %v7394_v36, %v7390_v27  ;;  %v7451_v27 = vld [vmem:[%s15783_s3 + $0x638] sm:$0xff] }
 0x1a9   : > { %7356 = vmatmul.mubr.msk.f32.vlgmr.msra.gmra.mrb[42].mxu1 %vm555_vm3, %v11422_v24  ;;  %2505 = vmatprep.mubr.f32.mxu0 %v15790_v35  ;;  %v11593_v36 = vld [vmem:[%s10518_s29 + $0x58] sm:$0xff] }
 0x1aa   : > { %3246 = vmatprep.mubr.f32.mxu1 %v15790_v35  ;;  %8485 = vmatpush1.bf16.msra.mxu1 %v8484_v25  ;;  %v7438_v25 = vld [vmem:[%s15783_s3 + $0x5d0] sm:$0xff] }
 0x1ab   : > { %8487 = vmatprep.subr.bf16.mxu1 %v8486_v26  ;;  %v7442_v26 = vld [vmem:[%s15783_s3 + $0x5f0] sm:$0xff] }
 0x1ac   : > { %7257 = vmatmul.mubr.msk.f32.gmra.mrb[38].mxu0 %vm555_vm3, %v10738_v29  ;;  %v8492_v29 = vpack.c.bf16 %v7402_v42, %v7398_v41  ;;  %v8512_v41 = vpack.c.bf16 %v7442_v26, %v7438_v25  ;;  %v7405_v42 = vld [vmem:[%s15783_s3 + $0x4c8] sm:$0xff]  ;;  %v7306_v25 = vld [vmem:[%s10518_s29 + $0xb0] sm:$0xff]  ;;  %v7307_v26 = vld [vmem:[%s10518_s29 + $0xb8] sm:$0xff] }
 0x1ad   : > { %7357 = vmatmul.mubr.msk.f32.gmra.mrb[44].mxu1 %vm555_vm3, %v11443_v39  ;;  %2511 = vmatprep.mubr.f32.mxu0 %v15790_v35 }
 0x1ae   : > { %3252 = vmatprep.mubr.f32.mxu1 %v15790_v35  ;;  %8489 = vmatpush1.bf16.msra.mxu1 %v8488_v28  ;;  %v7396_v28 = vld [vmem:[%s15783_s3 + $0x480] sm:$0xff] }
 0x1af   : > { %8491 = vmatprep.subr.bf16.mxu1 %v8490_v40  ;;  %v7400_v40 = vld [vmem:[%s15783_s3 + $0x4a0] sm:$0xff] }
 0x1b0   : > { %7258 = vmatmul.mubr.msk.f32.gmra.mrb[40].mxu0 %vm555_vm3, %v10747_v30  ;;  %v8496_v30 = vpack.c.bf16 %v7410_v49, %v7406_v48  ;;  %v7404_v48 = vld [vmem:[%s15783_s3 + $0x4c0] sm:$0xff] }
 0x1b1   : > { %7358 = vmatmul.mubr.msk.f32.gmra.mrb[46].mxu1 %vm555_vm3, %v11464_v46  ;;  %2517 = vmatprep.mubr.f32.mxu0 %v15790_v35  ;;  %v7408_v49 = vld [vmem:[%s15783_s3 + $0x4e0] sm:$0xff] }
 0x1b2   : > { %3258 = vmatprep.mubr.f32.mxu1 %v15790_v35  ;;  %8493 = vmatpush1.bf16.msra.mxu1 %v8492_v29  ;;  %v11614_v29 = vld [vmem:[%s10518_s29 + $0x60] sm:$0xff] }
 0x1b3   : > { %8495 = vmatprep.subr.bf16.mxu1 %v8494_v47  ;;  %v8430_v47 = vpack.c.bf16 %v7409_v44, %v7405_v42  ;;  %v7453_v42 = vld [vmem:[%s15783_s3 + $0x648] sm:$0xff] }
 0x1b4   : > { %7259 = vmatmul.mubr.msk.f32.gmra.mrb[42].mxu0 %vm555_vm3, %v10756_v31  ;;  %v8500_v31 = vpack.c.bf16 %v7418_v62, %v7414_v56  ;;  %v7412_v56 = vld [vmem:[%s15783_s3 + $0x500] sm:$0xff]  ;;  %v7457_v44 = vld [vmem:[%s15783_s3 + $0x668] sm:$0xff] }
 0x1b5   : > { %7359 = vmatmul.mubr.msk.f32.gmra.mrb[0].mxu1 %vm555_vm3, %v11485_v52  ;;  %2523 = vmatprep.mubr.f32.mxu0 %v15790_v35  ;;  %v7416_v62 = vld [vmem:[%s15783_s3 + $0x520] sm:$0xff] }
 0x1b6   : > { %3264 = vmatprep.mubr.f32.mxu1 %v15790_v35  ;;  %8497 = vmatpush1.bf16.msra.mxu1 %v8496_v30  ;;  %v11635_v30 = vld [vmem:[%s10518_s29 + $0x68] sm:$0xff] }
 0x1b7   : > { %8499 = vmatprep.subr.bf16.mxu1 %v8498_v53  ;;  %v8434_v53 = vpack.c.bf16 %v7417_v51, %v7413_v50  ;;  %v7454_v51 = vld [vmem:[%s15783_s3 + $0x650] sm:$0xff] }
 0x1b8   : > { %7260 = vmatmul.mubr.msk.f32.gmra.mrb[44].mxu0 %vm555_vm3, %v11186_v57 }
 0x1b9   : > { %7360 = vmatmul.mubr.msk.f32.gmra.mrb[2].mxu1 %vm555_vm3, %v11506_v60  ;;  %2529 = vmatprep.mubr.f32.mxu0 %v15790_v35 }
 0x1ba   : > { %3270 = vmatprep.mubr.f32.mxu1 %v15790_v35  ;;  %8501 = vmatpush1.bf16.msra.mxu1 %v8500_v31  ;;  %v7298_v31 = vld [vmem:[%s10518_s29 + $0x70] sm:$0xff] }
 0x1bb   : > { %8503 = vmatprep.subr.bf16.mxu1 %v8502_v61  ;;  %v8436_v61 = vpack.c.bf16 %v7416_v62, %v7412_v56  ;;  %v7465_v56 = vld [vmem:[%s15783_s3 + $0x6a8] sm:$0xff]  ;;  %v7463_v62 = vld [vmem:[%s15783_s3 + $0x698] sm:$0xff] }
 0x1bc   : > { %7261 = vmatmul.mubr.msk.f32.gmra.mrb[46].mxu0 %vm555_vm3, %v11401_v19 }
 0x1bd   : > { %7361 = vmatmul.mubr.msk.f32.gmra.mrb[4].mxu1 %vm555_vm3, %v11527_v4  ;;  %3031 = vmatprep.mubr.f32.mxu0 %v15790_v35 }
 0x1be   : > { %3276 = vmatprep.mubr.f32.mxu1 %v15790_v35  ;;  %8505 = vmatpush1.bf16.msra.mxu1 %v8504_v5  ;;  %v7299_v5 = vld [vmem:[%s10518_s29 + $0x78] sm:$0xff] }
 0x1bf   : > { %8507 = vmatprep.subr.bf16.mxu1 %v8506_v11  ;;  %v7437_v11 = vld [vmem:[%s15783_s3 + $0x5c8] sm:$0xff] }
 0x1c0   : > { %7330 = vmatmul.mubr.msk.f32.vlgmr.msra.gmra.mrb[0].mxu0 %vm555_vm3, %v11422_v24  ;;  %v7447_v24 = vld [vmem:[%s15783_s3 + $0x618] sm:$0xff] }
 0x1c1   : > { %7362 = vmatmul.mubr.msk.f32.gmra.mrb[6].mxu1 %vm555_vm3, %v11560_v13  ;;  %3037 = vmatprep.mubr.f32.mxu0 %v15790_v35  ;;  %v8514_v45 = vpack.c.bf16 %v7451_v27, %v7447_v24  ;;  %v11748_v24 = vld [vmem:[%s10518_s29 + $0xc0] sm:$0xff] }
 0x1c2   : > { %3282 = vmatprep.mubr.f32.mxu1 %v15790_v35  ;;  %8421 = vmatpush1.bf16.msra.mxu0 %v8420_v15  ;;  %v7445_v15 = vld [vmem:[%s15783_s3 + $0x608] sm:$0xff]  ;;  %v7444_v27 = vld [vmem:[%s15783_s3 + $0x600] sm:$0xff] }
 0x1c3   : > { %8423 = vmatprep.subr.bf16.mxu0 %v8422_v16  ;;  %8509 = vmatpush1.bf16.msra.mxu1 %v8508_v21  ;;  %v7449_v16 = vld [vmem:[%s15783_s3 + $0x628] sm:$0xff]  ;;  %v7303_v21 = vld [vmem:[%s10518_s29 + $0x98] sm:$0xff] }
 0x1c4   : > { %7331 = vmatmul.mubr.msk.f32.gmra.mrb[2].mxu0 %vm555_vm3, %v11443_v39  ;;  %8511 = vmatprep.subr.bf16.mxu1 %v8510_v23  ;;  %v8428_v39 = vpack.c.bf16 %v7400_v40, %v7396_v28  ;;  %v7305_v23 = vld [vmem:[%s10518_s29 + $0xa8] sm:$0xff]  ;;  %v7450_v28 = vld [vmem:[%s15783_s3 + $0x630] sm:$0xff] }
 0x1c5   : > { %7363 = vmatmul.mubr.msk.f32.gmra.mrb[8].mxu1 %vm555_vm3, %v11593_v36  ;;  %3043 = vmatprep.mubr.f32.mxu0 %v15790_v35 }
 0x1c6   : > { %3288 = vmatprep.mubr.f32.mxu1 %v15790_v35  ;;  %8425 = vmatpush1.bf16.msra.mxu0 %v8424_v37  ;;  %v7446_v37 = vld [vmem:[%s15783_s3 + $0x610] sm:$0xff] }
 0x1c7   : > { %8427 = vmatprep.subr.bf16.mxu0 %v8426_v38  ;;  %8513 = vmatpush1.bf16.msra.mxu1 %v8512_v41  ;;  %v8516_v40 = vpack.c.bf16 %v7450_v28, %v7446_v37  ;;  %v11778_v41 = vld [vmem:[%s10518_s29 + $0xd8] sm:$0xff]  ;;  %v7488_v28 = vld [vmem:[%s15783_s3 + $0x760] sm:$0xff] }
 0x1c8   : > { %7332 = vmatmul.mubr.msk.f32.gmra.mrb[4].mxu0 %vm555_vm3, %v11464_v46  ;;  %8515 = vmatprep.subr.bf16.mxu1 %v8514_v45  ;;  %v8432_v46 = vpack.c.bf16 %v7408_v49, %v7404_v48  ;;  %v7455_v45 = vld [vmem:[%s15783_s3 + $0x658] sm:$0xff]  ;;  %v7456_v48 = vld [vmem:[%s15783_s3 + $0x660] sm:$0xff] }
 0x1c9   : > { %7364 = vmatmul.mubr.msk.f32.gmra.mrb[10].mxu1 %vm555_vm3, %v11614_v29  ;;  %3049 = vmatprep.mubr.f32.mxu0 %v15790_v35 }
 0x1ca   : > { %3294 = vmatprep.mubr.f32.mxu1 %v15790_v35  ;;  %8429 = vmatpush1.bf16.msra.mxu0 %v8428_v39  ;;  %v7459_v39 = vld [vmem:[%s15783_s3 + $0x678] sm:$0xff] }
 0x1cb   : > { %8431 = vmatprep.subr.bf16.mxu0 %v8430_v47  ;;  %8517 = vmatpush1.bf16.msra.mxu1 %v8516_v40  ;;  %v7452_v47 = vld [vmem:[%s15783_s3 + $0x640] sm:$0xff]  ;;  %v8518_v49 = vpack.c.bf16 %v7459_v39, %v7455_v45  ;;  %v7497_v39 = vld [vmem:[%s15783_s3 + $0x7a8] sm:$0xff] }
 0x1cc   : > { %7333 = vmatmul.mubr.msk.f32.gmra.mrb[6].mxu0 %vm555_vm3, %v11485_v52  ;;  %v8438_v52 = vpack.c.bf16 %v7425_v59, %v7421_v58  ;;  %v8456_v50 = vpack.c.bf16 %v7456_v48, %v7452_v47  ;;  %v7467_v58 = vld [vmem:[%s15783_s3 + $0x6b8] sm:$0xff] }
 0x1cd   : > { %7365 = vmatmul.mubr.msk.f32.gmra.mrb[12].mxu1 %vm555_vm3, %v11635_v30  ;;  %3055 = vmatprep.mubr.f32.mxu0 %v15790_v35  ;;  %v7495_v47 = vld [vmem:[%s15783_s3 + $0x798] sm:$0xff] }
 0x1ce   : > { %3300 = vmatprep.mubr.f32.mxu1 %v15790_v35  ;;  %8433 = vmatpush1.bf16.msra.mxu0 %v8432_v46  ;;  %v7461_v46 = vld [vmem:[%s15783_s3 + $0x688] sm:$0xff] }
 0x1cf   : > { %8435 = vmatprep.subr.bf16.mxu0 %v8434_v53  ;;  %8519 = vmatprep.subr.bf16.mxu1 %v8518_v49  ;;  %v8458_v59 = vpack.c.bf16 %v7465_v56, %v7461_v46  ;;  %v7499_v49 = vld [vmem:[%s15783_s3 + $0x7b8] sm:$0xff]  ;;  %v7494_v46 = vld [vmem:[%s15783_s3 + $0x790] sm:$0xff] }
 0x1d0   : > { %7334 = vmatmul.mubr.msk.f32.gmra.mrb[8].mxu0 %vm555_vm3, %v11506_v60  ;;  %v8442_v60 = vpack.c.bf16 %v7433_v3, %v7429_v2  ;;  %v7466_v2 = vld [vmem:[%s15783_s3 + $0x6b0] sm:$0xff] }
 0x1d1   : > { %7366 = vmatmul.mubr.msk.f32.gmra.mrb[14].mxu1 %vm555_vm3, %v7298_v31  ;;  %3061 = vmatprep.mubr.f32.mxu0 %v15790_v35  ;;  %v8524_v3 = vpack.c.bf16 %v7466_v2, %v7462_v0  ;;  %v7498_v56 = vld [vmem:[%s15783_s3 + $0x7b0] sm:$0xff]  ;;  %v7500_v0 = vld [vmem:[%s15783_s3 + $0x7c0] sm:$0xff] }
 0x1d2   : > { %3306 = vmatprep.mubr.f32.mxu1 %v15790_v35  ;;  %8437 = vmatpush1.bf16.msra.mxu0 %v8436_v61  ;;  %v7460_v61 = vld [vmem:[%s15783_s3 + $0x680] sm:$0xff] }
 0x1d3   : > { %8439 = vmatprep.subr.bf16.mxu0 %v8438_v52  ;;  %v7464_v52 = vld [vmem:[%s15783_s3 + $0x6a0] sm:$0xff] }
 0x1d4   : > { %7335 = vmatmul.mubr.msk.f32.gmra.mrb[10].mxu0 %vm555_vm3, %v11527_v4  ;;  %v8446_v4 = vpack.c.bf16 %v7441_v12, %v7437_v11  ;;  %v8460_v1 = vpack.c.bf16 %v7464_v52, %v7460_v61  ;;  %v7468_v11 = vld [vmem:[%s15783_s3 + $0x6c0] sm:$0xff]  ;;  %v7507_v52 = vld [vmem:[%s15783_s3 + $0x7f8] sm:$0xff] }
 0x1d5   : > { %7367 = vmatmul.mubr.msk.f32.gmra.mrb[16].mxu1 %vm555_vm3, %v7299_v5  ;;  %3067 = vmatprep.mubr.f32.mxu0 %v15790_v35  ;;  %v7472_v12 = vld [vmem:[%s15783_s3 + $0x6e0] sm:$0xff] }
 0x1d6   : > { %3312 = vmatprep.mubr.f32.mxu1 %v15790_v35  ;;  %8441 = vmatpush1.bf16.msra.mxu0 %v8440_v7  ;;  %v7473_v7 = vld [vmem:[%s15783_s3 + $0x6e8] sm:$0xff] }
 0x1d7   : > { %8443 = vmatprep.subr.bf16.mxu0 %v8442_v60  ;;  %v7471_v60 = vld [vmem:[%s15783_s3 + $0x6d8] sm:$0xff] }
 0x1d8   : > { %7336 = vmatmul.mubr.msk.f32.gmra.mrb[12].mxu0 %vm555_vm3, %v11560_v13  ;;  %v8450_v13 = vpack.c.bf16 %v7449_v16, %v7445_v15  ;;  %v7477_v15 = vld [vmem:[%s15783_s3 + $0x708] sm:$0xff] }
 0x1d9   : > { %7368 = vmatmul.mubr.msk.f32.gmra.mrb[18].mxu1 %vm555_vm3, %v7300_v54  ;;  %3073 = vmatprep.mubr.f32.mxu0 %v15790_v35  ;;  %v7481_v16 = vld [vmem:[%s15783_s3 + $0x728] sm:$0xff] }
 0x1da   : > { %3318 = vmatprep.mubr.f32.mxu1 %v15790_v35  ;;  %8445 = vmatpush1.bf16.msra.mxu0 %v8444_v14  ;;  %v8464_v14 = vpack.c.bf16 %v7472_v12, %v7468_v11  ;;  %v3616_v11 = vld [vmem:[%s15783_s3 + $0x18] sm:$0xff] }
 0x1db   : > { %8447 = vmatprep.subr.bf16.mxu0 %v8446_v4  ;;  %v7470_v4 = vld [vmem:[%s15783_s3 + $0x6d0] sm:$0xff] }
 0x1dc   : > { %7337 = vmatmul.mubr.msk.f32.gmra.mrb[14].mxu0 %vm555_vm3, %v11593_v36  ;;  %v7448_v36 = vld [vmem:[%s15783_s3 + $0x620] sm:$0xff]  ;;  %v8528_v8 = vpack.c.bf16 %v7474_v32, %v7470_v4 }
 0x1dd   : > { %7369 = vmatmul.mubr.msk.f32.gmra.mrb[20].mxu1 %vm555_vm3, %v7301_v17  ;;  %3079 = vmatprep.mubr.f32.mxu0 %v15790_v35  ;;  %v8452_v38 = vpack.c.bf16 %v7448_v36, %v7444_v27  ;;  %v7489_v27 = vld [vmem:[%s15783_s3 + $0x768] sm:$0xff]  ;;  %v7487_v36 = vld [vmem:[%s15783_s3 + $0x758] sm:$0xff] }
 0x1de   : > { %3324 = vmatprep.mubr.f32.mxu1 %v15790_v35  ;;  %8449 = vmatpush1.bf16.msra.mxu0 %v8448_v18  ;;  %v8466_v18 = vpack.c.bf16 %v7481_v16, %v7477_v15 }
 0x1df   : > { %8451 = vmatprep.subr.bf16.mxu0 %v8450_v13  ;;  %v7483_v13 = vld [vmem:[%s15783_s3 + $0x738] sm:$0xff] }
 0x1e0   : > { %7338 = vmatmul.mubr.msk.f32.gmra.mrb[16].mxu0 %vm555_vm3, %v11614_v29  ;;  %v8454_v29 = vpack.c.bf16 %v7457_v44, %v7453_v42  ;;  %v7486_v44 = vld [vmem:[%s15783_s3 + $0x750] sm:$0xff] }
 0x1e1   : > { %7370 = vmatmul.mubr.msk.f32.gmra.mrb[22].mxu1 %vm555_vm3, %v7302_v20  ;;  %3085 = vmatprep.mubr.f32.mxu0 %v15790_v35 }
 0x1e2   : > { %3330 = vmatprep.mubr.f32.mxu1 %v15790_v35  ;;  %8453 = vmatpush1.bf16.msra.mxu0 %v8452_v38  ;;  %v7484_v38 = vld [vmem:[%s15783_s3 + $0x740] sm:$0xff] }
 0x1e3   : > { %8455 = vmatprep.subr.bf16.mxu0 %v8454_v29  ;;  %v8472_v42 = vpack.c.bf16 %v7488_v28, %v7484_v38  ;;  %v7493_v29 = vld [vmem:[%s15783_s3 + $0x788] sm:$0xff] }
 0x1e4   : > { %7339 = vmatmul.mubr.msk.f32.gmra.mrb[18].mxu0 %vm555_vm3, %v11635_v30  ;;  %v7458_v30 = vld [vmem:[%s15783_s3 + $0x670] sm:$0xff]  ;;  %v8474_v48 = vpack.c.bf16 %v7497_v39, %v7493_v29 }
 0x1e5   : > { %7371 = vmatmul.mubr.msk.f32.gmra.mrb[24].mxu1 %vm555_vm3, %v7303_v21  ;;  %3091 = vmatprep.mubr.f32.mxu0 %v15790_v35  ;;  %v8520_v53 = vpack.c.bf16 %v7458_v30, %v7454_v51  ;;  %v7492_v51 = vld [vmem:[%s15783_s3 + $0x780] sm:$0xff] }
 0x1e6   : > { %3336 = vmatprep.mubr.f32.mxu1 %v15790_v35  ;;  %8457 = vmatpush1.bf16.msra.mxu0 %v8456_v50  ;;  %v8538_v50 = vpack.c.bf16 %v7499_v49, %v7495_v47  ;;  %v7496_v30 = vld [vmem:[%s15783_s3 + $0x7a0] sm:$0xff] }
 0x1e7   : > { %8521 = vmatpush1.bf16.msra.mxu1 %v8520_v53  ;;  %8459 = vmatprep.subr.bf16.mxu0 %v8458_v59  ;;  %v8476_v53 = vpack.c.bf16 %v7496_v30, %v7492_v51  ;;  %v7505_v59 = vld [vmem:[%s15783_s3 + $0x7e8] sm:$0xff] }
 0x1e8   : > { %7340 = vmatmul.mubr.msk.f32.gmra.mrb[20].mxu0 %vm555_vm3, %v7298_v31  ;;  %v8522_v31 = vpack.c.bf16 %v7467_v58, %v7463_v62  ;;  %v8540_v62 = vpack.c.bf16 %v7498_v56, %v7494_v46  ;;  %v7501_v58 = vld [vmem:[%s15783_s3 + $0x7c8] sm:$0xff] }
 0x1e9   : > { %7372 = vmatmul.mubr.msk.f32.gmra.mrb[26].mxu1 %vm555_vm3, %v7304_v22  ;;  %3097 = vmatprep.mubr.f32.mxu0 %v15790_v35  ;;  %v8478_v61 = vpack.c.bf16 %v7505_v59, %v7501_v58  ;;  %v3553_v58 = vld [vmem:[%s15782_s2] sm:$0x3] }
 0x1ea   : > { %3342 = vmatprep.mubr.f32.mxu1 %v15790_v35  ;;  %8523 = vmatprep.subr.bf16.mxu1 %v8522_v31  ;;  %v7503_v31 = vld [vmem:[%s15783_s3 + $0x7d8] sm:$0xff] }
 0x1eb   : > { %8461 = vmatpush1.bf16.msra.mxu0 %v8460_v1  ;;  %8525 = vmatpush1.bf16.msra.mxu1 %v8524_v3  ;;  %v7504_v1 = vld [vmem:[%s15783_s3 + $0x7e0] sm:$0xff]  ;;  %v8542_v2 = vpack.c.bf16 %v7507_v52, %v7503_v31 }
 0x1ec   : > { %7341 = vmatmul.mubr.msk.f32.gmra.mrb[22].mxu0 %vm555_vm3, %v7299_v5  ;;  %v7469_v5 = vld [vmem:[%s15783_s3 + $0x6c8] sm:$0xff]  ;;  %v8480_v3 = vpack.c.bf16 %v7504_v1, %v7500_v0 }
 0x1ed   : > { %7373 = vmatmul.mubr.msk.f32.gmra.mrb[28].mxu1 %vm555_vm3, %v7305_v23  ;;  %3103 = vmatprep.mubr.f32.mxu0 %v15790_v35  ;;  %v8462_v9 = vpack.c.bf16 %v7473_v7, %v7469_v5  ;;  %v7502_v5 = vld [vmem:[%s15783_s3 + $0x7d0] sm:$0xff] }
 0x1ee   : > { %3348 = vmatprep.mubr.f32.mxu1 %v15790_v35  ;;  %v7506_v7 = vld [vmem:[%s15783_s3 + $0x7f0] sm:$0xff] }
 0x1ef   : > { %8463 = vmatprep.subr.bf16.mxu0 %v8462_v9  ;;  %v3614_v9 = vld [vmem:[%s15783_s3 + $0x8] sm:$0xff] }
 0x1f0   : > { %7342 = vmatmul.mubr.msk.f32.gmra.mrb[24].mxu0 %vm555_vm3, %v7300_v54  ;;  %v8526_v54 = vpack.c.bf16 %v7475_v10, %v7471_v60  ;;  %v8544_v60 = vpack.c.bf16 %v7506_v7, %v7502_v5  ;;  %v3618_v10 = vld [vmem:[%s15783_s3 + $0x28] sm:$0xff] }
 0x1f1   : > { %7374 = vmatmul.mubr.msk.f32.gmra.mrb[30].mxu1 %vm555_vm3, %v7306_v25  ;;  %3109 = vmatprep.mubr.f32.mxu0 %v15790_v35  ;;  %v8546_v12 = vpack.c.bf16 %v3618_v10, %v3614_v9 }
 0x1f2   : > { %3354 = vmatprep.mubr.f32.mxu1 %v15790_v35  ;;  %8527 = vmatprep.subr.bf16.mxu1 %v8526_v54  ;;  %v3620_v54 = vld [vmem:[%s15783_s3 + $0x38] sm:$0xff] }
 0x1f3   : > { %8465 = vmatpush1.bf16.msra.mxu0 %v8464_v14  ;;  %8529 = vmatpush1.bf16.msra.mxu1 %v8528_v8  ;;  %v8610_v14 = vpack.c.bf16 %v3620_v54, %v3616_v11  ;;  %v3617_v54 = vld [vmem:[%s15783_s3 + $0x20] sm:$0xff] }
 0x1f4   : > { %7343 = vmatmul.mubr.msk.f32.gmra.mrb[26].mxu0 %vm555_vm3, %v7301_v17  ;;  %v7479_v17 = vld [vmem:[%s15783_s3 + $0x718] sm:$0xff]  ;;  %8467 = vmatprep.subr.bf16.mxu0 %v8466_v18 }
 0x1f5   : > { %7375 = vmatmul.mubr.msk.f32.gmra.mrb[32].mxu1 %vm555_vm3, %v7307_v26  ;;  %3115 = vmatprep.mubr.f32.mxu0 %v15790_v35 }
 0x1f6   : > { %3360 = vmatprep.mubr.f32.mxu1 %v15790_v35 }
 0x1f8   : > { %7344 = vmatmul.mubr.msk.f32.gmra.mrb[28].mxu0 %vm555_vm3, %v7302_v20  ;;  %v8530_v20 = vpack.c.bf16 %v7483_v13, %v7479_v17 }
 0x1f9   : > { %7376 = vmatmul.mubr.msk.f32.gmra.mrb[34].mxu1 %vm555_vm3, %v11748_v24  ;;  %3121 = vmatprep.mubr.f32.mxu0 %v15790_v35 }
 0x1fa   : > { %3366 = vmatprep.mubr.f32.mxu1 %v15790_v35  ;;  %8531 = vmatprep.subr.bf16.mxu1 %v8530_v20 }
 0x1fc   : > { %7345 = vmatmul.mubr.msk.f32.gmra.mrb[30].mxu0 %vm555_vm3, %v7303_v21  ;;  %v7476_v21 = vld [vmem:[%s15783_s3 + $0x700] sm:$0xff] }
 0x1fd   : > { %7377 = vmatmul.mubr.msk.f32.gmra.mrb[36].mxu1 %vm555_vm3, %v11186_v57  ;;  %3127 = vmatprep.mubr.f32.mxu0 %v15790_v35 }
 0x1fe   : > { %3372 = vmatprep.mubr.f32.mxu1 %v15790_v35 }
 0x200   : > { %7346 = vmatmul.mubr.msk.f32.gmra.mrb[32].mxu0 %vm555_vm3, %v7304_v22  ;;  %v7480_v22 = vld [vmem:[%s15783_s3 + $0x720] sm:$0xff] }
 0x201   : > { %7378 = vmatmul.mubr.msk.f32.gmra.mrb[38].mxu1 %vm555_vm3, %v11401_v19  ;;  %3133 = vmatprep.mubr.f32.mxu0 %v15790_v35 }
 0x202   : > { %3378 = vmatprep.mubr.f32.mxu1 %v15790_v35 }
 0x204   : > { %7347 = vmatmul.mubr.msk.f32.gmra.mrb[34].mxu0 %vm555_vm3, %v7305_v23  ;;  %v7478_v23 = vld [vmem:[%s15783_s3 + $0x710] sm:$0xff] }
 0x205   : > { %7379 = vmatmul.mubr.msk.f32.gmra.mrb[40].mxu1 %vm555_vm3, %v11778_v41  ;;  %3139 = vmatprep.mubr.f32.mxu0 %v15790_v35 }
 0x208   : > { %7348 = vmatmul.mubr.msk.f32.gmra.mrb[36].mxu0 %vm555_vm3, %v7306_v25  ;;  %v8468_v25 = vpack.c.bf16 %v7480_v22, %v7476_v21 }
 0x209   : > { %3145 = vmatprep.mubr.f32.mxu0 %v15790_v35 }
 0x20a   : > { %8469 = vmatpush1.bf16.msra.mxu0 %v8468_v25 }
 0x20c   : > { %7349 = vmatmul.mubr.msk.f32.gmra.mrb[38].mxu0 %vm555_vm3, %v7307_v26 }
 0x20d   : > { %3151 = vmatprep.mubr.f32.mxu0 %v15790_v35 }
 0x210   : > { %7350 = vmatmul.mubr.msk.f32.gmra.mrb[40].mxu0 %vm555_vm3, %v11748_v24  ;;  %v7485_v24 = vld [vmem:[%s15783_s3 + $0x748] sm:$0xff] }
 0x211   : > { %3157 = vmatprep.mubr.f32.mxu0 %v15790_v35  ;;  %v8470_v37 = vpack.c.bf16 %v7489_v27, %v7485_v24 }
 0x213   : > { %8471 = vmatprep.subr.bf16.mxu0 %v8470_v37 }
 0x214   : > { %7351 = vmatmul.mubr.msk.f32.gmra.mrb[42].mxu0 %vm555_vm3, %v11186_v57  ;;  %v7482_v57 = vld [vmem:[%s15783_s3 + $0x730] sm:$0xff] }
 0x215   : > { %3163 = vmatprep.mubr.f32.mxu0 %v15790_v35  ;;  %v8532_v26 = vpack.c.bf16 %v7482_v57, %v7478_v23  ;;  %8473 = vmatpush1.bf16.msra.mxu0 %v8472_v42 }
 0x216   : > { %8475 = vmatprep.subr.bf16.mxu0 %v8474_v48 }
 0x217   : > { %8533 = vmatpush1.bf16.msra.mxu1 %v8532_v26 }
 0x218   : > { %7352 = vmatmul.mubr.msk.f32.gmra.mrb[44].mxu0 %vm555_vm3, %v11401_v19  ;;  %v7491_v19 = vld [vmem:[%s15783_s3 + $0x778] sm:$0xff] }
 0x219   : > { %3169 = vmatprep.mubr.f32.mxu0 %v15790_v35  ;;  %v8534_v40 = vpack.c.bf16 %v7491_v19, %v7487_v36  ;;  %8477 = vmatpush1.bf16.msra.mxu0 %v8476_v53 }
 0x21a   : > { %8479 = vmatprep.subr.bf16.mxu0 %v8478_v61 }
 0x21b   : > { %8535 = vmatprep.subr.bf16.mxu1 %v8534_v40  ;;  %v3555_v40 = vlaneseq }
 0x21c   : > { %7353 = vmatmul.mubr.msk.f32.gmra.mrb[46].mxu0 %vm555_vm3, %v11778_v41  ;;  %v7490_v41 = vld [vmem:[%s15783_s3 + $0x770] sm:$0xff] }
 0x21d   : > { %v8536_v45 = vpack.c.bf16 %v7490_v41, %v7486_v44  ;;  %8481 = vmatpush1.bf16.msra.mxu0 %v8480_v3  ;;  %v12009_v49 = vshrl.u32 %v3555_v40, 7 }
 0x21e   : > { %8547 = vmatprep.subr.bf16.mxu0 %v8546_v12  ;;  %v3613_v12 = vld [vmem:[%s15783_s3] sm:$0xff] }
 0x21f   : > { %8537 = vmatpush1.bf16.msra.mxu1 %v8536_v45  ;;  %v12026_v31 = vsub.s32 1, %v12009_v49 }
 0x220   : > { %8539 = vmatprep.subr.bf16.mxu1 %v8538_v50 }
 0x221   : > { %v12040_v10 = vrot.slane %v3553_v58, %v12026_v31 }
 0x223   : > { %8541 = vmatpush1.bf16.msra.mxu1 %v8540_v62  ;;  %v12020_v62 = vsub.s32 0, %v12009_v49 }
 0x224   : > { %8543 = vmatprep.subr.bf16.mxu1 %v8542_v2 }
 0x225   : > { %v12035_v5 = vrot.slane %v3553_v58, %v12020_v62 }
 0x227   : > { %8545 = vmatpush1.bf16.msra.mxu1 %v8544_v60 }
 0x228   : > { %8611 = vmatprep.subr.bf16.mxu1 %v8610_v14 }
 0x27c   : > { %v3242_v4 = vpop.f32.mrb[42].mxu1 }
 0x27d   : > { %v9651_v32 = vadd.f32 %v3242_v4, %v11286_v6  ;;  %v3244_v8 = vpop.f32.mrb[43].mxu1 }
 0x27e   : > { %v9652_v15 = vadd.f32 %v3244_v8, %v11288_v33  ;;  %v3615_v8 = vld [vmem:[%s15783_s3 + $0x10] sm:$0xff] }
 0x280   : > { %v3248_v16 = vpop.f32.mrb[44].mxu1 }
 0x281   : > { %v9653_v17 = vadd.f32 %v3248_v16, %v11296_v55  ;;  %v3250_v18 = vpop.f32.mrb[45].mxu1  ;;  %v3622_v16 = vld [vmem:[%s15783_s3 + $0x48] sm:$0xff] }
 0x282   : > { %v9654_v13 = vadd.f32 %v3250_v18, %v11298_v34 }
 0x283   : > { %v3483_v20 = vmax.f32 %v9651_v32, %v9653_v17 }
 0x284   : > { %v3484_v21 = vmax.f32 %v9652_v15, %v9654_v13  ;;  %v3254_v22 = vpop.f32.mrb[46].mxu1  ;;  %v3619_v15 = vld [vmem:[%s15783_s3 + $0x30] sm:$0xff]  ;;  %v3626_v13 = vld [vmem:[%s15783_s3 + $0x68] sm:$0xff] }
 0x285   : > { %v9655_v23 = vadd.f32 %v3254_v22, %v11306_v43  ;;  %v3256_v25 = vpop.f32.mrb[47].mxu1  ;;  %v8550_v40 = vpack.c.bf16 %v3626_v13, %v3622_v16  ;;  %v3642_v13 = vld [vmem:[%s15783_s3 + $0xe8] sm:$0xff] }
 0x286   : > { %v9656_v57 = vadd.f32 %v3256_v25, %v11308_v63  ;;  %v8548_v25 = vpack.c.bf16 %v3617_v54, %v3613_v12 }
 0x288   : > { %v3260_v26 = vpop.f32.mrb[0].mxu1 }
 0x289   : > { %v3487_v24 = vmax.f32 %v9655_v23, %v3260_v26  ;;  %v3262_v6 = vpop.f32.mrb[1].mxu1  ;;  %v3621_v26 = vld [vmem:[%s15783_s3 + $0x40] sm:$0xff] }
 0x28a   : > { %v3488_v27 = vmax.f32 %v9656_v57, %v3262_v6  ;;  %v8612_v57 = vpack.c.bf16 %v3619_v15, %v3615_v8  ;;  %v3635_v8 = vld [vmem:[%s15783_s3 + $0xb0] sm:$0xff]  ;;  %v3638_v15 = vld [vmem:[%s15783_s3 + $0xc8] sm:$0xff] }
 0x28c   : > { %v11985_v36 = vpop.f32.mrb[2].mxu1 }
 0x28d   : > { %v11987_v33 = vpop.f32.mrb[3].mxu1 }
 0x290   : > { %v11989_v55 = vpop.f32.mrb[4].mxu1 }
 0x291   : > { %v3491_v34 = vmax.f32 %v11985_v36, %v11989_v55  ;;  %v11993_v37 = vpop.f32.mrb[5].mxu1  ;;  %v3629_v36 = vld [vmem:[%s15783_s3 + $0x80] sm:$0xff] }
 0x292   : > { %v3492_v43 = vmax.f32 %v11987_v33, %v11993_v37  ;;  %v3633_v55 = vld [vmem:[%s15783_s3 + $0xa0] sm:$0xff] }
 0x293   : > { %v3033_v19 = vpop.f32.mrb[0].mxu0 }
 0x294   : > { %v11997_v63 = vpop.f32.mrb[6].mxu1  ;;  %v3035_v38 = vpop.f32.mrb[1].mxu0 }
 0x295   : > { %v11999_v28 = vpop.f32.mrb[7].mxu1 }
 0x297   : > { %v3039_v42 = vpop.f32.mrb[2].mxu0 }
 0x298   : > { %v3481_v44 = vmax.f32 %v3033_v19, %v3039_v42  ;;  %v12001_v41 = vpop.f32.mrb[8].mxu1  ;;  %v3041_v45 = vpop.f32.mrb[3].mxu0 }
 0x299   : > { %v3495_v29 = vmax.f32 %v11997_v63, %v12001_v41  ;;  %v3482_v39 = vmax.f32 %v3035_v38, %v3041_v45  ;;  %v12005_v47 = vpop.f32.mrb[9].mxu1  ;;  %v3627_v45 = vld [vmem:[%s15783_s3 + $0x70] sm:$0xff]  ;;  %v3645_v63 = vld [vmem:[%s15783_s3 + $0x100] sm:$0xff] }
 0x29a   : > { %v12007_v48 = vmax.f32 %v3481_v44, %v3483_v20  ;;  %v3496_v50 = vmax.f32 %v11999_v28, %v12005_v47  ;;  %v3624_v20 = vld [vmem:[%s15783_s3 + $0x58] sm:$0xff]  ;;  %v3623_v44 = vld [vmem:[%s15783_s3 + $0x50] sm:$0xff]  ;;  %v3649_v41 = vld [vmem:[%s15783_s3 + $0x120] sm:$0xff] }
 0x29b   : > { %v12013_v51 = vmax.f32 %v3482_v39, %v3484_v21  ;;  %v3045_v30 = vpop.f32.mrb[4].mxu0  ;;  %v3628_v21 = vld [vmem:[%s15783_s3 + $0x78] sm:$0xff]  ;;  %v3630_v39 = vld [vmem:[%s15783_s3 + $0x88] sm:$0xff]  ;;  %v8616_v54 = vpack.c.bf16 %v3627_v45, %v3623_v44  ;;  %v8558_v45 = vpack.c.bf16 %v3642_v13, %v3638_v15  ;;  %v3651_v15 = vld [vmem:[%s15783_s3 + $0x130] sm:$0xff] }
 0x29c   : > { %v12015_v46 = vpop.f32.mrb[10].mxu1  ;;  %v3047_v53 = vpop.f32.mrb[5].mxu0  ;;  %v8614_v42 = vpack.c.bf16 %v3628_v21, %v3624_v20  ;;  %v3640_v20 = vld [vmem:[%s15783_s3 + $0xd8] sm:$0xff] }
 0x29d   : > { %v12017_v56 = vpop.f32.mrb[11].mxu1  ;;  %v3644_v21 = vld [vmem:[%s15783_s3 + $0xf8] sm:$0xff] }
 0x29f   : > { %v3051_v59 = vpop.f32.mrb[6].mxu0 }
 0x2a0   : > { %v3485_v61 = vmax.f32 %v3045_v30, %v3051_v59  ;;  %v12028_v52 = vpop.f32.mrb[12].mxu1  ;;  %v3053_v0 = vpop.f32.mrb[7].mxu0  ;;  %v3634_v59 = vld [vmem:[%s15783_s3 + $0xa8] sm:$0xff] }
 0x2a1   : > { %v3499_v1 = vmax.f32 %v12015_v46, %v12028_v52  ;;  %v3486_v2 = vmax.f32 %v3047_v53, %v3053_v0  ;;  %v12032_v3 = vpop.f32.mrb[13].mxu1  ;;  %v3636_v0 = vld [vmem:[%s15783_s3 + $0xb8] sm:$0xff]  ;;  %v8554_v33 = vpack.c.bf16 %v3634_v59, %v3630_v39  ;;  %v8622_v39 = vpack.c.bf16 %v3644_v21, %v3640_v20  ;;  %v3643_v59 = vld [vmem:[%s15783_s3 + $0xf0] sm:$0xff]  ;;  %v3658_v21 = vld [vmem:[%s15783_s3 + $0x168] sm:$0xff] }
 0x2a2   : > { %v3531_v7 = vmax.f32 %v3485_v61, %v3487_v24  ;;  %v3500_v60 = vmax.f32 %v12017_v56, %v12032_v3  ;;  %v3625_v24 = vld [vmem:[%s15783_s3 + $0x60] sm:$0xff]  ;;  %v3632_v61 = vld [vmem:[%s15783_s3 + $0x98] sm:$0xff] }
 0x2a3   : > { %v3532_v9 = vmax.f32 %v3486_v2, %v3488_v27  ;;  %v3057_v11 = vpop.f32.mrb[8].mxu0  ;;  %v8552_v12 = vpack.c.bf16 %v3625_v24, %v3621_v26  ;;  %v8618_v37 = vpack.c.bf16 %v3636_v0, %v3632_v61  ;;  %v3637_v24 = vld [vmem:[%s15783_s3 + $0xc0] sm:$0xff]  ;;  %v3646_v61 = vld [vmem:[%s15783_s3 + $0x108] sm:$0xff] }
 0x2a4   : > { %v3567_v14 = vadd.f32 %v12035_v5, %v3531_v7  ;;  %v12049_v4 = vpop.f32.mrb[14].mxu1  ;;  %v3059_v32 = vpop.f32.mrb[9].mxu0  ;;  %v3661_v46 = vld [vmem:[%s15783_s3 + $0x180] sm:$0xff] }
 0x2a5   : > { %v3568_v17 = vadd.f32 %v12040_v10, %v3532_v9  ;;  %v12061_v18 = vpop.f32.mrb[15].mxu1  ;;  %v3665_v52 = vld [vmem:[%s15783_s3 + $0x1a0] sm:$0xff] }
 0x2a6   : > { %v12080_v6 = vmax.f32 %v3567_v14, 0.0 }
 0x2a7   : > { %v12072_v22 = vmax.f32 %v3568_v17, 0.0  ;;  %v3063_v23 = vpop.f32.mrb[10].mxu0 }
 0x2a8   : > { %v3489_v27 = vmax.f32 %v3057_v11, %v3063_v23  ;;  %v12082_v19 = vpop.f32.mrb[16].mxu1  ;;  %v3065_v38 = vpop.f32.mrb[11].mxu0 }
 0x2a9   : > { %v3503_v30 = vmax.f32 %v12049_v4, %v12082_v19  ;;  %v3490_v53 = vmax.f32 %v3059_v32, %v3065_v38  ;;  %v12095_v58 = vpop.f32.mrb[17].mxu1  ;;  %3934 = vmatprep.mubr.f32.mxu0 %v12072_v22  ;;  %4047 = vmatprep.mubr.f32.mxu1 %v12072_v22  ;;  %v3677_v4 = vld [vmem:[%s15783_s3 + $0x200] sm:$0xff] }
 0x2aa   : > { %v3533_v2 = vmax.f32 %v3489_v27, %v3491_v34  ;;  %v3504_v7 = vmax.f32 %v12061_v18, %v12095_v58  ;;  %3935 = vmatmul.mubr.f32.vlgmr.msra.gmra.mrb[54].mxu0 %v12080_v6  ;;  %4048 = vmatmul.mubr.f32.vlgmr.msra.gmra.mrb[48].mxu1 %v12080_v6  ;;  %v3641_v27 = vld [vmem:[%s15783_s3 + $0xe0] sm:$0xff] }
 0x2ab   : > { %v3534_v9 = vmax.f32 %v3490_v53, %v3492_v43  ;;  %8549 = vmatpush1.bf16.msra.mxu0 %v8548_v25  ;;  %8613 = vmatpush1.bf16.msra.mxu1 %v8612_v57  ;;  %v3069_v11 = vpop.f32.mrb[12].mxu0  ;;  %v3631_v43 = vld [vmem:[%s15783_s3 + $0x90] sm:$0xff]  ;;  %v8556_v57 = vpack.c.bf16 %v3633_v55, %v3629_v36  ;;  %v3681_v19 = vld [vmem:[%s15783_s3 + $0x220] sm:$0xff] }
 0x2ac   : > { %v3569_v34 = vadd.f32 %v12035_v5, %v3533_v2  ;;  %v12125_v14 = vpop.f32.mrb[18].mxu1  ;;  %v3071_v32 = vpop.f32.mrb[13].mxu0  ;;  %8551 = vmatprep.subr.bf16.mxu0 %v8550_v40  ;;  %8615 = vmatprep.subr.bf16.mxu1 %v8614_v42  ;;  %v8620_v26 = vpack.c.bf16 %v3635_v8, %v3631_v43  ;;  %v3639_v53 = vld [vmem:[%s15783_s3 + $0xd0] sm:$0xff] }
 0x2ad   : > { %v3570_v16 = vadd.f32 %v12040_v10, %v3534_v9  ;;  %v12137_v17 = vpop.f32.mrb[19].mxu1 }
 0x2ae   : > { %v12156_v38 = vmax.f32 %v3569_v34, 0.0 }
 0x2af   : > { %v12148_v23 = vmax.f32 %v3570_v16, 0.0  ;;  %8553 = vmatpush1.bf16.msra.mxu0 %v8552_v12  ;;  %8617 = vmatpush1.bf16.msra.mxu1 %v8616_v54  ;;  %v3075_v25 = vpop.f32.mrb[14].mxu0  ;;  %v3648_v12 = vld [vmem:[%s15783_s3 + $0x118] sm:$0xff]  ;;  %v3654_v16 = vld [vmem:[%s15783_s3 + $0x148] sm:$0xff] }
 0x2b0   : > { %v3493_v40 = vmax.f32 %v3069_v11, %v3075_v25  ;;  %v12158_v42 = vpop.f32.mrb[20].mxu1  ;;  %v3077_v44 = vpop.f32.mrb[15].mxu0  ;;  %8555 = vmatprep.subr.bf16.mxu0 %v8554_v33  ;;  %8619 = vmatprep.subr.bf16.mxu1 %v8618_v37  ;;  %v3650_v11 = vld [vmem:[%s15783_s3 + $0x128] sm:$0xff]  ;;  %v3652_v54 = vld [vmem:[%s15783_s3 + $0x138] sm:$0xff]  ;;  %v8560_v33 = vpack.c.bf16 %v3641_v27, %v3637_v24  ;;  %v8624_v37 = vpack.c.bf16 %v3643_v59, %v3639_v53 }
 0x2b1   : > { %v3507_v0 = vmax.f32 %v12125_v14, %v12158_v42  ;;  %v3494_v2 = vmax.f32 %v3071_v32, %v3077_v44  ;;  %v12171_v9 = vpop.f32.mrb[21].mxu1  ;;  %3940 = vmatprep.mubr.f32.mxu0 %v12148_v23  ;;  %4053 = vmatprep.mubr.f32.mxu1 %v12148_v23  ;;  %v8562_v28 = vpack.c.bf16 %v3650_v11, %v3646_v61  ;;  %v3656_v25 = vld [vmem:[%s15783_s3 + $0x158] sm:$0xff]  ;;  %v3653_v44 = vld [vmem:[%s15783_s3 + $0x140] sm:$0xff] }
 0x2b2   : > { %v3535_v36 = vmax.f32 %v3493_v40, %v3495_v29  ;;  %v3508_v55 = vmax.f32 %v12137_v17, %v12171_v9  ;;  %3941 = vmatmul.mubr.f32.gmra.mrb[56].mxu0 %v12156_v38  ;;  %4054 = vmatmul.mubr.f32.gmra.mrb[50].mxu1 %v12156_v38  ;;  %v8626_v47 = vpack.c.bf16 %v3652_v54, %v3648_v12  ;;  %v3655_v12 = vld [vmem:[%s15783_s3 + $0x150] sm:$0xff]  ;;  %v3693_v14 = vld [vmem:[%s15783_s3 + $0x280] sm:$0xff] }
 0x2b3   : > { %v3536_v34 = vmax.f32 %v3494_v2, %v3496_v50  ;;  %8557 = vmatpush1.bf16.msra.mxu0 %v8556_v57  ;;  %8621 = vmatpush1.bf16.msra.mxu1 %v8620_v26  ;;  %v3081_v32 = vpop.f32.mrb[16].mxu0  ;;  %v3647_v50 = vld [vmem:[%s15783_s3 + $0x110] sm:$0xff]  ;;  %v3660_v57 = vld [vmem:[%s15783_s3 + $0x178] sm:$0xff]  ;;  %v8564_v27 = vpack.c.bf16 %v3649_v41, %v3645_v63  ;;  %v8566_v2 = vpack.c.bf16 %v3658_v21, %v3654_v16  ;;  %v3697_v42 = vld [vmem:[%s15783_s3 + $0x2a0] sm:$0xff] }
 0x2b4   : > { %v3571_v29 = vadd.f32 %v12035_v5, %v3535_v36  ;;  %v12201_v43 = vpop.f32.mrb[22].mxu1  ;;  %v3083_v8 = vpop.f32.mrb[17].mxu0  ;;  %8559 = vmatprep.subr.bf16.mxu0 %v8558_v45  ;;  %8623 = vmatprep.subr.bf16.mxu1 %v8622_v39  ;;  %v8628_v40 = vpack.c.bf16 %v3651_v15, %v3647_v50  ;;  %v3657_v45 = vld [vmem:[%s15783_s3 + $0x160] sm:$0xff]  ;;  %v8630_v11 = vpack.c.bf16 %v3660_v57, %v3656_v25  ;;  %v3659_v54 = vld [vmem:[%s15783_s3 + $0x170] sm:$0xff]  ;;  %v3662_v36 = vld [vmem:[%s15783_s3 + $0x188] sm:$0xff] }
 0x2b5   : > { %v3572_v13 = vadd.f32 %v12040_v10, %v3536_v34  ;;  %v12213_v20 = vpop.f32.mrb[23].mxu1  ;;  %v3664_v63 = vld [vmem:[%s15783_s3 + $0x198] sm:$0xff]  ;;  %v8568_v50 = vpack.c.bf16 %v3657_v45, %v3653_v44  ;;  %v8632_v15 = vpack.c.bf16 %v3659_v54, %v3655_v12  ;;  %v3667_v21 = vld [vmem:[%s15783_s3 + $0x1b0] sm:$0xff]  ;;  %v3670_v25 = vld [vmem:[%s15783_s3 + $0x1c8] sm:$0xff] }
 0x2b6   : > { %v12232_v39 = vmax.f32 %v3571_v29, 0.0  ;;  %v3668_v41 = vld [vmem:[%s15783_s3 + $0x1b8] sm:$0xff]  ;;  %v3673_v12 = vld [vmem:[%s15783_s3 + $0x1e0] sm:$0xff] }
 0x2b7   : > { %v12224_v26 = vmax.f32 %v3572_v13, 0.0  ;;  %8561 = vmatpush1.bf16.msra.mxu0 %v8560_v33  ;;  %8625 = vmatpush1.bf16.msra.mxu1 %v8624_v37  ;;  %v3087_v24 = vpop.f32.mrb[18].mxu0  ;;  %v3666_v37 = vld [vmem:[%s15783_s3 + $0x1a8] sm:$0xff]  ;;  %v8634_v3 = vpack.c.bf16 %v3668_v41, %v3664_v63  ;;  %v3676_v44 = vld [vmem:[%s15783_s3 + $0x1f8] sm:$0xff] }
 0x2b8   : > { %v3497_v53 = vmax.f32 %v3081_v32, %v3087_v24  ;;  %v12234_v59 = vpop.f32.mrb[24].mxu1  ;;  %v3089_v61 = vpop.f32.mrb[19].mxu0  ;;  %8563 = vmatprep.subr.bf16.mxu0 %v8562_v28  ;;  %8627 = vmatprep.subr.bf16.mxu1 %v8626_v47  ;;  %v8570_v56 = vpack.c.bf16 %v3666_v37, %v3662_v36 }
 0x2b9   : > { %v3511_v34 = vmax.f32 %v12201_v43, %v12234_v59  ;;  %v3498_v32 = vmax.f32 %v3083_v8, %v3089_v61  ;;  %v12247_v33 = vpop.f32.mrb[25].mxu1  ;;  %3946 = vmatprep.mubr.f32.mxu0 %v12224_v26  ;;  %4059 = vmatprep.mubr.f32.mxu1 %v12224_v26  ;;  %v8572_v61 = vpack.c.bf16 %v3665_v52, %v3661_v46  ;;  %v3682_v52 = vld [vmem:[%s15783_s3 + $0x228] sm:$0xff]  ;;  %v3709_v43 = vld [vmem:[%s15783_s3 + $0x300] sm:$0xff] }
 0x2ba   : > { %v3537_v29 = vmax.f32 %v3497_v53, %v3499_v1  ;;  %v3512_v8 = vmax.f32 %v12213_v20, %v12247_v33  ;;  %3947 = vmatmul.mubr.f32.gmra.mrb[58].mxu0 %v12232_v39  ;;  %4060 = vmatmul.mubr.f32.gmra.mrb[52].mxu1 %v12232_v39  ;;  %v3713_v59 = vld [vmem:[%s15783_s3 + $0x320] sm:$0xff] }
 0x2bb   : > { %v3538_v28 = vmax.f32 %v3498_v32, %v3500_v60  ;;  %8565 = vmatpush1.bf16.msra.mxu0 %v8564_v27  ;;  %8629 = vmatpush1.bf16.msra.mxu1 %v8628_v40  ;;  %v3093_v47 = vpop.f32.mrb[20].mxu0  ;;  %v3663_v60 = vld [vmem:[%s15783_s3 + $0x190] sm:$0xff]  ;;  %v3674_v27 = vld [vmem:[%s15783_s3 + $0x1e8] sm:$0xff]  ;;  %v3672_v40 = vld [vmem:[%s15783_s3 + $0x1d8] sm:$0xff] }
 0x2bc   : > { %v3573_v1 = vadd.f32 %v12035_v5, %v3537_v29  ;;  %v12277_v16 = vpop.f32.mrb[26].mxu1  ;;  %v3095_v13 = vpop.f32.mrb[21].mxu0  ;;  %8567 = vmatprep.subr.bf16.mxu0 %v8566_v2  ;;  %8631 = vmatprep.subr.bf16.mxu1 %v8630_v11  ;;  %v8636_v2 = vpack.c.bf16 %v3667_v21, %v3663_v60  ;;  %v3669_v11 = vld [vmem:[%s15783_s3 + $0x1c0] sm:$0xff]  ;;  %v8574_v63 = vpack.c.bf16 %v3674_v27, %v3670_v25  ;;  %v3671_v29 = vld [vmem:[%s15783_s3 + $0x1d0] sm:$0xff] }
 0x2bd   : > { %v3574_v57 = vadd.f32 %v12040_v10, %v3538_v28  ;;  %v12289_v24 = vpop.f32.mrb[27].mxu1  ;;  %v8638_v41 = vpack.c.bf16 %v3676_v44, %v3672_v40  ;;  %v3675_v28 = vld [vmem:[%s15783_s3 + $0x1f0] sm:$0xff]  ;;  %v8576_v25 = vpack.c.bf16 %v3673_v12, %v3669_v11  ;;  %v3690_v11 = vld [vmem:[%s15783_s3 + $0x268] sm:$0xff]  ;;  %v3688_v12 = vld [vmem:[%s15783_s3 + $0x258] sm:$0xff] }
 0x2be   : > { %v12308_v54 = vmax.f32 %v3573_v1, 0.0  ;;  %v3680_v1 = vld [vmem:[%s15783_s3 + $0x218] sm:$0xff]  ;;  %v3683_v44 = vld [vmem:[%s15783_s3 + $0x230] sm:$0xff] }
 0x2bf   : > { %v12300_v45 = vmax.f32 %v3574_v57, 0.0  ;;  %8569 = vmatpush1.bf16.msra.mxu0 %v8568_v50  ;;  %8633 = vmatpush1.bf16.msra.mxu1 %v8632_v15  ;;  %v3099_v53 = vpop.f32.mrb[22].mxu0  ;;  %v3678_v50 = vld [vmem:[%s15783_s3 + $0x208] sm:$0xff]  ;;  %v8640_v57 = vpack.c.bf16 %v3675_v28, %v3671_v29  ;;  %v3685_v28 = vld [vmem:[%s15783_s3 + $0x240] sm:$0xff] }
 0x2c0   : > { %v3501_v36 = vmax.f32 %v3093_v47, %v3099_v53  ;;  %v12310_v32 = vpop.f32.mrb[28].mxu1  ;;  %v3101_v37 = vpop.f32.mrb[23].mxu0  ;;  %8571 = vmatprep.subr.bf16.mxu0 %v8570_v56  ;;  %8635 = vmatprep.subr.bf16.mxu1 %v8634_v3  ;;  %v3684_v56 = vld [vmem:[%s15783_s3 + $0x238] sm:$0xff]  ;;  %v8578_v18 = vpack.c.bf16 %v3682_v52, %v3678_v50  ;;  %v3686_v53 = vld [vmem:[%s15783_s3 + $0x248] sm:$0xff]  ;;  %v3689_v50 = vld [vmem:[%s15783_s3 + $0x260] sm:$0xff] }
 0x2c1   : > { %v3515_v47 = vmax.f32 %v12277_v16, %v12310_v32  ;;  %v3502_v15 = vmax.f32 %v3095_v13, %v3101_v37  ;;  %v12323_v46 = vpop.f32.mrb[29].mxu1  ;;  %3952 = vmatprep.mubr.f32.mxu0 %v12300_v45  ;;  %4065 = vmatprep.mubr.f32.mxu1 %v12300_v45  ;;  %v8642_v58 = vpack.c.bf16 %v3684_v56, %v3680_v1  ;;  %v3725_v16 = vld [vmem:[%s15783_s3 + $0x380] sm:$0xff] }
 0x2c2   : > { %v3539_v13 = vmax.f32 %v3501_v36, %v3503_v30  ;;  %v3516_v3 = vmax.f32 %v12289_v24, %v12323_v46  ;;  %3953 = vmatmul.mubr.f32.gmra.mrb[60].mxu0 %v12308_v54  ;;  %4066 = vmatmul.mubr.f32.gmra.mrb[54].mxu1 %v12308_v54  ;;  %v3692_v36 = vld [vmem:[%s15783_s3 + $0x278] sm:$0xff]  ;;  %v3729_v24 = vld [vmem:[%s15783_s3 + $0x3a0] sm:$0xff]  ;;  %v3727_v46 = vld [vmem:[%s15783_s3 + $0x390] sm:$0xff] }
 0x2c3   : > { %v3540_v60 = vmax.f32 %v3502_v15, %v3504_v7  ;;  %8573 = vmatpush1.bf16.msra.mxu0 %v8572_v61  ;;  %8637 = vmatpush1.bf16.msra.mxu1 %v8636_v2  ;;  %v3105_v21 = vpop.f32.mrb[24].mxu0  ;;  %v3679_v7 = vld [vmem:[%s15783_s3 + $0x210] sm:$0xff] }
 0x2c4   : > { %v3575_v30 = vadd.f32 %v12035_v5, %v3539_v13  ;;  %v12353_v27 = vpop.f32.mrb[30].mxu1  ;;  %v3107_v40 = vpop.f32.mrb[25].mxu0  ;;  %8575 = vmatprep.subr.bf16.mxu0 %v8574_v63  ;;  %8639 = vmatprep.subr.bf16.mxu1 %v8638_v41  ;;  %v8580_v41 = vpack.c.bf16 %v3681_v19, %v3677_v4  ;;  %v8644_v29 = vpack.c.bf16 %v3683_v44, %v3679_v7  ;;  %v3694_v4 = vld [vmem:[%s15783_s3 + $0x288] sm:$0xff]  ;;  %v3700_v7 = vld [vmem:[%s15783_s3 + $0x2b8] sm:$0xff] }
 0x2c5   : > { %v3576_v61 = vadd.f32 %v12040_v10, %v3540_v60  ;;  %v12365_v2 = vpop.f32.mrb[31].mxu1  ;;  %v8582_v13 = vpack.c.bf16 %v3690_v11, %v3686_v53  ;;  %v8646_v60 = vpack.c.bf16 %v3692_v36, %v3688_v12  ;;  %v8584_v11 = vpack.c.bf16 %v3689_v50, %v3685_v28 }
 0x2c6   : > { %v12384_v15 = vmax.f32 %v3575_v30, 0.0 }
 0x2c7   : > { %v12376_v37 = vmax.f32 %v3576_v61, 0.0  ;;  %8577 = vmatpush1.bf16.msra.mxu0 %v8576_v25  ;;  %8641 = vmatpush1.bf16.msra.mxu1 %v8640_v57  ;;  %v3111_v63 = vpop.f32.mrb[26].mxu0  ;;  %v3687_v25 = vld [vmem:[%s15783_s3 + $0x250] sm:$0xff] }
 0x2c8   : > { %v3505_v52 = vmax.f32 %v3105_v21, %v3111_v63  ;;  %v12386_v1 = vpop.f32.mrb[32].mxu1  ;;  %v3113_v56 = vpop.f32.mrb[27].mxu0  ;;  %8579 = vmatprep.subr.bf16.mxu0 %v8578_v18  ;;  %8643 = vmatprep.subr.bf16.mxu1 %v8642_v58  ;;  %v3691_v57 = vld [vmem:[%s15783_s3 + $0x270] sm:$0xff]  ;;  %v3698_v18 = vld [vmem:[%s15783_s3 + $0x2a8] sm:$0xff]  ;;  %v3696_v58 = vld [vmem:[%s15783_s3 + $0x298] sm:$0xff] }
 0x2c9   : > { %v3519_v21 = vmax.f32 %v12353_v27, %v12386_v1  ;;  %v3506_v19 = vmax.f32 %v3107_v40, %v3113_v56  ;;  %v12399_v30 = vpop.f32.mrb[33].mxu1  ;;  %3958 = vmatprep.mubr.f32.mxu0 %v12376_v37  ;;  %4071 = vmatprep.mubr.f32.mxu1 %v12376_v37  ;;  %v8648_v12 = vpack.c.bf16 %v3691_v57, %v3687_v25  ;;  %v3704_v56 = vld [vmem:[%s15783_s3 + $0x2d8] sm:$0xff] }
 0x2ca   : > { %v3541_v40 = vmax.f32 %v3505_v52, %v3507_v0  ;;  %v3520_v44 = vmax.f32 %v12365_v2, %v12399_v30  ;;  %3959 = vmatmul.mubr.f32.gmra.mrb[62].mxu0 %v12384_v15  ;;  %4072 = vmatmul.mubr.f32.gmra.mrb[56].mxu1 %v12384_v15  ;;  %v8586_v17 = vpack.c.bf16 %v3698_v18, %v3694_v4  ;;  %v3706_v52 = vld [vmem:[%s15783_s3 + $0x2e8] sm:$0xff]  ;;  %v3705_v18 = vld [vmem:[%s15783_s3 + $0x2e0] sm:$0xff]  ;;  %v7510_v30 = vld [vmem:[%s15783_s3 + $0x810] sm:$0xff] }
 0x2cb   : > { %v3542_v53 = vmax.f32 %v3506_v19, %v3508_v55  ;;  %8581 = vmatpush1.bf16.msra.mxu0 %v8580_v41  ;;  %8645 = vmatpush1.bf16.msra.mxu1 %v8644_v29  ;;  %v3117_v61 = vpop.f32.mrb[28].mxu0  ;;  %v8650_v9 = vpack.c.bf16 %v3700_v7, %v3696_v58  ;;  %v3695_v55 = vld [vmem:[%s15783_s3 + $0x290] sm:$0xff]  ;;  %v3702_v29 = vld [vmem:[%s15783_s3 + $0x2c8] sm:$0xff]  ;;  %v8588_v57 = vpack.c.bf16 %v3697_v42, %v3693_v14  ;;  %v3701_v19 = vld [vmem:[%s15783_s3 + $0x2c0] sm:$0xff] }
 0x2cc   : > { %v3577_v0 = vadd.f32 %v12035_v5, %v3541_v40  ;;  %v12429_v36 = vpop.f32.mrb[34].mxu1  ;;  %v3119_v63 = vpop.f32.mrb[29].mxu0  ;;  %8583 = vmatprep.subr.bf16.mxu0 %v8582_v13  ;;  %8647 = vmatprep.subr.bf16.mxu1 %v8646_v60  ;;  %v3699_v41 = vld [vmem:[%s15783_s3 + $0x2b0] sm:$0xff]  ;;  %v3708_v13 = vld [vmem:[%s15783_s3 + $0x2f8] sm:$0xff]  ;;  %v3565_v27 = vadd.f32 %v12035_v5, %v12007_v48  ;;  %v7512_v2 = vld [vmem:[%s15783_s3 + $0x820] sm:$0xff] }
 0x2cd   : > { %v3578_v28 = vadd.f32 %v12040_v10, %v3542_v53  ;;  %v12441_v50 = vpop.f32.mrb[35].mxu1  ;;  %v8652_v4 = vpack.c.bf16 %v3699_v41, %v3695_v55  ;;  %v3703_v14 = vld [vmem:[%s15783_s3 + $0x2d0] sm:$0xff]  ;;  %v3712_v41 = vld [vmem:[%s15783_s3 + $0x318] sm:$0xff] }
 0x2ce   : > { %v12460_v58 = vmax.f32 %v3577_v0, 0.0  ;;  %v3707_v42 = vld [vmem:[%s15783_s3 + $0x2f0] sm:$0xff]  ;;  %v3710_v0 = vld [vmem:[%s15783_s3 + $0x308] sm:$0xff] }
 0x2cf   : > { %v12452_v60 = vmax.f32 %v3578_v28, 0.0  ;;  %8585 = vmatpush1.bf16.msra.mxu0 %v8584_v11  ;;  %8649 = vmatpush1.bf16.msra.mxu1 %v8648_v12  ;;  %v3123_v25 = vpop.f32.mrb[30].mxu0  ;;  %v8590_v11 = vpack.c.bf16 %v3706_v52, %v3702_v29  ;;  %v8654_v12 = vpack.c.bf16 %v3708_v13, %v3704_v56  ;;  %v3716_v29 = vld [vmem:[%s15783_s3 + $0x338] sm:$0xff]  ;;  %v8592_v13 = vpack.c.bf16 %v3705_v18, %v3701_v19  ;;  %v7514_v48 = vld [vmem:[%s15783_s3 + $0x830] sm:$0xff] }
 0x2d0   : > { %v3509_v7 = vmax.f32 %v3117_v61, %v3123_v25  ;;  %v12462_v40 = vpop.f32.mrb[36].mxu1  ;;  %v3125_v53 = vpop.f32.mrb[31].mxu0  ;;  %8587 = vmatprep.subr.bf16.mxu0 %v8586_v17  ;;  %8651 = vmatprep.subr.bf16.mxu1 %v8650_v9  ;;  %v3714_v9 = vld [vmem:[%s15783_s3 + $0x328] sm:$0xff]  ;;  %v8656_v25 = vpack.c.bf16 %v3707_v42, %v3703_v14  ;;  %v8658_v33 = vpack.c.bf16 %v3716_v29, %v3712_v41  ;;  %v3724_v14 = vld [vmem:[%s15783_s3 + $0x378] sm:$0xff]  ;;  %v3717_v41 = vld [vmem:[%s15783_s3 + $0x340] sm:$0xff] }
 0x2d1   : > { %v3523_v61 = vmax.f32 %v12429_v36, %v12462_v40  ;;  %v3510_v55 = vmax.f32 %v3119_v63, %v3125_v53  ;;  %v12475_v17 = vpop.f32.mrb[37].mxu1  ;;  %3964 = vmatprep.mubr.f32.mxu0 %v12452_v60  ;;  %4077 = vmatprep.mubr.f32.mxu1 %v12452_v60  ;;  %v8594_v20 = vpack.c.bf16 %v3714_v9, %v3710_v0  ;;  %v3721_v29 = vld [vmem:[%s15783_s3 + $0x360] sm:$0xff] }
 0x2d2   : > { %v3543_v63 = vmax.f32 %v3509_v7, %v3511_v34  ;;  %v3524_v28 = vmax.f32 %v12441_v50, %v12475_v17  ;;  %3965 = vmatmul.mubr.f32.gmra.mrb[64].mxu0 %v12460_v58  ;;  %4078 = vmatmul.mubr.f32.gmra.mrb[58].mxu1 %v12460_v58  ;;  %v7528_v50 = vld [vmem:[%s15783_s3 + $0x8a0] sm:$0xff] }
 0x2d3   : > { %v3544_v52 = vmax.f32 %v3510_v55, %v3512_v8  ;;  %8589 = vmatpush1.bf16.msra.mxu0 %v8588_v57  ;;  %8653 = vmatpush1.bf16.msra.mxu1 %v8652_v4  ;;  %v3129_v56 = vpop.f32.mrb[32].mxu0  ;;  %v3711_v8 = vld [vmem:[%s15783_s3 + $0x310] sm:$0xff]  ;;  %v3718_v4 = vld [vmem:[%s15783_s3 + $0x348] sm:$0xff]  ;;  %v8596_v55 = vpack.c.bf16 %v3713_v59, %v3709_v43 }
 0x2d4   : > { %v3579_v34 = vadd.f32 %v12035_v5, %v3543_v63  ;;  %v12505_v7 = vpop.f32.mrb[38].mxu1  ;;  %v3131_v53 = vpop.f32.mrb[33].mxu0  ;;  %8591 = vmatprep.subr.bf16.mxu0 %v8590_v11  ;;  %8655 = vmatprep.subr.bf16.mxu1 %v8654_v12  ;;  %v3715_v57 = vld [vmem:[%s15783_s3 + $0x330] sm:$0xff]  ;;  %v3722_v11 = vld [vmem:[%s15783_s3 + $0x368] sm:$0xff]  ;;  %v3720_v12 = vld [vmem:[%s15783_s3 + $0x358] sm:$0xff] }
 0x2d5   : > { %v3580_v19 = vadd.f32 %v12040_v10, %v3544_v52  ;;  %v12517_v18 = vpop.f32.mrb[39].mxu1  ;;  %v8660_v9 = vpack.c.bf16 %v3715_v57, %v3711_v8  ;;  %v3719_v43 = vld [vmem:[%s15783_s3 + $0x350] sm:$0xff]  ;;  %v3728_v57 = vld [vmem:[%s15783_s3 + $0x398] sm:$0xff] }
 0x2d6   : > { %v12536_v63 = vmax.f32 %v3579_v34, 0.0  ;;  %v3723_v59 = vld [vmem:[%s15783_s3 + $0x370] sm:$0xff]  ;;  %v3726_v34 = vld [vmem:[%s15783_s3 + $0x388] sm:$0xff] }
 0x2d7   : > { %v12528_v42 = vmax.f32 %v3580_v19, 0.0  ;;  %8593 = vmatpush1.bf16.msra.mxu0 %v8592_v13  ;;  %8657 = vmatpush1.bf16.msra.mxu1 %v8656_v25  ;;  %v3135_v0 = vpop.f32.mrb[34].mxu0  ;;  %v8598_v13 = vpack.c.bf16 %v3722_v11, %v3718_v4  ;;  %v8662_v25 = vpack.c.bf16 %v3724_v14, %v3720_v12  ;;  %v3732_v4 = vld [vmem:[%s15783_s3 + $0x3b8] sm:$0xff] }
 0x2d8   : > { %v3513_v52 = vmax.f32 %v3129_v56, %v3135_v0  ;;  %v12538_v35 = vpop.f32.mrb[40].mxu1  ;;  %v3137_v19 = vpop.f32.mrb[35].mxu0  ;;  %8595 = vmatprep.subr.bf16.mxu0 %v8594_v20  ;;  %8659 = vmatprep.subr.bf16.mxu1 %v8658_v33  ;;  %v3730_v33 = vld [vmem:[%s15783_s3 + $0x3a8] sm:$0xff]  ;;  %v8600_v0 = vpack.c.bf16 %v3721_v29, %v3717_v41  ;;  %v8666_v11 = vpack.c.bf16 %v3732_v4, %v3728_v57 }
 0x2d9   : > { %v3527_v56 = vmax.f32 %v12505_v7, %v12538_v35  ;;  %v3514_v8 = vmax.f32 %v3131_v53, %v3137_v19  ;;  %v12551_v20 = vpop.f32.mrb[41].mxu1  ;;  %3970 = vmatprep.mubr.f32.mxu0 %v12528_v42  ;;  %4083 = vmatprep.mubr.f32.mxu1 %v12528_v42  ;;  %v8664_v19 = vpack.c.bf16 %v3723_v59, %v3719_v43  ;;  %v3738_v29 = vld [vmem:[%s15783_s3 + $0x3e8] sm:$0xff] }
 0x2da   : > { %v3545_v53 = vmax.f32 %v3513_v52, %v3515_v47  ;;  %3971 = vmatmul.mubr.f32.gmra.mrb[66].mxu0 %v12536_v63  ;;  %4084 = vmatmul.mubr.f32.gmra.mrb[60].mxu1 %v12536_v63  ;;  %v8602_v52 = vpack.c.bf16 %v3730_v33, %v3726_v34  ;;  %v3566_v41 = vadd.f32 %v12040_v10, %v12013_v51  ;;  %v3733_v51 = vld [vmem:[%s15783_s3 + $0x3c0] sm:$0xff] }
 0x2db   : > { %v3546_v12 = vmax.f32 %v3514_v8, %v3516_v3  ;;  %8597 = vmatpush1.bf16.msra.mxu0 %v8596_v55  ;;  %8661 = vmatpush1.bf16.msra.mxu1 %v8660_v9  ;;  %v3141_v14 = vpop.f32.mrb[36].mxu0  ;;  %v3731_v3 = vld [vmem:[%s15783_s3 + $0x3b0] sm:$0xff]  ;;  %v3734_v9 = vld [vmem:[%s15783_s3 + $0x3c8] sm:$0xff]  ;;  %v8604_v34 = vpack.c.bf16 %v3729_v24, %v3725_v16  ;;  %v3737_v33 = vld [vmem:[%s15783_s3 + $0x3e0] sm:$0xff]  ;;  %v15796_v35 = vmax.f32 %v12517_v18, %v12551_v20 }
 0x2dc   : > { %v3581_v32 = vadd.f32 %v12035_v5, %v3545_v53  ;;  %v3143_v47 = vpop.f32.mrb[37].mxu0  ;;  %8599 = vmatprep.subr.bf16.mxu0 %v8598_v13  ;;  %8663 = vmatprep.subr.bf16.mxu1 %v8662_v25  ;;  %v3736_v13 = vld [vmem:[%s15783_s3 + $0x3d8] sm:$0xff]  ;;  %v8668_v8 = vpack.c.bf16 %v3731_v3, %v3727_v46  ;;  %v3590_v46 = vmax.f32 %v3566_v41, 0.0  ;;  %v7508_v41 = vld [vmem:[%s15783_s3 + $0x800] sm:$0xff] }
 0x2dd   : > { %v3582_v55 = vadd.f32 %v12040_v10, %v3546_v12  ;;  %v3740_v25 = vld [vmem:[%s15783_s3 + $0x3f8] sm:$0xff]  ;;  %v3735_v12 = vld [vmem:[%s15783_s3 + $0x3d0] sm:$0xff] }
 0x2de   : > { %v12610_v57 = vmax.f32 %v3581_v32, 0.0  ;;  %v8670_v32 = vpack.c.bf16 %v3740_v25, %v3736_v13  ;;  %v7515_v24 = vld [vmem:[%s15783_s3 + $0x838] sm:$0xff]  ;;  %v7521_v25 = vld [vmem:[%s15783_s3 + $0x868] sm:$0xff] }
 0x2df   : > { %v12602_v43 = vmax.f32 %v3582_v55, 0.0  ;;  %8601 = vmatpush1.bf16.msra.mxu0 %v8600_v0  ;;  %8665 = vmatpush1.bf16.msra.mxu1 %v8664_v19  ;;  %v3147_v59 = vpop.f32.mrb[38].mxu0  ;;  %v3739_v0 = vld [vmem:[%s15783_s3 + $0x3f0] sm:$0xff]  ;;  %v7509_v19 = vld [vmem:[%s15783_s3 + $0x808] sm:$0xff] }
 0x2e0   : > { %v3517_v4 = vmax.f32 %v3141_v14, %v3147_v59  ;;  %v3149_v53 = vpop.f32.mrb[39].mxu0  ;;  %8603 = vmatprep.subr.bf16.mxu0 %v8602_v52  ;;  %8667 = vmatprep.subr.bf16.mxu1 %v8666_v11  ;;  %v8606_v14 = vpack.c.bf16 %v3738_v29, %v3734_v9  ;;  %v7513_v11 = vld [vmem:[%s15783_s3 + $0x828] sm:$0xff]  ;;  %v7511_v52 = vld [vmem:[%s15783_s3 + $0x818] sm:$0xff]  ;;  %v8608_v9 = vpack.c.bf16 %v3737_v33, %v3733_v51  ;;  %v3589_v51 = vmax.f32 %v3565_v27, 0.0 }
 0x2e1   : > { %v3518_v16 = vmax.f32 %v3143_v47, %v3149_v53  ;;  %3976 = vmatprep.mubr.f32.mxu0 %v12602_v43  ;;  %4089 = vmatprep.mubr.f32.mxu1 %v12602_v43  ;;  %v8672_v29 = vpack.c.bf16 %v3739_v0, %v3735_v12  ;;  %v8738_v13 = vpack.c.bf16 %v7515_v24, %v7511_v52  ;;  %v7519_v59 = vld [vmem:[%s15783_s3 + $0x858] sm:$0xff]  ;;  %v7516_v0 = vld [vmem:[%s15783_s3 + $0x840] sm:$0xff]  ;;  %v7522_v52 = vld [vmem:[%s15783_s3 + $0x870] sm:$0xff] }
 0x2e2   : > { %v12635_v47 = vmax.f32 %v3517_v4, %v3519_v21  ;;  %3977 = vmatmul.mubr.f32.gmra.mrb[68].mxu0 %v12610_v57  ;;  %4090 = vmatmul.mubr.f32.gmra.mrb[62].mxu1 %v12610_v57  ;;  %v8674_v21 = vpack.c.bf16 %v7513_v11, %v7509_v19  ;;  %v8676_v53 = vpack.c.bf16 %v7512_v2, %v7508_v41  ;;  %v7520_v19 = vld [vmem:[%s15783_s3 + $0x860] sm:$0xff]  ;;  %v7518_v11 = vld [vmem:[%s15783_s3 + $0x850] sm:$0xff]  ;;  %v7525_v24 = vld [vmem:[%s15783_s3 + $0x888] sm:$0xff] }
 0x2e3   : > { %v12642_v3 = vmax.f32 %v3518_v16, %v3520_v44  ;;  %8605 = vmatpush1.bf16.msra.mxu0 %v8604_v34  ;;  %8669 = vmatpush1.bf16.msra.mxu1 %v8668_v8  ;;  %v3153_v55 = vpop.f32.mrb[40].mxu0  ;;  %v7517_v44 = vld [vmem:[%s15783_s3 + $0x848] sm:$0xff]  ;;  %v7523_v34 = vld [vmem:[%s15783_s3 + $0x878] sm:$0xff]  ;;  %v8740_v12 = vpack.c.bf16 %v7514_v48, %v7510_v30  ;;  %v8680_v27 = vpack.c.bf16 %v7520_v19, %v7516_v0  ;;  %v7538_v0 = vld [vmem:[%s15783_s3 + $0x8f0] sm:$0xff] }
 0x2e4   : > { %4160 = vmatprep.mubr.f32.mxu0 %v3590_v46  ;;  %4273 = vmatprep.mubr.f32.mxu1 %v3590_v46  ;;  %v3155_v1 = vpop.f32.mrb[41].mxu0  ;;  %v7533_v41 = vld [vmem:[%s15783_s3 + $0x8c8] sm:$0xff]  ;;  %v7535_v30 = vld [vmem:[%s15783_s3 + $0x8d8] sm:$0xff] }
 0x2e5   : > { %8607 = vmatprep.subr.bf16.mxu0 %v8606_v14  ;;  %8671 = vmatprep.subr.bf16.mxu1 %v8670_v32  ;;  %v8678_v14 = vpack.c.bf16 %v7521_v25, %v7517_v44  ;;  %v8742_v32 = vpack.c.bf16 %v7523_v34, %v7519_v59  ;;  %v7537_v2 = vld [vmem:[%s15783_s3 + $0x8e8] sm:$0xff]  ;;  %v7539_v48 = vld [vmem:[%s15783_s3 + $0x8f8] sm:$0xff] }
 0x2e6   : > { %v7541_v19 = vld [vmem:[%s15783_s3 + $0x908] sm:$0xff] }
 0x2e7   : > { %8609 = vmatpush1.bf16.msra.mxu0 %v8608_v9  ;;  %8673 = vmatpush1.bf16.msra.mxu1 %v8672_v29  ;;  %v3159_v8 = vpop.f32.mrb[42].mxu0  ;;  %v7527_v9 = vld [vmem:[%s15783_s3 + $0x898] sm:$0xff] }
 0x2e8   : > { %v3521_v33 = vmax.f32 %v3153_v55, %v3159_v8  ;;  %v3161_v4 = vpop.f32.mrb[43].mxu0  ;;  %8675 = vmatprep.subr.bf16.mxu0 %v8674_v21  ;;  %8739 = vmatprep.subr.bf16.mxu1 %v8738_v13  ;;  %v7529_v55 = vld [vmem:[%s15783_s3 + $0x8a8] sm:$0xff]  ;;  %v7531_v29 = vld [vmem:[%s15783_s3 + $0x8b8] sm:$0xff]  ;;  %v7524_v21 = vld [vmem:[%s15783_s3 + $0x880] sm:$0xff] }
 0x2e9   : > { %v3522_v16 = vmax.f32 %v3155_v1, %v3161_v4  ;;  %v8744_v1 = vpack.c.bf16 %v7522_v52, %v7518_v11  ;;  %v8682_v17 = vpack.c.bf16 %v7529_v55, %v7525_v24  ;;  %v7530_v13 = vld [vmem:[%s15783_s3 + $0x8b0] sm:$0xff]  ;;  %v8684_v59 = vpack.c.bf16 %v7528_v50, %v7524_v21  ;;  %v7532_v8 = vld [vmem:[%s15783_s3 + $0x8c0] sm:$0xff]  ;;  %v7547_v11 = vld [vmem:[%s15783_s3 + $0x938] sm:$0xff] }
 0x2ea   : > { %v12688_v46 = vmax.f32 %v3521_v33, %v3523_v61  ;;  %4161 = vmatmul.mubr.f32.vlgmr.msra.gmra.mrb[54].mxu0 %v3589_v51  ;;  %4274 = vmatmul.mubr.f32.vlgmr.msra.gmra.mrb[48].mxu1 %v3589_v51  ;;  %v7536_v51 = vld [vmem:[%s15783_s3 + $0x8e0] sm:$0xff]  ;;  %v8686_v4 = vpack.c.bf16 %v7537_v2, %v7533_v41  ;;  %v7550_v41 = vld [vmem:[%s15783_s3 + $0x950] sm:$0xff] }
 0x2eb   : > { %v12702_v36 = vmax.f32 %v3522_v16, %v3524_v28  ;;  %4166 = vmatprep.mubr.f32.mxu0 %v12072_v22  ;;  %4279 = vmatprep.mubr.f32.mxu1 %v12072_v22  ;;  %v3165_v40 = vpop.f32.mrb[44].mxu0  ;;  %v8746_v28 = vpack.c.bf16 %v7531_v29, %v7527_v9  ;;  %v7526_v22 = vld [vmem:[%s15783_s3 + $0x890] sm:$0xff]  ;;  %v7540_v24 = vld [vmem:[%s15783_s3 + $0x900] sm:$0xff] }
 0x2ec   : > { %8677 = vmatpush1.bf16.msra.mxu0 %v8676_v53  ;;  %8741 = vmatpush1.bf16.msra.mxu1 %v8740_v12  ;;  %v3167_v61 = vpop.f32.mrb[45].mxu0  ;;  %v8748_v34 = vpack.c.bf16 %v7530_v13, %v7526_v22  ;;  %v8750_v53 = vpack.c.bf16 %v7539_v48, %v7535_v30  ;;  %v7534_v12 = vld [vmem:[%s15783_s3 + $0x8d0] sm:$0xff]  ;;  %v7544_v55 = vld [vmem:[%s15783_s3 + $0x920] sm:$0xff]  ;;  %v7557_v30 = vld [vmem:[%s15783_s3 + $0x988] sm:$0xff] }
 0x2ed   : > { %8679 = vmatprep.subr.bf16.mxu0 %v8678_v14  ;;  %8743 = vmatprep.subr.bf16.mxu1 %v8742_v32  ;;  %v7545_v14 = vld [vmem:[%s15783_s3 + $0x928] sm:$0xff]  ;;  %v7543_v32 = vld [vmem:[%s15783_s3 + $0x918] sm:$0xff]  ;;  %v8752_v52 = vpack.c.bf16 %v7538_v0, %v7534_v12  ;;  %v7542_v9 = vld [vmem:[%s15783_s3 + $0x910] sm:$0xff]  ;;  %v8692_v21 = vpack.c.bf16 %v7544_v55, %v7540_v24 }
 0x2ee   : > { %4167 = vmatmul.mubr.f32.gmra.mrb[56].mxu0 %v12080_v6  ;;  %4280 = vmatmul.mubr.f32.gmra.mrb[50].mxu1 %v12080_v6  ;;  %v8690_v18 = vpack.c.bf16 %v7545_v14, %v7541_v19  ;;  %v8754_v20 = vpack.c.bf16 %v7547_v11, %v7543_v32  ;;  %v7546_v29 = vld [vmem:[%s15783_s3 + $0x930] sm:$0xff]  ;;  %v7561_v48 = vld [vmem:[%s15783_s3 + $0x9a8] sm:$0xff]  ;;  %v7567_v19 = vld [vmem:[%s15783_s3 + $0x9d8] sm:$0xff] }
 0x2ef   : > { %4172 = vmatprep.mubr.f32.mxu0 %v12148_v23  ;;  %4285 = vmatprep.mubr.f32.mxu1 %v12148_v23  ;;  %v3171_v44 = vpop.f32.mrb[46].mxu0  ;;  %v8756_v50 = vpack.c.bf16 %v7546_v29, %v7542_v9  ;;  %v7554_v2 = vld [vmem:[%s15783_s3 + $0x970] sm:$0xff]  ;;  %v7565_v12 = vld [vmem:[%s15783_s3 + $0x9c8] sm:$0xff]  ;;  %v7571_v14 = vld [vmem:[%s15783_s3 + $0x9f8] sm:$0xff] }
 0x2f0   : > { %8681 = vmatpush1.bf16.msra.mxu0 %v8680_v27  ;;  %8745 = vmatpush1.bf16.msra.mxu1 %v8744_v1  ;;  %v3525_v6 = vmax.f32 %v3165_v40, %v3171_v44  ;;  %v3173_v25 = vpop.f32.mrb[47].mxu0  ;;  %v7549_v40 = vld [vmem:[%s15783_s3 + $0x948] sm:$0xff]  ;;  %v7551_v27 = vld [vmem:[%s15783_s3 + $0x958] sm:$0xff]  ;;  %v8766_v24 = vpack.c.bf16 %v7571_v14, %v7567_v19  ;;  %v7566_v55 = vld [vmem:[%s15783_s3 + $0x9d0] sm:$0xff] }
 0x2f1   : > { %v3526_v33 = vmax.f32 %v3167_v61, %v3173_v25  ;;  %8683 = vmatprep.subr.bf16.mxu0 %v8682_v17  ;;  %8747 = vmatprep.subr.bf16.mxu1 %v8746_v28  ;;  %v7553_v61 = vld [vmem:[%s15783_s3 + $0x968] sm:$0xff]  ;;  %v7555_v1 = vld [vmem:[%s15783_s3 + $0x978] sm:$0xff]  ;;  %v7548_v17 = vld [vmem:[%s15783_s3 + $0x940] sm:$0xff] }
 0x2f2   : > { %v12752_v16 = vmax.f32 %v3525_v6, %v3527_v56  ;;  %4173 = vmatmul.mubr.f32.gmra.mrb[58].mxu0 %v12156_v38  ;;  %4286 = vmatmul.mubr.f32.gmra.mrb[52].mxu1 %v12156_v38  ;;  %v8688_v56 = vpack.c.bf16 %v7536_v51, %v7532_v8  ;;  %v7552_v28 = vld [vmem:[%s15783_s3 + $0x960] sm:$0xff]  ;;  %v8694_v22 = vpack.c.bf16 %v7553_v61, %v7549_v40  ;;  %v7559_v44 = vld [vmem:[%s15783_s3 + $0x998] sm:$0xff]  ;;  %v7569_v0 = vld [vmem:[%s15783_s3 + $0x9e8] sm:$0xff] }
 0x2f3   : > { %v12768_v7 = vmax.f32 %v3526_v33, %v15796_v35  ;;  %4178 = vmatprep.mubr.f32.mxu0 %v12224_v26  ;;  %4291 = vmatprep.mubr.f32.mxu1 %v12224_v26  ;;  %v8758_v13 = vpack.c.bf16 %v7555_v1, %v7551_v27  ;;  %v7563_v6 = vld [vmem:[%s15783_s3 + $0x9b8] sm:$0xff]  ;;  %v8696_v25 = vpack.c.bf16 %v7552_v28, %v7548_v17  ;;  %v7560_v8 = vld [vmem:[%s15783_s3 + $0x9a0] sm:$0xff]  ;;  %v7577_v9 = vld [vmem:[%s15783_s3 + $0xa28] sm:$0xff] }
 0x2f4   : > { %8685 = vmatpush1.bf16.msra.mxu0 %v8684_v59  ;;  %8749 = vmatpush1.bf16.msra.mxu1 %v8748_v34  ;;  %v8760_v59 = vpack.c.bf16 %v7554_v2, %v7550_v41  ;;  %v7556_v34 = vld [vmem:[%s15783_s3 + $0x980] sm:$0xff]  ;;  %v8698_v51 = vpack.c.bf16 %v7561_v48, %v7557_v30  ;;  %v8762_v33 = vpack.c.bf16 %v7563_v6, %v7559_v44  ;;  %v7575_v29 = vld [vmem:[%s15783_s3 + $0xa18] sm:$0xff]  ;;  %v7574_v28 = vld [vmem:[%s15783_s3 + $0xa10] sm:$0xff] }
 0x2f5   : > { %8687 = vmatprep.subr.bf16.mxu0 %v8686_v4  ;;  %8751 = vmatprep.subr.bf16.mxu1 %v8750_v53  ;;  %v7558_v4 = vld [vmem:[%s15783_s3 + $0x990] sm:$0xff]  ;;  %v8700_v32 = vpack.c.bf16 %v7560_v8, %v7556_v34  ;;  %v7564_v35 = vld [vmem:[%s15783_s3 + $0x9c0] sm:$0xff]  ;;  %v7579_v40 = vld [vmem:[%s15783_s3 + $0xa38] sm:$0xff] }
 0x2f6   : > { %4179 = vmatmul.mubr.f32.gmra.mrb[60].mxu0 %v12232_v39  ;;  %4292 = vmatmul.mubr.f32.gmra.mrb[54].mxu1 %v12232_v39  ;;  %v7562_v53 = vld [vmem:[%s15783_s3 + $0x9b0] sm:$0xff]  ;;  %v7572_v1 = vld [vmem:[%s15783_s3 + $0xa00] sm:$0xff]  ;;  %v8770_v17 = vpack.c.bf16 %v7579_v40, %v7575_v29  ;;  %v7585_v41 = vld [vmem:[%s15783_s3 + $0xa68] sm:$0xff] }
 0x2f7   : > { %4184 = vmatprep.mubr.f32.mxu0 %v12300_v45  ;;  %4297 = vmatprep.mubr.f32.mxu1 %v12300_v45  ;;  %v8764_v11 = vpack.c.bf16 %v7562_v53, %v7558_v4  ;;  %v7583_v2 = vld [vmem:[%s15783_s3 + $0xa58] sm:$0xff]  ;;  %v7580_v6 = vld [vmem:[%s15783_s3 + $0xa40] sm:$0xff]  ;;  %v7586_v8 = vld [vmem:[%s15783_s3 + $0xa70] sm:$0xff] }
 0x2f8   : > { %8689 = vmatpush1.bf16.msra.mxu0 %v8688_v56  ;;  %8753 = vmatpush1.bf16.msra.mxu1 %v8752_v52  ;;  %v7568_v56 = vld [vmem:[%s15783_s3 + $0x9e0] sm:$0xff]  ;;  %v8702_v52 = vpack.c.bf16 %v7569_v0, %v7565_v12  ;;  %v7587_v30 = vld [vmem:[%s15783_s3 + $0xa78] sm:$0xff] }
 0x2f9   : > { %8691 = vmatprep.subr.bf16.mxu0 %v8690_v18  ;;  %8755 = vmatprep.subr.bf16.mxu1 %v8754_v20  ;;  %v7570_v18 = vld [vmem:[%s15783_s3 + $0x9f0] sm:$0xff]  ;;  %v7573_v20 = vld [vmem:[%s15783_s3 + $0xa08] sm:$0xff]  ;;  %v8704_v61 = vpack.c.bf16 %v7568_v56, %v7564_v35  ;;  %v8774_v34 = vpack.c.bf16 %v7587_v30, %v7583_v2  ;;  %v7591_v4 = vld [vmem:[%s15783_s3 + $0xa98] sm:$0xff] }
 0x2fa   : > { %4185 = vmatmul.mubr.f32.gmra.mrb[62].mxu0 %v12308_v54  ;;  %4298 = vmatmul.mubr.f32.gmra.mrb[56].mxu1 %v12308_v54  ;;  %v8768_v27 = vpack.c.bf16 %v7570_v18, %v7566_v55  ;;  %v7595_v53 = vld [vmem:[%s15783_s3 + $0xab8] sm:$0xff]  ;;  %v7588_v19 = vld [vmem:[%s15783_s3 + $0xa80] sm:$0xff]  ;;  %v7590_v35 = vld [vmem:[%s15783_s3 + $0xa90] sm:$0xff] }
 0x2fb   : > { %4190 = vmatprep.mubr.f32.mxu0 %v12376_v37  ;;  %4303 = vmatprep.mubr.f32.mxu1 %v12376_v37  ;;  %v7592_v14 = vld [vmem:[%s15783_s3 + $0xaa0] sm:$0xff]  ;;  %v7594_v56 = vld [vmem:[%s15783_s3 + $0xab0] sm:$0xff]  ;;  %v7599_v55 = vld [vmem:[%s15783_s3 + $0xad8] sm:$0xff] }
 0x2fc   : > { %8693 = vmatpush1.bf16.msra.mxu0 %v8692_v21  ;;  %8757 = vmatpush1.bf16.msra.mxu1 %v8756_v50  ;;  %v7576_v21 = vld [vmem:[%s15783_s3 + $0xa20] sm:$0xff]  ;;  %v8706_v50 = vpack.c.bf16 %v7577_v9, %v7573_v20  ;;  %v7603_v18 = vld [vmem:[%s15783_s3 + $0xaf8] sm:$0xff]  ;;  %v8716_v20 = vpack.c.bf16 %v7592_v14, %v7588_v19  ;;  %v8780_v9 = vpack.c.bf16 %v7594_v56, %v7590_v35  ;;  %v7614_v19 = vld [vmem:[%s15783_s3 + $0xb50] sm:$0xff] }
 0x2fd   : > { %8695 = vmatprep.subr.bf16.mxu0 %v8694_v22  ;;  %8759 = vmatprep.subr.bf16.mxu1 %v8758_v13  ;;  %v7578_v22 = vld [vmem:[%s15783_s3 + $0xa30] sm:$0xff]  ;;  %v7581_v13 = vld [vmem:[%s15783_s3 + $0xa48] sm:$0xff]  ;;  %v8708_v48 = vpack.c.bf16 %v7576_v21, %v7572_v1  ;;  %v7596_v29 = vld [vmem:[%s15783_s3 + $0xac0] sm:$0xff] }
 0x2fe   : > { %4191 = vmatmul.mubr.f32.gmra.mrb[64].mxu0 %v12384_v15  ;;  %4304 = vmatmul.mubr.f32.gmra.mrb[58].mxu1 %v12384_v15  ;;  %v8772_v44 = vpack.c.bf16 %v7578_v22, %v7574_v28  ;;  %v7600_v40 = vld [vmem:[%s15783_s3 + $0xae0] sm:$0xff]  ;;  %v7598_v1 = vld [vmem:[%s15783_s3 + $0xad0] sm:$0xff]  ;;  %v7607_v28 = vld [vmem:[%s15783_s3 + $0xb18] sm:$0xff] }
 0x2ff   : > { %4196 = vmatprep.mubr.f32.mxu0 %v12452_v60  ;;  %4309 = vmatprep.mubr.f32.mxu1 %v12452_v60  ;;  %v7602_v21 = vld [vmem:[%s15783_s3 + $0xaf0] sm:$0xff]  ;;  %v7611_v22 = vld [vmem:[%s15783_s3 + $0xb38] sm:$0xff]  ;;  %v7604_v2 = vld [vmem:[%s15783_s3 + $0xb00] sm:$0xff] }
 0x300   : > { %8697 = vmatpush1.bf16.msra.mxu0 %v8696_v25  ;;  %8761 = vmatpush1.bf16.msra.mxu1 %v8760_v59  ;;  %v7584_v25 = vld [vmem:[%s15783_s3 + $0xa60] sm:$0xff]  ;;  %v8710_v59 = vpack.c.bf16 %v7585_v41, %v7581_v13  ;;  %v8720_v13 = vpack.c.bf16 %v7600_v40, %v7596_v29  ;;  %v8784_v41 = vpack.c.bf16 %v7602_v21, %v7598_v1  ;;  %v7618_v14 = vld [vmem:[%s15783_s3 + $0xb70] sm:$0xff]  ;;  %v7623_v35 = vld [vmem:[%s15783_s3 + $0xb98] sm:$0xff] }
 0x301   : > { %8699 = vmatprep.subr.bf16.mxu0 %v8698_v51  ;;  %8763 = vmatprep.subr.bf16.mxu1 %v8762_v33  ;;  %v7589_v51 = vld [vmem:[%s15783_s3 + $0xa88] sm:$0xff]  ;;  %v8712_v12 = vpack.c.bf16 %v7584_v25, %v7580_v6  ;;  %v7608_v30 = vld [vmem:[%s15783_s3 + $0xb20] sm:$0xff]  ;;  %v7606_v6 = vld [vmem:[%s15783_s3 + $0xb10] sm:$0xff] }
 0x302   : > { %4197 = vmatmul.mubr.f32.gmra.mrb[66].mxu0 %v12460_v58  ;;  %4310 = vmatmul.mubr.f32.gmra.mrb[60].mxu1 %v12460_v58  ;;  %v7593_v33 = vld [vmem:[%s15783_s3 + $0xaa8] sm:$0xff]  ;;  %v7610_v25 = vld [vmem:[%s15783_s3 + $0xb30] sm:$0xff]  ;;  %v7627_v56 = vld [vmem:[%s15783_s3 + $0xbb8] sm:$0xff] }
 0x303   : > { %4202 = vmatprep.mubr.f32.mxu0 %v12528_v42  ;;  %4315 = vmatprep.mubr.f32.mxu1 %v12528_v42  ;;  %v7622_v29 = vld [vmem:[%s15783_s3 + $0xb90] sm:$0xff]  ;;  %v7631_v1 = vld [vmem:[%s15783_s3 + $0xbd8] sm:$0xff] }
 0x304   : > { %8701 = vmatpush1.bf16.msra.mxu0 %v8700_v32  ;;  %8765 = vmatpush1.bf16.msra.mxu1 %v8764_v11  ;;  %v8714_v32 = vpack.c.bf16 %v7593_v33, %v7589_v51  ;;  %v8778_v11 = vpack.c.bf16 %v7595_v53, %v7591_v4  ;;  %v8724_v51 = vpack.c.bf16 %v7608_v30, %v7604_v2  ;;  %v7612_v4 = vld [vmem:[%s15783_s3 + $0xb40] sm:$0xff]  ;;  %v7626_v40 = vld [vmem:[%s15783_s3 + $0xbb0] sm:$0xff]  ;;  %v7635_v21 = vld [vmem:[%s15783_s3 + $0xbf8] sm:$0xff] }
 0x305   : > { %8703 = vmatprep.subr.bf16.mxu0 %v8702_v52  ;;  %8767 = vmatprep.subr.bf16.mxu1 %v8766_v24  ;;  %v7597_v52 = vld [vmem:[%s15783_s3 + $0xac8] sm:$0xff]  ;;  %v8788_v33 = vpack.c.bf16 %v7610_v25, %v7606_v6  ;;  %v7616_v53 = vld [vmem:[%s15783_s3 + $0xb60] sm:$0xff]  ;;  %v7630_v2 = vld [vmem:[%s15783_s3 + $0xbd0] sm:$0xff] }
 0x306   : > { %4203 = vmatmul.mubr.f32.gmra.mrb[68].mxu0 %v12536_v63  ;;  %4316 = vmatmul.mubr.f32.gmra.mrb[62].mxu1 %v12536_v63  ;;  %v7601_v24 = vld [vmem:[%s15783_s3 + $0xae8] sm:$0xff]  ;;  %v7634_v30 = vld [vmem:[%s15783_s3 + $0xbf0] sm:$0xff]  ;;  %v7639_v6 = vld [vmem:[%s15783_s3 + $0xc18] sm:$0xff] }
 0x307   : > { %4515 = vmatprep.mubr.f32.mxu0 %v12148_v23  ;;  %4628 = vmatprep.mubr.f32.mxu1 %v12148_v23  ;;  %v7582_v23 = vld [vmem:[%s15783_s3 + $0xa50] sm:$0xff]  ;;  %v7643_v25 = vld [vmem:[%s15783_s3 + $0xc38] sm:$0xff] }
 0x308   : > { %8705 = vmatpush1.bf16.msra.mxu0 %v8704_v61  ;;  %8769 = vmatpush1.bf16.msra.mxu1 %v8768_v27  ;;  %v8776_v0 = vpack.c.bf16 %v7586_v8, %v7582_v23  ;;  %v8718_v61 = vpack.c.bf16 %v7601_v24, %v7597_v52  ;;  %v8782_v27 = vpack.c.bf16 %v7603_v18, %v7599_v55  ;;  %v7615_v23 = vld [vmem:[%s15783_s3 + $0xb58] sm:$0xff]  ;;  %v7620_v55 = vld [vmem:[%s15783_s3 + $0xb80] sm:$0xff] }
 0x309   : > { %8707 = vmatprep.subr.bf16.mxu0 %v8706_v50  ;;  %8771 = vmatprep.subr.bf16.mxu1 %v8770_v17  ;;  %v7605_v50 = vld [vmem:[%s15783_s3 + $0xb08] sm:$0xff]  ;;  %v7619_v8 = vld [vmem:[%s15783_s3 + $0xb78] sm:$0xff]  ;;  %v8728_v52 = vpack.c.bf16 %v7616_v53, %v7612_v4  ;;  %v8792_v24 = vpack.c.bf16 %v7618_v14, %v7614_v19  ;;  %v7624_v18 = vld [vmem:[%s15783_s3 + $0xba0] sm:$0xff] }
 0x30a   : > { %v7609_v17 = vld [vmem:[%s15783_s3 + $0xb28] sm:$0xff]  ;;  %v7638_v4 = vld [vmem:[%s15783_s3 + $0xc10] sm:$0xff]  ;;  %v7647_v19 = vld [vmem:[%s15783_s3 + $0xc58] sm:$0xff] }
 0x30b   : > { %v7642_v53 = vld [vmem:[%s15783_s3 + $0xc30] sm:$0xff]  ;;  %v7651_v14 = vld [vmem:[%s15783_s3 + $0xc78] sm:$0xff] }
 0x30c   : > { %8709 = vmatpush1.bf16.msra.mxu0 %v8708_v48  ;;  %8773 = vmatpush1.bf16.msra.mxu1 %v8772_v44  ;;  %v8722_v48 = vpack.c.bf16 %v7609_v17, %v7605_v50  ;;  %v8786_v44 = vpack.c.bf16 %v7611_v22, %v7607_v28  ;;  %v8732_v50 = vpack.c.bf16 %v7624_v18, %v7620_v55  ;;  %v7628_v28 = vld [vmem:[%s15783_s3 + $0xbc0] sm:$0xff]  ;;  %v7646_v55 = vld [vmem:[%s15783_s3 + $0xc50] sm:$0xff] }
 0x30d   : > { %8711 = vmatprep.subr.bf16.mxu0 %v8710_v59  ;;  %8775 = vmatprep.subr.bf16.mxu1 %v8774_v34  ;;  %v7613_v59 = vld [vmem:[%s15783_s3 + $0xb48] sm:$0xff]  ;;  %v8796_v17 = vpack.c.bf16 %v7626_v40, %v7622_v29  ;;  %v7632_v22 = vld [vmem:[%s15783_s3 + $0xbe0] sm:$0xff]  ;;  %v7650_v18 = vld [vmem:[%s15783_s3 + $0xc70] sm:$0xff] }
 0x30e   : > { %v7617_v34 = vld [vmem:[%s15783_s3 + $0xb68] sm:$0xff]  ;;  %v7655_v29 = vld [vmem:[%s15783_s3 + $0xc98] sm:$0xff] }
 0x30f   : > { %v7659_v40 = vld [vmem:[%s15783_s3 + $0xcb8] sm:$0xff] }
 0x310   : > { %8713 = vmatpush1.bf16.msra.mxu0 %v8712_v12  ;;  %8777 = vmatpush1.bf16.msra.mxu1 %v8776_v0  ;;  %v8726_v12 = vpack.c.bf16 %v7617_v34, %v7613_v59  ;;  %v8790_v0 = vpack.c.bf16 %v7619_v8, %v7615_v23  ;;  %v8736_v59 = vpack.c.bf16 %v7632_v22, %v7628_v28  ;;  %v7658_v28 = vld [vmem:[%s15783_s3 + $0xcb0] sm:$0xff]  ;;  %v7661_v22 = vld [vmem:[%s15783_s3 + $0xcc8] sm:$0xff] }
 0x311   : > { %8715 = vmatprep.subr.bf16.mxu0 %v8714_v32  ;;  %8779 = vmatprep.subr.bf16.mxu1 %v8778_v11  ;;  %v7621_v32 = vld [vmem:[%s15783_s3 + $0xb88] sm:$0xff]  ;;  %v8800_v34 = vpack.c.bf16 %v7634_v30, %v7630_v2  ;;  %v8866_v8 = vpack.c.bf16 %v7643_v25, %v7639_v6  ;;  %v7667_v2 = vld [vmem:[%s15783_s3 + $0xcf8] sm:$0xff]  ;;  %v7664_v6 = vld [vmem:[%s15783_s3 + $0xce0] sm:$0xff] }
 0x312   : > { %v7625_v11 = vld [vmem:[%s15783_s3 + $0xba8] sm:$0xff] }
 0x314   : > { %8717 = vmatpush1.bf16.msra.mxu0 %v8716_v20  ;;  %8781 = vmatpush1.bf16.msra.mxu1 %v8780_v9  ;;  %v8730_v20 = vpack.c.bf16 %v7625_v11, %v7621_v32  ;;  %v8794_v9 = vpack.c.bf16 %v7627_v56, %v7623_v35  ;;  %v8868_v11 = vpack.c.bf16 %v7642_v53, %v7638_v4  ;;  %v7644_v35 = vld [vmem:[%s15783_s3 + $0xc40] sm:$0xff]  ;;  %v7675_v4 = vld [vmem:[%s15783_s3 + $0xd38] sm:$0xff] }
 0x315   : > { %8719 = vmatprep.subr.bf16.mxu0 %v8718_v61  ;;  %8783 = vmatprep.subr.bf16.mxu1 %v8782_v27  ;;  %v7629_v61 = vld [vmem:[%s15783_s3 + $0xbc8] sm:$0xff]  ;;  %v7648_v56 = vld [vmem:[%s15783_s3 + $0xc60] sm:$0xff] }
 0x316   : > { %v7633_v27 = vld [vmem:[%s15783_s3 + $0xbe8] sm:$0xff] }
 0x318   : > { %8721 = vmatpush1.bf16.msra.mxu0 %v8720_v13  ;;  %8785 = vmatpush1.bf16.msra.mxu1 %v8784_v41  ;;  %v8734_v13 = vpack.c.bf16 %v7633_v27, %v7629_v61  ;;  %v8798_v41 = vpack.c.bf16 %v7635_v21, %v7631_v1  ;;  %v8808_v61 = vpack.c.bf16 %v7648_v56, %v7644_v35  ;;  %v7652_v27 = vld [vmem:[%s15783_s3 + $0xc80] sm:$0xff]  ;;  %v7674_v35 = vld [vmem:[%s15783_s3 + $0xd30] sm:$0xff]  ;;  %v7677_v56 = vld [vmem:[%s15783_s3 + $0xd48] sm:$0xff] }
 0x319   : > { %8723 = vmatprep.subr.bf16.mxu0 %v8722_v48  ;;  %8787 = vmatprep.subr.bf16.mxu1 %v8786_v44  ;;  %v7637_v48 = vld [vmem:[%s15783_s3 + $0xc08] sm:$0xff]  ;;  %v7656_v1 = vld [vmem:[%s15783_s3 + $0xca0] sm:$0xff] }
 0x31a   : > { %v7641_v44 = vld [vmem:[%s15783_s3 + $0xc28] sm:$0xff]  ;;  %v8812_v30 = vpack.c.bf16 %v7656_v1, %v7652_v27  ;;  %v7682_v27 = vld [vmem:[%s15783_s3 + $0xd70] sm:$0xff] }
 0x31b   : > { %v8802_v23 = vpack.c.bf16 %v7641_v44, %v7637_v48  ;;  %v7660_v44 = vld [vmem:[%s15783_s3 + $0xcc0] sm:$0xff]  ;;  %v7685_v1 = vld [vmem:[%s15783_s3 + $0xd88] sm:$0xff] }
 0x31c   : > { %8725 = vmatpush1.bf16.msra.mxu0 %v8724_v51  ;;  %8789 = vmatpush1.bf16.msra.mxu1 %v8788_v33  ;;  %v7636_v51 = vld [vmem:[%s15783_s3 + $0xc00] sm:$0xff]  ;;  %v8816_v53 = vpack.c.bf16 %v7664_v6, %v7660_v44  ;;  %v7686_v44 = vld [vmem:[%s15783_s3 + $0xd90] sm:$0xff] }
 0x31d   : > { %8727 = vmatprep.subr.bf16.mxu0 %v8726_v12  ;;  %8791 = vmatprep.subr.bf16.mxu1 %v8790_v0  ;;  %v7640_v33 = vld [vmem:[%s15783_s3 + $0xc20] sm:$0xff]  ;;  %v7645_v12 = vld [vmem:[%s15783_s3 + $0xc48] sm:$0xff]  ;;  %v7690_v6 = vld [vmem:[%s15783_s3 + $0xdb0] sm:$0xff] }
 0x31e   : > { %v7649_v0 = vld [vmem:[%s15783_s3 + $0xc68] sm:$0xff]  ;;  %v8804_v32 = vpack.c.bf16 %v7640_v33, %v7636_v51  ;;  %v7671_v33 = vld [vmem:[%s15783_s3 + $0xd18] sm:$0xff] }
 0x31f   : > { %v7673_v51 = vld [vmem:[%s15783_s3 + $0xd28] sm:$0xff] }
 0x320   : > { %8729 = vmatpush1.bf16.msra.mxu0 %v8728_v52  ;;  %8793 = vmatpush1.bf16.msra.mxu1 %v8792_v24  ;;  %v8806_v52 = vpack.c.bf16 %v7649_v0, %v7645_v12  ;;  %v8870_v24 = vpack.c.bf16 %v7651_v14, %v7647_v19  ;;  %v7668_v0 = vld [vmem:[%s15783_s3 + $0xd00] sm:$0xff] }
 0x321   : > { %8731 = vmatprep.subr.bf16.mxu0 %v8730_v20  ;;  %8795 = vmatprep.subr.bf16.mxu1 %v8794_v9  ;;  %v7653_v20 = vld [vmem:[%s15783_s3 + $0xc88] sm:$0xff]  ;;  %v7672_v19 = vld [vmem:[%s15783_s3 + $0xd20] sm:$0xff] }
 0x322   : > { %v7657_v9 = vld [vmem:[%s15783_s3 + $0xca8] sm:$0xff] }
 0x323   : > { %v8810_v21 = vpack.c.bf16 %v7657_v9, %v7653_v20  ;;  %v7676_v9 = vld [vmem:[%s15783_s3 + $0xd40] sm:$0xff] }
 0x324   : > { %8733 = vmatpush1.bf16.msra.mxu0 %v8732_v50  ;;  %8797 = vmatpush1.bf16.msra.mxu1 %v8796_v17  ;;  %v8874_v50 = vpack.c.bf16 %v7659_v40, %v7655_v29  ;;  %v7654_v17 = vld [vmem:[%s15783_s3 + $0xc90] sm:$0xff]  ;;  %v7680_v29 = vld [vmem:[%s15783_s3 + $0xd60] sm:$0xff] }
 0x325   : > { %8735 = vmatprep.subr.bf16.mxu0 %v8734_v13  ;;  %8799 = vmatprep.subr.bf16.mxu1 %v8798_v41  ;;  %v7665_v13 = vld [vmem:[%s15783_s3 + $0xce8] sm:$0xff]  ;;  %v7663_v41 = vld [vmem:[%s15783_s3 + $0xcd8] sm:$0xff]  ;;  %v8876_v48 = vpack.c.bf16 %v7658_v28, %v7654_v17  ;;  %v8824_v28 = vpack.c.bf16 %v7680_v29, %v7676_v9  ;;  %v7702_v29 = vld [vmem:[%s15783_s3 + $0xe10] sm:$0xff] }
 0x326   : > { %v8814_v25 = vpack.c.bf16 %v7665_v13, %v7661_v22  ;;  %v7691_v17 = vld [vmem:[%s15783_s3 + $0xdb8] sm:$0xff]  ;;  %v7684_v13 = vld [vmem:[%s15783_s3 + $0xd80] sm:$0xff] }
 0x328   : > { %8737 = vmatpush1.bf16.msra.mxu0 %v8736_v59  ;;  %8801 = vmatpush1.bf16.msra.mxu1 %v8800_v34  ;;  %v8878_v59 = vpack.c.bf16 %v7667_v2, %v7663_v41  ;;  %v7662_v34 = vld [vmem:[%s15783_s3 + $0xcd0] sm:$0xff]  ;;  %v7688_v41 = vld [vmem:[%s15783_s3 + $0xda0] sm:$0xff]  ;;  %v3584_v2 = vadd.f32 %v12040_v10, %v12642_v3  ;;  %v7697_v3 = vld [vmem:[%s15783_s3 + $0xde8] sm:$0xff] }
 0x329   : > { %8803 = vmatprep.subr.bf16.mxu0 %v8802_v23  ;;  %8867 = vmatprep.subr.bf16.mxu1 %v8866_v8  ;;  %v7666_v23 = vld [vmem:[%s15783_s3 + $0xcf0] sm:$0xff]  ;;  %v7669_v8 = vld [vmem:[%s15783_s3 + $0xd08] sm:$0xff] }
 0x32a   : > { %v8880_v12 = vpack.c.bf16 %v7666_v23, %v7662_v34  ;;  %v8818_v14 = vpack.c.bf16 %v7673_v51, %v7669_v8  ;;  %v7699_v34 = vld [vmem:[%s15783_s3 + $0xdf8] sm:$0xff]  ;;  %v3583_v23 = vadd.f32 %v12035_v5, %v12635_v47  ;;  %v8828_v8 = vpack.c.bf16 %v7688_v41, %v7684_v13  ;;  %v7694_v47 = vld [vmem:[%s15783_s3 + $0xdd0] sm:$0xff] }
 0x32b   : > { %4516 = vmatmul.mubr.f32.vlgmr.msra.gmra.mrb[54].mxu0 %v12156_v38  ;;  %4629 = vmatmul.mubr.f32.vlgmr.msra.gmra.mrb[48].mxu1 %v12156_v38  ;;  %v8872_v38 = vpack.c.bf16 %v7650_v18, %v7646_v55  ;;  %v7683_v55 = vld [vmem:[%s15783_s3 + $0xd78] sm:$0xff]  ;;  %v8820_v18 = vpack.c.bf16 %v7672_v19, %v7668_v0  ;;  %v8892_v51 = vpack.c.bf16 %v7690_v6, %v7686_v44  ;;  %v7698_v19 = vld [vmem:[%s15783_s3 + $0xdf0] sm:$0xff] }
 0x32c   : > { %4521 = vmatprep.mubr.f32.mxu0 %v12224_v26  ;;  %4634 = vmatprep.mubr.f32.mxu1 %v12224_v26  ;;  %v7714_v41 = vld [vmem:[%s15783_s3 + $0xe70] sm:$0xff]  ;;  %v7723_v44 = vld [vmem:[%s15783_s3 + $0xeb8] sm:$0xff] }
 0x32d   : > { %8805 = vmatpush1.bf16.msra.mxu0 %v8804_v32  ;;  %8869 = vmatpush1.bf16.msra.mxu1 %v8868_v11  ;;  %v8882_v32 = vpack.c.bf16 %v7675_v4, %v7671_v33  ;;  %v7670_v11 = vld [vmem:[%s15783_s3 + $0xd10] sm:$0xff]  ;;  %v7692_v33 = vld [vmem:[%s15783_s3 + $0xdc0] sm:$0xff] }
 0x32e   : > { %8807 = vmatprep.subr.bf16.mxu0 %v8806_v52  ;;  %8871 = vmatprep.subr.bf16.mxu1 %v8870_v24  ;;  %v7681_v52 = vld [vmem:[%s15783_s3 + $0xd68] sm:$0xff]  ;;  %v7679_v24 = vld [vmem:[%s15783_s3 + $0xd58] sm:$0xff]  ;;  %v8884_v20 = vpack.c.bf16 %v7674_v35, %v7670_v11  ;;  %v7696_v4 = vld [vmem:[%s15783_s3 + $0xde0] sm:$0xff] }
 0x32f   : > { %4522 = vmatmul.mubr.f32.gmra.mrb[56].mxu0 %v12232_v39  ;;  %4635 = vmatmul.mubr.f32.gmra.mrb[50].mxu1 %v12232_v39  ;;  %v8822_v40 = vpack.c.bf16 %v7681_v52, %v7677_v56  ;;  %v7703_v11 = vld [vmem:[%s15783_s3 + $0xe18] sm:$0xff]  ;;  %v13306_v56 = vmax.f32 %v3583_v23, 0.0  ;;  %v8832_v52 = vpack.c.bf16 %v7696_v4, %v7692_v33  ;;  %v7725_v33 = vld [vmem:[%s15783_s3 + $0xec8] sm:$0xff] }
 0x330   : > { %4527 = vmatprep.mubr.f32.mxu0 %v12300_v45  ;;  %4640 = vmatprep.mubr.f32.mxu1 %v12300_v45  ;;  %v7707_v35 = vld [vmem:[%s15783_s3 + $0xe38] sm:$0xff]  ;;  %v7729_v4 = vld [vmem:[%s15783_s3 + $0xee8] sm:$0xff] }
 0x331   : > { %8809 = vmatpush1.bf16.msra.mxu0 %v8808_v61  ;;  %8873 = vmatpush1.bf16.msra.mxu1 %v8872_v38  ;;  %v8886_v61 = vpack.c.bf16 %v7683_v55, %v7679_v24  ;;  %v7678_v38 = vld [vmem:[%s15783_s3 + $0xd50] sm:$0xff]  ;;  %v8896_v24 = vpack.c.bf16 %v7698_v19, %v7694_v47  ;;  %v7700_v55 = vld [vmem:[%s15783_s3 + $0xe00] sm:$0xff]  ;;  %v8898_v9 = vpack.c.bf16 %v7707_v35, %v7703_v11 }
 0x332   : > { %8811 = vmatprep.subr.bf16.mxu0 %v8810_v21  ;;  %8875 = vmatprep.subr.bf16.mxu1 %v8874_v50  ;;  %v7689_v21 = vld [vmem:[%s15783_s3 + $0xda8] sm:$0xff]  ;;  %v7687_v50 = vld [vmem:[%s15783_s3 + $0xd98] sm:$0xff]  ;;  %v8888_v22 = vpack.c.bf16 %v7682_v27, %v7678_v38  ;;  %v8846_v11 = vpack.c.bf16 %v7729_v4, %v7725_v33  ;;  %v7748_v33 = vld [vmem:[%s15783_s3 + $0xf80] sm:$0xff] }
 0x333   : > { %4528 = vmatmul.mubr.f32.gmra.mrb[58].mxu0 %v12308_v54  ;;  %4641 = vmatmul.mubr.f32.gmra.mrb[52].mxu1 %v12308_v54  ;;  %v7713_v38 = vld [vmem:[%s15783_s3 + $0xe68] sm:$0xff]  ;;  %v7711_v27 = vld [vmem:[%s15783_s3 + $0xe58] sm:$0xff]  ;;  %v7752_v4 = vld [vmem:[%s15783_s3 + $0xfa0] sm:$0xff] }
 0x334   : > { %4533 = vmatprep.mubr.f32.mxu0 %v12376_v37  ;;  %4646 = vmatprep.mubr.f32.mxu1 %v12376_v37 }
 0x335   : > { %8813 = vmatpush1.bf16.msra.mxu0 %v8812_v30  ;;  %8877 = vmatpush1.bf16.msra.mxu1 %v8876_v48  ;;  %v8826_v30 = vpack.c.bf16 %v7689_v21, %v7685_v1  ;;  %v8890_v48 = vpack.c.bf16 %v7691_v17, %v7687_v50  ;;  %v7715_v1 = vld [vmem:[%s15783_s3 + $0xe78] sm:$0xff]  ;;  %v7708_v17 = vld [vmem:[%s15783_s3 + $0xe40] sm:$0xff] }
 0x336   : > { %8815 = vmatprep.subr.bf16.mxu0 %v8814_v25  ;;  %8879 = vmatprep.subr.bf16.mxu1 %v8878_v59  ;;  %v7693_v25 = vld [vmem:[%s15783_s3 + $0xdc8] sm:$0xff]  ;;  %v7695_v59 = vld [vmem:[%s15783_s3 + $0xdd8] sm:$0xff]  ;;  %v8902_v13 = vpack.c.bf16 %v7715_v1, %v7711_v27 }
 0x337   : > { %4534 = vmatmul.mubr.f32.gmra.mrb[60].mxu0 %v12384_v15  ;;  %4647 = vmatmul.mubr.f32.gmra.mrb[54].mxu1 %v12384_v15  ;;  %v8894_v0 = vpack.c.bf16 %v7699_v34, %v7695_v59  ;;  %v7720_v59 = vld [vmem:[%s15783_s3 + $0xea0] sm:$0xff] }
 0x338   : > { %4539 = vmatprep.mubr.f32.mxu0 %v12452_v60  ;;  %4652 = vmatprep.mubr.f32.mxu1 %v12452_v60 }
 0x339   : > { %8817 = vmatpush1.bf16.msra.mxu0 %v8816_v53  ;;  %8881 = vmatpush1.bf16.msra.mxu1 %v8880_v12  ;;  %v13282_v53 = vmax.f32 %v3584_v2, 0.0  ;;  %v8830_v12 = vpack.c.bf16 %v7697_v3, %v7693_v25  ;;  %v7717_v2 = vld [vmem:[%s15783_s3 + $0xe88] sm:$0xff]  ;;  %v7716_v3 = vld [vmem:[%s15783_s3 + $0xe80] sm:$0xff] }
 0x33a   : > { %8819 = vmatprep.subr.bf16.mxu0 %v8818_v14  ;;  %8883 = vmatprep.subr.bf16.mxu1 %v8882_v32  ;;  %v7701_v14 = vld [vmem:[%s15783_s3 + $0xe08] sm:$0xff]  ;;  %v8844_v47 = vpack.c.bf16 %v7720_v59, %v7716_v3 }
 0x33b   : > { %4540 = vmatmul.mubr.f32.gmra.mrb[62].mxu0 %v12460_v58  ;;  %4653 = vmatmul.mubr.f32.gmra.mrb[56].mxu1 %v12460_v58  ;;  %v7705_v32 = vld [vmem:[%s15783_s3 + $0xe28] sm:$0xff] }
 0x33c   : > { %4545 = vmatprep.mubr.f32.mxu0 %v12528_v42  ;;  %4658 = vmatprep.mubr.f32.mxu1 %v12528_v42  ;;  %v7749_v3 = vld [vmem:[%s15783_s3 + $0xf88] sm:$0xff] }
 0x33d   : > { %8821 = vmatpush1.bf16.msra.mxu0 %v8820_v18  ;;  %8885 = vmatpush1.bf16.msra.mxu1 %v8884_v20  ;;  %v7704_v18 = vld [vmem:[%s15783_s3 + $0xe20] sm:$0xff]  ;;  %v8834_v20 = vpack.c.bf16 %v7705_v32, %v7701_v14  ;;  %v7753_v59 = vld [vmem:[%s15783_s3 + $0xfa8] sm:$0xff] }
 0x33e   : > { %8823 = vmatprep.subr.bf16.mxu0 %v8822_v40  ;;  %8887 = vmatprep.subr.bf16.mxu1 %v8886_v61  ;;  %v7706_v40 = vld [vmem:[%s15783_s3 + $0xe30] sm:$0xff]  ;;  %v7709_v61 = vld [vmem:[%s15783_s3 + $0xe48] sm:$0xff]  ;;  %v8836_v21 = vpack.c.bf16 %v7704_v18, %v7700_v55  ;;  %v7724_v14 = vld [vmem:[%s15783_s3 + $0xec0] sm:$0xff] }
 0x33f   : > { %4546 = vmatmul.mubr.f32.gmra.mrb[64].mxu0 %v12536_v63  ;;  %4659 = vmatmul.mubr.f32.gmra.mrb[58].mxu1 %v12536_v63  ;;  %v8900_v50 = vpack.c.bf16 %v7706_v40, %v7702_v29  ;;  %v7728_v32 = vld [vmem:[%s15783_s3 + $0xee0] sm:$0xff]  ;;  %v7733_v55 = vld [vmem:[%s15783_s3 + $0xf08] sm:$0xff] }
 0x340   : > { %4551 = vmatprep.mubr.f32.mxu0 %v12602_v43  ;;  %4664 = vmatprep.mubr.f32.mxu1 %v12602_v43  ;;  %v7737_v18 = vld [vmem:[%s15783_s3 + $0xf28] sm:$0xff]  ;;  %v8848_v29 = vpack.c.bf16 %v7728_v32, %v7724_v14 }
 0x341   : > { %8825 = vmatpush1.bf16.msra.mxu0 %v8824_v28  ;;  %8889 = vmatpush1.bf16.msra.mxu1 %v8888_v22  ;;  %v7712_v28 = vld [vmem:[%s15783_s3 + $0xe60] sm:$0xff]  ;;  %v8838_v22 = vpack.c.bf16 %v7713_v38, %v7709_v61  ;;  %v8850_v27 = vpack.c.bf16 %v7737_v18, %v7733_v55  ;;  %v7757_v14 = vld [vmem:[%s15783_s3 + $0xfc8] sm:$0xff] }
 0x342   : > { %8827 = vmatprep.subr.bf16.mxu0 %v8826_v30  ;;  %8891 = vmatprep.subr.bf16.mxu1 %v8890_v48  ;;  %v7721_v30 = vld [vmem:[%s15783_s3 + $0xea8] sm:$0xff]  ;;  %v7719_v48 = vld [vmem:[%s15783_s3 + $0xe98] sm:$0xff]  ;;  %v8840_v6 = vpack.c.bf16 %v7712_v28, %v7708_v17  ;;  %v7732_v61 = vld [vmem:[%s15783_s3 + $0xf00] sm:$0xff] }
 0x343   : > { %4552 = vmatmul.mubr.f32.gmra.mrb[66].mxu0 %v12610_v57  ;;  %4665 = vmatmul.mubr.f32.gmra.mrb[60].mxu1 %v12610_v57  ;;  %v8842_v34 = vpack.c.bf16 %v7721_v30, %v7717_v2  ;;  %v8906_v23 = vpack.c.bf16 %v7723_v44, %v7719_v48  ;;  %v7736_v38 = vld [vmem:[%s15783_s3 + $0xf20] sm:$0xff]  ;;  %v7741_v17 = vld [vmem:[%s15783_s3 + $0xf48] sm:$0xff] }
 0x344   : > { %4557 = vmatprep.mubr.f32.mxu0 %v13282_v53  ;;  %4670 = vmatprep.mubr.f32.mxu1 %v13282_v53  ;;  %v7745_v28 = vld [vmem:[%s15783_s3 + $0xf68] sm:$0xff]  ;;  %v7740_v2 = vld [vmem:[%s15783_s3 + $0xf40] sm:$0xff] }
 0x345   : > { %8829 = vmatpush1.bf16.msra.mxu0 %v8828_v8  ;;  %8893 = vmatpush1.bf16.msra.mxu1 %v8892_v51  ;;  %v7718_v8 = vld [vmem:[%s15783_s3 + $0xe90] sm:$0xff]  ;;  %v7744_v30 = vld [vmem:[%s15783_s3 + $0xf60] sm:$0xff]  ;;  %v8854_v48 = vpack.c.bf16 %v7745_v28, %v7741_v17  ;;  %v7761_v32 = vld [vmem:[%s15783_s3 + $0xfe8] sm:$0xff] }
 0x346   : > { %8831 = vmatprep.subr.bf16.mxu0 %v8830_v12  ;;  %8895 = vmatprep.subr.bf16.mxu1 %v8894_v0  ;;  %v7722_v51 = vld [vmem:[%s15783_s3 + $0xeb0] sm:$0xff]  ;;  %v7727_v12 = vld [vmem:[%s15783_s3 + $0xed8] sm:$0xff]  ;;  %v7756_v55 = vld [vmem:[%s15783_s3 + $0xfc0] sm:$0xff] }
 0x347   : > { %4558 = vmatmul.mubr.f32.gmra.mrb[68].mxu0 %v13306_v56  ;;  %4671 = vmatmul.mubr.f32.gmra.mrb[62].mxu1 %v13306_v56  ;;  %v7731_v0 = vld [vmem:[%s15783_s3 + $0xef8] sm:$0xff]  ;;  %v8908_v19 = vpack.c.bf16 %v7722_v51, %v7718_v8  ;;  %v8856_v8 = vpack.c.bf16 %v7744_v30, %v7740_v2  ;;  %v7760_v18 = vld [vmem:[%s15783_s3 + $0xfe0] sm:$0xff]  ;;  %v7773_v2 = vld [vmem:[%s15783_s3 + $0x1048] sm:$0xff] }
 0x348   : > { %4902 = vmatprep.mubr.f32.mxu0 %v12224_v26  ;;  %5015 = vmatprep.mubr.f32.mxu1 %v12224_v26  ;;  %v7710_v26 = vld [vmem:[%s15783_s3 + $0xe50] sm:$0xff]  ;;  %v8910_v35 = vpack.c.bf16 %v7731_v0, %v7727_v12  ;;  %v8858_v12 = vpack.c.bf16 %v7753_v59, %v7749_v3  ;;  %v7777_v30 = vld [vmem:[%s15783_s3 + $0x1068] sm:$0xff]  ;;  %v7772_v3 = vld [vmem:[%s15783_s3 + $0x1040] sm:$0xff] }
 0x349   : > { %8833 = vmatpush1.bf16.msra.mxu0 %v8832_v52  ;;  %8897 = vmatpush1.bf16.msra.mxu1 %v8896_v24  ;;  %v8904_v25 = vpack.c.bf16 %v7714_v41, %v7710_v26  ;;  %v7726_v52 = vld [vmem:[%s15783_s3 + $0xed0] sm:$0xff]  ;;  %v8852_v26 = vpack.c.bf16 %v7736_v38, %v7732_v61  ;;  %v7765_v61 = vld [vmem:[%s15783_s3 + $0x1008] sm:$0xff]  ;;  %v7776_v59 = vld [vmem:[%s15783_s3 + $0x1060] sm:$0xff] }
 0x34a   : > { %8835 = vmatprep.subr.bf16.mxu0 %v8834_v20  ;;  %8899 = vmatprep.subr.bf16.mxu1 %v8898_v9  ;;  %v7730_v24 = vld [vmem:[%s15783_s3 + $0xef0] sm:$0xff]  ;;  %v7735_v20 = vld [vmem:[%s15783_s3 + $0xf18] sm:$0xff]  ;;  %v7769_v38 = vld [vmem:[%s15783_s3 + $0x1028] sm:$0xff] }
 0x34b   : > { %v7739_v9 = vld [vmem:[%s15783_s3 + $0xf38] sm:$0xff]  ;;  %v8912_v40 = vpack.c.bf16 %v7730_v24, %v7726_v52  ;;  %v8860_v52 = vpack.c.bf16 %v7752_v4, %v7748_v33  ;;  %v8930_v17 = vpack.c.bf16 %v7769_v38, %v7765_v61  ;;  %v7781_v33 = vld [vmem:[%s15783_s3 + $0x1088] sm:$0xff]  ;;  %v7792_v61 = vld [vmem:[%s15783_s3 + $0x10e0] sm:$0xff] }
 0x34c   : > { %v8914_v1 = vpack.c.bf16 %v7739_v9, %v7735_v20  ;;  %v8862_v20 = vpack.c.bf16 %v7761_v32, %v7757_v14  ;;  %v7785_v4 = vld [vmem:[%s15783_s3 + $0x10a8] sm:$0xff]  ;;  %v7784_v14 = vld [vmem:[%s15783_s3 + $0x10a0] sm:$0xff] }
 0x34d   : > { %8837 = vmatpush1.bf16.msra.mxu0 %v8836_v21  ;;  %8901 = vmatpush1.bf16.msra.mxu1 %v8900_v50  ;;  %v7734_v21 = vld [vmem:[%s15783_s3 + $0xf10] sm:$0xff]  ;;  %v8938_v32 = vpack.c.bf16 %v7785_v4, %v7781_v33  ;;  %v7808_v33 = vld [vmem:[%s15783_s3 + $0x1160] sm:$0xff] }
 0x34e   : > { %8839 = vmatprep.subr.bf16.mxu0 %v8838_v22  ;;  %8903 = vmatprep.subr.bf16.mxu1 %v8902_v13  ;;  %v7738_v50 = vld [vmem:[%s15783_s3 + $0xf30] sm:$0xff]  ;;  %v7743_v22 = vld [vmem:[%s15783_s3 + $0xf58] sm:$0xff] }
 0x34f   : > { %v7747_v13 = vld [vmem:[%s15783_s3 + $0xf78] sm:$0xff]  ;;  %v8916_v41 = vpack.c.bf16 %v7738_v50, %v7734_v21  ;;  %v8864_v21 = vpack.c.bf16 %v7760_v18, %v7756_v55  ;;  %v7793_v55 = vld [vmem:[%s15783_s3 + $0x10e8] sm:$0xff] }
 0x350   : > { %v8918_v44 = vpack.c.bf16 %v7747_v13, %v7743_v22  ;;  %v7764_v22 = vld [vmem:[%s15783_s3 + $0x1000] sm:$0xff]  ;;  %v7791_v18 = vld [vmem:[%s15783_s3 + $0x10d8] sm:$0xff] }
 0x351   : > { %8841 = vmatpush1.bf16.msra.mxu0 %v8840_v6  ;;  %8905 = vmatpush1.bf16.msra.mxu1 %v8904_v25  ;;  %v7742_v6 = vld [vmem:[%s15783_s3 + $0xf50] sm:$0xff]  ;;  %v7768_v13 = vld [vmem:[%s15783_s3 + $0x1020] sm:$0xff] }
 0x352   : > { %8843 = vmatprep.subr.bf16.mxu0 %v8842_v34  ;;  %8907 = vmatprep.subr.bf16.mxu1 %v8906_v23  ;;  %v7746_v25 = vld [vmem:[%s15783_s3 + $0xf70] sm:$0xff]  ;;  %v7751_v34 = vld [vmem:[%s15783_s3 + $0xf98] sm:$0xff] }
 0x353   : > { %v7755_v23 = vld [vmem:[%s15783_s3 + $0xfb8] sm:$0xff]  ;;  %v8920_v51 = vpack.c.bf16 %v7746_v25, %v7742_v6  ;;  %v8932_v6 = vpack.c.bf16 %v7768_v13, %v7764_v22 }
 0x354   : > { %v8922_v0 = vpack.c.bf16 %v7755_v23, %v7751_v34  ;;  %v8934_v34 = vpack.c.bf16 %v7777_v30, %v7773_v2  ;;  %v7803_v22 = vld [vmem:[%s15783_s3 + $0x1138] sm:$0xff]  ;;  %v7800_v2 = vld [vmem:[%s15783_s3 + $0x1120] sm:$0xff] }
 0x355   : > { %8845 = vmatpush1.bf16.msra.mxu0 %v8844_v47  ;;  %8909 = vmatpush1.bf16.msra.mxu1 %v8908_v19  ;;  %v7750_v47 = vld [vmem:[%s15783_s3 + $0xf90] sm:$0xff] }
 0x356   : > { %8847 = vmatprep.subr.bf16.mxu0 %v8846_v11  ;;  %8911 = vmatprep.subr.bf16.mxu1 %v8910_v35  ;;  %v7754_v19 = vld [vmem:[%s15783_s3 + $0xfb0] sm:$0xff]  ;;  %v7759_v11 = vld [vmem:[%s15783_s3 + $0xfd8] sm:$0xff] }
 0x357   : > { %v7763_v35 = vld [vmem:[%s15783_s3 + $0xff8] sm:$0xff]  ;;  %v8924_v24 = vpack.c.bf16 %v7754_v19, %v7750_v47  ;;  %v8936_v47 = vpack.c.bf16 %v7776_v59, %v7772_v3  ;;  %v7780_v19 = vld [vmem:[%s15783_s3 + $0x1080] sm:$0xff]  ;;  %v7809_v3 = vld [vmem:[%s15783_s3 + $0x1168] sm:$0xff] }
 0x358   : > { %v8926_v9 = vpack.c.bf16 %v7763_v35, %v7759_v11  ;;  %v7782_v35 = vld [vmem:[%s15783_s3 + $0x1090] sm:$0xff]  ;;  %v7807_v59 = vld [vmem:[%s15783_s3 + $0x1158] sm:$0xff] }
 0x359   : > { %8849 = vmatpush1.bf16.msra.mxu0 %v8848_v29  ;;  %8913 = vmatpush1.bf16.msra.mxu1 %v8912_v40  ;;  %v7758_v29 = vld [vmem:[%s15783_s3 + $0xfd0] sm:$0xff] }
 0x35a   : > { %8851 = vmatprep.subr.bf16.mxu0 %v8850_v27  ;;  %8915 = vmatprep.subr.bf16.mxu1 %v8914_v1  ;;  %v7762_v40 = vld [vmem:[%s15783_s3 + $0xff0] sm:$0xff]  ;;  %v7767_v27 = vld [vmem:[%s15783_s3 + $0x1018] sm:$0xff] }
 0x35b   : > { %v7771_v1 = vld [vmem:[%s15783_s3 + $0x1038] sm:$0xff]  ;;  %v8928_v50 = vpack.c.bf16 %v7762_v40, %v7758_v29  ;;  %v7788_v40 = vld [vmem:[%s15783_s3 + $0x10c0] sm:$0xff] }
 0x35c   : > { %v8994_v28 = vpack.c.bf16 %v7771_v1, %v7767_v27  ;;  %v7790_v1 = vld [vmem:[%s15783_s3 + $0x10d0] sm:$0xff]  ;;  %v8944_v13 = vpack.c.bf16 %v7792_v61, %v7788_v40  ;;  %v7821_v40 = vld [vmem:[%s15783_s3 + $0x11c8] sm:$0xff]  ;;  %v7823_v61 = vld [vmem:[%s15783_s3 + $0x11d8] sm:$0xff] }
 0x35d   : > { %8853 = vmatpush1.bf16.msra.mxu0 %v8852_v26  ;;  %8917 = vmatpush1.bf16.msra.mxu1 %v8916_v41  ;;  %v7766_v26 = vld [vmem:[%s15783_s3 + $0x1010] sm:$0xff] }
 0x35e   : > { %8855 = vmatprep.subr.bf16.mxu0 %v8854_v48  ;;  %8919 = vmatprep.subr.bf16.mxu1 %v8918_v44  ;;  %v7770_v41 = vld [vmem:[%s15783_s3 + $0x1030] sm:$0xff]  ;;  %v7775_v48 = vld [vmem:[%s15783_s3 + $0x1058] sm:$0xff] }
 0x35f   : > { %v7779_v44 = vld [vmem:[%s15783_s3 + $0x1078] sm:$0xff]  ;;  %v8996_v25 = vpack.c.bf16 %v7770_v41, %v7766_v26  ;;  %v7796_v41 = vld [vmem:[%s15783_s3 + $0x1100] sm:$0xff] }
 0x360   : > { %v8998_v23 = vpack.c.bf16 %v7779_v44, %v7775_v48  ;;  %v7798_v44 = vld [vmem:[%s15783_s3 + $0x1110] sm:$0xff] }
 0x361   : > { %8857 = vmatpush1.bf16.msra.mxu0 %v8856_v8  ;;  %8921 = vmatpush1.bf16.msra.mxu1 %v8920_v51  ;;  %v7774_v8 = vld [vmem:[%s15783_s3 + $0x1050] sm:$0xff] }
 0x362   : > { %8859 = vmatprep.subr.bf16.mxu0 %v8858_v12  ;;  %8923 = vmatprep.subr.bf16.mxu1 %v8922_v0  ;;  %v7778_v51 = vld [vmem:[%s15783_s3 + $0x1070] sm:$0xff]  ;;  %v7783_v12 = vld [vmem:[%s15783_s3 + $0x1098] sm:$0xff] }
 0x363   : > { %v7787_v0 = vld [vmem:[%s15783_s3 + $0x10b8] sm:$0xff] }
 0x364   : > { %v9002_v11 = vpack.c.bf16 %v7787_v0, %v7783_v12  ;;  %v7806_v0 = vld [vmem:[%s15783_s3 + $0x1150] sm:$0xff] }
 0x365   : > { %8861 = vmatpush1.bf16.msra.mxu0 %v8860_v52  ;;  %8925 = vmatpush1.bf16.msra.mxu1 %v8924_v24  ;;  %v7786_v52 = vld [vmem:[%s15783_s3 + $0x10b0] sm:$0xff]  ;;  %v7789_v24 = vld [vmem:[%s15783_s3 + $0x10c8] sm:$0xff] }
 0x366   : > { %8863 = vmatprep.subr.bf16.mxu0 %v8862_v20  ;;  %8927 = vmatprep.subr.bf16.mxu1 %v8926_v9  ;;  %v7795_v20 = vld [vmem:[%s15783_s3 + $0x10f8] sm:$0xff]  ;;  %v8940_v9 = vpack.c.bf16 %v7784_v14, %v7780_v19  ;;  %v9004_v29 = vpack.c.bf16 %v7786_v52, %v7782_v35  ;;  %v8942_v38 = vpack.c.bf16 %v7793_v55, %v7789_v24  ;;  %v7817_v19 = vld [vmem:[%s15783_s3 + $0x11a8] sm:$0xff]  ;;  %v7812_v52 = vld [vmem:[%s15783_s3 + $0x1180] sm:$0xff] }
 0x367   : > { %v9006_v27 = vpack.c.bf16 %v7795_v20, %v7791_v18  ;;  %v7815_v14 = vld [vmem:[%s15783_s3 + $0x1198] sm:$0xff]  ;;  %v7816_v24 = vld [vmem:[%s15783_s3 + $0x11a0] sm:$0xff]  ;;  %v3586_v55 = vadd.f32 %v12040_v10, %v12702_v36  ;;  %v7825_v36 = vld [vmem:[%s15783_s3 + $0x11e8] sm:$0xff] }
 0x369   : > { %8865 = vmatpush1.bf16.msra.mxu0 %v8864_v21  ;;  %8929 = vmatpush1.bf16.msra.mxu1 %v8928_v50  ;;  %v7794_v21 = vld [vmem:[%s15783_s3 + $0x10f0] sm:$0xff]  ;;  %v7797_v50 = vld [vmem:[%s15783_s3 + $0x1108] sm:$0xff] }
 0x36a   : > { %8931 = vmatprep.subr.bf16.mxu0 %v8930_v17  ;;  %8995 = vmatprep.subr.bf16.mxu1 %v8994_v28  ;;  %v7801_v17 = vld [vmem:[%s15783_s3 + $0x1128] sm:$0xff]  ;;  %v7799_v28 = vld [vmem:[%s15783_s3 + $0x1118] sm:$0xff]  ;;  %v9008_v26 = vpack.c.bf16 %v7794_v21, %v7790_v1  ;;  %v8956_v1 = vpack.c.bf16 %v7816_v24, %v7812_v52 }
 0x36b   : > { %v8946_v30 = vpack.c.bf16 %v7801_v17, %v7797_v50  ;;  %v9010_v48 = vpack.c.bf16 %v7803_v22, %v7799_v28  ;;  %v7820_v50 = vld [vmem:[%s15783_s3 + $0x11c0] sm:$0xff]  ;;  %v13706_v28 = vmax.f32 %v3586_v55, 0.0  ;;  %v8958_v22 = vpack.c.bf16 %v7825_v36, %v7821_v40  ;;  %v7845_v52 = vld [vmem:[%s15783_s3 + $0x1288] sm:$0xff]  ;;  %v7847_v55 = vld [vmem:[%s15783_s3 + $0x1298] sm:$0xff] }
 0x36c   : > { %4903 = vmatmul.mubr.f32.vlgmr.msra.gmra.mrb[54].mxu0 %v12232_v39  ;;  %5016 = vmatmul.mubr.f32.vlgmr.msra.gmra.mrb[48].mxu1 %v12232_v39  ;;  %v9000_v39 = vpack.c.bf16 %v7778_v51, %v7774_v8  ;;  %v7804_v51 = vld [vmem:[%s15783_s3 + $0x1140] sm:$0xff]  ;;  %v7849_v24 = vld [vmem:[%s15783_s3 + $0x12a8] sm:$0xff] }
 0x36d   : > { %4908 = vmatprep.mubr.f32.mxu0 %v12300_v45  ;;  %5021 = vmatprep.mubr.f32.mxu1 %v12300_v45  ;;  %v7824_v17 = vld [vmem:[%s15783_s3 + $0x11e0] sm:$0xff]  ;;  %v8970_v36 = vpack.c.bf16 %v7849_v24, %v7845_v52 }
 0x36e   : > { %8933 = vmatpush1.bf16.msra.mxu0 %v8932_v6  ;;  %8997 = vmatpush1.bf16.msra.mxu1 %v8996_v25  ;;  %v7802_v6 = vld [vmem:[%s15783_s3 + $0x1130] sm:$0xff]  ;;  %v7805_v25 = vld [vmem:[%s15783_s3 + $0x1148] sm:$0xff]  ;;  %v7848_v40 = vld [vmem:[%s15783_s3 + $0x12a0] sm:$0xff] }
 0x36f   : > { %8935 = vmatprep.subr.bf16.mxu0 %v8934_v34  ;;  %8999 = vmatprep.subr.bf16.mxu1 %v8998_v23  ;;  %v7811_v34 = vld [vmem:[%s15783_s3 + $0x1178] sm:$0xff]  ;;  %v8948_v23 = vpack.c.bf16 %v7800_v2, %v7796_v41  ;;  %v9012_v8 = vpack.c.bf16 %v7802_v6, %v7798_v44  ;;  %v8950_v4 = vpack.c.bf16 %v7809_v3, %v7805_v25  ;;  %v7829_v41 = vld [vmem:[%s15783_s3 + $0x1208] sm:$0xff]  ;;  %v7828_v3 = vld [vmem:[%s15783_s3 + $0x1200] sm:$0xff] }
 0x370   : > { %4909 = vmatmul.mubr.f32.gmra.mrb[56].mxu0 %v12308_v54  ;;  %5022 = vmatmul.mubr.f32.gmra.mrb[50].mxu1 %v12308_v54  ;;  %v9014_v12 = vpack.c.bf16 %v7811_v34, %v7807_v59  ;;  %v7833_v2 = vld [vmem:[%s15783_s3 + $0x1228] sm:$0xff]  ;;  %v8960_v6 = vpack.c.bf16 %v7824_v17, %v7820_v50  ;;  %v7832_v59 = vld [vmem:[%s15783_s3 + $0x1220] sm:$0xff]  ;;  %v7855_v50 = vld [vmem:[%s15783_s3 + $0x12d8] sm:$0xff] }
 0x371   : > { %4914 = vmatprep.mubr.f32.mxu0 %v12376_v37  ;;  %5027 = vmatprep.mubr.f32.mxu1 %v12376_v37  ;;  %v8962_v34 = vpack.c.bf16 %v7833_v2, %v7829_v41  ;;  %v7859_v17 = vld [vmem:[%s15783_s3 + $0x12f8] sm:$0xff] }
 0x372   : > { %8937 = vmatpush1.bf16.msra.mxu0 %v8936_v47  ;;  %9001 = vmatpush1.bf16.msra.mxu1 %v9000_v39  ;;  %v7810_v47 = vld [vmem:[%s15783_s3 + $0x1170] sm:$0xff]  ;;  %v7813_v39 = vld [vmem:[%s15783_s3 + $0x1188] sm:$0xff]  ;;  %v9038_v2 = vpack.c.bf16 %v7859_v17, %v7855_v50 }
 0x373   : > { %8939 = vmatprep.subr.bf16.mxu0 %v8938_v32  ;;  %9003 = vmatprep.subr.bf16.mxu1 %v9002_v11  ;;  %v7819_v32 = vld [vmem:[%s15783_s3 + $0x11b8] sm:$0xff]  ;;  %v8952_v11 = vpack.c.bf16 %v7808_v33, %v7804_v51  ;;  %v9016_v35 = vpack.c.bf16 %v7810_v47, %v7806_v0  ;;  %v8954_v18 = vpack.c.bf16 %v7817_v19, %v7813_v39  ;;  %v7834_v51 = vld [vmem:[%s15783_s3 + $0x1230] sm:$0xff]  ;;  %v7837_v33 = vld [vmem:[%s15783_s3 + $0x1248] sm:$0xff] }
 0x374   : > { %4915 = vmatmul.mubr.f32.gmra.mrb[58].mxu0 %v12384_v15  ;;  %5028 = vmatmul.mubr.f32.gmra.mrb[52].mxu1 %v12384_v15  ;;  %v9018_v20 = vpack.c.bf16 %v7819_v32, %v7815_v14  ;;  %v7843_v0 = vld [vmem:[%s15783_s3 + $0x1278] sm:$0xff]  ;;  %v8964_v47 = vpack.c.bf16 %v7832_v59, %v7828_v3  ;;  %v7836_v19 = vld [vmem:[%s15783_s3 + $0x1240] sm:$0xff]  ;;  %v7878_v50 = vld [vmem:[%s15783_s3 + $0x1390] sm:$0xff] }
 0x375   : > { %4920 = vmatprep.mubr.f32.mxu0 %v12452_v60  ;;  %5033 = vmatprep.mubr.f32.mxu1 %v12452_v60  ;;  %v7840_v14 = vld [vmem:[%s15783_s3 + $0x1260] sm:$0xff]  ;;  %v7863_v3 = vld [vmem:[%s15783_s3 + $0x1318] sm:$0xff]  ;;  %v7882_v17 = vld [vmem:[%s15783_s3 + $0x13b0] sm:$0xff] }
 0x376   : > { %8941 = vmatpush1.bf16.msra.mxu0 %v8940_v9  ;;  %9005 = vmatpush1.bf16.msra.mxu1 %v9004_v29  ;;  %v7814_v9 = vld [vmem:[%s15783_s3 + $0x1190] sm:$0xff]  ;;  %v7867_v59 = vld [vmem:[%s15783_s3 + $0x1338] sm:$0xff] }
 0x377   : > { %8943 = vmatprep.subr.bf16.mxu0 %v8942_v38  ;;  %9007 = vmatprep.subr.bf16.mxu1 %v9006_v27  ;;  %v7818_v29 = vld [vmem:[%s15783_s3 + $0x11b0] sm:$0xff]  ;;  %v7827_v38 = vld [vmem:[%s15783_s3 + $0x11f8] sm:$0xff]  ;;  %v3585_v27 = vadd.f32 %v12035_v5, %v12688_v46 }
 0x378   : > { %4921 = vmatmul.mubr.f32.gmra.mrb[60].mxu0 %v12460_v58  ;;  %5034 = vmatmul.mubr.f32.gmra.mrb[54].mxu1 %v12460_v58  ;;  %v9020_v21 = vpack.c.bf16 %v7818_v29, %v7814_v9  ;;  %v7822_v46 = vld [vmem:[%s15783_s3 + $0x11d0] sm:$0xff]  ;;  %v7844_v29 = vld [vmem:[%s15783_s3 + $0x1280] sm:$0xff] }
 0x379   : > { %4926 = vmatprep.mubr.f32.mxu0 %v12528_v42  ;;  %5039 = vmatprep.mubr.f32.mxu1 %v12528_v42  ;;  %v13730_v44 = vmax.f32 %v3585_v27, 0.0  ;;  %v7850_v27 = vld [vmem:[%s15783_s3 + $0x12b0] sm:$0xff] }
 0x37a   : > { %8945 = vmatpush1.bf16.msra.mxu0 %v8944_v13  ;;  %9009 = vmatpush1.bf16.msra.mxu1 %v9008_v26  ;;  %v9022_v13 = vpack.c.bf16 %v7827_v38, %v7823_v61  ;;  %v7826_v26 = vld [vmem:[%s15783_s3 + $0x11f0] sm:$0xff] }
 0x37b   : > { %8947 = vmatprep.subr.bf16.mxu0 %v8946_v30  ;;  %9011 = vmatprep.subr.bf16.mxu1 %v9010_v48  ;;  %v7831_v30 = vld [vmem:[%s15783_s3 + $0x1218] sm:$0xff]  ;;  %v9024_v25 = vpack.c.bf16 %v7826_v26, %v7822_v46  ;;  %v7846_v38 = vld [vmem:[%s15783_s3 + $0x1290] sm:$0xff]  ;;  %v7852_v46 = vld [vmem:[%s15783_s3 + $0x12c0] sm:$0xff] }
 0x37c   : > { %4927 = vmatmul.mubr.f32.gmra.mrb[62].mxu0 %v12536_v63  ;;  %5040 = vmatmul.mubr.f32.gmra.mrb[56].mxu1 %v12536_v63  ;;  %v7835_v48 = vld [vmem:[%s15783_s3 + $0x1238] sm:$0xff]  ;;  %v7856_v26 = vld [vmem:[%s15783_s3 + $0x12e0] sm:$0xff] }
 0x37d   : > { %4932 = vmatprep.mubr.f32.mxu0 %v12602_v43  ;;  %5045 = vmatprep.mubr.f32.mxu1 %v12602_v43 }
 0x37e   : > { %8949 = vmatpush1.bf16.msra.mxu0 %v8948_v23  ;;  %9013 = vmatpush1.bf16.msra.mxu1 %v9012_v8  ;;  %v9026_v23 = vpack.c.bf16 %v7835_v48, %v7831_v30  ;;  %v7830_v8 = vld [vmem:[%s15783_s3 + $0x1210] sm:$0xff] }
 0x37f   : > { %8951 = vmatprep.subr.bf16.mxu0 %v8950_v4  ;;  %9015 = vmatprep.subr.bf16.mxu1 %v9014_v12  ;;  %v7841_v4 = vld [vmem:[%s15783_s3 + $0x1268] sm:$0xff]  ;;  %v7839_v12 = vld [vmem:[%s15783_s3 + $0x1258] sm:$0xff]  ;;  %v9028_v39 = vpack.c.bf16 %v7834_v51, %v7830_v8  ;;  %v7854_v30 = vld [vmem:[%s15783_s3 + $0x12d0] sm:$0xff] }
 0x380   : > { %4933 = vmatmul.mubr.f32.gmra.mrb[64].mxu0 %v12610_v57  ;;  %5046 = vmatmul.mubr.f32.gmra.mrb[58].mxu1 %v12610_v57  ;;  %v8966_v32 = vpack.c.bf16 %v7841_v4, %v7837_v33  ;;  %v7858_v48 = vld [vmem:[%s15783_s3 + $0x12f0] sm:$0xff]  ;;  %v7860_v8 = vld [vmem:[%s15783_s3 + $0x1300] sm:$0xff]  ;;  %v9042_v4 = vpack.c.bf16 %v7867_v59, %v7863_v3 }
 0x381   : > { %4938 = vmatprep.mubr.f32.mxu0 %v13282_v53  ;;  %5051 = vmatprep.mubr.f32.mxu1 %v13282_v53  ;;  %v7864_v51 = vld [vmem:[%s15783_s3 + $0x1320] sm:$0xff]  ;;  %v7886_v3 = vld [vmem:[%s15783_s3 + $0x13d0] sm:$0xff] }
 0x382   : > { %8953 = vmatpush1.bf16.msra.mxu0 %v8952_v11  ;;  %9017 = vmatpush1.bf16.msra.mxu1 %v9016_v35  ;;  %v9030_v11 = vpack.c.bf16 %v7843_v0, %v7839_v12  ;;  %v7842_v35 = vld [vmem:[%s15783_s3 + $0x1270] sm:$0xff] }
 0x383   : > { %8955 = vmatprep.subr.bf16.mxu0 %v8954_v18  ;;  %9019 = vmatprep.subr.bf16.mxu1 %v9018_v20  ;;  %v7851_v18 = vld [vmem:[%s15783_s3 + $0x12b8] sm:$0xff]  ;;  %v8968_v20 = vpack.c.bf16 %v7840_v14, %v7836_v19  ;;  %v7862_v12 = vld [vmem:[%s15783_s3 + $0x1310] sm:$0xff] }
 0x384   : > { %4939 = vmatmul.mubr.f32.gmra.mrb[66].mxu0 %v13306_v56  ;;  %5052 = vmatmul.mubr.f32.gmra.mrb[60].mxu1 %v13306_v56  ;;  %v9034_v61 = vpack.c.bf16 %v7851_v18, %v7847_v55  ;;  %v7866_v0 = vld [vmem:[%s15783_s3 + $0x1330] sm:$0xff]  ;;  %v7871_v19 = vld [vmem:[%s15783_s3 + $0x1358] sm:$0xff] }
 0x385   : > { %4944 = vmatprep.mubr.f32.mxu0 %v13706_v28  ;;  %5057 = vmatprep.mubr.f32.mxu1 %v13706_v28  ;;  %v7875_v14 = vld [vmem:[%s15783_s3 + $0x1378] sm:$0xff]  ;;  %v7870_v55 = vld [vmem:[%s15783_s3 + $0x1350] sm:$0xff] }
 0x386   : > { %8957 = vmatpush1.bf16.msra.mxu0 %v8956_v1  ;;  %9021 = vmatpush1.bf16.msra.mxu1 %v9020_v21  ;;  %v7853_v1 = vld [vmem:[%s15783_s3 + $0x12c8] sm:$0xff]  ;;  %v9046_v24 = vpack.c.bf16 %v7875_v14, %v7871_v19  ;;  %v7874_v18 = vld [vmem:[%s15783_s3 + $0x1370] sm:$0xff] }
 0x387   : > { %8959 = vmatprep.subr.bf16.mxu0 %v8958_v22  ;;  %9023 = vmatprep.subr.bf16.mxu1 %v9022_v13  ;;  %v7857_v21 = vld [vmem:[%s15783_s3 + $0x12e8] sm:$0xff]  ;;  %v8972_v22 = vpack.c.bf16 %v7848_v40, %v7844_v29  ;;  %v9036_v13 = vpack.c.bf16 %v7850_v27, %v7846_v38  ;;  %v7879_v29 = vld [vmem:[%s15783_s3 + $0x1398] sm:$0xff]  ;;  %v7876_v38 = vld [vmem:[%s15783_s3 + $0x1380] sm:$0xff] }
 0x388   : > { %4945 = vmatmul.mubr.f32.gmra.mrb[68].mxu0 %v13730_v44  ;;  %5058 = vmatmul.mubr.f32.gmra.mrb[62].mxu1 %v13730_v44  ;;  %v8974_v41 = vpack.c.bf16 %v7857_v21, %v7853_v1  ;;  %v7883_v40 = vld [vmem:[%s15783_s3 + $0x13b8] sm:$0xff]  ;;  %v7880_v27 = vld [vmem:[%s15783_s3 + $0x13a0] sm:$0xff]  ;;  %v7890_v59 = vld [vmem:[%s15783_s3 + $0x13f0] sm:$0xff] }
 0x389   : > { %5289 = vmatprep.mubr.f32.mxu0 %v12300_v45  ;;  %5402 = vmatprep.mubr.f32.mxu1 %v12300_v45  ;;  %v7838_v45 = vld [vmem:[%s15783_s3 + $0x1250] sm:$0xff]  ;;  %v9050_v21 = vpack.c.bf16 %v7883_v40, %v7879_v29 }
 0x38a   : > { %8961 = vmatpush1.bf16.msra.mxu0 %v8960_v6  ;;  %9025 = vmatpush1.bf16.msra.mxu1 %v9024_v25  ;;  %v9032_v9 = vpack.c.bf16 %v7842_v35, %v7838_v45  ;;  %v7861_v6 = vld [vmem:[%s15783_s3 + $0x1308] sm:$0xff]  ;;  %v7868_v45 = vld [vmem:[%s15783_s3 + $0x1340] sm:$0xff]  ;;  %v7894_v19 = vld [vmem:[%s15785_s5 + $0x410] sm:$0xff] }
 0x38b   : > { %8963 = vmatprep.subr.bf16.mxu0 %v8962_v34  ;;  %9027 = vmatprep.subr.bf16.mxu1 %v9026_v23  ;;  %v7865_v25 = vld [vmem:[%s15783_s3 + $0x1328] sm:$0xff]  ;;  %v8976_v34 = vpack.c.bf16 %v7856_v26, %v7852_v46  ;;  %v9040_v23 = vpack.c.bf16 %v7858_v48, %v7854_v30  ;;  %v7872_v35 = vld [vmem:[%s15783_s3 + $0x1360] sm:$0xff]  ;;  %v7887_v46 = vld [vmem:[%s15783_s3 + $0x13d8] sm:$0xff] }
 0x38c   : > { %v8978_v33 = vpack.c.bf16 %v7865_v25, %v7861_v6  ;;  %v7891_v26 = vld [vmem:[%s15783_s3 + $0x13f8] sm:$0xff]  ;;  %v7884_v30 = vld [vmem:[%s15783_s3 + $0x13c0] sm:$0xff]  ;;  %v7898_v14 = vld [vmem:[%s15785_s5 + $0x430] sm:$0xff] }
 0x38d   : > { %v7888_v48 = vld [vmem:[%s15783_s3 + $0x13e0] sm:$0xff]  ;;  %v9054_v25 = vpack.c.bf16 %v7891_v26, %v7887_v46  ;;  %v7902_v29 = vld [vmem:[%s15785_s5 + $0x450] sm:$0xff]  ;;  %v7917_v46 = vld [vmem:[%s15785_s5 + $0x4c8] sm:$0xff] }
 0x38e   : > { %8965 = vmatpush1.bf16.msra.mxu0 %v8964_v47  ;;  %9029 = vmatpush1.bf16.msra.mxu1 %v9028_v39  ;;  %v7869_v47 = vld [vmem:[%s15783_s3 + $0x1348] sm:$0xff]  ;;  %v7906_v40 = vld [vmem:[%s15785_s5 + $0x470] sm:$0xff] }
 0x38f   : > { %8967 = vmatprep.subr.bf16.mxu0 %v8966_v32  ;;  %9031 = vmatprep.subr.bf16.mxu1 %v9030_v11  ;;  %v7873_v39 = vld [vmem:[%s15783_s3 + $0x1368] sm:$0xff]  ;;  %v8980_v32 = vpack.c.bf16 %v7864_v51, %v7860_v8  ;;  %v9044_v11 = vpack.c.bf16 %v7866_v0, %v7862_v12  ;;  %v7895_v8 = vld [vmem:[%s15785_s5 + $0x418] sm:$0xff] }
 0x390   : > { %v8982_v52 = vpack.c.bf16 %v7873_v39, %v7869_v47  ;;  %v7899_v51 = vld [vmem:[%s15785_s5 + $0x438] sm:$0xff]  ;;  %v7892_v47 = vld [vmem:[%s15785_s5 + $0x400] sm:$0xff]  ;;  %v7921_v26 = vld [vmem:[%s15785_s5 + $0x4e8] sm:$0xff] }
 0x391   : > { %v9122_v0 = vpack.c.bf16 %v7899_v51, %v7895_v8  ;;  %v7896_v39 = vld [vmem:[%s15785_s5 + $0x420] sm:$0xff]  ;;  %v7927_v8 = vld [vmem:[%s15785_s5 + $0x518] sm:$0xff] }
 0x392   : > { %8969 = vmatpush1.bf16.msra.mxu0 %v8968_v20  ;;  %9033 = vmatpush1.bf16.msra.mxu1 %v9032_v9  ;;  %v7877_v20 = vld [vmem:[%s15783_s3 + $0x1388] sm:$0xff]  ;;  %v7931_v51 = vld [vmem:[%s15785_s5 + $0x538] sm:$0xff] }
 0x393   : > { %8971 = vmatprep.subr.bf16.mxu0 %v8970_v36  ;;  %9035 = vmatprep.subr.bf16.mxu1 %v9034_v61  ;;  %v7881_v9 = vld [vmem:[%s15783_s3 + $0x13a8] sm:$0xff]  ;;  %v8984_v36 = vpack.c.bf16 %v7872_v35, %v7868_v45  ;;  %v9048_v61 = vpack.c.bf16 %v7874_v18, %v7870_v55  ;;  %v7903_v45 = vld [vmem:[%s15785_s5 + $0x458] sm:$0xff]  ;;  %v7900_v55 = vld [vmem:[%s15785_s5 + $0x440] sm:$0xff] }
 0x394   : > { %v8986_v1 = vpack.c.bf16 %v7881_v9, %v7877_v20  ;;  %v7907_v35 = vld [vmem:[%s15785_s5 + $0x478] sm:$0xff]  ;;  %v7904_v18 = vld [vmem:[%s15785_s5 + $0x460] sm:$0xff] }
 0x395   : > { %v9126_v9 = vpack.c.bf16 %v7907_v35, %v7903_v45  ;;  %v7932_v35 = vld [vmem:[%s15785_s5 + $0x540] sm:$0xff] }
 0x396   : > { %8973 = vmatpush1.bf16.msra.mxu0 %v8972_v22  ;;  %9037 = vmatpush1.bf16.msra.mxu1 %v9036_v13  ;;  %v7885_v22 = vld [vmem:[%s15783_s3 + $0x13c8] sm:$0xff] }
 0x397   : > { %8975 = vmatprep.subr.bf16.mxu0 %v8974_v41  ;;  %9039 = vmatprep.subr.bf16.mxu1 %v9038_v2  ;;  %v7889_v13 = vld [vmem:[%s15783_s3 + $0x13e8] sm:$0xff]  ;;  %v8988_v41 = vpack.c.bf16 %v7880_v27, %v7876_v38  ;;  %v9052_v2 = vpack.c.bf16 %v7882_v17, %v7878_v50  ;;  %v7911_v38 = vld [vmem:[%s15785_s5 + $0x498] sm:$0xff]  ;;  %v7912_v50 = vld [vmem:[%s15785_s5 + $0x4a0] sm:$0xff] }
 0x398   : > { %v8990_v6 = vpack.c.bf16 %v7889_v13, %v7885_v22  ;;  %v7915_v27 = vld [vmem:[%s15785_s5 + $0x4b8] sm:$0xff]  ;;  %v7914_v13 = vld [vmem:[%s15785_s5 + $0x4b0] sm:$0xff] }
 0x399   : > { %v9130_v22 = vpack.c.bf16 %v7915_v27, %v7911_v38  ;;  %v7944_v38 = vld [vmem:[%s15785_s5 + $0x5a0] sm:$0xff]  ;;  %v3588_v27 = vadd.f32 %v12040_v10, %v12768_v7  ;;  %v7953_v10 = vld [vmem:[%s15785_s5 + $0x5e8] sm:$0xff]  ;;  %v7951_v7 = vld [vmem:[%s15785_s5 + $0x5d8] sm:$0xff] }
 0x39a   : > { %8977 = vmatpush1.bf16.msra.mxu0 %v8976_v34  ;;  %9041 = vmatpush1.bf16.msra.mxu1 %v9040_v23  ;;  %v7893_v34 = vld [vmem:[%s15785_s5 + $0x408] sm:$0xff] }
 0x39b   : > { %8979 = vmatprep.subr.bf16.mxu0 %v8978_v33  ;;  %9043 = vmatprep.subr.bf16.mxu1 %v9042_v4  ;;  %v7897_v23 = vld [vmem:[%s15785_s5 + $0x428] sm:$0xff]  ;;  %v8992_v33 = vpack.c.bf16 %v7888_v48, %v7884_v30  ;;  %v9056_v4 = vpack.c.bf16 %v7890_v59, %v7886_v3  ;;  %v7916_v48 = vld [vmem:[%s15785_s5 + $0x4c0] sm:$0xff]  ;;  %v7922_v59 = vld [vmem:[%s15785_s5 + $0x4f0] sm:$0xff] }
 0x39c   : > { %v9058_v12 = vpack.c.bf16 %v7897_v23, %v7893_v34  ;;  %v7925_v34 = vld [vmem:[%s15785_s5 + $0x508] sm:$0xff] }
 0x39d   : > { %v7929_v23 = vld [vmem:[%s15785_s5 + $0x528] sm:$0xff] }
 0x39e   : > { %8981 = vmatpush1.bf16.msra.mxu0 %v8980_v32  ;;  %9045 = vmatpush1.bf16.msra.mxu1 %v9044_v11  ;;  %v7901_v32 = vld [vmem:[%s15785_s5 + $0x448] sm:$0xff] }
 0x39f   : > { %8983 = vmatprep.subr.bf16.mxu0 %v8982_v52  ;;  %9047 = vmatprep.subr.bf16.mxu1 %v9046_v24  ;;  %v7905_v11 = vld [vmem:[%s15785_s5 + $0x468] sm:$0xff]  ;;  %v9060_v52 = vpack.c.bf16 %v7896_v39, %v7892_v47  ;;  %v9124_v24 = vpack.c.bf16 %v7898_v14, %v7894_v19  ;;  %v9138_v47 = vpack.c.bf16 %v7931_v51, %v7927_v8  ;;  %v7930_v39 = vld [vmem:[%s15785_s5 + $0x530] sm:$0xff] }
 0x3a0   : > { %v9062_v20 = vpack.c.bf16 %v7905_v11, %v7901_v32  ;;  %v7933_v19 = vld [vmem:[%s15785_s5 + $0x548] sm:$0xff]  ;;  %v7935_v32 = vld [vmem:[%s15785_s5 + $0x558] sm:$0xff]  ;;  %v7962_v8 = vld [vmem:[%s15785_s5 + $0x630] sm:$0xff] }
 0x3a1   : > { %v7937_v14 = vld [vmem:[%s15785_s5 + $0x568] sm:$0xff]  ;;  %v7939_v11 = vld [vmem:[%s15785_s5 + $0x578] sm:$0xff] }
 0x3a2   : > { %8985 = vmatpush1.bf16.msra.mxu0 %v8984_v36  ;;  %9049 = vmatpush1.bf16.msra.mxu1 %v9048_v61  ;;  %v7909_v36 = vld [vmem:[%s15785_s5 + $0x488] sm:$0xff] }
 0x3a3   : > { %8987 = vmatprep.subr.bf16.mxu0 %v8986_v1  ;;  %9051 = vmatprep.subr.bf16.mxu1 %v9050_v21  ;;  %v7913_v61 = vld [vmem:[%s15785_s5 + $0x4a8] sm:$0xff]  ;;  %v9064_v1 = vpack.c.bf16 %v7904_v18, %v7900_v55  ;;  %v7908_v21 = vld [vmem:[%s15785_s5 + $0x480] sm:$0xff]  ;;  %v9142_v55 = vpack.c.bf16 %v7939_v11, %v7935_v32  ;;  %v7938_v18 = vld [vmem:[%s15785_s5 + $0x570] sm:$0xff] }
 0x3a4   : > { %v9066_v17 = vpack.c.bf16 %v7913_v61, %v7909_v36  ;;  %v9068_v30 = vpack.c.bf16 %v7912_v50, %v7908_v21  ;;  %v7940_v61 = vld [vmem:[%s15785_s5 + $0x580] sm:$0xff]  ;;  %v7946_v21 = vld [vmem:[%s15785_s5 + $0x5b0] sm:$0xff]  ;;  %v7949_v50 = vld [vmem:[%s15785_s5 + $0x5c8] sm:$0xff] }
 0x3a5   : > { %v7965_v51 = vld [vmem:[%s15785_s5 + $0x648] sm:$0xff]  ;;  %v7970_v32 = vld [vmem:[%s15785_s5 + $0x670] sm:$0xff] }
 0x3a6   : > { %8989 = vmatpush1.bf16.msra.mxu0 %v8988_v41  ;;  %9053 = vmatpush1.bf16.msra.mxu1 %v9052_v2  ;;  %v7919_v41 = vld [vmem:[%s15785_s5 + $0x4d8] sm:$0xff]  ;;  %v7973_v11 = vld [vmem:[%s15785_s5 + $0x688] sm:$0xff] }
 0x3a7   : > { %8991 = vmatprep.subr.bf16.mxu0 %v8990_v6  ;;  %9055 = vmatprep.subr.bf16.mxu1 %v9054_v25  ;;  %v7923_v2 = vld [vmem:[%s15785_s5 + $0x4f8] sm:$0xff]  ;;  %v7920_v6 = vld [vmem:[%s15785_s5 + $0x4e0] sm:$0xff]  ;;  %v9070_v25 = vpack.c.bf16 %v7921_v26, %v7917_v46  ;;  %v3612_v26 = vmax.f32 %v3588_v27, 0.0 }
 0x3a8   : > { %v9134_v3 = vpack.c.bf16 %v7923_v2, %v7919_v41  ;;  %v7952_v46 = vld [vmem:[%s15785_s5 + $0x5e0] sm:$0xff]  ;;  %v9086_v41 = vpack.c.bf16 %v7953_v10, %v7949_v50  ;;  %v7957_v2 = vld [vmem:[%s15785_s5 + $0x608] sm:$0xff]  ;;  %v7982_v10 = vld [vmem:[%s15785_s5 + $0x6d0] sm:$0xff] }
 0x3aa   : > { %8993 = vmatpush1.bf16.msra.mxu0 %v8992_v33  ;;  %9057 = vmatpush1.bf16.msra.mxu1 %v9056_v4  ;;  %v9072_v33 = vpack.c.bf16 %v7920_v6, %v7916_v48  ;;  %v7924_v4 = vld [vmem:[%s15785_s5 + $0x500] sm:$0xff]  ;;  %v7963_v48 = vld [vmem:[%s15785_s5 + $0x638] sm:$0xff] }
 0x3ab   : > { %9059 = vmatprep.subr.bf16.mxu0 %v9058_v12  ;;  %9123 = vmatprep.subr.bf16.mxu1 %v9122_v0  ;;  %v7928_v12 = vld [vmem:[%s15785_s5 + $0x520] sm:$0xff]  ;;  %v9074_v0 = vpack.c.bf16 %v7929_v23, %v7925_v34  ;;  %v7958_v23 = vld [vmem:[%s15785_s5 + $0x610] sm:$0xff] }
 0x3ac   : > { %v9076_v45 = vpack.c.bf16 %v7928_v12, %v7924_v4  ;;  %v7971_v4 = vld [vmem:[%s15785_s5 + $0x678] sm:$0xff] }
 0x3ad   : > { %5290 = vmatmul.mubr.f32.vlgmr.msra.gmra.mrb[54].mxu0 %v12308_v54  ;;  %5403 = vmatmul.mubr.f32.vlgmr.msra.gmra.mrb[48].mxu1 %v12308_v54  ;;  %v9128_v54 = vpack.c.bf16 %v7906_v40, %v7902_v29  ;;  %v7943_v29 = vld [vmem:[%s15785_s5 + $0x598] sm:$0xff] }
 0x3ae   : > { %5295 = vmatprep.mubr.f32.mxu0 %v12376_v37  ;;  %5408 = vmatprep.mubr.f32.mxu1 %v12376_v37  ;;  %v7910_v37 = vld [vmem:[%s15785_s5 + $0x490] sm:$0xff]  ;;  %v7947_v40 = vld [vmem:[%s15785_s5 + $0x5b8] sm:$0xff] }
 0x3af   : > { %9061 = vmatpush1.bf16.msra.mxu0 %v9060_v52  ;;  %9125 = vmatpush1.bf16.msra.mxu1 %v9124_v24  ;;  %v7936_v52 = vld [vmem:[%s15785_s5 + $0x560] sm:$0xff]  ;;  %v9078_v24 = vpack.c.bf16 %v7937_v14, %v7933_v19  ;;  %v7966_v14 = vld [vmem:[%s15785_s5 + $0x650] sm:$0xff] }
 0x3b0   : > { %9063 = vmatprep.subr.bf16.mxu0 %v9062_v20  ;;  %9127 = vmatprep.subr.bf16.mxu1 %v9126_v9  ;;  %v7941_v20 = vld [vmem:[%s15785_s5 + $0x588] sm:$0xff]  ;;  %v9080_v36 = vpack.c.bf16 %v7936_v52, %v7932_v35  ;;  %v7979_v35 = vld [vmem:[%s15785_s5 + $0x6b8] sm:$0xff] }
 0x3b1   : > { %5296 = vmatmul.mubr.f32.gmra.mrb[56].mxu0 %v12384_v15  ;;  %5409 = vmatmul.mubr.f32.gmra.mrb[50].mxu1 %v12384_v15  ;;  %v9132_v15 = vpack.c.bf16 %v7914_v13, %v7910_v37  ;;  %v7945_v9 = vld [vmem:[%s15785_s5 + $0x5a8] sm:$0xff]  ;;  %v7948_v13 = vld [vmem:[%s15785_s5 + $0x5c0] sm:$0xff] }
 0x3b2   : > { %5301 = vmatprep.mubr.f32.mxu0 %v12452_v60  ;;  %5414 = vmatprep.mubr.f32.mxu1 %v12452_v60  ;;  %v7918_v60 = vld [vmem:[%s15785_s5 + $0x4d0] sm:$0xff] }
 0x3b3   : > { %9065 = vmatpush1.bf16.msra.mxu0 %v9064_v1  ;;  %9129 = vmatpush1.bf16.msra.mxu1 %v9128_v54  ;;  %v9082_v1 = vpack.c.bf16 %v7945_v9, %v7941_v20  ;;  %v9146_v54 = vpack.c.bf16 %v7947_v40, %v7943_v29  ;;  %v7976_v20 = vld [vmem:[%s15785_s5 + $0x6a0] sm:$0xff]  ;;  %v7974_v9 = vld [vmem:[%s15785_s5 + $0x690] sm:$0xff] }
 0x3b4   : > { %9067 = vmatprep.subr.bf16.mxu0 %v9066_v17  ;;  %9131 = vmatprep.subr.bf16.mxu1 %v9130_v22  ;;  %v7955_v17 = vld [vmem:[%s15785_s5 + $0x5f8] sm:$0xff]  ;;  %v3587_v22 = vadd.f32 %v12035_v5, %v12752_v16  ;;  %v7950_v5 = vld [vmem:[%s15785_s5 + $0x5d0] sm:$0xff] }
 0x3b5   : > { %5302 = vmatmul.mubr.f32.gmra.mrb[58].mxu0 %v12460_v58  ;;  %5415 = vmatmul.mubr.f32.gmra.mrb[52].mxu1 %v12460_v58  ;;  %v9136_v58 = vpack.c.bf16 %v7922_v59, %v7918_v60  ;;  %v7954_v16 = vld [vmem:[%s15785_s5 + $0x5f0] sm:$0xff]  ;;  %v7960_v60 = vld [vmem:[%s15785_s5 + $0x620] sm:$0xff] }
 0x3b6   : > { %5307 = vmatprep.mubr.f32.mxu0 %v12528_v42  ;;  %5420 = vmatprep.mubr.f32.mxu1 %v12528_v42  ;;  %v7926_v42 = vld [vmem:[%s15785_s5 + $0x510] sm:$0xff]  ;;  %v3611_v6 = vmax.f32 %v3587_v22, 0.0  ;;  %v7989_v22 = vld [vmem:[%s15785_s5 + $0x708] sm:$0xff] }
 0x3b7   : > { %9069 = vmatpush1.bf16.msra.mxu0 %v9068_v30  ;;  %9133 = vmatpush1.bf16.msra.mxu1 %v9132_v15  ;;  %v7961_v30 = vld [vmem:[%s15785_s5 + $0x628] sm:$0xff]  ;;  %v7959_v15 = vld [vmem:[%s15785_s5 + $0x618] sm:$0xff]  ;;  %v7978_v29 = vld [vmem:[%s15785_s5 + $0x6b0] sm:$0xff] }
 0x3b8   : > { %9071 = vmatprep.subr.bf16.mxu0 %v9070_v25  ;;  %9135 = vmatprep.subr.bf16.mxu1 %v9134_v3  ;;  %v9088_v25 = vpack.c.bf16 %v7952_v46, %v7948_v13  ;;  %v9152_v3 = vpack.c.bf16 %v7954_v16, %v7950_v5  ;;  %v9090_v59 = vpack.c.bf16 %v7961_v30, %v7957_v2  ;;  %v7995_v46 = vld [vmem:[%s15785_s5 + $0x738] sm:$0xff]  ;;  %v7990_v16 = vld [vmem:[%s15785_s5 + $0x710] sm:$0xff] }
 0x3b9   : > { %5308 = vmatmul.mubr.f32.gmra.mrb[60].mxu0 %v12536_v63  ;;  %5421 = vmatmul.mubr.f32.gmra.mrb[54].mxu1 %v12536_v63  ;;  %v9140_v63 = vpack.c.bf16 %v7930_v39, %v7926_v42  ;;  %v9154_v34 = vpack.c.bf16 %v7963_v48, %v7959_v15  ;;  %v7968_v42 = vld [vmem:[%s15785_s5 + $0x660] sm:$0xff]  ;;  %v7994_v2 = vld [vmem:[%s15785_s5 + $0x730] sm:$0xff]  ;;  %v7997_v15 = vld [vmem:[%s15785_s5 + $0x748] sm:$0xff] }
 0x3ba   : > { %5313 = vmatprep.mubr.f32.mxu0 %v12602_v43  ;;  %5426 = vmatprep.mubr.f32.mxu1 %v12602_v43  ;;  %v7934_v43 = vld [vmem:[%s15785_s5 + $0x550] sm:$0xff]  ;;  %v9172_v30 = vpack.c.bf16 %v7994_v2, %v7990_v16  ;;  %v8001_v48 = vld [vmem:[%s15785_s5 + $0x768] sm:$0xff] }
 0x3bb   : > { %9073 = vmatpush1.bf16.msra.mxu0 %v9072_v33  ;;  %9137 = vmatpush1.bf16.msra.mxu1 %v9136_v58  ;;  %v7969_v33 = vld [vmem:[%s15785_s5 + $0x668] sm:$0xff]  ;;  %v7967_v58 = vld [vmem:[%s15785_s5 + $0x658] sm:$0xff] }
 0x3bc   : > { %9075 = vmatprep.subr.bf16.mxu0 %v9074_v0  ;;  %9139 = vmatprep.subr.bf16.mxu1 %v9138_v47  ;;  %v9156_v0 = vpack.c.bf16 %v7962_v8, %v7958_v23  ;;  %v7964_v47 = vld [vmem:[%s15785_s5 + $0x640] sm:$0xff]  ;;  %v9094_v39 = vpack.c.bf16 %v7969_v33, %v7965_v51  ;;  %v9158_v19 = vpack.c.bf16 %v7971_v4, %v7967_v58  ;;  %v7998_v23 = vld [vmem:[%s15785_s5 + $0x750] sm:$0xff]  ;;  %v8005_v33 = vld [vmem:[%s15785_s5 + $0x788] sm:$0xff] }
 0x3bd   : > { %5314 = vmatmul.mubr.f32.gmra.mrb[62].mxu0 %v12610_v57  ;;  %5427 = vmatmul.mubr.f32.gmra.mrb[56].mxu1 %v12610_v57  ;;  %v9144_v57 = vpack.c.bf16 %v7938_v18, %v7934_v43  ;;  %v9096_v52 = vpack.c.bf16 %v7968_v42, %v7964_v47  ;;  %v8002_v8 = vld [vmem:[%s15785_s5 + $0x770] sm:$0xff]  ;;  %v8009_v58 = vld [vmem:[%s15785_s5 + $0x7a8] sm:$0xff]  ;;  %v8007_v4 = vld [vmem:[%s15785_s5 + $0x798] sm:$0xff] }
 0x3be   : > { %5319 = vmatprep.mubr.f32.mxu0 %v13282_v53  ;;  %5432 = vmatprep.mubr.f32.mxu1 %v13282_v53  ;;  %v7942_v53 = vld [vmem:[%s15785_s5 + $0x590] sm:$0xff]  ;;  %v9176_v51 = vpack.c.bf16 %v8002_v8, %v7998_v23  ;;  %v8004_v47 = vld [vmem:[%s15785_s5 + $0x780] sm:$0xff] }
 0x3bf   : > { %9077 = vmatpush1.bf16.msra.mxu0 %v9076_v45  ;;  %9141 = vmatpush1.bf16.msra.mxu1 %v9140_v63  ;;  %v9148_v37 = vpack.c.bf16 %v7946_v21, %v7942_v53  ;;  %v7977_v45 = vld [vmem:[%s15785_s5 + $0x6a8] sm:$0xff]  ;;  %v7975_v63 = vld [vmem:[%s15785_s5 + $0x698] sm:$0xff]  ;;  %v7984_v53 = vld [vmem:[%s15785_s5 + $0x6e0] sm:$0xff] }
 0x3c0   : > { %9079 = vmatprep.subr.bf16.mxu0 %v9078_v24  ;;  %9143 = vmatprep.subr.bf16.mxu1 %v9142_v55  ;;  %v9160_v24 = vpack.c.bf16 %v7970_v32, %v7966_v14  ;;  %v7972_v55 = vld [vmem:[%s15785_s5 + $0x680] sm:$0xff]  ;;  %v9098_v43 = vpack.c.bf16 %v7977_v45, %v7973_v11  ;;  %v9162_v18 = vpack.c.bf16 %v7979_v35, %v7975_v63  ;;  %v8006_v14 = vld [vmem:[%s15785_s5 + $0x790] sm:$0xff]  ;;  %v8013_v45 = vld [vmem:[%s15785_s5 + $0x7c8] sm:$0xff] }
 0x3c1   : > { %5320 = vmatmul.mubr.f32.gmra.mrb[64].mxu0 %v13306_v56  ;;  %5433 = vmatmul.mubr.f32.gmra.mrb[58].mxu1 %v13306_v56  ;;  %v9084_v56 = vpack.c.bf16 %v7944_v38, %v7940_v61  ;;  %v9100_v40 = vpack.c.bf16 %v7976_v20, %v7972_v55  ;;  %v7985_v61 = vld [vmem:[%s15785_s5 + $0x6e8] sm:$0xff]  ;;  %v7983_v38 = vld [vmem:[%s15785_s5 + $0x6d8] sm:$0xff]  ;;  %v8008_v42 = vld [vmem:[%s15785_s5 + $0x7a0] sm:$0xff] }
 0x3c2   : > { %5325 = vmatprep.mubr.f32.mxu0 %v13706_v28  ;;  %5438 = vmatprep.mubr.f32.mxu1 %v13706_v28  ;;  %v9150_v28 = vpack.c.bf16 %v7955_v17, %v7951_v7  ;;  %v7986_v7 = vld [vmem:[%s15785_s5 + $0x6f0] sm:$0xff]  ;;  %v8017_v63 = vld [vmem:[%s15785_s5 + $0x7e8] sm:$0xff]  ;;  %v8015_v35 = vld [vmem:[%s15785_s5 + $0x7d8] sm:$0xff] }
 0x3c3   : > { %9081 = vmatpush1.bf16.msra.mxu0 %v9080_v36  ;;  %9145 = vmatpush1.bf16.msra.mxu1 %v9144_v57  ;;  %v9164_v36 = vpack.c.bf16 %v7978_v29, %v7974_v9  ;;  %v7981_v57 = vld [vmem:[%s15785_s5 + $0x6c8] sm:$0xff]  ;;  %v9168_v17 = vpack.c.bf16 %v7986_v7, %v7982_v10  ;;  %v8010_v32 = vld [vmem:[%s15785_s5 + $0x7b0] sm:$0xff]  ;;  %v8012_v55 = vld [vmem:[%s15785_s5 + $0x7c0] sm:$0xff] }
 0x3c4   : > { %9083 = vmatprep.subr.bf16.mxu0 %v9082_v1  ;;  %9147 = vmatprep.subr.bf16.mxu1 %v9146_v54  ;;  %v9102_v27 = vpack.c.bf16 %v7985_v61, %v7981_v57  ;;  %v7987_v1 = vld [vmem:[%s15785_s5 + $0x6f8] sm:$0xff]  ;;  %v7980_v54 = vld [vmem:[%s15785_s5 + $0x6c0] sm:$0xff]  ;;  %v9180_v11 = vpack.c.bf16 %v8010_v32, %v8006_v14  ;;  %v8014_v9 = vld [vmem:[%s15785_s5 + $0x7d0] sm:$0xff] }
 0x3c5   : > { %5326 = vmatmul.mubr.f32.gmra.mrb[66].mxu0 %v13730_v44  ;;  %5439 = vmatmul.mubr.f32.gmra.mrb[60].mxu1 %v13730_v44  ;;  %v7956_v44 = vld [vmem:[%s15785_s5 + $0x600] sm:$0xff]  ;;  %v9166_v21 = vpack.c.bf16 %v7987_v1, %v7983_v38  ;;  %v9104_v50 = vpack.c.bf16 %v7984_v53, %v7980_v54  ;;  %v8018_v29 = vld [vmem:[%s15785_s5 + $0x7f0] sm:$0xff]  ;;  %v5540_v57 = vld [vmem:[%s15785_s5 + $0x28] sm:$0xff] }
 0x3c6   : > { %5331 = vmatprep.mubr.f32.mxu0 %v3612_v26  ;;  %5444 = vmatprep.mubr.f32.mxu1 %v3612_v26  ;;  %v9092_v12 = vpack.c.bf16 %v7960_v60, %v7956_v44  ;;  %v7988_v26 = vld [vmem:[%s15785_s5 + $0x700] sm:$0xff]  ;;  %v5538_v61 = vld [vmem:[%s15785_s5 + $0x18] sm:$0xff]  ;;  %v5541_v14 = vld [vmem:[%s15785_s5 + $0x30] sm:$0xff] }
 0x3c7   : > { %9085 = vmatpush1.bf16.msra.mxu0 %v9084_v56  ;;  %9149 = vmatpush1.bf16.msra.mxu1 %v9148_v37  ;;  %v7993_v56 = vld [vmem:[%s15785_s5 + $0x728] sm:$0xff]  ;;  %v7991_v37 = vld [vmem:[%s15785_s5 + $0x718] sm:$0xff]  ;;  %v7996_v44 = vld [vmem:[%s15785_s5 + $0x740] sm:$0xff] }
 0x3c8   : > { %9087 = vmatprep.subr.bf16.mxu0 %v9086_v41  ;;  %9151 = vmatprep.subr.bf16.mxu1 %v9150_v28  ;;  %v9106_v13 = vpack.c.bf16 %v7993_v56, %v7989_v22  ;;  %v7992_v41 = vld [vmem:[%s15785_s5 + $0x720] sm:$0xff]  ;;  %v9170_v28 = vpack.c.bf16 %v7995_v46, %v7991_v37 }
 0x3c9   : > { %5332 = vmatmul.mubr.f32.gmra.mrb[68].mxu0 %v3611_v6  ;;  %5445 = vmatmul.mubr.f32.gmra.mrb[62].mxu1 %v3611_v6  ;;  %v9108_v5 = vpack.c.bf16 %v7992_v41, %v7988_v26  ;;  %v7999_v6 = vld [vmem:[%s15785_s5 + $0x758] sm:$0xff]  ;;  %v8000_v60 = vld [vmem:[%s15785_s5 + $0x760] sm:$0xff] }
 0x3ca   : > { %v5507_v10 = vld [vmem:[%s15784_s4] sm:$0x3] }
 0x3cb   : > { %9089 = vmatpush1.bf16.msra.mxu0 %v9088_v25  ;;  %9153 = vmatpush1.bf16.msra.mxu1 %v9152_v3  ;;  %v9110_v25 = vpack.c.bf16 %v8001_v48, %v7997_v15  ;;  %v8003_v3 = vld [vmem:[%s15785_s5 + $0x778] sm:$0xff]  ;;  %v14346_v37 = vrot.slane %v5507_v10, %v12020_v62 }
 0x3cc   : > { %9091 = vmatprep.subr.bf16.mxu0 %v9090_v59  ;;  %9155 = vmatprep.subr.bf16.mxu1 %v9154_v34  ;;  %v9174_v59 = vpack.c.bf16 %v8003_v3, %v7999_v6  ;;  %v9112_v34 = vpack.c.bf16 %v8000_v60, %v7996_v44 }
 0x3cf   : > { %9093 = vmatpush1.bf16.msra.mxu0 %v9092_v12  ;;  %9157 = vmatpush1.bf16.msra.mxu1 %v9156_v0  ;;  %v9114_v12 = vpack.c.bf16 %v8009_v58, %v8005_v33  ;;  %v8011_v0 = vld [vmem:[%s15785_s5 + $0x7b8] sm:$0xff] }
 0x3d0   : > { %9095 = vmatprep.subr.bf16.mxu0 %v9094_v39  ;;  %9159 = vmatprep.subr.bf16.mxu1 %v9158_v19  ;;  %v9178_v39 = vpack.c.bf16 %v8011_v0, %v8007_v4  ;;  %v9116_v19 = vpack.c.bf16 %v8008_v42, %v8004_v47 }
 0x3d3   : > { %9097 = vmatpush1.bf16.msra.mxu0 %v9096_v52  ;;  %9161 = vmatpush1.bf16.msra.mxu1 %v9160_v24  ;;  %v9118_v52 = vpack.c.bf16 %v8017_v63, %v8013_v45  ;;  %v8019_v24 = vld [vmem:[%s15785_s5 + $0x7f8] sm:$0xff]  ;;  %v5548_v45 = vld [vmem:[%s15785_s5 + $0x68] sm:$0xff] }
 0x3d4   : > { %9099 = vmatprep.subr.bf16.mxu0 %v9098_v43  ;;  %9163 = vmatprep.subr.bf16.mxu1 %v9162_v18  ;;  %v8016_v43 = vld [vmem:[%s15785_s5 + $0x7e0] sm:$0xff]  ;;  %v9182_v18 = vpack.c.bf16 %v8019_v24, %v8015_v35  ;;  %v5546_v35 = vld [vmem:[%s15785_s5 + $0x58] sm:$0xff] }
 0x3d5   : > { %v9120_v20 = vpack.c.bf16 %v8016_v43, %v8012_v55 }
 0x3d7   : > { %9101 = vmatpush1.bf16.msra.mxu0 %v9100_v40  ;;  %9165 = vmatpush1.bf16.msra.mxu1 %v9164_v36  ;;  %v9184_v40 = vpack.c.bf16 %v8018_v29, %v8014_v9  ;;  %v5536_v36 = vld [vmem:[%s15785_s5 + $0x8] sm:$0xff]  ;;  %v5543_v9 = vld [vmem:[%s15785_s5 + $0x40] sm:$0xff] }
 0x3d8   : > { %9103 = vmatprep.subr.bf16.mxu0 %v9102_v27  ;;  %9167 = vmatprep.subr.bf16.mxu1 %v9166_v21  ;;  %v9186_v38 = vpack.c.bf16 %v5540_v57, %v5536_v36  ;;  %v5542_v27 = vld [vmem:[%s15785_s5 + $0x38] sm:$0xff]  ;;  %v5547_v29 = vld [vmem:[%s15785_s5 + $0x60] sm:$0xff] }
 0x3d9   : > { %v9250_v1 = vpack.c.bf16 %v5542_v27, %v5538_v61 }
 0x3db   : > { %9105 = vmatpush1.bf16.msra.mxu0 %v9104_v50  ;;  %9169 = vmatpush1.bf16.msra.mxu1 %v9168_v17 }
 0x3dc   : > { %9107 = vmatprep.subr.bf16.mxu0 %v9106_v13  ;;  %9171 = vmatprep.subr.bf16.mxu1 %v9170_v28 }
 0x3df   : > { %9109 = vmatpush1.bf16.msra.mxu0 %v9108_v5  ;;  %9173 = vmatpush1.bf16.msra.mxu1 %v9172_v30 }
 0x3e0   : > { %9111 = vmatprep.subr.bf16.mxu0 %v9110_v25  ;;  %9175 = vmatprep.subr.bf16.mxu1 %v9174_v59 }
 0x3e3   : > { %9113 = vmatpush1.bf16.msra.mxu0 %v9112_v34  ;;  %9177 = vmatpush1.bf16.msra.mxu1 %v9176_v51  ;;  %v14352_v51 = vrot.slane %v5507_v10, %v12026_v31 }
 0x3e4   : > { %9115 = vmatprep.subr.bf16.mxu0 %v9114_v12  ;;  %9179 = vmatprep.subr.bf16.mxu1 %v9178_v39  ;;  %v5535_v12 = vld [vmem:[%s15785_s5] sm:$0xff] }
 0x3e5   : > { %v5539_v39 = vld [vmem:[%s15785_s5 + $0x20] sm:$0xff] }
 0x3e7   : > { %9117 = vmatpush1.bf16.msra.mxu0 %v9116_v19  ;;  %9181 = vmatpush1.bf16.msra.mxu1 %v9180_v11  ;;  %v5537_v19 = vld [vmem:[%s15785_s5 + $0x10] sm:$0xff]  ;;  %v5544_v11 = vld [vmem:[%s15785_s5 + $0x48] sm:$0xff] }
 0x3e8   : > { %9119 = vmatprep.subr.bf16.mxu0 %v9118_v52  ;;  %9183 = vmatprep.subr.bf16.mxu1 %v9182_v18  ;;  %v5550_v52 = vld [vmem:[%s15785_s5 + $0x78] sm:$0xff]  ;;  %v9188_v18 = vpack.c.bf16 %v5539_v39, %v5535_v12  ;;  %v9190_v27 = vpack.c.bf16 %v5548_v45, %v5544_v11  ;;  %v5563_v39 = vld [vmem:[%s15785_s5 + $0xe0] sm:$0xff] }
 0x3e9   : > { %v9254_v10 = vpack.c.bf16 %v5550_v52, %v5546_v35  ;;  %v5565_v35 = vld [vmem:[%s15785_s5 + $0xf0] sm:$0xff]  ;;  %v5568_v52 = vld [vmem:[%s15785_s5 + $0x108] sm:$0xff] }
 0x3eb   : > { %9121 = vmatpush1.bf16.msra.mxu0 %v9120_v20  ;;  %9185 = vmatpush1.bf16.msra.mxu1 %v9184_v40  ;;  %v9252_v20 = vpack.c.bf16 %v5541_v14, %v5537_v19 }
 0x3ec   : > { %9187 = vmatprep.subr.bf16.mxu0 %v9186_v38  ;;  %9251 = vmatprep.subr.bf16.mxu1 %v9250_v1  ;;  %v5545_v1 = vld [vmem:[%s15785_s5 + $0x50] sm:$0xff] }
 0x480   : > { %v5291_v54 = vpop.f32.mrb[54].mxu0  ;;  %v5404_v53 = vpop.f32.mrb[48].mxu1 }
 0x481   : > { %v5293_v21 = vpop.f32.mrb[55].mxu0  ;;  %v5406_v50 = vpop.f32.mrb[49].mxu1 }
 0x484   : > { %v5297_v7 = vpop.f32.mrb[56].mxu0  ;;  %v5410_v17 = vpop.f32.mrb[50].mxu1 }
 0x485   : > { %v5483_v22 = vmax.f32 %v5291_v54, %v5297_v7  ;;  %v5485_v56 = vmax.f32 %v5404_v53, %v5410_v17  ;;  %v5299_v13 = vpop.f32.mrb[57].mxu0  ;;  %v5412_v46 = vpop.f32.mrb[51].mxu1  ;;  %v5549_v54 = vld [vmem:[%s15785_s5 + $0x70] sm:$0xff]  ;;  %v5552_v53 = vld [vmem:[%s15785_s5 + $0x88] sm:$0xff]  ;;  %v5554_v17 = vld [vmem:[%s15785_s5 + $0x98] sm:$0xff] }
 0x486   : > { %v5484_v26 = vmax.f32 %v5293_v21, %v5299_v13  ;;  %v5486_v41 = vmax.f32 %v5406_v50, %v5412_v46  ;;  %v5556_v7 = vld [vmem:[%s15785_s5 + $0xa8] sm:$0xff] }
 0x487   : > { %v5499_v28 = vmax.f32 %v5483_v22, %v5485_v56  ;;  %v5558_v22 = vld [vmem:[%s15785_s5 + $0xb8] sm:$0xff] }
 0x488   : > { %v5500_v5 = vmax.f32 %v5484_v26, %v5486_v41  ;;  %v5303_v16 = vpop.f32.mrb[58].mxu0  ;;  %v5416_v2 = vpop.f32.mrb[52].mxu1 }
 0x489   : > { %v14349_v30 = vadd.f32 %v14346_v37, %v5499_v28  ;;  %v5305_v15 = vpop.f32.mrb[59].mxu0  ;;  %v5418_v48 = vpop.f32.mrb[53].mxu1  ;;  %v9192_v28 = vpack.c.bf16 %v5547_v29, %v5543_v9 }
 0x48a   : > { %v5520_v63 = vadd.f32 %v14352_v51, %v5500_v5  ;;  %v9256_v5 = vpack.c.bf16 %v5549_v54, %v5545_v1  ;;  %v5569_v54 = vld [vmem:[%s15785_s5 + $0x110] sm:$0xff] }
 0x48c   : > { %v5309_v6 = vpop.f32.mrb[60].mxu0  ;;  %v5422_v25 = vpop.f32.mrb[54].mxu1  ;;  %v5528_v13 = vmax.f32 %v5520_v63, 0.0  ;;  %v5561_v63 = vld [vmem:[%s15785_s5 + $0xd0] sm:$0xff] }
 0x48d   : > { %v5487_v3 = vmax.f32 %v5303_v16, %v5309_v6  ;;  %v5489_v44 = vmax.f32 %v5416_v2, %v5422_v25  ;;  %v5311_v60 = vpop.f32.mrb[61].mxu0  ;;  %v5424_v59 = vpop.f32.mrb[55].mxu1  ;;  %v5551_v16 = vld [vmem:[%s15785_s5 + $0x80] sm:$0xff] }
 0x48e   : > { %v5488_v34 = vmax.f32 %v5305_v15, %v5311_v60  ;;  %v5490_v23 = vmax.f32 %v5418_v48, %v5424_v59  ;;  %v5555_v2 = vld [vmem:[%s15785_s5 + $0xa0] sm:$0xff]  ;;  %v5553_v15 = vld [vmem:[%s15785_s5 + $0x90] sm:$0xff]  ;;  %v5560_v59 = vld [vmem:[%s15785_s5 + $0xc8] sm:$0xff] }
 0x48f   : > { %v5501_v8 = vmax.f32 %v5487_v3, %v5489_v44  ;;  %v9194_v3 = vpack.c.bf16 %v5556_v7, %v5552_v53  ;;  %v9258_v44 = vpack.c.bf16 %v5558_v22, %v5554_v17  ;;  %v5557_v60 = vld [vmem:[%s15785_s5 + $0xb0] sm:$0xff]  ;;  %v9196_v12 = vpack.c.bf16 %v5555_v2, %v5551_v16  ;;  %v5586_v16 = vld [vmem:[%s15785_s5 + $0x198] sm:$0xff] }
 0x490   : > { %v5502_v33 = vmax.f32 %v5488_v34, %v5490_v23  ;;  %v5315_v58 = vpop.f32.mrb[62].mxu0  ;;  %v5428_v4 = vpop.f32.mrb[56].mxu1  ;;  %v5564_v34 = vld [vmem:[%s15785_s5 + $0xe8] sm:$0xff]  ;;  %v5562_v23 = vld [vmem:[%s15785_s5 + $0xd8] sm:$0xff]  ;;  %v5573_v53 = vld [vmem:[%s15785_s5 + $0x130] sm:$0xff] }
 0x491   : > { %v5521_v0 = vadd.f32 %v14346_v37, %v5501_v8  ;;  %v5317_v47 = vpop.f32.mrb[63].mxu0  ;;  %v5430_v42 = vpop.f32.mrb[57].mxu1  ;;  %v5566_v8 = vld [vmem:[%s15785_s5 + $0xf8] sm:$0xff]  ;;  %v9268_v22 = vpack.c.bf16 %v5573_v53, %v5569_v54  ;;  %v5607_v54 = vld [vmem:[%s15785_s5 + $0x240] sm:$0xff] }
 0x492   : > { %v5522_v32 = vadd.f32 %v14352_v51, %v5502_v33  ;;  %v9262_v45 = vpack.c.bf16 %v5566_v8, %v5562_v23  ;;  %v5590_v2 = vld [vmem:[%s15785_s5 + $0x1b8] sm:$0xff]  ;;  %v5592_v23 = vld [vmem:[%s15785_s5 + $0x1c8] sm:$0xff]  ;;  %v5611_v53 = vld [vmem:[%s15785_s5 + $0x260] sm:$0xff] }
 0x493   : > { %v5529_v40 = vmax.f32 %v5521_v0, 0.0  ;;  %v9260_v0 = vpack.c.bf16 %v5557_v60, %v5553_v15  ;;  %v9274_v60 = vpack.c.bf16 %v5590_v2, %v5586_v16  ;;  %v5596_v8 = vld [vmem:[%s15785_s5 + $0x1e8] sm:$0xff]  ;;  %v5617_v16 = vld [vmem:[%s15785_s5 + $0x290] sm:$0xff] }
 0x494   : > { %v5321_v24 = vpop.f32.mrb[64].mxu0  ;;  %v5434_v55 = vpop.f32.mrb[58].mxu1  ;;  %v5530_v43 = vmax.f32 %v5522_v32, 0.0  ;;  %v5621_v2 = vld [vmem:[%s15785_s5 + $0x2b0] sm:$0xff] }
 0x495   : > { %v5491_v36 = vmax.f32 %v5315_v58, %v5321_v24  ;;  %v5493_v57 = vmax.f32 %v5428_v4, %v5434_v55  ;;  %v5323_v61 = vpop.f32.mrb[65].mxu0  ;;  %v5436_v38 = vpop.f32.mrb[59].mxu1 }
 0x496   : > { %v5492_v21 = vmax.f32 %v5317_v47, %v5323_v61  ;;  %v5494_v50 = vmax.f32 %v5430_v42, %v5436_v38  ;;  %5856 = vmatprep.mubr.f32.mxu0 %v5530_v43  ;;  %5927 = vmatprep.mubr.f32.mxu1 %v5530_v43  ;;  %v9198_v47 = vpack.c.bf16 %v5564_v34, %v5560_v59  ;;  %v5559_v42 = vld [vmem:[%s15785_s5 + $0xc0] sm:$0xff]  ;;  %v5572_v43 = vld [vmem:[%s15785_s5 + $0x128] sm:$0xff]  ;;  %v5585_v59 = vld [vmem:[%s15785_s5 + $0x190] sm:$0xff] }
 0x497   : > { %v5503_v56 = vmax.f32 %v5491_v36, %v5493_v57  ;;  %5857 = vmatmul.mubr.f32.vlgmr.msra.gmra.mrb[70].mxu0 %v5529_v40  ;;  %5928 = vmatmul.mubr.f32.vlgmr.msra.gmra.mrb[64].mxu1 %v5529_v40  ;;  %v9200_v40 = vpack.c.bf16 %v5563_v39, %v5559_v42  ;;  %v9264_v36 = vpack.c.bf16 %v5565_v35, %v5561_v63  ;;  %v5567_v57 = vld [vmem:[%s15785_s5 + $0x100] sm:$0xff]  ;;  %v5589_v34 = vld [vmem:[%s15785_s5 + $0x1b0] sm:$0xff]  ;;  %v5602_v63 = vld [vmem:[%s15785_s5 + $0x218] sm:$0xff] }
 0x498   : > { %v5504_v46 = vmax.f32 %v5492_v21, %v5494_v50  ;;  %9189 = vmatpush1.bf16.msra.mxu0 %v9188_v18  ;;  %9253 = vmatpush1.bf16.msra.mxu1 %v9252_v20  ;;  %v5327_v26 = vpop.f32.mrb[66].mxu0  ;;  %v5440_v41 = vpop.f32.mrb[60].mxu1  ;;  %v5570_v18 = vld [vmem:[%s15785_s5 + $0x118] sm:$0xff]  ;;  %v5571_v61 = vld [vmem:[%s15785_s5 + $0x120] sm:$0xff]  ;;  %v5576_v21 = vld [vmem:[%s15785_s5 + $0x148] sm:$0xff]  ;;  %v9214_v39 = vpack.c.bf16 %v5596_v8, %v5592_v23 }
 0x499   : > { %v14415_v48 = vadd.f32 %v14346_v37, %v5503_v56  ;;  %5998 = vmatprep.mubr.f32.mxu0 %v5528_v13  ;;  %6069 = vmatprep.mubr.f32.mxu1 %v5528_v13  ;;  %v5329_v6 = vpop.f32.mrb[67].mxu0  ;;  %v5442_v25 = vpop.f32.mrb[61].mxu1  ;;  %v5574_v20 = vld [vmem:[%s15785_s5 + $0x138] sm:$0xff]  ;;  %v9204_v17 = vpack.c.bf16 %v5571_v61, %v5567_v57  ;;  %v5575_v56 = vld [vmem:[%s15785_s5 + $0x140] sm:$0xff] }
 0x49a   : > { %9191 = vmatprep.subr.bf16.mxu0 %v9190_v27  ;;  %9255 = vmatprep.subr.bf16.mxu1 %v9254_v10  ;;  %v14433_v33 = vadd.f32 %v14352_v51, %v5504_v46  ;;  %v9202_v27 = vpack.c.bf16 %v5572_v43, %v5568_v52  ;;  %v9266_v1 = vpack.c.bf16 %v5574_v20, %v5570_v18  ;;  %v5578_v50 = vld [vmem:[%s15785_s5 + $0x158] sm:$0xff]  ;;  %v5579_v13 = vld [vmem:[%s15785_s5 + $0x160] sm:$0xff] }
 0x49b   : > { %v5582_v10 = vld [vmem:[%s15785_s5 + $0x178] sm:$0xff]  ;;  %v9208_v15 = vpack.c.bf16 %v5579_v13, %v5575_v56  ;;  %v5595_v42 = vld [vmem:[%s15785_s5 + $0x1e0] sm:$0xff] }
 0x49c   : > { %9193 = vmatpush1.bf16.msra.mxu0 %v9192_v28  ;;  %9257 = vmatpush1.bf16.msra.mxu1 %v9256_v5  ;;  %v5333_v58 = vpop.f32.mrb[68].mxu0  ;;  %v5446_v4 = vpop.f32.mrb[62].mxu1  ;;  %v5584_v28 = vld [vmem:[%s15785_s5 + $0x188] sm:$0xff]  ;;  %v5606_v35 = vld [vmem:[%s15785_s5 + $0x238] sm:$0xff]  ;;  %v5603_v43 = vld [vmem:[%s15785_s5 + $0x220] sm:$0xff] }
 0x49d   : > { %v5495_v19 = vmax.f32 %v5327_v26, %v5333_v58  ;;  %v5497_v14 = vmax.f32 %v5440_v41, %v5446_v4  ;;  %v5335_v32 = vpop.f32.mrb[69].mxu0  ;;  %v5448_v11 = vpop.f32.mrb[63].mxu1  ;;  %9195 = vmatprep.subr.bf16.mxu0 %v9194_v3  ;;  %9259 = vmatprep.subr.bf16.mxu1 %v9258_v44  ;;  %v9270_v26 = vpack.c.bf16 %v5582_v10, %v5578_v50  ;;  %v5581_v41 = vld [vmem:[%s15785_s5 + $0x170] sm:$0xff]  ;;  %v5588_v5 = vld [vmem:[%s15785_s5 + $0x1a8] sm:$0xff]  ;;  %v5587_v3 = vld [vmem:[%s15785_s5 + $0x1a0] sm:$0xff] }
 0x49e   : > { %v5496_v24 = vmax.f32 %v5329_v6, %v5335_v32  ;;  %v5498_v55 = vmax.f32 %v5442_v25, %v5448_v11  ;;  %v5583_v25 = vld [vmem:[%s15785_s5 + $0x180] sm:$0xff]  ;;  %v9210_v44 = vpack.c.bf16 %v5588_v5, %v5584_v28  ;;  %v5594_v58 = vld [vmem:[%s15785_s5 + $0x1d8] sm:$0xff]  ;;  %v5597_v32 = vld [vmem:[%s15785_s5 + $0x1f0] sm:$0xff]  ;;  %v9282_v20 = vpack.c.bf16 %v5606_v35, %v5602_v63 }
 0x49f   : > { %v5505_v9 = vmax.f32 %v5495_v19, %v5497_v14  ;;  %v5598_v4 = vld [vmem:[%s15785_s5 + $0x1f8] sm:$0xff]  ;;  %v5593_v14 = vld [vmem:[%s15785_s5 + $0x1d0] sm:$0xff]  ;;  %v5600_v11 = vld [vmem:[%s15785_s5 + $0x208] sm:$0xff] }
 0x4a0   : > { %v5506_v29 = vmax.f32 %v5496_v24, %v5498_v55  ;;  %9197 = vmatpush1.bf16.msra.mxu0 %v9196_v12  ;;  %9261 = vmatpush1.bf16.msra.mxu1 %v9260_v0  ;;  %v9212_v12 = vpack.c.bf16 %v5587_v3, %v5583_v25  ;;  %v9276_v0 = vpack.c.bf16 %v5589_v34, %v5585_v59  ;;  %v5599_v55 = vld [vmem:[%s15785_s5 + $0x200] sm:$0xff]  ;;  %v5610_v57 = vld [vmem:[%s15785_s5 + $0x258] sm:$0xff]  ;;  %v5609_v50 = vld [vmem:[%s15785_s5 + $0x250] sm:$0xff] }
 0x4a1   : > { %v14466_v38 = vadd.f32 %v14346_v37, %v5505_v9  ;;  %9199 = vmatprep.subr.bf16.mxu0 %v9198_v47  ;;  %9263 = vmatprep.subr.bf16.mxu1 %v9262_v45  ;;  %v5580_v37 = vld [vmem:[%s15785_s5 + $0x168] sm:$0xff]  ;;  %v5591_v47 = vld [vmem:[%s15785_s5 + $0x1c0] sm:$0xff]  ;;  %v9278_v19 = vpack.c.bf16 %v5598_v4, %v5594_v58  ;;  %v9280_v24 = vpack.c.bf16 %v5597_v32, %v5593_v14  ;;  %v5601_v9 = vld [vmem:[%s15785_s5 + $0x210] sm:$0xff] }
 0x4a2   : > { %v14487_v7 = vadd.f32 %v14352_v51, %v5506_v29  ;;  %v9206_v46 = vpack.c.bf16 %v5580_v37, %v5576_v21  ;;  %v5577_v51 = vld [vmem:[%s15785_s5 + $0x150] sm:$0xff]  ;;  %v5604_v45 = vld [vmem:[%s15785_s5 + $0x228] sm:$0xff]  ;;  %v9216_v52 = vpack.c.bf16 %v5595_v42, %v5591_v47  ;;  %v5614_v61 = vld [vmem:[%s15785_s5 + $0x278] sm:$0xff] }
 0x4a3   : > { %v9272_v6 = vpack.c.bf16 %v5581_v41, %v5577_v51  ;;  %v9218_v18 = vpack.c.bf16 %v5604_v45, %v5600_v11  ;;  %v5605_v29 = vld [vmem:[%s15785_s5 + $0x230] sm:$0xff]  ;;  %v9286_v37 = vpack.c.bf16 %v5614_v61, %v5610_v57  ;;  %v5618_v56 = vld [vmem:[%s15785_s5 + $0x298] sm:$0xff]  ;;  %v5615_v51 = vld [vmem:[%s15785_s5 + $0x280] sm:$0xff] }
 0x4a4   : > { %9201 = vmatpush1.bf16.msra.mxu0 %v9200_v40  ;;  %9265 = vmatpush1.bf16.msra.mxu1 %v9264_v36  ;;  %v5608_v40 = vld [vmem:[%s15785_s5 + $0x248] sm:$0xff]  ;;  %v5613_v10 = vld [vmem:[%s15785_s5 + $0x270] sm:$0xff]  ;;  %v5622_v13 = vld [vmem:[%s15785_s5 + $0x2b8] sm:$0xff] }
 0x4a5   : > { %9203 = vmatprep.subr.bf16.mxu0 %v9202_v27  ;;  %9267 = vmatprep.subr.bf16.mxu1 %v9266_v1  ;;  %v5612_v36 = vld [vmem:[%s15785_s5 + $0x268] sm:$0xff]  ;;  %v9220_v27 = vpack.c.bf16 %v5603_v43, %v5599_v55  ;;  %v9284_v1 = vpack.c.bf16 %v5605_v29, %v5601_v9  ;;  %v5619_v41 = vld [vmem:[%s15785_s5 + $0x2a0] sm:$0xff]  ;;  %v9290_v5 = vpack.c.bf16 %v5622_v13, %v5618_v56  ;;  %v5626_v25 = vld [vmem:[%s15785_s5 + $0x2d8] sm:$0xff] }
 0x4a6   : > { %v9222_v21 = vpack.c.bf16 %v5612_v36, %v5608_v40  ;;  %v5630_v3 = vld [vmem:[%s15785_s5 + $0x2f8] sm:$0xff]  ;;  %v5623_v59 = vld [vmem:[%s15785_s5 + $0x2c0] sm:$0xff]  ;;  %v5625_v58 = vld [vmem:[%s15785_s5 + $0x2d0] sm:$0xff] }
 0x4a7   : > { %v5627_v34 = vld [vmem:[%s15785_s5 + $0x2e0] sm:$0xff]  ;;  %v9294_v8 = vpack.c.bf16 %v5630_v3, %v5626_v25  ;;  %v5629_v4 = vld [vmem:[%s15785_s5 + $0x2f0] sm:$0xff]  ;;  %v5634_v47 = vld [vmem:[%s15785_s5 + $0x318] sm:$0xff] }
 0x4a8   : > { %9205 = vmatpush1.bf16.msra.mxu0 %v9204_v17  ;;  %9269 = vmatpush1.bf16.msra.mxu1 %v9268_v22  ;;  %v5616_v17 = vld [vmem:[%s15785_s5 + $0x288] sm:$0xff]  ;;  %v5638_v42 = vld [vmem:[%s15785_s5 + $0x338] sm:$0xff]  ;;  %v5631_v14 = vld [vmem:[%s15785_s5 + $0x300] sm:$0xff] }
 0x4a9   : > { %9207 = vmatprep.subr.bf16.mxu0 %v9206_v46  ;;  %9271 = vmatprep.subr.bf16.mxu1 %v9270_v26  ;;  %v5620_v22 = vld [vmem:[%s15785_s5 + $0x2a8] sm:$0xff]  ;;  %v9224_v46 = vpack.c.bf16 %v5611_v53, %v5607_v54  ;;  %v9288_v26 = vpack.c.bf16 %v5613_v10, %v5609_v50  ;;  %v5635_v32 = vld [vmem:[%s15785_s5 + $0x320] sm:$0xff]  ;;  %v9298_v45 = vpack.c.bf16 %v5638_v42, %v5634_v47  ;;  %v5633_v63 = vld [vmem:[%s15785_s5 + $0x310] sm:$0xff] }
 0x4aa   : > { %v9226_v28 = vpack.c.bf16 %v5620_v22, %v5616_v17  ;;  %v5637_v35 = vld [vmem:[%s15785_s5 + $0x330] sm:$0xff]  ;;  %v5642_v55 = vld [vmem:[%s15785_s5 + $0x358] sm:$0xff]  ;;  %v5639_v9 = vld [vmem:[%s15785_s5 + $0x340] sm:$0xff] }
 0x4ab   : > { %v5646_v43 = vld [vmem:[%s15785_s5 + $0x378] sm:$0xff]  ;;  %v5643_v29 = vld [vmem:[%s15785_s5 + $0x360] sm:$0xff]  ;;  %v5641_v57 = vld [vmem:[%s15785_s5 + $0x350] sm:$0xff] }
 0x4ac   : > { %9209 = vmatpush1.bf16.msra.mxu0 %v9208_v15  ;;  %9273 = vmatpush1.bf16.msra.mxu1 %v9272_v6  ;;  %v5624_v15 = vld [vmem:[%s15785_s5 + $0x2c8] sm:$0xff]  ;;  %v9302_v36 = vpack.c.bf16 %v5646_v43, %v5642_v55  ;;  %v5645_v61 = vld [vmem:[%s15785_s5 + $0x370] sm:$0xff]  ;;  %v5650_v54 = vld [vmem:[%s15785_s5 + $0x398] sm:$0xff]  ;;  %v5532_v55 = vmax.f32 %v14433_v33, 0.0 }
 0x4ad   : > { %9211 = vmatprep.subr.bf16.mxu0 %v9210_v44  ;;  %9275 = vmatprep.subr.bf16.mxu1 %v9274_v60  ;;  %v5628_v6 = vld [vmem:[%s15785_s5 + $0x2e8] sm:$0xff]  ;;  %v9228_v44 = vpack.c.bf16 %v5619_v41, %v5615_v51  ;;  %v9292_v60 = vpack.c.bf16 %v5621_v2, %v5617_v16  ;;  %v5654_v53 = vld [vmem:[%s15785_s5 + $0x3b8] sm:$0xff]  ;;  %v5647_v50 = vld [vmem:[%s15785_s5 + $0x380] sm:$0xff] }
 0x4ae   : > { %v9230_v23 = vpack.c.bf16 %v5628_v6, %v5624_v15  ;;  %v5651_v10 = vld [vmem:[%s15785_s5 + $0x3a0] sm:$0xff]  ;;  %v9306_v22 = vpack.c.bf16 %v5654_v53, %v5650_v54  ;;  %v5649_v56 = vld [vmem:[%s15785_s5 + $0x390] sm:$0xff]  ;;  %v5658_v51 = vld [vmem:[%s15785_s5 + $0x3d8] sm:$0xff] }
 0x4af   : > { %v5653_v13 = vld [vmem:[%s15785_s5 + $0x3b0] sm:$0xff]  ;;  %v5662_v41 = vld [vmem:[%s15785_s5 + $0x3f8] sm:$0xff]  ;;  %v5655_v16 = vld [vmem:[%s15785_s5 + $0x3c0] sm:$0xff] }
 0x4b0   : > { %9213 = vmatpush1.bf16.msra.mxu0 %v9212_v12  ;;  %9277 = vmatpush1.bf16.msra.mxu1 %v9276_v0  ;;  %v5632_v12 = vld [vmem:[%s15785_s5 + $0x308] sm:$0xff]  ;;  %v5659_v2 = vld [vmem:[%s15785_s5 + $0x3e0] sm:$0xff]  ;;  %v9310_v6 = vpack.c.bf16 %v5662_v41, %v5658_v51  ;;  %v5657_v25 = vld [vmem:[%s15785_s5 + $0x3d0] sm:$0xff] }
 0x4b1   : > { %9215 = vmatprep.subr.bf16.mxu0 %v9214_v39  ;;  %9279 = vmatprep.subr.bf16.mxu1 %v9278_v19  ;;  %v5636_v0 = vld [vmem:[%s15785_s5 + $0x328] sm:$0xff]  ;;  %v9232_v39 = vpack.c.bf16 %v5627_v34, %v5623_v59  ;;  %v9296_v19 = vpack.c.bf16 %v5629_v4, %v5625_v58  ;;  %v5661_v3 = vld [vmem:[%s15785_s5 + $0x3f0] sm:$0xff]  ;;  %v8023_v59 = vld [vmem:[%s15785_s5 + $0x818] sm:$0xff] }
 0x4b2   : > { %v9234_v11 = vpack.c.bf16 %v5636_v0, %v5632_v12  ;;  %v8027_v34 = vld [vmem:[%s15785_s5 + $0x838] sm:$0xff]  ;;  %v8020_v12 = vld [vmem:[%s15785_s5 + $0x800] sm:$0xff]  ;;  %v8022_v47 = vld [vmem:[%s15785_s5 + $0x810] sm:$0xff] }
 0x4b3   : > { %v9378_v4 = vpack.c.bf16 %v8027_v34, %v8023_v59  ;;  %v8024_v0 = vld [vmem:[%s15785_s5 + $0x820] sm:$0xff]  ;;  %v8026_v42 = vld [vmem:[%s15785_s5 + $0x830] sm:$0xff]  ;;  %v8039_v33 = vld [vmem:[%s15785_s5 + $0x898] sm:$0xff] }
 0x4b4   : > { %9217 = vmatpush1.bf16.msra.mxu0 %v9216_v52  ;;  %9281 = vmatpush1.bf16.msra.mxu1 %v9280_v24  ;;  %v5640_v52 = vld [vmem:[%s15785_s5 + $0x348] sm:$0xff]  ;;  %v8042_v53 = vld [vmem:[%s15785_s5 + $0x8b0] sm:$0xff] }
 0x4b5   : > { %9219 = vmatprep.subr.bf16.mxu0 %v9218_v18  ;;  %9283 = vmatprep.subr.bf16.mxu1 %v9282_v20  ;;  %v5644_v24 = vld [vmem:[%s15785_s5 + $0x368] sm:$0xff]  ;;  %v9236_v18 = vpack.c.bf16 %v5635_v32, %v5631_v14  ;;  %v9300_v20 = vpack.c.bf16 %v5637_v35, %v5633_v63  ;;  %v8031_v14 = vld [vmem:[%s15785_s5 + $0x858] sm:$0xff]  ;;  %v9380_v63 = vpack.c.bf16 %v8026_v42, %v8022_v47  ;;  %v8028_v35 = vld [vmem:[%s15785_s5 + $0x840] sm:$0xff] }
 0x4b6   : > { %v9238_v40 = vpack.c.bf16 %v5644_v24, %v5640_v52  ;;  %v8035_v32 = vld [vmem:[%s15785_s5 + $0x878] sm:$0xff]  ;;  %v8032_v52 = vld [vmem:[%s15785_s5 + $0x860] sm:$0xff]  ;;  %v8030_v24 = vld [vmem:[%s15785_s5 + $0x850] sm:$0xff] }
 0x4b7   : > { %v8050_v41 = vld [vmem:[%s15785_s5 + $0x8f0] sm:$0xff]  ;;  %v8060_v42 = vld [vmem:[%s15785_s5 + $0x940] sm:$0xff] }
 0x4b8   : > { %9221 = vmatpush1.bf16.msra.mxu0 %v9220_v27  ;;  %9285 = vmatpush1.bf16.msra.mxu1 %v9284_v1  ;;  %v5648_v27 = vld [vmem:[%s15785_s5 + $0x388] sm:$0xff]  ;;  %v8058_v34 = vld [vmem:[%s15785_s5 + $0x930] sm:$0xff] }
 0x4b9   : > { %9223 = vmatprep.subr.bf16.mxu0 %v9222_v21  ;;  %9287 = vmatprep.subr.bf16.mxu1 %v9286_v37  ;;  %v5652_v1 = vld [vmem:[%s15785_s5 + $0x3a8] sm:$0xff]  ;;  %v9240_v21 = vpack.c.bf16 %v5643_v29, %v5639_v9  ;;  %v9304_v37 = vpack.c.bf16 %v5645_v61, %v5641_v57  ;;  %v8043_v29 = vld [vmem:[%s15785_s5 + $0x8b8] sm:$0xff]  ;;  %v8036_v61 = vld [vmem:[%s15785_s5 + $0x880] sm:$0xff] }
 0x4ba   : > { %v9242_v17 = vpack.c.bf16 %v5652_v1, %v5648_v27  ;;  %v8041_v9 = vld [vmem:[%s15785_s5 + $0x8a8] sm:$0xff]  ;;  %v8040_v27 = vld [vmem:[%s15785_s5 + $0x8a0] sm:$0xff]  ;;  %v8038_v1 = vld [vmem:[%s15785_s5 + $0x890] sm:$0xff]  ;;  %v9386_v54 = vpack.c.bf16 %v8043_v29, %v8039_v33 }
 0x4bb   : > { %v8077_v33 = vld [vmem:[%s15785_s5 + $0x9c8] sm:$0xff] }
 0x4bc   : > { %9225 = vmatpush1.bf16.msra.mxu0 %v9224_v46  ;;  %9289 = vmatpush1.bf16.msra.mxu1 %v9288_v26  ;;  %v5656_v46 = vld [vmem:[%s15785_s5 + $0x3c8] sm:$0xff] }
 0x4bd   : > { %9227 = vmatprep.subr.bf16.mxu0 %v9226_v28  ;;  %9291 = vmatprep.subr.bf16.mxu1 %v9290_v5  ;;  %v5660_v26 = vld [vmem:[%s15785_s5 + $0x3e8] sm:$0xff]  ;;  %v9244_v28 = vpack.c.bf16 %v5651_v10, %v5647_v50  ;;  %v9308_v5 = vpack.c.bf16 %v5653_v13, %v5649_v56  ;;  %v8047_v50 = vld [vmem:[%s15785_s5 + $0x8d8] sm:$0xff]  ;;  %v8044_v13 = vld [vmem:[%s15785_s5 + $0x8c0] sm:$0xff] }
 0x4be   : > { %v9246_v15 = vpack.c.bf16 %v5660_v26, %v5656_v46  ;;  %v8051_v10 = vld [vmem:[%s15785_s5 + $0x8f8] sm:$0xff]  ;;  %v8048_v46 = vld [vmem:[%s15785_s5 + $0x8e0] sm:$0xff]  ;;  %v8046_v26 = vld [vmem:[%s15785_s5 + $0x8d0] sm:$0xff] }
 0x4bf   : > { %v9390_v51 = vpack.c.bf16 %v8051_v10, %v8047_v50  ;;  %v8081_v29 = vld [vmem:[%s15785_s5 + $0x9e8] sm:$0xff] }
 0x4c0   : > { %9229 = vmatpush1.bf16.msra.mxu0 %v9228_v44  ;;  %9293 = vmatpush1.bf16.msra.mxu1 %v9292_v60  ;;  %v8021_v44 = vld [vmem:[%s15785_s5 + $0x808] sm:$0xff] }
 0x4c1   : > { %9231 = vmatprep.subr.bf16.mxu0 %v9230_v23  ;;  %9295 = vmatprep.subr.bf16.mxu1 %v9294_v8  ;;  %v8025_v60 = vld [vmem:[%s15785_s5 + $0x828] sm:$0xff]  ;;  %v9248_v23 = vpack.c.bf16 %v5659_v2, %v5655_v16  ;;  %v9312_v8 = vpack.c.bf16 %v5661_v3, %v5657_v25  ;;  %v8055_v16 = vld [vmem:[%s15785_s5 + $0x918] sm:$0xff]  ;;  %v8052_v3 = vld [vmem:[%s15785_s5 + $0x900] sm:$0xff] }
 0x4c2   : > { %v9314_v58 = vpack.c.bf16 %v8025_v60, %v8021_v44  ;;  %v8059_v2 = vld [vmem:[%s15785_s5 + $0x938] sm:$0xff]  ;;  %v8056_v44 = vld [vmem:[%s15785_s5 + $0x920] sm:$0xff]  ;;  %v8054_v60 = vld [vmem:[%s15785_s5 + $0x910] sm:$0xff] }
 0x4c3   : > { %v9394_v59 = vpack.c.bf16 %v8059_v2, %v8055_v16  ;;  %v8085_v50 = vld [vmem:[%s15785_s5 + $0xa08] sm:$0xff] }
 0x4c4   : > { %9233 = vmatpush1.bf16.msra.mxu0 %v9232_v39  ;;  %9297 = vmatpush1.bf16.msra.mxu1 %v9296_v19  ;;  %v8029_v39 = vld [vmem:[%s15785_s5 + $0x848] sm:$0xff] }
 0x4c5   : > { %9235 = vmatprep.subr.bf16.mxu0 %v9234_v11  ;;  %9299 = vmatprep.subr.bf16.mxu1 %v9298_v45  ;;  %v8033_v19 = vld [vmem:[%s15785_s5 + $0x868] sm:$0xff]  ;;  %v9316_v11 = vpack.c.bf16 %v8024_v0, %v8020_v12  ;;  %v5527_v45 = vmax.f32 %v14349_v30, 0.0  ;;  %v8034_v30 = vld [vmem:[%s15785_s5 + $0x870] sm:$0xff]  ;;  %v9332_v12 = vpack.c.bf16 %v8056_v44, %v8052_v3  ;;  %v9396_v0 = vpack.c.bf16 %v8058_v34, %v8054_v60  ;;  %v8092_v60 = vld [vmem:[%s15785_s5 + $0xa40] sm:$0xff] }
 0x4c6   : > { %v9318_v43 = vpack.c.bf16 %v8033_v19, %v8029_v39  ;;  %v8064_v39 = vld [vmem:[%s15785_s5 + $0x960] sm:$0xff]  ;;  %v8062_v19 = vld [vmem:[%s15785_s5 + $0x950] sm:$0xff]  ;;  %v8089_v10 = vld [vmem:[%s15785_s5 + $0xa28] sm:$0xff] }
 0x4c7   : > { %v8093_v16 = vld [vmem:[%s15785_s5 + $0xa48] sm:$0xff]  ;;  %v8094_v34 = vld [vmem:[%s15785_s5 + $0xa50] sm:$0xff] }
 0x4c8   : > { %9237 = vmatpush1.bf16.msra.mxu0 %v9236_v18  ;;  %9301 = vmatpush1.bf16.msra.mxu1 %v9300_v20  ;;  %v9382_v18 = vpack.c.bf16 %v8035_v32, %v8031_v14  ;;  %v8037_v20 = vld [vmem:[%s15785_s5 + $0x888] sm:$0xff]  ;;  %v8066_v32 = vld [vmem:[%s15785_s5 + $0x970] sm:$0xff] }
 0x4c9   : > { %9239 = vmatprep.subr.bf16.mxu0 %v9238_v40  ;;  %9303 = vmatprep.subr.bf16.mxu1 %v9302_v36  ;;  %v9320_v40 = vpack.c.bf16 %v8032_v52, %v8028_v35  ;;  %v9384_v36 = vpack.c.bf16 %v8034_v30, %v8030_v24  ;;  %v9322_v57 = vpack.c.bf16 %v8041_v9, %v8037_v20  ;;  %v8075_v35 = vld [vmem:[%s15785_s5 + $0x9b8] sm:$0xff]  ;;  %v8070_v30 = vld [vmem:[%s15785_s5 + $0x990] sm:$0xff]  ;;  %v8097_v2 = vld [vmem:[%s15785_s5 + $0xa68] sm:$0xff] }
 0x4ca   : > { %v9336_v52 = vpack.c.bf16 %v8064_v39, %v8060_v42  ;;  %v9400_v24 = vpack.c.bf16 %v8066_v32, %v8062_v19  ;;  %v8074_v9 = vld [vmem:[%s15785_s5 + $0x9b0] sm:$0xff]  ;;  %v9350_v44 = vpack.c.bf16 %v8097_v2, %v8093_v16  ;;  %v8100_v19 = vld [vmem:[%s15785_s5 + $0xa80] sm:$0xff] }
 0x4cb   : > { %v8102_v32 = vld [vmem:[%s15785_s5 + $0xa90] sm:$0xff] }
 0x4cc   : > { %9241 = vmatpush1.bf16.msra.mxu0 %v9240_v21  ;;  %9305 = vmatpush1.bf16.msra.mxu1 %v9304_v37  ;;  %v8045_v21 = vld [vmem:[%s15785_s5 + $0x8c8] sm:$0xff]  ;;  %v8130_v2 = vld [vmem:[%s15785_s5 + $0xb70] sm:$0xff] }
 0x4cd   : > { %9243 = vmatprep.subr.bf16.mxu0 %v9242_v17  ;;  %9307 = vmatprep.subr.bf16.mxu1 %v9306_v22  ;;  %v8049_v37 = vld [vmem:[%s15785_s5 + $0x8e8] sm:$0xff]  ;;  %v9324_v17 = vpack.c.bf16 %v8040_v27, %v8036_v61  ;;  %v9388_v22 = vpack.c.bf16 %v8042_v53, %v8038_v1  ;;  %v9404_v61 = vpack.c.bf16 %v8074_v9, %v8070_v30  ;;  %v8076_v1 = vld [vmem:[%s15785_s5 + $0x9c0] sm:$0xff]  ;;  %v8078_v53 = vld [vmem:[%s15785_s5 + $0x9d0] sm:$0xff] }
 0x4ce   : > { %v9326_v56 = vpack.c.bf16 %v8049_v37, %v8045_v21  ;;  %v9342_v27 = vpack.c.bf16 %v8081_v29, %v8077_v33  ;;  %v8082_v37 = vld [vmem:[%s15785_s5 + $0x9f0] sm:$0xff]  ;;  %v8108_v30 = vld [vmem:[%s15785_s5 + $0xac0] sm:$0xff] }
 0x4cf   : > { %v8110_v9 = vld [vmem:[%s15785_s5 + $0xad0] sm:$0xff] }
 0x4d0   : > { %9245 = vmatpush1.bf16.msra.mxu0 %v9244_v28  ;;  %9309 = vmatpush1.bf16.msra.mxu1 %v9308_v5  ;;  %v8053_v28 = vld [vmem:[%s15785_s5 + $0x908] sm:$0xff]  ;;  %v8114_v29 = vld [vmem:[%s15785_s5 + $0xaf0] sm:$0xff] }
 0x4d1   : > { %9247 = vmatprep.subr.bf16.mxu0 %v9246_v15  ;;  %9311 = vmatprep.subr.bf16.mxu1 %v9310_v6  ;;  %v8057_v5 = vld [vmem:[%s15785_s5 + $0x928] sm:$0xff]  ;;  %v9328_v15 = vpack.c.bf16 %v8048_v46, %v8044_v13  ;;  %v9392_v6 = vpack.c.bf16 %v8050_v41, %v8046_v26  ;;  %v9408_v13 = vpack.c.bf16 %v8082_v37, %v8078_v53  ;;  %v8084_v26 = vld [vmem:[%s15785_s5 + $0xa00] sm:$0xff]  ;;  %v8086_v41 = vld [vmem:[%s15785_s5 + $0xa10] sm:$0xff] }
 0x4d2   : > { %v9330_v25 = vpack.c.bf16 %v8057_v5, %v8053_v28  ;;  %v9346_v46 = vpack.c.bf16 %v8089_v10, %v8085_v50  ;;  %v8090_v5 = vld [vmem:[%s15785_s5 + $0xa30] sm:$0xff]  ;;  %v8116_v53 = vld [vmem:[%s15785_s5 + $0xb00] sm:$0xff] }
 0x4d3   : > { %v9412_v3 = vpack.c.bf16 %v8090_v5, %v8086_v41  ;;  %v8118_v37 = vld [vmem:[%s15785_s5 + $0xb10] sm:$0xff]  ;;  %v8124_v41 = vld [vmem:[%s15785_s5 + $0xb40] sm:$0xff] }
 0x4d4   : > { %9249 = vmatpush1.bf16.msra.mxu0 %v9248_v23  ;;  %9313 = vmatpush1.bf16.msra.mxu1 %v9312_v8  ;;  %v8061_v23 = vld [vmem:[%s15785_s5 + $0x948] sm:$0xff]  ;;  %v8122_v10 = vld [vmem:[%s15785_s5 + $0xb30] sm:$0xff] }
 0x4d5   : > { %9315 = vmatprep.subr.bf16.mxu0 %v9314_v58  ;;  %9379 = vmatprep.subr.bf16.mxu1 %v9378_v4  ;;  %v8065_v8 = vld [vmem:[%s15785_s5 + $0x968] sm:$0xff]  ;;  %v8063_v58 = vld [vmem:[%s15785_s5 + $0x958] sm:$0xff]  ;;  %v8126_v5 = vld [vmem:[%s15785_s5 + $0xb50] sm:$0xff] }
 0x4d6   : > { %v8067_v4 = vld [vmem:[%s15785_s5 + $0x978] sm:$0xff]  ;;  %v9334_v47 = vpack.c.bf16 %v8065_v8, %v8061_v23  ;;  %v8098_v8 = vld [vmem:[%s15785_s5 + $0xa70] sm:$0xff] }
 0x4d7   : > { %5999 = vmatmul.mubr.f32.vlgmr.msra.gmra.mrb[70].mxu0 %v5527_v45  ;;  %6070 = vmatmul.mubr.f32.vlgmr.msra.gmra.mrb[64].mxu1 %v5527_v45  ;;  %v9398_v14 = vpack.c.bf16 %v8067_v4, %v8063_v58  ;;  %v8073_v45 = vld [vmem:[%s15785_s5 + $0x9a8] sm:$0xff]  ;;  %v9416_v42 = vpack.c.bf16 %v8098_v8, %v8094_v34  ;;  %v8132_v34 = vld [vmem:[%s15785_s5 + $0xb80] sm:$0xff]  ;;  %v8134_v8 = vld [vmem:[%s15785_s5 + $0xb90] sm:$0xff] }
 0x4d8   : > { %9317 = vmatpush1.bf16.msra.mxu0 %v9316_v11  ;;  %6269 = vmatprep.mubr.f32.mxu0 %v5532_v55  ;;  %v8069_v11 = vld [vmem:[%s15785_s5 + $0x988] sm:$0xff] }
 0x4d9   : > { %9381 = vmatpush1.bf16.msra.mxu1 %v9380_v63  ;;  %6340 = vmatprep.mubr.f32.mxu1 %v5532_v55  ;;  %v8071_v63 = vld [vmem:[%s15785_s5 + $0x998] sm:$0xff]  ;;  %v9338_v55 = vpack.c.bf16 %v8073_v45, %v8069_v11  ;;  %v8101_v58 = vld [vmem:[%s15785_s5 + $0xa88] sm:$0xff]  ;;  %v8106_v45 = vld [vmem:[%s15785_s5 + $0xab0] sm:$0xff] }
 0x4da   : > { %9319 = vmatprep.subr.bf16.mxu0 %v9318_v43  ;;  %9383 = vmatprep.subr.bf16.mxu1 %v9382_v18  ;;  %v8068_v43 = vld [vmem:[%s15785_s5 + $0x980] sm:$0xff]  ;;  %v9402_v20 = vpack.c.bf16 %v8075_v35, %v8071_v63  ;;  %v8105_v4 = vld [vmem:[%s15785_s5 + $0xaa8] sm:$0xff] }
 0x4db   : > { %v8072_v18 = vld [vmem:[%s15785_s5 + $0x9a0] sm:$0xff]  ;;  %v9354_v39 = vpack.c.bf16 %v8105_v4, %v8101_v58  ;;  %v8109_v63 = vld [vmem:[%s15785_s5 + $0xac8] sm:$0xff]  ;;  %v8138_v4 = vld [vmem:[%s15785_s5 + $0xbb0] sm:$0xff] }
 0x4dc   : > { %9321 = vmatpush1.bf16.msra.mxu0 %v9320_v40  ;;  %v8079_v40 = vld [vmem:[%s15785_s5 + $0x9d8] sm:$0xff]  ;;  %v8113_v35 = vld [vmem:[%s15785_s5 + $0xae8] sm:$0xff] }
 0x4dd   : > { %9385 = vmatpush1.bf16.msra.mxu1 %v9384_v36  ;;  %9323 = vmatprep.subr.bf16.mxu0 %v9322_v57  ;;  %v8083_v36 = vld [vmem:[%s15785_s5 + $0x9f8] sm:$0xff]  ;;  %v9340_v57 = vpack.c.bf16 %v8072_v18, %v8068_v43  ;;  %v9420_v43 = vpack.c.bf16 %v8106_v45, %v8102_v32  ;;  %v9358_v18 = vpack.c.bf16 %v8113_v35, %v8109_v63  ;;  %v8140_v32 = vld [vmem:[%s15785_s5 + $0xbc0] sm:$0xff]  ;;  %v8142_v45 = vld [vmem:[%s15785_s5 + $0xbd0] sm:$0xff] }
 0x4de   : > { %9387 = vmatprep.subr.bf16.mxu1 %v9386_v54  ;;  %v8080_v54 = vld [vmem:[%s15785_s5 + $0x9e0] sm:$0xff]  ;;  %v9406_v21 = vpack.c.bf16 %v8083_v36, %v8079_v40  ;;  %v8117_v40 = vld [vmem:[%s15785_s5 + $0xb08] sm:$0xff]  ;;  %v8146_v35 = vld [vmem:[%s15785_s5 + $0xbf0] sm:$0xff] }
 0x4df   : > { %v8121_v36 = vld [vmem:[%s15785_s5 + $0xb28] sm:$0xff] }
 0x4e0   : > { %9325 = vmatpush1.bf16.msra.mxu0 %v9324_v17  ;;  %v8087_v17 = vld [vmem:[%s15785_s5 + $0xa18] sm:$0xff] }
 0x4e1   : > { %9389 = vmatpush1.bf16.msra.mxu1 %v9388_v22  ;;  %9327 = vmatprep.subr.bf16.mxu0 %v9326_v56  ;;  %v8091_v22 = vld [vmem:[%s15785_s5 + $0xa38] sm:$0xff]  ;;  %v9344_v56 = vpack.c.bf16 %v8080_v54, %v8076_v1  ;;  %v9424_v1 = vpack.c.bf16 %v8114_v29, %v8110_v9  ;;  %v9362_v54 = vpack.c.bf16 %v8121_v36, %v8117_v40  ;;  %v8148_v9 = vld [vmem:[%s15785_s5 + $0xc00] sm:$0xff]  ;;  %v8150_v40 = vld [vmem:[%s15785_s5 + $0xc10] sm:$0xff] }
 0x4e2   : > { %9391 = vmatprep.subr.bf16.mxu1 %v9390_v51  ;;  %v8088_v51 = vld [vmem:[%s15785_s5 + $0xa20] sm:$0xff]  ;;  %v9410_v28 = vpack.c.bf16 %v8091_v22, %v8087_v17  ;;  %v8125_v17 = vld [vmem:[%s15785_s5 + $0xb48] sm:$0xff]  ;;  %v8154_v36 = vld [vmem:[%s15785_s5 + $0xc30] sm:$0xff] }
 0x4e3   : > { %v8129_v22 = vld [vmem:[%s15785_s5 + $0xb68] sm:$0xff] }
 0x4e4   : > { %9329 = vmatpush1.bf16.msra.mxu0 %v9328_v15  ;;  %v8095_v15 = vld [vmem:[%s15785_s5 + $0xa58] sm:$0xff] }
 0x4e5   : > { %9393 = vmatpush1.bf16.msra.mxu1 %v9392_v6  ;;  %9331 = vmatprep.subr.bf16.mxu0 %v9330_v25  ;;  %v8099_v6 = vld [vmem:[%s15785_s5 + $0xa78] sm:$0xff]  ;;  %v9348_v25 = vpack.c.bf16 %v8088_v51, %v8084_v26  ;;  %v9428_v26 = vpack.c.bf16 %v8122_v10, %v8118_v37  ;;  %v9366_v51 = vpack.c.bf16 %v8129_v22, %v8125_v17  ;;  %v8156_v37 = vld [vmem:[%s15785_s5 + $0xc40] sm:$0xff]  ;;  %v8158_v10 = vld [vmem:[%s15785_s5 + $0xc50] sm:$0xff] }
 0x4e6   : > { %9395 = vmatprep.subr.bf16.mxu1 %v9394_v59  ;;  %v8096_v59 = vld [vmem:[%s15785_s5 + $0xa60] sm:$0xff]  ;;  %v9414_v23 = vpack.c.bf16 %v8099_v6, %v8095_v15  ;;  %v8133_v15 = vld [vmem:[%s15785_s5 + $0xb88] sm:$0xff] }
 0x4e7   : > { %v8137_v6 = vld [vmem:[%s15785_s5 + $0xba8] sm:$0xff] }
 0x4e8   : > { %9333 = vmatpush1.bf16.msra.mxu0 %v9332_v12  ;;  %v8103_v12 = vld [vmem:[%s15785_s5 + $0xa98] sm:$0xff]  ;;  %v8165_v22 = vld [vmem:[%s15785_s5 + $0xc88] sm:$0xff] }
 0x4e9   : > { %9397 = vmatpush1.bf16.msra.mxu1 %v9396_v0  ;;  %9335 = vmatprep.subr.bf16.mxu0 %v9334_v47  ;;  %v8107_v0 = vld [vmem:[%s15785_s5 + $0xab8] sm:$0xff]  ;;  %v9352_v47 = vpack.c.bf16 %v8096_v59, %v8092_v60  ;;  %v9432_v60 = vpack.c.bf16 %v8130_v2, %v8126_v5  ;;  %v9370_v59 = vpack.c.bf16 %v8137_v6, %v8133_v15  ;;  %v8166_v2 = vld [vmem:[%s15785_s5 + $0xc90] sm:$0xff] }
 0x4ea   : > { %9399 = vmatprep.subr.bf16.mxu1 %v9398_v14  ;;  %v8104_v14 = vld [vmem:[%s15785_s5 + $0xaa0] sm:$0xff]  ;;  %v9418_v11 = vpack.c.bf16 %v8107_v0, %v8103_v12  ;;  %v8141_v12 = vld [vmem:[%s15785_s5 + $0xbc8] sm:$0xff]  ;;  %v8170_v6 = vld [vmem:[%s15785_s5 + $0xcb0] sm:$0xff] }
 0x4eb   : > { %v8145_v0 = vld [vmem:[%s15785_s5 + $0xbe8] sm:$0xff] }
 0x4ec   : > { %9337 = vmatpush1.bf16.msra.mxu0 %v9336_v52  ;;  %v8111_v52 = vld [vmem:[%s15785_s5 + $0xad8] sm:$0xff] }
 0x4ed   : > { %9401 = vmatpush1.bf16.msra.mxu1 %v9400_v24  ;;  %9339 = vmatprep.subr.bf16.mxu0 %v9338_v55  ;;  %v8115_v24 = vld [vmem:[%s15785_s5 + $0xaf8] sm:$0xff]  ;;  %v9356_v55 = vpack.c.bf16 %v8104_v14, %v8100_v19  ;;  %v9436_v19 = vpack.c.bf16 %v8138_v4, %v8134_v8  ;;  %v9374_v14 = vpack.c.bf16 %v8145_v0, %v8141_v12  ;;  %v8172_v8 = vld [vmem:[%s15785_s5 + $0xcc0] sm:$0xff]  ;;  %v8174_v4 = vld [vmem:[%s15785_s5 + $0xcd0] sm:$0xff] }
 0x4ee   : > { %9403 = vmatprep.subr.bf16.mxu1 %v9402_v20  ;;  %v8112_v20 = vld [vmem:[%s15785_s5 + $0xae0] sm:$0xff]  ;;  %v9422_v33 = vpack.c.bf16 %v8115_v24, %v8111_v52  ;;  %v8149_v52 = vld [vmem:[%s15785_s5 + $0xc08] sm:$0xff]  ;;  %v8178_v0 = vld [vmem:[%s15785_s5 + $0xcf0] sm:$0xff] }
 0x4ef   : > { %v8153_v24 = vld [vmem:[%s15785_s5 + $0xc28] sm:$0xff] }
 0x4f0   : > { %9341 = vmatpush1.bf16.msra.mxu0 %v9340_v57  ;;  %v8119_v57 = vld [vmem:[%s15785_s5 + $0xb18] sm:$0xff] }
 0x4f1   : > { %9405 = vmatpush1.bf16.msra.mxu1 %v9404_v61  ;;  %9343 = vmatprep.subr.bf16.mxu0 %v9342_v27  ;;  %v8123_v61 = vld [vmem:[%s15785_s5 + $0xb38] sm:$0xff]  ;;  %v9360_v27 = vpack.c.bf16 %v8112_v20, %v8108_v30  ;;  %v9440_v30 = vpack.c.bf16 %v8146_v35, %v8142_v45  ;;  %v9442_v20 = vpack.c.bf16 %v8153_v24, %v8149_v52  ;;  %v8180_v45 = vld [vmem:[%s15785_s5 + $0xd00] sm:$0xff]  ;;  %v8182_v35 = vld [vmem:[%s15785_s5 + $0xd10] sm:$0xff] }
 0x4f2   : > { %9407 = vmatprep.subr.bf16.mxu1 %v9406_v21  ;;  %v8120_v21 = vld [vmem:[%s15785_s5 + $0xb20] sm:$0xff]  ;;  %v9426_v50 = vpack.c.bf16 %v8123_v61, %v8119_v57  ;;  %v8157_v57 = vld [vmem:[%s15785_s5 + $0xc48] sm:$0xff]  ;;  %v8186_v24 = vld [vmem:[%s15785_s5 + $0xd30] sm:$0xff] }
 0x4f3   : > { %v8161_v61 = vld [vmem:[%s15785_s5 + $0xc68] sm:$0xff] }
 0x4f4   : > { %9345 = vmatpush1.bf16.msra.mxu0 %v9344_v56  ;;  %v8127_v56 = vld [vmem:[%s15785_s5 + $0xb58] sm:$0xff]  ;;  %v9446_v17 = vpack.c.bf16 %v8161_v61, %v8157_v57  ;;  %v8194_v61 = vld [vmem:[%s15785_s5 + $0xd70] sm:$0xff] }
 0x4f5   : > { %9409 = vmatpush1.bf16.msra.mxu1 %v9408_v13  ;;  %9347 = vmatprep.subr.bf16.mxu0 %v9346_v46  ;;  %v8131_v13 = vld [vmem:[%s15785_s5 + $0xb78] sm:$0xff]  ;;  %v9364_v46 = vpack.c.bf16 %v8120_v21, %v8116_v53  ;;  %v5531_v53 = vmax.f32 %v14415_v48, 0.0  ;;  %v9508_v21 = vpack.c.bf16 %v8154_v36, %v8150_v40  ;;  %v8162_v48 = vld [vmem:[%s15785_s5 + $0xc70] sm:$0xff]  ;;  %v8192_v40 = vld [vmem:[%s15785_s5 + $0xd60] sm:$0xff] }
 0x4f6   : > { %9411 = vmatprep.subr.bf16.mxu1 %v9410_v28  ;;  %v8128_v28 = vld [vmem:[%s15785_s5 + $0xb60] sm:$0xff]  ;;  %v9430_v16 = vpack.c.bf16 %v8131_v13, %v8127_v56  ;;  %v8169_v56 = vld [vmem:[%s15785_s5 + $0xca8] sm:$0xff]  ;;  %v5534_v13 = vmax.f32 %v14487_v7, 0.0  ;;  %v8190_v36 = vld [vmem:[%s15785_s5 + $0xd50] sm:$0xff] }
 0x4f7   : > { %v9450_v5 = vpack.c.bf16 %v8169_v56, %v8165_v22  ;;  %v8164_v7 = vld [vmem:[%s15785_s5 + $0xc80] sm:$0xff]  ;;  %v8202_v56 = vld [vmem:[%s15785_s5 + $0xdb0] sm:$0xff] }
 0x4f8   : > { %9349 = vmatpush1.bf16.msra.mxu0 %v9348_v25  ;;  %v8135_v25 = vld [vmem:[%s15785_s5 + $0xb98] sm:$0xff] }
 0x4f9   : > { %9413 = vmatpush1.bf16.msra.mxu1 %v9412_v3  ;;  %9351 = vmatprep.subr.bf16.mxu0 %v9350_v44  ;;  %v8139_v3 = vld [vmem:[%s15785_s5 + $0xbb8] sm:$0xff]  ;;  %v9368_v44 = vpack.c.bf16 %v8128_v28, %v8124_v41  ;;  %v9512_v28 = vpack.c.bf16 %v8162_v48, %v8158_v10  ;;  %v8196_v10 = vld [vmem:[%s15785_s5 + $0xd80] sm:$0xff]  ;;  %v8198_v48 = vld [vmem:[%s15785_s5 + $0xd90] sm:$0xff] }
 0x4fa   : > { %9415 = vmatprep.subr.bf16.mxu1 %v9414_v23  ;;  %v8136_v23 = vld [vmem:[%s15785_s5 + $0xba0] sm:$0xff]  ;;  %v9434_v58 = vpack.c.bf16 %v8139_v3, %v8135_v25  ;;  %v8173_v25 = vld [vmem:[%s15785_s5 + $0xcc8] sm:$0xff] }
 0x4fb   : > { %v8177_v3 = vld [vmem:[%s15785_s5 + $0xce8] sm:$0xff] }
 0x4fc   : > { %9353 = vmatpush1.bf16.msra.mxu0 %v9352_v47  ;;  %v8143_v47 = vld [vmem:[%s15785_s5 + $0xbd8] sm:$0xff] }
 0x4fd   : > { %9417 = vmatpush1.bf16.msra.mxu1 %v9416_v42  ;;  %9355 = vmatprep.subr.bf16.mxu0 %v9354_v39  ;;  %v8147_v42 = vld [vmem:[%s15785_s5 + $0xbf8] sm:$0xff]  ;;  %v9372_v39 = vpack.c.bf16 %v8136_v23, %v8132_v34  ;;  %v9516_v34 = vpack.c.bf16 %v8170_v6, %v8166_v2  ;;  %v9454_v23 = vpack.c.bf16 %v8177_v3, %v8173_v25  ;;  %v8206_v2 = vld [vmem:[%s15785_s5 + $0xdd0] sm:$0xff]  ;;  %v8213_v25 = vld [vmem:[%s15785_s5 + $0xe08] sm:$0xff] }
 0x4fe   : > { %9419 = vmatprep.subr.bf16.mxu1 %v9418_v11  ;;  %v8144_v11 = vld [vmem:[%s15785_s5 + $0xbe0] sm:$0xff]  ;;  %v9438_v63 = vpack.c.bf16 %v8147_v42, %v8143_v47  ;;  %v8181_v47 = vld [vmem:[%s15785_s5 + $0xd08] sm:$0xff]  ;;  %v8210_v6 = vld [vmem:[%s15785_s5 + $0xdf0] sm:$0xff] }
 0x4ff   : > { %v8185_v42 = vld [vmem:[%s15785_s5 + $0xd28] sm:$0xff] }
 0x500   : > { %9357 = vmatpush1.bf16.msra.mxu0 %v9356_v55  ;;  %v8151_v55 = vld [vmem:[%s15785_s5 + $0xc18] sm:$0xff]  ;;  %v8217_v3 = vld [vmem:[%s15785_s5 + $0xe28] sm:$0xff] }
 0x501   : > { %9421 = vmatpush1.bf16.msra.mxu1 %v9420_v43  ;;  %9359 = vmatprep.subr.bf16.mxu0 %v9358_v18  ;;  %v8155_v43 = vld [vmem:[%s15785_s5 + $0xc38] sm:$0xff]  ;;  %v9376_v18 = vpack.c.bf16 %v8144_v11, %v8140_v32  ;;  %v9520_v32 = vpack.c.bf16 %v8178_v0, %v8174_v4  ;;  %v9458_v11 = vpack.c.bf16 %v8185_v42, %v8181_v47  ;;  %v8214_v4 = vld [vmem:[%s15785_s5 + $0xe10] sm:$0xff]  ;;  %v8221_v47 = vld [vmem:[%s15785_s5 + $0xe48] sm:$0xff] }
 0x502   : > { %9423 = vmatprep.subr.bf16.mxu1 %v9422_v33  ;;  %v8152_v33 = vld [vmem:[%s15785_s5 + $0xc20] sm:$0xff]  ;;  %v9506_v29 = vpack.c.bf16 %v8155_v43, %v8151_v55  ;;  %v8189_v55 = vld [vmem:[%s15785_s5 + $0xd48] sm:$0xff]  ;;  %v8218_v0 = vld [vmem:[%s15785_s5 + $0xe30] sm:$0xff] }
 0x503   : > { %v8193_v43 = vld [vmem:[%s15785_s5 + $0xd68] sm:$0xff] }
 0x504   : > { %9361 = vmatpush1.bf16.msra.mxu0 %v9360_v27  ;;  %v9444_v27 = vpack.c.bf16 %v8152_v33, %v8148_v9  ;;  %v9524_v9 = vpack.c.bf16 %v8186_v24, %v8182_v35  ;;  %v9462_v33 = vpack.c.bf16 %v8193_v43, %v8189_v55  ;;  %v8225_v42 = vld [vmem:[%s15785_s5 + $0xe68] sm:$0xff]  ;;  %v8222_v35 = vld [vmem:[%s15785_s5 + $0xe50] sm:$0xff] }
 0x505   : > { %9425 = vmatpush1.bf16.msra.mxu1 %v9424_v1  ;;  %9363 = vmatprep.subr.bf16.mxu0 %v9362_v54  ;;  %v8159_v1 = vld [vmem:[%s15785_s5 + $0xc58] sm:$0xff]  ;;  %v8226_v24 = vld [vmem:[%s15785_s5 + $0xe70] sm:$0xff]  ;;  %v8229_v55 = vld [vmem:[%s15785_s5 + $0xe88] sm:$0xff] }
 0x506   : > { %9427 = vmatprep.subr.bf16.mxu1 %v9426_v50  ;;  %v8163_v54 = vld [vmem:[%s15785_s5 + $0xc78] sm:$0xff]  ;;  %v8160_v50 = vld [vmem:[%s15785_s5 + $0xc60] sm:$0xff]  ;;  %v8233_v43 = vld [vmem:[%s15785_s5 + $0xea8] sm:$0xff] }
 0x507   : > { %v9448_v41 = vpack.c.bf16 %v8160_v50, %v8156_v37  ;;  %v9528_v37 = vpack.c.bf16 %v8194_v61, %v8190_v36  ;;  %v8230_v36 = vld [vmem:[%s15785_s5 + $0xe90] sm:$0xff] }
 0x508   : > { %9365 = vmatpush1.bf16.msra.mxu0 %v9364_v46  ;;  %v9510_v46 = vpack.c.bf16 %v8163_v54, %v8159_v1  ;;  %v8201_v1 = vld [vmem:[%s15785_s5 + $0xda8] sm:$0xff]  ;;  %v8199_v54 = vld [vmem:[%s15785_s5 + $0xd98] sm:$0xff]  ;;  %v8234_v61 = vld [vmem:[%s15785_s5 + $0xeb0] sm:$0xff] }
 0x509   : > { %9429 = vmatpush1.bf16.msra.mxu1 %v9428_v26  ;;  %9367 = vmatprep.subr.bf16.mxu0 %v9366_v51  ;;  %v8167_v26 = vld [vmem:[%s15785_s5 + $0xc98] sm:$0xff] }
 0x50a   : > { %9431 = vmatprep.subr.bf16.mxu1 %v9430_v16  ;;  %v8171_v51 = vld [vmem:[%s15785_s5 + $0xcb8] sm:$0xff]  ;;  %v8168_v16 = vld [vmem:[%s15785_s5 + $0xca0] sm:$0xff] }
 0x50b   : > { %v9514_v15 = vpack.c.bf16 %v8171_v51, %v8167_v26  ;;  %v8207_v26 = vld [vmem:[%s15785_s5 + $0xdd8] sm:$0xff] }
 0x50c   : > { %9369 = vmatpush1.bf16.msra.mxu0 %v9368_v44  ;;  %v8175_v44 = vld [vmem:[%s15785_s5 + $0xcd8] sm:$0xff] }
 0x50d   : > { %9433 = vmatpush1.bf16.msra.mxu1 %v9432_v60  ;;  %9371 = vmatprep.subr.bf16.mxu0 %v9370_v59  ;;  %v8179_v60 = vld [vmem:[%s15785_s5 + $0xcf8] sm:$0xff]  ;;  %v9452_v59 = vpack.c.bf16 %v8168_v16, %v8164_v7  ;;  %v8204_v7 = vld [vmem:[%s15785_s5 + $0xdc0] sm:$0xff] }
 0x50e   : > { %9435 = vmatprep.subr.bf16.mxu1 %v9434_v58  ;;  %v8176_v58 = vld [vmem:[%s15785_s5 + $0xce0] sm:$0xff]  ;;  %v9518_v12 = vpack.c.bf16 %v8179_v60, %v8175_v44  ;;  %v8211_v51 = vld [vmem:[%s15785_s5 + $0xdf8] sm:$0xff] }
 0x50f   : > { %v8208_v16 = vld [vmem:[%s15785_s5 + $0xde0] sm:$0xff]  ;;  %v8215_v44 = vld [vmem:[%s15785_s5 + $0xe18] sm:$0xff] }
 0x510   : > { %9373 = vmatpush1.bf16.msra.mxu0 %v9372_v39  ;;  %v8183_v39 = vld [vmem:[%s15785_s5 + $0xd18] sm:$0xff] }
 0x511   : > { %9437 = vmatpush1.bf16.msra.mxu1 %v9436_v19  ;;  %9375 = vmatprep.subr.bf16.mxu0 %v9374_v14  ;;  %v8187_v19 = vld [vmem:[%s15785_s5 + $0xd38] sm:$0xff]  ;;  %v9456_v14 = vpack.c.bf16 %v8176_v58, %v8172_v8  ;;  %v8212_v8 = vld [vmem:[%s15785_s5 + $0xe00] sm:$0xff] }
 0x512   : > { %9439 = vmatprep.subr.bf16.mxu1 %v9438_v63  ;;  %v8184_v63 = vld [vmem:[%s15785_s5 + $0xd20] sm:$0xff]  ;;  %v9522_v52 = vpack.c.bf16 %v8187_v19, %v8183_v39  ;;  %v8219_v60 = vld [vmem:[%s15785_s5 + $0xe38] sm:$0xff] }
 0x513   : > { %v8216_v58 = vld [vmem:[%s15785_s5 + $0xe20] sm:$0xff]  ;;  %v8223_v39 = vld [vmem:[%s15785_s5 + $0xe58] sm:$0xff] }
 0x514   : > { %9377 = vmatpush1.bf16.msra.mxu0 %v9376_v18  ;;  %v8191_v18 = vld [vmem:[%s15785_s5 + $0xd58] sm:$0xff] }
 0x515   : > { %9441 = vmatpush1.bf16.msra.mxu1 %v9440_v30  ;;  %9443 = vmatprep.subr.bf16.mxu0 %v9442_v20  ;;  %v8195_v30 = vld [vmem:[%s15785_s5 + $0xd78] sm:$0xff]  ;;  %v9460_v20 = vpack.c.bf16 %v8184_v63, %v8180_v45  ;;  %v8220_v45 = vld [vmem:[%s15785_s5 + $0xe40] sm:$0xff] }
 0x516   : > { %9507 = vmatprep.subr.bf16.mxu1 %v9506_v29  ;;  %v8188_v29 = vld [vmem:[%s15785_s5 + $0xd40] sm:$0xff]  ;;  %v9526_v57 = vpack.c.bf16 %v8195_v30, %v8191_v18  ;;  %v8227_v19 = vld [vmem:[%s15785_s5 + $0xe78] sm:$0xff] }
 0x517   : > { %6270 = vmatmul.mubr.f32.vlgmr.msra.gmra.mrb[70].mxu0 %v5531_v53  ;;  %v8224_v63 = vld [vmem:[%s15785_s5 + $0xe60] sm:$0xff]  ;;  %v8231_v18 = vld [vmem:[%s15785_s5 + $0xe98] sm:$0xff] }
 0x518   : > { %6341 = vmatmul.mubr.f32.vlgmr.msra.gmra.mrb[64].mxu1 %v5531_v53  ;;  %9445 = vmatpush1.bf16.msra.mxu0 %v9444_v27  ;;  %v8197_v27 = vld [vmem:[%s15785_s5 + $0xd88] sm:$0xff]  ;;  %v8203_v53 = vld [vmem:[%s15785_s5 + $0xdb8] sm:$0xff] }
 0x519   : > { %6544 = vmatprep.mubr.f32.mxu0 %v5534_v13  ;;  %9509 = vmatpush1.bf16.msra.mxu1 %v9508_v21  ;;  %v9464_v21 = vpack.c.bf16 %v8192_v40, %v8188_v29  ;;  %v9466_v50 = vpack.c.bf16 %v8201_v1, %v8197_v27  ;;  %v9530_v22 = vpack.c.bf16 %v8203_v53, %v8199_v54  ;;  %v8235_v30 = vld [vmem:[%s15785_s5 + $0xeb8] sm:$0xff]  ;;  %v8228_v29 = vld [vmem:[%s15785_s5 + $0xe80] sm:$0xff]  ;;  %v8237_v27 = vld [vmem:[%s15785_s5 + $0xec8] sm:$0xff] }
 0x51a   : > { %6615 = vmatprep.mubr.f32.mxu1 %v5534_v13  ;;  %9447 = vmatprep.subr.bf16.mxu0 %v9446_v17  ;;  %v8200_v17 = vld [vmem:[%s15785_s5 + $0xda0] sm:$0xff]  ;;  %v8205_v13 = vld [vmem:[%s15785_s5 + $0xdc8] sm:$0xff]  ;;  %v8239_v54 = vld [vmem:[%s15785_s5 + $0xed8] sm:$0xff] }
 0x51b   : > { %9511 = vmatprep.subr.bf16.mxu1 %v9510_v46  ;;  %v8209_v46 = vld [vmem:[%s15785_s5 + $0xde8] sm:$0xff]  ;;  %v8232_v40 = vld [vmem:[%s15785_s5 + $0xea0] sm:$0xff]  ;;  %v8243_v53 = vld [vmem:[%s15785_s5 + $0xef8] sm:$0xff] }
 0x51c   : > { %9449 = vmatpush1.bf16.msra.mxu0 %v9448_v41  ;;  %v9468_v41 = vpack.c.bf16 %v8200_v17, %v8196_v10  ;;  %v8241_v1 = vld [vmem:[%s15785_s5 + $0xee8] sm:$0xff]  ;;  %v8236_v10 = vld [vmem:[%s15785_s5 + $0xec0] sm:$0xff] }
 0x51d   : > { %9513 = vmatpush1.bf16.msra.mxu1 %v9512_v28  ;;  %9451 = vmatprep.subr.bf16.mxu0 %v9450_v5  ;;  %v9532_v28 = vpack.c.bf16 %v8202_v56, %v8198_v48  ;;  %v9470_v5 = vpack.c.bf16 %v8209_v46, %v8205_v13  ;;  %v8240_v17 = vld [vmem:[%s15785_s5 + $0xee0] sm:$0xff]  ;;  %v8238_v48 = vld [vmem:[%s15785_s5 + $0xed0] sm:$0xff]  ;;  %v8245_v13 = vld [vmem:[%s15785_s5 + $0xf08] sm:$0xff] }
 0x51e   : > { %9515 = vmatprep.subr.bf16.mxu1 %v9514_v15  ;;  %v9534_v15 = vpack.c.bf16 %v8211_v51, %v8207_v26  ;;  %v8242_v56 = vld [vmem:[%s15785_s5 + $0xef0] sm:$0xff]  ;;  %v8249_v46 = vld [vmem:[%s15785_s5 + $0xf28] sm:$0xff]  ;;  %v8247_v26 = vld [vmem:[%s15785_s5 + $0xf18] sm:$0xff] }
 0x51f   : > { %v8251_v51 = vld [vmem:[%s15785_s5 + $0xf38] sm:$0xff] }
 0x520   : > { %9453 = vmatpush1.bf16.msra.mxu0 %v9452_v59  ;;  %v9472_v59 = vpack.c.bf16 %v8208_v16, %v8204_v7  ;;  %v8244_v7 = vld [vmem:[%s15785_s5 + $0xf00] sm:$0xff] }
 0x521   : > { %9517 = vmatpush1.bf16.msra.mxu1 %v9516_v34  ;;  %9455 = vmatprep.subr.bf16.mxu0 %v9454_v23  ;;  %v9536_v34 = vpack.c.bf16 %v8210_v6, %v8206_v2  ;;  %v9474_v23 = vpack.c.bf16 %v8217_v3, %v8213_v25  ;;  %v8248_v16 = vld [vmem:[%s15785_s5 + $0xf20] sm:$0xff]  ;;  %v8246_v2 = vld [vmem:[%s15785_s5 + $0xf10] sm:$0xff]  ;;  %v8253_v25 = vld [vmem:[%s15785_s5 + $0xf48] sm:$0xff] }
 0x522   : > { %9519 = vmatprep.subr.bf16.mxu1 %v9518_v12  ;;  %v9538_v12 = vpack.c.bf16 %v8219_v60, %v8215_v44  ;;  %v8250_v6 = vld [vmem:[%s15785_s5 + $0xf30] sm:$0xff]  ;;  %v8257_v3 = vld [vmem:[%s15785_s5 + $0xf68] sm:$0xff]  ;;  %v8255_v44 = vld [vmem:[%s15785_s5 + $0xf58] sm:$0xff] }
 0x523   : > { %v8259_v60 = vld [vmem:[%s15785_s5 + $0xf78] sm:$0xff] }
 0x524   : > { %9457 = vmatpush1.bf16.msra.mxu0 %v9456_v14  ;;  %v9476_v14 = vpack.c.bf16 %v8216_v58, %v8212_v8  ;;  %v8252_v8 = vld [vmem:[%s15785_s5 + $0xf40] sm:$0xff] }
 0x525   : > { %9521 = vmatpush1.bf16.msra.mxu1 %v9520_v32  ;;  %9459 = vmatprep.subr.bf16.mxu0 %v9458_v11  ;;  %v9540_v32 = vpack.c.bf16 %v8218_v0, %v8214_v4  ;;  %v9478_v11 = vpack.c.bf16 %v8225_v42, %v8221_v47  ;;  %v8256_v58 = vld [vmem:[%s15785_s5 + $0xf60] sm:$0xff]  ;;  %v8254_v4 = vld [vmem:[%s15785_s5 + $0xf50] sm:$0xff]  ;;  %v8261_v47 = vld [vmem:[%s15785_s5 + $0xf88] sm:$0xff] }
 0x526   : > { %9523 = vmatprep.subr.bf16.mxu1 %v9522_v52  ;;  %v9542_v52 = vpack.c.bf16 %v8227_v19, %v8223_v39  ;;  %v8258_v0 = vld [vmem:[%s15785_s5 + $0xf70] sm:$0xff]  ;;  %v8265_v42 = vld [vmem:[%s15785_s5 + $0xfa8] sm:$0xff]  ;;  %v8263_v39 = vld [vmem:[%s15785_s5 + $0xf98] sm:$0xff] }
 0x527   : > { %v8267_v19 = vld [vmem:[%s15785_s5 + $0xfb8] sm:$0xff] }
 0x528   : > { %9461 = vmatpush1.bf16.msra.mxu0 %v9460_v20  ;;  %v9480_v20 = vpack.c.bf16 %v8224_v63, %v8220_v45  ;;  %v8260_v45 = vld [vmem:[%s15785_s5 + $0xf80] sm:$0xff] }
 0x529   : > { %9525 = vmatpush1.bf16.msra.mxu1 %v9524_v9  ;;  %9463 = vmatprep.subr.bf16.mxu0 %v9462_v33  ;;  %v9544_v9 = vpack.c.bf16 %v8226_v24, %v8222_v35  ;;  %v9482_v33 = vpack.c.bf16 %v8233_v43, %v8229_v55  ;;  %v8264_v63 = vld [vmem:[%s15785_s5 + $0xfa0] sm:$0xff]  ;;  %v8262_v35 = vld [vmem:[%s15785_s5 + $0xf90] sm:$0xff]  ;;  %v8269_v55 = vld [vmem:[%s15785_s5 + $0xfc8] sm:$0xff] }
 0x52a   : > { %9527 = vmatprep.subr.bf16.mxu1 %v9526_v57  ;;  %v9546_v57 = vpack.c.bf16 %v8235_v30, %v8231_v18  ;;  %v8266_v24 = vld [vmem:[%s15785_s5 + $0xfb0] sm:$0xff]  ;;  %v8273_v43 = vld [vmem:[%s15785_s5 + $0xfe8] sm:$0xff]  ;;  %v8271_v18 = vld [vmem:[%s15785_s5 + $0xfd8] sm:$0xff] }
 0x52b   : > { %v8275_v30 = vld [vmem:[%s15785_s5 + $0xff8] sm:$0xff] }
 0x52c   : > { %9465 = vmatpush1.bf16.msra.mxu0 %v9464_v21  ;;  %v9484_v21 = vpack.c.bf16 %v8232_v40, %v8228_v29  ;;  %v8268_v29 = vld [vmem:[%s15785_s5 + $0xfc0] sm:$0xff] }
 0x52d   : > { %9529 = vmatpush1.bf16.msra.mxu1 %v9528_v37  ;;  %9467 = vmatprep.subr.bf16.mxu0 %v9466_v50  ;;  %v9548_v37 = vpack.c.bf16 %v8234_v61, %v8230_v36  ;;  %v9486_v50 = vpack.c.bf16 %v8241_v1, %v8237_v27  ;;  %v8272_v40 = vld [vmem:[%s15785_s5 + $0xfe0] sm:$0xff]  ;;  %v8270_v36 = vld [vmem:[%s15785_s5 + $0xfd0] sm:$0xff]  ;;  %v6673_v1 = vld [vmem:[%s15787_s7 + $0x88] sm:$0xff] }
 0x52e   : > { %9531 = vmatprep.subr.bf16.mxu1 %v9530_v22  ;;  %v9550_v22 = vpack.c.bf16 %v8243_v53, %v8239_v54  ;;  %v8274_v61 = vld [vmem:[%s15785_s5 + $0xff0] sm:$0xff]  ;;  %v6672_v27 = vld [vmem:[%s15787_s7 + $0x80] sm:$0xff]  ;;  %v9504_v54 = vpack.c.bf16 %v8272_v40, %v8268_v29  ;;  %v6685_v40 = vld [vmem:[%s15787_s7 + $0xe8] sm:$0xff] }
 0x52f   : > { %v9568_v53 = vpack.c.bf16 %v8274_v61, %v8270_v36  ;;  %v6684_v29 = vld [vmem:[%s15787_s7 + $0xe0] sm:$0xff] }
 0x530   : > { %9469 = vmatpush1.bf16.msra.mxu0 %v9468_v41  ;;  %v9488_v41 = vpack.c.bf16 %v8240_v17, %v8236_v10  ;;  %v6657_v10 = vld [vmem:[%s15787_s7 + $0x8] sm:$0xff]  ;;  %v9594_v61 = vpack.c.bf16 %v6685_v40, %v6684_v29  ;;  %v8276_v29 = vld [vmem:[%s15788_s8] ss:$0 sm:$0xff] }
 0x531   : > { %9533 = vmatpush1.bf16.msra.mxu1 %v9532_v28  ;;  %9471 = vmatprep.subr.bf16.mxu0 %v9470_v5  ;;  %v9552_v28 = vpack.c.bf16 %v8242_v56, %v8238_v48  ;;  %v9490_v5 = vpack.c.bf16 %v8249_v46, %v8245_v13  ;;  %v6689_v17 = vld [vmem:[%s15787_s7 + $0x108] sm:$0xff]  ;;  %v6674_v48 = vld [vmem:[%s15787_s7 + $0x90] sm:$0xff]  ;;  %v5533_v13 = vmax.f32 %v14466_v38, 0.0  ;;  %v6691_v38 = vld [vmem:[%s15787_s7 + $0x118] sm:$0xff] }
 0x532   : > { %9535 = vmatprep.subr.bf16.mxu1 %v9534_v15  ;;  %v9554_v15 = vpack.c.bf16 %v8251_v51, %v8247_v26  ;;  %v6690_v26 = vld [vmem:[%s15787_s7 + $0x110] sm:$0xff] }
 0x534   : > { %9473 = vmatpush1.bf16.msra.mxu0 %v9472_v59  ;;  %v9492_v59 = vpack.c.bf16 %v8248_v16, %v8244_v7  ;;  %v6676_v7 = vld [vmem:[%s15787_s7 + $0xa0] sm:$0xff]  ;;  %v6677_v16 = vld [vmem:[%s15787_s7 + $0xa8] sm:$0xff] }
 0x535   : > { %9537 = vmatpush1.bf16.msra.mxu1 %v9536_v34  ;;  %9475 = vmatprep.subr.bf16.mxu0 %v9474_v23  ;;  %v9556_v34 = vpack.c.bf16 %v8250_v6, %v8246_v2  ;;  %v9494_v23 = vpack.c.bf16 %v8257_v3, %v8253_v25  ;;  %v6692_v6 = vld [vmem:[%s15787_s7 + $0x120] sm:$0xff]  ;;  %v9578_v25 = vpack.c.bf16 %v6677_v16, %v6676_v7  ;;  %v6713_v7 = vld [vmem:[%s15787_s7 + $0x1c8] sm:$0xff] }
 0x536   : > { %9539 = vmatprep.subr.bf16.mxu1 %v9538_v12  ;;  %v9558_v12 = vpack.c.bf16 %v8259_v60, %v8255_v44  ;;  %v6660_v3 = vld [vmem:[%s15787_s7 + $0x20] sm:$0xff]  ;;  %v6661_v44 = vld [vmem:[%s15787_s7 + $0x28] sm:$0xff] }
 0x537   : > { %v6693_v60 = vld [vmem:[%s15787_s7 + $0x128] sm:$0xff] }
 0x538   : > { %9477 = vmatpush1.bf16.msra.mxu0 %v9476_v14  ;;  %v9496_v14 = vpack.c.bf16 %v8256_v58, %v8252_v8  ;;  %v9609_v8 = vpack.c.bf16 %v6693_v60, %v6692_v6  ;;  %v6694_v58 = vld [vmem:[%s15787_s7 + $0x130] sm:$0xff]  ;;  %v6716_v60 = vld [vmem:[%s15787_s7 + $0x1e0] sm:$0xff] }
 0x539   : > { %9541 = vmatpush1.bf16.msra.mxu1 %v9540_v32  ;;  %9479 = vmatprep.subr.bf16.mxu0 %v9478_v11  ;;  %v9560_v32 = vpack.c.bf16 %v8258_v0, %v8254_v4  ;;  %v9498_v11 = vpack.c.bf16 %v8265_v42, %v8261_v47  ;;  %v6663_v0 = vld [vmem:[%s15787_s7 + $0x38] sm:$0xff]  ;;  %v6680_v42 = vld [vmem:[%s15787_s7 + $0xc0] sm:$0xff] }
 0x53a   : > { %9543 = vmatprep.subr.bf16.mxu1 %v9542_v52  ;;  %v9562_v52 = vpack.c.bf16 %v8267_v19, %v8263_v39  ;;  %v6695_v47 = vld [vmem:[%s15787_s7 + $0x138] sm:$0xff]  ;;  %v6681_v39 = vld [vmem:[%s15787_s7 + $0xc8] sm:$0xff] }
 0x53c   : > { %9481 = vmatpush1.bf16.msra.mxu0 %v9480_v20  ;;  %v9500_v20 = vpack.c.bf16 %v8264_v63, %v8260_v45  ;;  %v6664_v45 = vld [vmem:[%s15787_s7 + $0x40] sm:$0xff]  ;;  %v6665_v63 = vld [vmem:[%s15787_s7 + $0x48] sm:$0xff] }
 0x53d   : > { %9545 = vmatpush1.bf16.msra.mxu1 %v9544_v9  ;;  %9483 = vmatprep.subr.bf16.mxu0 %v9482_v33  ;;  %v9564_v9 = vpack.c.bf16 %v8266_v24, %v8262_v35  ;;  %v9502_v33 = vpack.c.bf16 %v8273_v43, %v8269_v55  ;;  %v6697_v35 = vld [vmem:[%s15787_s7 + $0x148] sm:$0xff]  ;;  %v6683_v24 = vld [vmem:[%s15787_s7 + $0xd8] sm:$0xff]  ;;  %v9588_v55 = vpack.c.bf16 %v6665_v63, %v6664_v45 }
 0x53e   : > { %9547 = vmatprep.subr.bf16.mxu1 %v9546_v57  ;;  %v9566_v57 = vpack.c.bf16 %v8275_v30, %v8271_v18  ;;  %v6698_v18 = vld [vmem:[%s15787_s7 + $0x150] sm:$0xff] }
 0x540   : > { %9485 = vmatpush1.bf16.msra.mxu0 %v9484_v21  ;;  %v6688_v21 = vld [vmem:[%s15787_s7 + $0x100] sm:$0xff] }
 0x541   : > { %9549 = vmatpush1.bf16.msra.mxu1 %v9548_v37  ;;  %9487 = vmatprep.subr.bf16.mxu0 %v9486_v50  ;;  %v9570_v37 = vpack.c.bf16 %v6673_v1, %v6672_v27  ;;  %v6656_v50 = vld [vmem:[%s15787_s7] sm:$0xff]  ;;  %v9603_v46 = vpack.c.bf16 %v6689_v17, %v6688_v21  ;;  %v6701_v1 = vld [vmem:[%s15787_s7 + $0x168] sm:$0xff]  ;;  %v6703_v21 = vld [vmem:[%s15787_s7 + $0x178] sm:$0xff] }
 0x542   : > { %9551 = vmatprep.subr.bf16.mxu1 %v9550_v22  ;;  %v6675_v22 = vld [vmem:[%s15787_s7 + $0x98] sm:$0xff]  ;;  %v9572_v56 = vpack.c.bf16 %v6657_v10, %v6656_v50  ;;  %v6700_v27 = vld [vmem:[%s15787_s7 + $0x160] sm:$0xff]  ;;  %v6705_v10 = vld [vmem:[%s15787_s7 + $0x188] sm:$0xff] }
 0x543   : > { %v9574_v51 = vpack.c.bf16 %v6675_v22, %v6674_v48  ;;  %v6704_v50 = vld [vmem:[%s15787_s7 + $0x180] sm:$0xff]  ;;  %v6706_v48 = vld [vmem:[%s15787_s7 + $0x190] sm:$0xff]  ;;  %v6707_v22 = vld [vmem:[%s15787_s7 + $0x198] sm:$0xff] }
 0x544   : > { %9489 = vmatpush1.bf16.msra.mxu0 %v9488_v41  ;;  %v6658_v41 = vld [vmem:[%s15787_s7 + $0x10] sm:$0xff]  ;;  %v9627_v17 = vpack.c.bf16 %v6705_v10, %v6704_v50 }
 0x545   : > { %9553 = vmatpush1.bf16.msra.mxu1 %v9552_v28  ;;  %9491 = vmatprep.subr.bf16.mxu0 %v9490_v5  ;;  %v6659_v28 = vld [vmem:[%s15787_s7 + $0x18] sm:$0xff]  ;;  %v10285_v5 = vmov 0.0|0.0  }
 0x546   : > { %9555 = vmatprep.subr.bf16.mxu1 %v9554_v15  ;;  %v9576_v2 = vpack.c.bf16 %v6659_v28, %v6658_v41  ;;  %v9606_v15 = vpack.c.bf16 %v6691_v38, %v6690_v26  ;;  %v6711_v41 = vld [vmem:[%s15787_s7 + $0x1b8] sm:$0xff]  ;;  %v6712_v38 = vld [vmem:[%s15787_s7 + $0x1c0] sm:$0xff] }
 0x547   : > { %v9639_v16 = vpack.c.bf16 %v6713_v7, %v6712_v38 }
 0x548   : > { %9493 = vmatpush1.bf16.msra.mxu0 %v9492_v59  ;;  %v6678_v59 = vld [vmem:[%s15787_s7 + $0xb0] sm:$0xff] }
 0x549   : > { %9557 = vmatpush1.bf16.msra.mxu1 %v9556_v34  ;;  %9495 = vmatprep.subr.bf16.mxu0 %v9494_v23  ;;  %v6679_v34 = vld [vmem:[%s15787_s7 + $0xb8] sm:$0xff]  ;;  %v9580_v23 = vpack.c.bf16 %v6661_v44, %v6660_v3  ;;  %v6669_v3 = vld [vmem:[%s15787_s7 + $0x68] sm:$0xff] }
 0x54a   : > { %9559 = vmatprep.subr.bf16.mxu1 %v9558_v12  ;;  %v9582_v4 = vpack.c.bf16 %v6679_v34, %v6678_v59  ;;  %v6662_v12 = vld [vmem:[%s15787_s7 + $0x30] sm:$0xff]  ;;  %v6717_v59 = vld [vmem:[%s15787_s7 + $0x1e8] sm:$0xff] }
 0x54b   : > { %v9584_v19 = vpack.c.bf16 %v6663_v0, %v6662_v12  ;;  %v9645_v34 = vpack.c.bf16 %v6717_v59, %v6716_v60  ;;  %v15797_v0 = vmov 0.0  }
 0x54c   : > { %9497 = vmatpush1.bf16.msra.mxu0 %v9496_v14  ;;  %v9612_v14 = vpack.c.bf16 %v6695_v47, %v6694_v58  ;;  %v6670_v58 = vld [vmem:[%s15787_s7 + $0x70] sm:$0xff] }
 0x54d   : > { %9561 = vmatpush1.bf16.msra.mxu1 %v9560_v32  ;;  %9499 = vmatprep.subr.bf16.mxu0 %v9498_v11  ;;  %v6696_v32 = vld [vmem:[%s15787_s7 + $0x140] sm:$0xff]  ;;  %v9586_v11 = vpack.c.bf16 %v6681_v39, %v6680_v42  ;;  %v6718_v47 = vld [vmem:[%s15787_s7 + $0x1f0] sm:$0xf]  ;;  %v6638_v39 = vsub.s32 2, %v12009_v49 }
 0x54e   : > { %9563 = vmatprep.subr.bf16.mxu1 %v9562_v52  ;;  %v6682_v52 = vld [vmem:[%s15787_s7 + $0xd0] sm:$0xff]  ;;  %v9615_v43 = vpack.c.bf16 %v6697_v35, %v6696_v32  ;;  %v6626_v42 = vld [vmem:[%s15786_s6] sm:$0xf] }
 0x54f   : > { %v9590_v30 = vpack.c.bf16 %v6683_v24, %v6682_v52  ;;  %v6639_v32 = vrot.slane %v6626_v42, %v6638_v39 }
 0x550   : > { %9501 = vmatpush1.bf16.msra.mxu0 %v9500_v20  ;;  %v6666_v20 = vld [vmem:[%s15787_s7 + $0x50] sm:$0xff] }
 0x551   : > { %9565 = vmatpush1.bf16.msra.mxu1 %v9564_v9  ;;  %9503 = vmatprep.subr.bf16.mxu0 %v9502_v33  ;;  %v6667_v9 = vld [vmem:[%s15787_s7 + $0x58] sm:$0xff] }
 0x552   : > { %9567 = vmatprep.subr.bf16.mxu1 %v9566_v57  ;;  %v6699_v33 = vld [vmem:[%s15787_s7 + $0x158] sm:$0xff]  ;;  %v9592_v36 = vpack.c.bf16 %v6667_v9, %v6666_v20 }
 0x553   : > { %v9618_v57 = vpack.c.bf16 %v6699_v33, %v6698_v18 }
 0x554   : > { %9505 = vmatpush1.bf16.msra.mxu0 %v9504_v54  ;;  %v9621_v54 = vpack.c.bf16 %v6701_v1, %v6700_v27 }
 0x555   : > { %9569 = vmatpush1.bf16.msra.mxu1 %v9568_v53  ;;  %9571 = vmatprep.subr.bf16.mxu0 %v9570_v37  ;;  %v6702_v53 = vld [vmem:[%s15787_s7 + $0x170] sm:$0xff] }
 0x556   : > { %9602 = vmatprep.subr.bf16.mxu1 %v10285_v5  ;;  %v9624_v37 = vpack.c.bf16 %v6703_v21, %v6702_v53 }
 0x557   : > { %6545 = vmatmul.mubr.f32.vlgmr.msra.gmra.mrb[70].mxu0 %v5533_v13 }
 0x558   : > { %6616 = vmatmul.mubr.f32.vlgmr.msra.gmra.mrb[64].mxu1 %v5533_v13  ;;  %9573 = vmatpush3.bf16.msra.mxu0 %v9572_v56  ;;  %v9630_v56 = vpack.c.bf16 %v6707_v22, %v6706_v48  ;;  %v6708_v13 = vld [vmem:[%s15787_s7 + $0x1a0] sm:$0xff] }
 0x559   : > { %9604 = vmatpush1.bf16.msra.mxu1 %v9603_v46  ;;  %9575 = vmatprep.subr.bf16.mxu0 %v9574_v51  ;;  %v6709_v46 = vld [vmem:[%s15787_s7 + $0x1a8] sm:$0xff]  ;;  %v6710_v51 = vld [vmem:[%s15787_s7 + $0x1b0] sm:$0xff] }
 0x55a   : > { %9605 = vmatprep.subr.bf16.mxu1 %v10285_v5  ;;  %v9633_v26 = vpack.c.bf16 %v6709_v46, %v6708_v13  ;;  %v9636_v28 = vpack.c.bf16 %v6711_v41, %v6710_v51 }
 0x55c   : > { %9577 = vmatpush3.bf16.msra.mxu0 %v9576_v2  ;;  %v6714_v2 = vld [vmem:[%s15787_s7 + $0x1d0] sm:$0xff] }
 0x55d   : > { %9607 = vmatpush1.bf16.msra.mxu1 %v9606_v15  ;;  %9579 = vmatprep.subr.bf16.mxu0 %v9578_v25  ;;  %v6715_v15 = vld [vmem:[%s15787_s7 + $0x1d8] sm:$0xff]  ;;  %v6668_v25 = vld [vmem:[%s15787_s7 + $0x60] sm:$0xff] }
 0x55e   : > { %9608 = vmatprep.subr.bf16.mxu1 %v10285_v5  ;;  %v9642_v6 = vpack.c.bf16 %v6715_v15, %v6714_v2  ;;  %v9596_v44 = vpack.c.bf16 %v6669_v3, %v6668_v25 }
 0x560   : > { %9581 = vmatpush3.bf16.msra.mxu0 %v9580_v23  ;;  %v6687_v23 = vld [vmem:[%s15787_s7 + $0xf8] sm:$0xff] }
 0x561   : > { %9610 = vmatpush1.bf16.msra.mxu1 %v9609_v8  ;;  %9583 = vmatprep.subr.bf16.mxu0 %v9582_v4  ;;  %v6671_v4 = vld [vmem:[%s15787_s7 + $0x78] sm:$0xff] }
 0x562   : > { %9611 = vmatprep.subr.bf16.mxu1 %v10285_v5  ;;  %v9600_v12 = vpack.c.bf16 %v6671_v4, %v6670_v58 }
 0x564   : > { %9585 = vmatpush3.bf16.msra.mxu0 %v9584_v19  ;;  %v6642_v19 = vsub.s32 3, %v12009_v49 }
 0x565   : > { %9613 = vmatpush1.bf16.msra.mxu1 %v9612_v14  ;;  %9587 = vmatprep.subr.bf16.mxu0 %v9586_v11  ;;  %v6631_v14 = vrot.slane %v6626_v42, %v12020_v62  ;;  %v6635_v11 = vrot.slane %v6626_v42, %v12026_v31 }
 0x566   : > { %9614 = vmatprep.subr.bf16.mxu1 %v10285_v5  ;;  %v6643_v45 = vrot.slane %v6626_v42, %v6642_v19 }
 0x568   : > { %9589 = vmatpush3.bf16.msra.mxu0 %v9588_v55 }
 0x569   : > { %9616 = vmatpush1.bf16.msra.mxu1 %v9615_v43  ;;  %9591 = vmatprep.subr.bf16.mxu0 %v9590_v30 }
 0x56a   : > { %9617 = vmatprep.subr.bf16.mxu1 %v10285_v5 }
 0x56c   : > { %9593 = vmatpush3.bf16.msra.mxu0 %v9592_v36 }
 0x56d   : > { %9619 = vmatpush1.bf16.msra.mxu1 %v9618_v57  ;;  %9595 = vmatprep.subr.bf16.mxu0 %v9594_v61 }
 0x56e   : > { %9620 = vmatprep.subr.bf16.mxu1 %v10285_v5 }
 0x570   : > { %9597 = vmatpush3.bf16.msra.mxu0 %v9596_v44 }
 0x571   : > { %9622 = vmatpush1.bf16.msra.mxu1 %v9621_v54 }
 0x572   : > { %9623 = vmatprep.subr.bf16.mxu1 %v10285_v5 }
 0x575   : > { %9625 = vmatpush1.bf16.msra.mxu1 %v9624_v37 }
 0x576   : > { %9626 = vmatprep.subr.bf16.mxu1 %v10285_v5 }
 0x579   : > { %9628 = vmatpush1.bf16.msra.mxu1 %v9627_v17 }
 0x57a   : > { %9629 = vmatprep.subr.bf16.mxu1 %v10285_v5 }
 0x57d   : > { %9631 = vmatpush1.bf16.msra.mxu1 %v9630_v56 }
 0x57e   : > { %9632 = vmatprep.subr.bf16.mxu1 %v10285_v5 }
 0x581   : > { %9634 = vmatpush1.bf16.msra.mxu1 %v9633_v26 }
 0x582   : > { %9635 = vmatprep.subr.bf16.mxu1 %v10285_v5 }
 0x585   : > { %9637 = vmatpush1.bf16.msra.mxu1 %v9636_v28 }
 0x586   : > { %9638 = vmatprep.subr.bf16.mxu1 %v10285_v5 }
 0x589   : > { %9640 = vmatpush1.bf16.msra.mxu1 %v9639_v16 }
 0x58a   : > { %9641 = vmatprep.subr.bf16.mxu1 %v10285_v5 }
 0x58d   : > { %9643 = vmatpush1.bf16.msra.mxu1 %v9642_v6 }
 0x58e   : > { %9644 = vmatprep.subr.bf16.mxu1 %v10285_v5  ;;  %v6686_v5 = vld [vmem:[%s15787_s7 + $0xf0] sm:$0xff] }
 0x58f   : > { %v9598_v8 = vpack.c.bf16 %v6687_v23, %v6686_v5 }
 0x591   : > { %9646 = vmatpush1.bf16.msra.mxu1 %v9645_v34  ;;  %9599 = vmatprep.subr.bf16.mxu0 %v9598_v8 }
 0x592   : > { %6863 = vmatprep.subr.mxu1 %v15797_v0  ;;  %9601 = vmatpush3.bf16.msra.mxu0 %v9600_v12 }
 0x595   : > { %8277 = vmatpush1.msk.msra.mxu1 %vm628_vm0, %v6718_v47 }
 0x62a   : > { %v6546_v63 = vpop.f32.mrb[70].mxu0 }
 0x62b   : > { %v6648_v35 = vadd.f32 %v6631_v14, %v6546_v63  ;;  %v6617_v52 = vpop.f32.mrb[64].mxu1  ;;  %v6548_v24 = vpop.f32.mrb[71].mxu0 }
 0x62c   : > { %v6650_v55 = vadd.f32 %v6639_v32, %v6617_v52  ;;  %v6649_v43 = vadd.f32 %v6635_v11, %v6548_v24  ;;  %v6619_v18 = vpop.f32.mrb[65].mxu1 }
 0x62d   : > { %v6651_v30 = vadd.f32 %v6643_v45, %v6619_v18  ;;  %v6652_v9 = vmax.f32 %v6648_v35, 0.0 }
 0x62e   : > { %v6653_v20 = vmax.f32 %v6649_v43, 0.0  ;;  %v6654_v33 = vmax.f32 %v6650_v55, 0.0 }
 0x62f   : > { %v6655_v49 = vmax.f32 %v6651_v30, 0.0 }
 0x630   : > { %6797 = vmatprep.mubr.f32.mxu0 %v6653_v20 }
 0x631   : > { %8278 = vmatprep.mubr.msk.f32.mxu1 %vm6726_vm4, %v6655_v49  ;;  %6798 = vmatmul.mubr.f32.vlgmr.msra.gmra.mrb[72].mxu0 %v6652_v9 }
 0x632   : > { %6868 = vmatmul.mubr.f32.vlgmr.msra.gmra.mrb[66].mxu1 %v6654_v33 }
 0x704   : > { %v8315_v62 = vpop.f32.mrb[72].mxu0 }
 0x705   : > { %v6869_v31 = vpop.f32.mrb[66].mxu1  ;;  %v8316_v40 = vpop.f32.mrb[73].mxu0 }
 0x706   : > { %v8317_v36 = vadd.f32 %v8316_v40, %v8315_v62  ;;  %v6871_v57 = vpop.f32.mrb[67].mxu1 }
 0x708   : > { %v6800_v61 = vadd.f32 %v8317_v36, %v8276_v29 }
 0x70a   : > { %v6870_v27 = vadd.f32 %v6869_v31, %v6800_v61 }
 0x70c   : > { %6874 = vst.msk [vmem:[%s472_s22] sm:$0xff] %vm6873_vm5, %v6870_v27 }
 0x70d   : > { %10232 = shalt.err (!%p10229_p5)
}
 0x70e   : > { %s10233_s28 = scalar_lea.hbm %s15736_s26, 128  ;;  %s10237_s22 = scalar_lea.hbm %s15789_s9, 256 }
 0x70f   : > { %p10234_p7 = scmp.ne.s32.totalorder %s15736_s26, %s10233_s28  ;;  %p10238_p12 = scmp.lt.u32.totalorder %s15736_s26, %s15789_s9 }
 0x710   : > { %p10239_p13 = scmp.lt.u32.totalorder %s10237_s22, %s10233_s28  ;;  %p10241_p1 = scmp.lt.u32.totalorder %s10233_s28, %s15736_s26 }
 0x711   : > { %p10235_p10 = pnand %p10234_p7, %p10375_p6 }
 0x712   : > { %p10240_p0 = por %p10239_p13, %p10238_p12 }
 0x713   : > { %p10236_p11 = pneg %p10235_p10 }
 0x714   : > { %p10242_p2 = por %p10241_p1, %p10240_p0 }
 0x716   : > { %p10243_p3 = pnand %p10242_p2, %p10236_p11 }
 0x718   : > { %10246 = shalt.err (!%p10243_p3)
}
 0x719   : > { %10177 = dma.vmem_to_hbm [thread:$0]  (%p10375_p6), %s15738_s24, 128, %s15736_s26, %s6876_s27  }
 0x71a PF: > { %s6901_s14 = sand.u32 1, %s10269_s30   ;;  %p10180_p4 = pnand %p6956_p9, %p10379_p8 }
 0x71b   : > { %s6902_s16 = scalar_lea.sflag [#allocation4], %s6901_s14 }
 0x71c   : > { %10264 = dma.done.wait (!%p10180_p4), %s6902_s16, 128  }
 0x71d   : > { %10266 = vsyncadd (!%p10180_p4), %s6902_s16, 4294967168  ;;  %p19_p5 = scmp.ge.s32.totalorder %s10360_s15, 4   ;;  %s15799_s30 = smov %s10273_s10 }
 0x71e   : > { %s15800_s10 = smov %s10277_s11  ;;  %s15801_s11 = smov %s10373_s18 }
 0x71f   : > { %s15802_s12 = smov %s10360_s15  ;;  %21 = sbr.rel (!%p19_p5) target bundleno = 3 (0x3), region = 149 }
 0x726   :  { %6907 = vsyncpa [#allocation4], 1 }
 0x727   :  { %6909 = vsyncpa [#allocation4 + $0x1], 1 }

</bundles_post_ra>
